<compile_context>
chip_gen: v7x
topology: tpu7x:2x2x1
jax: 0.10.0
libtpu: 0.0.40
codegen_flags: <defaults>
</compile_context>

<pallas_src>
import functools

import jax
import jax.numpy as jnp
from jax import lax
from jax.experimental import pallas as pl
from jax.experimental.pallas import tpu as pltpu


# ---------------------------------------------------------------------------
# Geometry (LeNet5 requires 32x32 inputs so conv3 produces a 1x1x120 map).
# ---------------------------------------------------------------------------
_K   = 5           # conv kernel size (all three convs)
_H1  = 32          # conv1 input grid
_H2  = 14          # conv2 input grid (after pool1)
_H3  = 5           # conv3 input grid (after pool2)
_C0  = 3           # input channels
_C1  = 6           # conv1 output channels
_C1P = 8           # lane width used to store the conv1 activation (6 real + 2 zero)
_C2  = 16          # conv2 output channels
_F1  = 120         # conv3 output channels
_F2  = 84          # fc1 output features
_P   = 128         # lane-dense padding for conv3 / fc widths

# In-kernel row extents (flat row index = y*width + x, per image).
_R1  = (_H1 - _K + 1) * _H1      # 896  conv1 rows computed (all y of valid outputs)
_B1  = 128                       # conv1 row block (896 = 7 * 128)
_P1R = 208                       # pool1 scratch rows (196 valid + pad for shifted reads)
_X2R = 200                       # kx-packed conv2 input rows
_R2  = (_H2 - _K + 1) * _H2      # 140  conv2 rows needed
_R2A = 144                       # conv2 rows computed (sublane-aligned)
_P2R = 32                        # pool2 scratch rows (25 valid)

# ---- Load-bearing static invariants (garbage-row analysis) -----------------
# conv1 blocks read packed-input rows < _R1 + (K-1)*H1 (must stay inside the image).
assert _R1 % _B1 == 0 and _R1 + (_K - 1) * _H1 <= _H1 * _H1
# pool1 only reads conv1-activation rows that were actually computed.
assert 2 * (_H2 - 1) * _H1 + _H1 + 1 + 2 * (_H2 - 1) < _R1
# the kx-pack of pool1 reads pool1 rows < _X2R + K - 1 (scratch must cover them).
assert _X2R + _K - 1 <= _P1R
# conv2 (computed over _R2A rows) reads packed-x2 rows < _R2A + (K-1)*H2.
assert _R2A + (_K - 1) * _H2 <= _X2R
# every *consumed* conv2 output only reads valid (written) pool1 entries.
assert (_H2 - 1) * _H2 + (_H2 - _K) + (_K - 1) < _H2 * _H2
# pool2 only reads conv2-activation rows that correspond to valid conv2 outputs.
assert 2 * (_H3 - 1) * _H2 + _H2 + 1 + 2 * (_H3 - 1) < _R2 <= _R2A
# conv3 selection only reads valid pool2 rows.
assert (_K - 1) * _H3 + (_K - 1) < _H3 * _H3 <= _P2R


# ---------------------------------------------------------------------------
# Kernel (runs once per image; all intermediates stay in VMEM scratch).
# ---------------------------------------------------------------------------
def _lenet5_kernel(x_ref, w1_ref, w2_ref, w3_ref, sh_ref, wfc_ref, out_ref,
                   a1_ref, p1_ref, x2_ref, a2_ref, p2_ref):
    f32 = jnp.float32
    bf16 = jnp.bfloat16

    # --- convLayer: Conv(3->6,5) [BN folded] + Tanh.
    #     Block-local f32 accumulation over the 5 ky taps (kx already packed
    #     into lanes), fused shift+tanh epilogue, one activation store / block.
    sh1 = sh_ref[0:1, :_C1P]
    for r0 in range(0, _R1, _B1):
        acc = jnp.zeros((_B1, _C1P), f32)
        for ky in range(_K):
            acc = acc + jnp.dot(x_ref[pl.ds(r0 + ky * _H1, _B1), :], w1_ref[ky],
                                preferred_element_type=f32)
        a1_ref[pl.ds(r0, _B1), :] = jnp.tanh(acc + sh1)

    # --- AvgPool2d(2,2): 4 strided sublane loads + VPU adds (no pooling matmul).
    for py in range(_H2):
        r0 = 2 * py * _H1
        s = (a1_ref[pl.ds(r0, _H2, stride=2), :]
             + a1_ref[pl.ds(r0 + 1, _H2, stride=2), :]
             + a1_ref[pl.ds(r0 + _H1, _H2, stride=2), :]
             + a1_ref[pl.ds(r0 + _H1 + 1, _H2, stride=2), :])
        p1_ref[pl.ds(py * _H2, _H2), :] = 0.25 * s

    # --- kx-pack pool1 into the conv2 matmul operand: lanes = [kx, channel].
    x2_ref[...] = jnp.concatenate(
        [p1_ref[pl.ds(kx, _X2R), :] for kx in range(_K)], axis=1).astype(bf16)

    # --- convLayer1: Conv(6->16,5) + Tanh; 5 matmuls (one per ky), local acc.
    sh2 = sh_ref[1:2, :_C2]
    acc = jnp.zeros((_R2A, _C2), f32)
    for ky in range(_K):
        acc = acc + jnp.dot(x2_ref[pl.ds(ky * _H2, _R2A), :], w2_ref[ky],
                            preferred_element_type=f32)
    a2_ref[...] = jnp.tanh(acc + sh2)

    # --- AvgPool2d(2,2) again.
    for py in range(_H3):
        r0 = 2 * py * _H2
        s = (a2_ref[pl.ds(r0, _H3, stride=2), :]
             + a2_ref[pl.ds(r0 + 1, _H3, stride=2), :]
             + a2_ref[pl.ds(r0 + _H2, _H3, stride=2), :]
             + a2_ref[pl.ds(r0 + _H2 + 1, _H3, stride=2), :])
        p2_ref[pl.ds(py * _H3, _H3), :] = 0.25 * s

    # --- convLayer2: Conv(16->120,5) at its single valid position + Tanh.
    #     Strided selection reads replace the old (B, r3) f32 selection matmul.
    sel = jnp.concatenate(
        [p2_ref[pl.ds(kx, _H3, stride=_H3), :] for kx in range(_K)], axis=1)  # (5, 80)
    h = sh_ref[2:3, :]
    for ky in range(_K):
        h = h + jnp.dot(sel[ky:ky + 1, :].astype(bf16), w3_ref[ky],
                        preferred_element_type=f32)
    h = jnp.tanh(h)

    # --- linearLayer: Linear(120->84) + Tanh + Linear(84->num_classes).
    h = jnp.tanh(jnp.dot(h.astype(bf16), wfc_ref[0],
                         preferred_element_type=f32) + sh_ref[3:4, :])
    out_ref[...] = jnp.dot(h.astype(bf16), wfc_ref[1],
                           preferred_element_type=f32) + sh_ref[4:5, :]


# ---------------------------------------------------------------------------
# Parameters: raw (torch layouts) and packed (kernel layouts).
# ---------------------------------------------------------------------------
def make_raw_params(key, num_classes):
    ks = jax.random.split(key, 5)

    def conv(k, co, ci):
        kw, kb = jax.random.split(k)
        return (jax.random.normal(kw, (co, ci, _K, _K), jnp.float32) * 0.1,
                jax.random.normal(kb, (co,), jnp.float32) * 0.1)

    def lin(k, do, di):
        kw, kb = jax.random.split(k)
        return (jax.random.normal(kw, (do, di), jnp.float32) * 0.1,
                jax.random.normal(kb, (do,), jnp.float32) * 0.1)

    w1, b1 = conv(ks[0], _C1, _C0)
    w2, b2 = conv(ks[1], _C2, _C1)
    w3, b3 = conv(ks[2], _F1, _C2)
    f1w, f1b = lin(ks[3], _F2, _F1)
    f2w, f2b = lin(ks[4], num_classes, _F2)
    return dict(w1=w1, b1=b1, w2=w2, b2=b2, w3=w3, b3=b3,
                fc1_w=f1w, fc1_b=f1b, fc2_w=f2w, fc2_b=f2b)


def _pack_conv(w, b, c_in_pad, c_out_pad):
    # Eval-mode BatchNorm with identity running stats folded into the weights.
    # TODO(synk): training-mode batch statistics / trained BN stats are not reproduced.
    c_out, c_in = w.shape[0], w.shape[1]
    gamma = jnp.ones((c_out,), jnp.float32)
    beta = jnp.zeros((c_out,), jnp.float32)
    mean = jnp.zeros((c_out,), jnp.float32)
    var = jnp.ones((c_out,), jnp.float32)
    scale = gamma * lax.rsqrt(var + 1e-5)
    shift = beta + (b - mean) * scale

    wt = jnp.transpose(w, (2, 3, 1, 0)) * scale                   # (ky, kx, ci, co)
    wk = jnp.zeros((_K, _K, c_in_pad, c_out_pad), jnp.float32)
    wk = wk.at[:, :, :c_in, :c_out].set(wt)
    wk = wk.reshape(_K, _K * c_in_pad, c_out_pad).astype(jnp.bfloat16)
    sh = jnp.zeros((_P,), jnp.float32).at[:c_out].set(shift)
    return wk, sh


def pack_params(raw):
    num_classes = raw["fc2_w"].shape[0]
    w1, sh1 = _pack_conv(raw["w1"], raw["b1"], _C0, _C1P)
    w2, sh2 = _pack_conv(raw["w2"], raw["b2"], _C1P, _C2)
    w3, sh3 = _pack_conv(raw["w3"], raw["b3"], _C2, _P)

    sh = jnp.zeros((8, _P), jnp.float32)
    sh = sh.at[0].set(sh1).at[1].set(sh2).at[2].set(sh3)
    sh = sh.at[3, :_F2].set(raw["fc1_b"]).at[4, :num_classes].set(raw["fc2_b"])

    wfc = jnp.zeros((2, _P, _P), jnp.float32)
    wfc = wfc.at[0, :_F1, :_F2].set(raw["fc1_w"].T)
    wfc = wfc.at[1, :_F2, :num_classes].set(raw["fc2_w"].T)
    return dict(w1=w1, w2=w2, w3=w3, sh=sh, wfc=wfc.astype(jnp.bfloat16))


# ---------------------------------------------------------------------------
# Forward pass: one pallas_call, grid over the batch.
# ---------------------------------------------------------------------------
def lenet5_forward(params, x_nchw, num_classes):
    B = x_nchw.shape[0]

    # Layout plumbing: NCHW -> NHWC -> kx-packed rows (row = y*W + x,
    # lanes = kx*3 + c, zero beyond the right image edge).  Only 15 real lanes
    # ever hit HBM.
    xh = jnp.transpose(x_nchw, (0, 2, 3, 1))
    xp = jnp.pad(xh, ((0, 0), (0, 0), (0, _K - 1), (0, 0)))
    xk = jnp.stack([xp[:, :, kx:kx + _H1, :] for kx in range(_K)], axis=3)
    xk = xk.reshape(B, _H1 * _H1, _K * _C0).astype(jnp.bfloat16)

    out = pl.pallas_call(
        _lenet5_kernel,
        out_shape=jax.ShapeDtypeStruct((B, 1, _P), jnp.float32),
        grid_spec=pltpu.PrefetchScalarGridSpec(
            num_scalar_prefetch=0,
            grid=(B,),
            in_specs=[
                pl.BlockSpec((None, _H1 * _H1, _K * _C0), lambda b: (b, 0, 0)),
                pl.BlockSpec((_K, _K * _C0, _C1P), lambda b: (0, 0, 0)),
                pl.BlockSpec((_K, _K * _C1P, _C2), lambda b: (0, 0, 0)),
                pl.BlockSpec((_K, _K * _C2, _P), lambda b: (0, 0, 0)),
                pl.BlockSpec((8, _P), lambda b: (0, 0)),
                pl.BlockSpec((2, _P, _P), lambda b: (0, 0, 0)),
            ],
            out_specs=pl.BlockSpec((None, 1, _P), lambda b: (b, 0, 0)),
            scratch_shapes=[
                pltpu.VMEM((_R1, _C1P), jnp.float32),          # conv1 activation
                pltpu.VMEM((_P1R, _C1P), jnp.float32),         # pool1 output
                pltpu.VMEM((_X2R, _K * _C1P), jnp.bfloat16),   # kx-packed conv2 input
                pltpu.VMEM((_R2A, _C2), jnp.float32),          # conv2 activation
                pltpu.VMEM((_P2R, _C2), jnp.float32),          # pool2 output
            ],
        ),
        # ~2 MiB VMEM per grid step -> default scoped VMEM limit is fine on
        # v5e / v6e / v7x; no generation-specific vmem_limit override needed.
        compiler_params=pltpu.CompilerParams(
            dimension_semantics=("parallel",)),
    )(xk, params["w1"], params["w2"], params["w3"], params["sh"], params["wfc"])

    return out[:, 0, :num_classes]


# ---------------------------------------------------------------------------
# Pure-JAX reference (same semantics: conv + identity-eval BN + tanh + avgpool).
# ---------------------------------------------------------------------------
def lenet5_reference(raw, x):
    def conv_bn_tanh(h, w, b):
        y = lax.conv_general_dilated(h, w, (1, 1), "VALID",
                                     dimension_numbers=("NCHW", "OIHW", "NCHW"))
        return jnp.tanh(y + b[None, :, None, None])

    def pool(h):
        B, C, H, W = h.shape
        return h.reshape(B, C, H // 2, 2, W // 2, 2).mean(axis=(3, 5))

    h = pool(conv_bn_tanh(x, raw["w1"], raw["b1"]))
    h = pool(conv_bn_tanh(h, raw["w2"], raw["b2"]))
    h = conv_bn_tanh(h, raw["w3"], raw["b3"])
    h = h.reshape(x.shape[0], -1)
    h = jnp.tanh(h @ raw["fc1_w"].T + raw["fc1_b"])
    return h @ raw["fc2_w"].T + raw["fc2_b"]


if __name__ == "__main__":
    num_classes = 10
    batch = 2

    key = jax.random.PRNGKey(0)
    k_raw, k_x = jax.random.split(key)
    raw = make_raw_params(k_raw, num_classes)
    params = pack_params(raw)

    # LeNet5 geometry requires 32x32 inputs so the final conv yields 1x1x120.
    x = jax.random.normal(k_x, (batch, _C0, _H1, _H1), jnp.float32)

    fwd = jax.jit(functools.partial(lenet5_forward, num_classes=num_classes))
    logits = fwd(params, x)
    jax.block_until_ready(logits)

    assert logits.shape == (batch, num_classes), logits.shape
    assert bool(jnp.all(jnp.isfinite(logits)))

    ref = lenet5_reference(raw, x)
    err = float(jnp.max(jnp.abs(logits - ref)))
    assert err < 5e-2, f"max |kernel - reference| = {err}"
    print("KERNEL_OK")
</pallas_src>

<mosaic_0001>
module attributes {stable_mosaic.version = 11 : i64} {
  func.func @_lenet5_kernel(%arg0: i32, %arg1: memref<1x1024x15xbf16, #tpu.memory_space<vmem>>, %arg2: memref<5x15x8xbf16, #tpu.memory_space<vmem>>, %arg3: memref<5x40x16xbf16, #tpu.memory_space<vmem>>, %arg4: memref<5x80x128xbf16, #tpu.memory_space<vmem>>, %arg5: memref<8x128xf32, #tpu.memory_space<vmem>>, %arg6: memref<2x128x128xbf16, #tpu.memory_space<vmem>>, %arg7: memref<1x1x128xf32, #tpu.memory_space<vmem>>, %arg8: memref<896x8xf32, #tpu.memory_space<vmem>>, %arg9: memref<208x8xf32, #tpu.memory_space<vmem>>, %arg10: memref<200x40xbf16, #tpu.memory_space<vmem>>, %arg11: memref<144x16xf32, #tpu.memory_space<vmem>>, %arg12: memref<32x16xf32, #tpu.memory_space<vmem>>) attributes {dimension_semantics = [#tpu.dimension_semantics<parallel>], iteration_bounds = array<i64: 2>, scalar_prefetch = 0 : i64, scratch_operands = 5 : i64, tpu.core_type = #tpu.core_type<tc>, window_params = [{transform_indices = @transform_0, window_bounds = array<i64: 1, 1024, 15>}, {pipeline_mode = #tpu.pipeline_mode<synchronous>, transform_indices = @transform_1, window_bounds = array<i64: 5, 15, 8>}, {pipeline_mode = #tpu.pipeline_mode<synchronous>, transform_indices = @transform_2, window_bounds = array<i64: 5, 40, 16>}, {pipeline_mode = #tpu.pipeline_mode<synchronous>, transform_indices = @transform_3, window_bounds = array<i64: 5, 80, 128>}, {pipeline_mode = #tpu.pipeline_mode<synchronous>, transform_indices = @transform_4, window_bounds = array<i64: 8, 128>}, {pipeline_mode = #tpu.pipeline_mode<synchronous>, transform_indices = @transform_5, window_bounds = array<i64: 2, 128, 128>}, {transform_indices = @transform_6, window_bounds = array<i64: 1, 1, 128>}]} {
    %c0 = arith.constant 0 : index
    %c0_0 = arith.constant 0 : index
    %0 = vector.load %arg5[%c0, %c0_0] : memref<8x128xf32, #tpu.memory_space<vmem>>, vector<1x8xf32>
    %cst = arith.constant 0.000000e+00 : f32
    %1 = vector.broadcast %cst : f32 to vector<128x8xf32>
    %c0_1 = arith.constant 0 : index
    %c0_2 = arith.constant 0 : index
    %c0_3 = arith.constant 0 : index
    %2 = vector.load %arg1[%c0_1, %c0_2, %c0_3] : memref<1x1024x15xbf16, #tpu.memory_space<vmem>>, vector<1x128x15xbf16>
    %3 = vector.shape_cast %2 : vector<1x128x15xbf16> to vector<128x15xbf16>
    %c0_4 = arith.constant 0 : index
    %c0_5 = arith.constant 0 : index
    %c0_6 = arith.constant 0 : index
    %4 = vector.load %arg2[%c0_4, %c0_5, %c0_6] : memref<5x15x8xbf16, #tpu.memory_space<vmem>>, vector<1x15x8xbf16>
    %5 = vector.shape_cast %4 : vector<1x15x8xbf16> to vector<15x8xbf16>
    %cst_7 = arith.constant dense<0.000000e+00> : vector<128x8xf32>
    %6 = tpu.matmul %3, %5, %cst_7 {dimension_numbers = #tpu.dot_dimension_numbers<[1], [0], [0], [1], [0, 0, 1, 1], [], []>} : vector<128x15xbf16>, vector<15x8xbf16>, vector<128x8xf32> -> vector<128x8xf32>
    %7 = arith.addf %1, %6 : vector<128x8xf32>
    %c0_8 = arith.constant 0 : index
    %c32 = arith.constant 32 : index
    %c0_9 = arith.constant 0 : index
    %8 = vector.load %arg1[%c0_8, %c32, %c0_9] : memref<1x1024x15xbf16, #tpu.memory_space<vmem>>, vector<1x128x15xbf16>
    %9 = vector.shape_cast %8 : vector<1x128x15xbf16> to vector<128x15xbf16>
    %c1 = arith.constant 1 : index
    %c0_10 = arith.constant 0 : index
    %c0_11 = arith.constant 0 : index
    %10 = vector.load %arg2[%c1, %c0_10, %c0_11] : memref<5x15x8xbf16, #tpu.memory_space<vmem>>, vector<1x15x8xbf16>
    %11 = vector.shape_cast %10 : vector<1x15x8xbf16> to vector<15x8xbf16>
    %cst_12 = arith.constant dense<0.000000e+00> : vector<128x8xf32>
    %12 = tpu.matmul %9, %11, %cst_12 {dimension_numbers = #tpu.dot_dimension_numbers<[1], [0], [0], [1], [0, 0, 1, 1], [], []>} : vector<128x15xbf16>, vector<15x8xbf16>, vector<128x8xf32> -> vector<128x8xf32>
    %13 = arith.addf %7, %12 : vector<128x8xf32>
    %c0_13 = arith.constant 0 : index
    %c64 = arith.constant 64 : index
    %c0_14 = arith.constant 0 : index
    %14 = vector.load %arg1[%c0_13, %c64, %c0_14] : memref<1x1024x15xbf16, #tpu.memory_space<vmem>>, vector<1x128x15xbf16>
    %15 = vector.shape_cast %14 : vector<1x128x15xbf16> to vector<128x15xbf16>
    %c2 = arith.constant 2 : index
    %c0_15 = arith.constant 0 : index
    %c0_16 = arith.constant 0 : index
    %16 = vector.load %arg2[%c2, %c0_15, %c0_16] : memref<5x15x8xbf16, #tpu.memory_space<vmem>>, vector<1x15x8xbf16>
    %17 = vector.shape_cast %16 : vector<1x15x8xbf16> to vector<15x8xbf16>
    %cst_17 = arith.constant dense<0.000000e+00> : vector<128x8xf32>
    %18 = tpu.matmul %15, %17, %cst_17 {dimension_numbers = #tpu.dot_dimension_numbers<[1], [0], [0], [1], [0, 0, 1, 1], [], []>} : vector<128x15xbf16>, vector<15x8xbf16>, vector<128x8xf32> -> vector<128x8xf32>
    %19 = arith.addf %13, %18 : vector<128x8xf32>
    %c0_18 = arith.constant 0 : index
    %c96 = arith.constant 96 : index
    %c0_19 = arith.constant 0 : index
    %20 = vector.load %arg1[%c0_18, %c96, %c0_19] : memref<1x1024x15xbf16, #tpu.memory_space<vmem>>, vector<1x128x15xbf16>
    %21 = vector.shape_cast %20 : vector<1x128x15xbf16> to vector<128x15xbf16>
    %c3 = arith.constant 3 : index
    %c0_20 = arith.constant 0 : index
    %c0_21 = arith.constant 0 : index
    %22 = vector.load %arg2[%c3, %c0_20, %c0_21] : memref<5x15x8xbf16, #tpu.memory_space<vmem>>, vector<1x15x8xbf16>
    %23 = vector.shape_cast %22 : vector<1x15x8xbf16> to vector<15x8xbf16>
    %cst_22 = arith.constant dense<0.000000e+00> : vector<128x8xf32>
    %24 = tpu.matmul %21, %23, %cst_22 {dimension_numbers = #tpu.dot_dimension_numbers<[1], [0], [0], [1], [0, 0, 1, 1], [], []>} : vector<128x15xbf16>, vector<15x8xbf16>, vector<128x8xf32> -> vector<128x8xf32>
    %25 = arith.addf %19, %24 : vector<128x8xf32>
    %c0_23 = arith.constant 0 : index
    %c128 = arith.constant 128 : index
    %c0_24 = arith.constant 0 : index
    %26 = vector.load %arg1[%c0_23, %c128, %c0_24] : memref<1x1024x15xbf16, #tpu.memory_space<vmem>>, vector<1x128x15xbf16>
    %27 = vector.shape_cast %26 : vector<1x128x15xbf16> to vector<128x15xbf16>
    %c4 = arith.constant 4 : index
    %c0_25 = arith.constant 0 : index
    %c0_26 = arith.constant 0 : index
    %28 = vector.load %arg2[%c4, %c0_25, %c0_26] : memref<5x15x8xbf16, #tpu.memory_space<vmem>>, vector<1x15x8xbf16>
    %29 = vector.shape_cast %28 : vector<1x15x8xbf16> to vector<15x8xbf16>
    %cst_27 = arith.constant dense<0.000000e+00> : vector<128x8xf32>
    %30 = tpu.matmul %27, %29, %cst_27 {dimension_numbers = #tpu.dot_dimension_numbers<[1], [0], [0], [1], [0, 0, 1, 1], [], []>} : vector<128x15xbf16>, vector<15x8xbf16>, vector<128x8xf32> -> vector<128x8xf32>
    %31 = arith.addf %25, %30 : vector<128x8xf32>
    %32 = vector.broadcast %0 : vector<1x8xf32> to vector<128x8xf32>
    %33 = arith.addf %31, %32 : vector<128x8xf32>
    %34 = math.tanh %33 : vector<128x8xf32>
    %c0_28 = arith.constant 0 : index
    %c0_29 = arith.constant 0 : index
    %35 = vector.load %arg8[%c0_28, %c0_29] : memref<896x8xf32, #tpu.memory_space<vmem>>, vector<128x8xf32>
    tpu.vector_store %arg8[%c0_28, %c0_29], %34 {strides = array<i32>} : memref<896x8xf32, #tpu.memory_space<vmem>>, vector<128x8xf32>,
    %cst_30 = arith.constant 0.000000e+00 : f32
    %36 = vector.broadcast %cst_30 : f32 to vector<128x8xf32>
    %c0_31 = arith.constant 0 : index
    %c128_32 = arith.constant 128 : index
    %c0_33 = arith.constant 0 : index
    %37 = vector.load %arg1[%c0_31, %c128_32, %c0_33] : memref<1x1024x15xbf16, #tpu.memory_space<vmem>>, vector<1x128x15xbf16>
    %38 = vector.shape_cast %37 : vector<1x128x15xbf16> to vector<128x15xbf16>
    %c0_34 = arith.constant 0 : index
    %c0_35 = arith.constant 0 : index
    %c0_36 = arith.constant 0 : index
    %39 = vector.load %arg2[%c0_34, %c0_35, %c0_36] : memref<5x15x8xbf16, #tpu.memory_space<vmem>>, vector<1x15x8xbf16>
    %40 = vector.shape_cast %39 : vector<1x15x8xbf16> to vector<15x8xbf16>
    %cst_37 = arith.constant dense<0.000000e+00> : vector<128x8xf32>
    %41 = tpu.matmul %38, %40, %cst_37 {dimension_numbers = #tpu.dot_dimension_numbers<[1], [0], [0], [1], [0, 0, 1, 1], [], []>} : vector<128x15xbf16>, vector<15x8xbf16>, vector<128x8xf32> -> vector<128x8xf32>
    %42 = arith.addf %36, %41 : vector<128x8xf32>
    %c0_38 = arith.constant 0 : index
    %c160 = arith.constant 160 : index
    %c0_39 = arith.constant 0 : index
    %43 = vector.load %arg1[%c0_38, %c160, %c0_39] : memref<1x1024x15xbf16, #tpu.memory_space<vmem>>, vector<1x128x15xbf16>
    %44 = vector.shape_cast %43 : vector<1x128x15xbf16> to vector<128x15xbf16>
    %c1_40 = arith.constant 1 : index
    %c0_41 = arith.constant 0 : index
    %c0_42 = arith.constant 0 : index
    %45 = vector.load %arg2[%c1_40, %c0_41, %c0_42] : memref<5x15x8xbf16, #tpu.memory_space<vmem>>, vector<1x15x8xbf16>
    %46 = vector.shape_cast %45 : vector<1x15x8xbf16> to vector<15x8xbf16>
    %cst_43 = arith.constant dense<0.000000e+00> : vector<128x8xf32>
    %47 = tpu.matmul %44, %46, %cst_43 {dimension_numbers = #tpu.dot_dimension_numbers<[1], [0], [0], [1], [0, 0, 1, 1], [], []>} : vector<128x15xbf16>, vector<15x8xbf16>, vector<128x8xf32> -> vector<128x8xf32>
    %48 = arith.addf %42, %47 : vector<128x8xf32>
    %c0_44 = arith.constant 0 : index
    %c192 = arith.constant 192 : index
    %c0_45 = arith.constant 0 : index
    %49 = vector.load %arg1[%c0_44, %c192, %c0_45] : memref<1x1024x15xbf16, #tpu.memory_space<vmem>>, vector<1x128x15xbf16>
    %50 = vector.shape_cast %49 : vector<1x128x15xbf16> to vector<128x15xbf16>
    %c2_46 = arith.constant 2 : index
    %c0_47 = arith.constant 0 : index
    %c0_48 = arith.constant 0 : index
    %51 = vector.load %arg2[%c2_46, %c0_47, %c0_48] : memref<5x15x8xbf16, #tpu.memory_space<vmem>>, vector<1x15x8xbf16>
    %52 = vector.shape_cast %51 : vector<1x15x8xbf16> to vector<15x8xbf16>
    %cst_49 = arith.constant dense<0.000000e+00> : vector<128x8xf32>
    %53 = tpu.matmul %50, %52, %cst_49 {dimension_numbers = #tpu.dot_dimension_numbers<[1], [0], [0], [1], [0, 0, 1, 1], [], []>} : vector<128x15xbf16>, vector<15x8xbf16>, vector<128x8xf32> -> vector<128x8xf32>
    %54 = arith.addf %48, %53 : vector<128x8xf32>
    %c0_50 = arith.constant 0 : index
    %c224 = arith.constant 224 : index
    %c0_51 = arith.constant 0 : index
    %55 = vector.load %arg1[%c0_50, %c224, %c0_51] : memref<1x1024x15xbf16, #tpu.memory_space<vmem>>, vector<1x128x15xbf16>
    %56 = vector.shape_cast %55 : vector<1x128x15xbf16> to vector<128x15xbf16>
    %c3_52 = arith.constant 3 : index
    %c0_53 = arith.constant 0 : index
    %c0_54 = arith.constant 0 : index
    %57 = vector.load %arg2[%c3_52, %c0_53, %c0_54] : memref<5x15x8xbf16, #tpu.memory_space<vmem>>, vector<1x15x8xbf16>
    %58 = vector.shape_cast %57 : vector<1x15x8xbf16> to vector<15x8xbf16>
    %cst_55 = arith.constant dense<0.000000e+00> : vector<128x8xf32>
    %59 = tpu.matmul %56, %58, %cst_55 {dimension_numbers = #tpu.dot_dimension_numbers<[1], [0], [0], [1], [0, 0, 1, 1], [], []>} : vector<128x15xbf16>, vector<15x8xbf16>, vector<128x8xf32> -> vector<128x8xf32>
    %60 = arith.addf %54, %59 : vector<128x8xf32>
    %c0_56 = arith.constant 0 : index
    %c256 = arith.constant 256 : index
    %c0_57 = arith.constant 0 : index
    %61 = vector.load %arg1[%c0_56, %c256, %c0_57] : memref<1x1024x15xbf16, #tpu.memory_space<vmem>>, vector<1x128x15xbf16>
    %62 = vector.shape_cast %61 : vector<1x128x15xbf16> to vector<128x15xbf16>
    %c4_58 = arith.constant 4 : index
    %c0_59 = arith.constant 0 : index
    %c0_60 = arith.constant 0 : index
    %63 = vector.load %arg2[%c4_58, %c0_59, %c0_60] : memref<5x15x8xbf16, #tpu.memory_space<vmem>>, vector<1x15x8xbf16>
    %64 = vector.shape_cast %63 : vector<1x15x8xbf16> to vector<15x8xbf16>
    %cst_61 = arith.constant dense<0.000000e+00> : vector<128x8xf32>
    %65 = tpu.matmul %62, %64, %cst_61 {dimension_numbers = #tpu.dot_dimension_numbers<[1], [0], [0], [1], [0, 0, 1, 1], [], []>} : vector<128x15xbf16>, vector<15x8xbf16>, vector<128x8xf32> -> vector<128x8xf32>
    %66 = arith.addf %60, %65 : vector<128x8xf32>
    %67 = vector.broadcast %0 : vector<1x8xf32> to vector<128x8xf32>
    %68 = arith.addf %66, %67 : vector<128x8xf32>
    %69 = math.tanh %68 : vector<128x8xf32>
    %c128_62 = arith.constant 128 : index
    %c0_63 = arith.constant 0 : index
    %70 = vector.load %arg8[%c128_62, %c0_63] : memref<896x8xf32, #tpu.memory_space<vmem>>, vector<128x8xf32>
    tpu.vector_store %arg8[%c128_62, %c0_63], %69 {strides = array<i32>} : memref<896x8xf32, #tpu.memory_space<vmem>>, vector<128x8xf32>,
    %cst_64 = arith.constant 0.000000e+00 : f32
    %71 = vector.broadcast %cst_64 : f32 to vector<128x8xf32>
    %c0_65 = arith.constant 0 : index
    %c256_66 = arith.constant 256 : index
    %c0_67 = arith.constant 0 : index
    %72 = vector.load %arg1[%c0_65, %c256_66, %c0_67] : memref<1x1024x15xbf16, #tpu.memory_space<vmem>>, vector<1x128x15xbf16>
    %73 = vector.shape_cast %72 : vector<1x128x15xbf16> to vector<128x15xbf16>
    %c0_68 = arith.constant 0 : index
    %c0_69 = arith.constant 0 : index
    %c0_70 = arith.constant 0 : index
    %74 = vector.load %arg2[%c0_68, %c0_69, %c0_70] : memref<5x15x8xbf16, #tpu.memory_space<vmem>>, vector<1x15x8xbf16>
    %75 = vector.shape_cast %74 : vector<1x15x8xbf16> to vector<15x8xbf16>
    %cst_71 = arith.constant dense<0.000000e+00> : vector<128x8xf32>
    %76 = tpu.matmul %73, %75, %cst_71 {dimension_numbers = #tpu.dot_dimension_numbers<[1], [0], [0], [1], [0, 0, 1, 1], [], []>} : vector<128x15xbf16>, vector<15x8xbf16>, vector<128x8xf32> -> vector<128x8xf32>
    %77 = arith.addf %71, %76 : vector<128x8xf32>
    %c0_72 = arith.constant 0 : index
    %c288 = arith.constant 288 : index
    %c0_73 = arith.constant 0 : index
    %78 = vector.load %arg1[%c0_72, %c288, %c0_73] : memref<1x1024x15xbf16, #tpu.memory_space<vmem>>, vector<1x128x15xbf16>
    %79 = vector.shape_cast %78 : vector<1x128x15xbf16> to vector<128x15xbf16>
    %c1_74 = arith.constant 1 : index
    %c0_75 = arith.constant 0 : index
    %c0_76 = arith.constant 0 : index
    %80 = vector.load %arg2[%c1_74, %c0_75, %c0_76] : memref<5x15x8xbf16, #tpu.memory_space<vmem>>, vector<1x15x8xbf16>
    %81 = vector.shape_cast %80 : vector<1x15x8xbf16> to vector<15x8xbf16>
    %cst_77 = arith.constant dense<0.000000e+00> : vector<128x8xf32>
    %82 = tpu.matmul %79, %81, %cst_77 {dimension_numbers = #tpu.dot_dimension_numbers<[1], [0], [0], [1], [0, 0, 1, 1], [], []>} : vector<128x15xbf16>, vector<15x8xbf16>, vector<128x8xf32> -> vector<128x8xf32>
    %83 = arith.addf %77, %82 : vector<128x8xf32>
    %c0_78 = arith.constant 0 : index
    %c320 = arith.constant 320 : index
    %c0_79 = arith.constant 0 : index
    %84 = vector.load %arg1[%c0_78, %c320, %c0_79] : memref<1x1024x15xbf16, #tpu.memory_space<vmem>>, vector<1x128x15xbf16>
    %85 = vector.shape_cast %84 : vector<1x128x15xbf16> to vector<128x15xbf16>
    %c2_80 = arith.constant 2 : index
    %c0_81 = arith.constant 0 : index
    %c0_82 = arith.constant 0 : index
    %86 = vector.load %arg2[%c2_80, %c0_81, %c0_82] : memref<5x15x8xbf16, #tpu.memory_space<vmem>>, vector<1x15x8xbf16>
    %87 = vector.shape_cast %86 : vector<1x15x8xbf16> to vector<15x8xbf16>
    %cst_83 = arith.constant dense<0.000000e+00> : vector<128x8xf32>
    %88 = tpu.matmul %85, %87, %cst_83 {dimension_numbers = #tpu.dot_dimension_numbers<[1], [0], [0], [1], [0, 0, 1, 1], [], []>} : vector<128x15xbf16>, vector<15x8xbf16>, vector<128x8xf32> -> vector<128x8xf32>
    %89 = arith.addf %83, %88 : vector<128x8xf32>
    %c0_84 = arith.constant 0 : index
    %c352 = arith.constant 352 : index
    %c0_85 = arith.constant 0 : index
    %90 = vector.load %arg1[%c0_84, %c352, %c0_85] : memref<1x1024x15xbf16, #tpu.memory_space<vmem>>, vector<1x128x15xbf16>
    %91 = vector.shape_cast %90 : vector<1x128x15xbf16> to vector<128x15xbf16>
    %c3_86 = arith.constant 3 : index
    %c0_87 = arith.constant 0 : index
    %c0_88 = arith.constant 0 : index
    %92 = vector.load %arg2[%c3_86, %c0_87, %c0_88] : memref<5x15x8xbf16, #tpu.memory_space<vmem>>, vector<1x15x8xbf16>
    %93 = vector.shape_cast %92 : vector<1x15x8xbf16> to vector<15x8xbf16>
    %cst_89 = arith.constant dense<0.000000e+00> : vector<128x8xf32>
    %94 = tpu.matmul %91, %93, %cst_89 {dimension_numbers = #tpu.dot_dimension_numbers<[1], [0], [0], [1], [0, 0, 1, 1], [], []>} : vector<128x15xbf16>, vector<15x8xbf16>, vector<128x8xf32> -> vector<128x8xf32>
    %95 = arith.addf %89, %94 : vector<128x8xf32>
    %c0_90 = arith.constant 0 : index
    %c384 = arith.constant 384 : index
    %c0_91 = arith.constant 0 : index
    %96 = vector.load %arg1[%c0_90, %c384, %c0_91] : memref<1x1024x15xbf16, #tpu.memory_space<vmem>>, vector<1x128x15xbf16>
    %97 = vector.shape_cast %96 : vector<1x128x15xbf16> to vector<128x15xbf16>
    %c4_92 = arith.constant 4 : index
    %c0_93 = arith.constant 0 : index
    %c0_94 = arith.constant 0 : index
    %98 = vector.load %arg2[%c4_92, %c0_93, %c0_94] : memref<5x15x8xbf16, #tpu.memory_space<vmem>>, vector<1x15x8xbf16>
    %99 = vector.shape_cast %98 : vector<1x15x8xbf16> to vector<15x8xbf16>
    %cst_95 = arith.constant dense<0.000000e+00> : vector<128x8xf32>
    %100 = tpu.matmul %97, %99, %cst_95 {dimension_numbers = #tpu.dot_dimension_numbers<[1], [0], [0], [1], [0, 0, 1, 1], [], []>} : vector<128x15xbf16>, vector<15x8xbf16>, vector<128x8xf32> -> vector<128x8xf32>
    %101 = arith.addf %95, %100 : vector<128x8xf32>
    %102 = vector.broadcast %0 : vector<1x8xf32> to vector<128x8xf32>
    %103 = arith.addf %101, %102 : vector<128x8xf32>
    %104 = math.tanh %103 : vector<128x8xf32>
    %c256_96 = arith.constant 256 : index
    %c0_97 = arith.constant 0 : index
    %105 = vector.load %arg8[%c256_96, %c0_97] : memref<896x8xf32, #tpu.memory_space<vmem>>, vector<128x8xf32>
    tpu.vector_store %arg8[%c256_96, %c0_97], %104 {strides = array<i32>} : memref<896x8xf32, #tpu.memory_space<vmem>>, vector<128x8xf32>,
    %cst_98 = arith.constant 0.000000e+00 : f32
    %106 = vector.broadcast %cst_98 : f32 to vector<128x8xf32>
    %c0_99 = arith.constant 0 : index
    %c384_100 = arith.constant 384 : index
    %c0_101 = arith.constant 0 : index
    %107 = vector.load %arg1[%c0_99, %c384_100, %c0_101] : memref<1x1024x15xbf16, #tpu.memory_space<vmem>>, vector<1x128x15xbf16>
    %108 = vector.shape_cast %107 : vector<1x128x15xbf16> to vector<128x15xbf16>
    %c0_102 = arith.constant 0 : index
    %c0_103 = arith.constant 0 : index
    %c0_104 = arith.constant 0 : index
    %109 = vector.load %arg2[%c0_102, %c0_103, %c0_104] : memref<5x15x8xbf16, #tpu.memory_space<vmem>>, vector<1x15x8xbf16>
    %110 = vector.shape_cast %109 : vector<1x15x8xbf16> to vector<15x8xbf16>
    %cst_105 = arith.constant dense<0.000000e+00> : vector<128x8xf32>
    %111 = tpu.matmul %108, %110, %cst_105 {dimension_numbers = #tpu.dot_dimension_numbers<[1], [0], [0], [1], [0, 0, 1, 1], [], []>} : vector<128x15xbf16>, vector<15x8xbf16>, vector<128x8xf32> -> vector<128x8xf32>
    %112 = arith.addf %106, %111 : vector<128x8xf32>
    %c0_106 = arith.constant 0 : index
    %c416 = arith.constant 416 : index
    %c0_107 = arith.constant 0 : index
    %113 = vector.load %arg1[%c0_106, %c416, %c0_107] : memref<1x1024x15xbf16, #tpu.memory_space<vmem>>, vector<1x128x15xbf16>
    %114 = vector.shape_cast %113 : vector<1x128x15xbf16> to vector<128x15xbf16>
    %c1_108 = arith.constant 1 : index
    %c0_109 = arith.constant 0 : index
    %c0_110 = arith.constant 0 : index
    %115 = vector.load %arg2[%c1_108, %c0_109, %c0_110] : memref<5x15x8xbf16, #tpu.memory_space<vmem>>, vector<1x15x8xbf16>
    %116 = vector.shape_cast %115 : vector<1x15x8xbf16> to vector<15x8xbf16>
    %cst_111 = arith.constant dense<0.000000e+00> : vector<128x8xf32>
    %117 = tpu.matmul %114, %116, %cst_111 {dimension_numbers = #tpu.dot_dimension_numbers<[1], [0], [0], [1], [0, 0, 1, 1], [], []>} : vector<128x15xbf16>, vector<15x8xbf16>, vector<128x8xf32> -> vector<128x8xf32>
    %118 = arith.addf %112, %117 : vector<128x8xf32>
    %c0_112 = arith.constant 0 : index
    %c448 = arith.constant 448 : index
    %c0_113 = arith.constant 0 : index
    %119 = vector.load %arg1[%c0_112, %c448, %c0_113] : memref<1x1024x15xbf16, #tpu.memory_space<vmem>>, vector<1x128x15xbf16>
    %120 = vector.shape_cast %119 : vector<1x128x15xbf16> to vector<128x15xbf16>
    %c2_114 = arith.constant 2 : index
    %c0_115 = arith.constant 0 : index
    %c0_116 = arith.constant 0 : index
    %121 = vector.load %arg2[%c2_114, %c0_115, %c0_116] : memref<5x15x8xbf16, #tpu.memory_space<vmem>>, vector<1x15x8xbf16>
    %122 = vector.shape_cast %121 : vector<1x15x8xbf16> to vector<15x8xbf16>
    %cst_117 = arith.constant dense<0.000000e+00> : vector<128x8xf32>
    %123 = tpu.matmul %120, %122, %cst_117 {dimension_numbers = #tpu.dot_dimension_numbers<[1], [0], [0], [1], [0, 0, 1, 1], [], []>} : vector<128x15xbf16>, vector<15x8xbf16>, vector<128x8xf32> -> vector<128x8xf32>
    %124 = arith.addf %118, %123 : vector<128x8xf32>
    %c0_118 = arith.constant 0 : index
    %c480 = arith.constant 480 : index
    %c0_119 = arith.constant 0 : index
    %125 = vector.load %arg1[%c0_118, %c480, %c0_119] : memref<1x1024x15xbf16, #tpu.memory_space<vmem>>, vector<1x128x15xbf16>
    %126 = vector.shape_cast %125 : vector<1x128x15xbf16> to vector<128x15xbf16>
    %c3_120 = arith.constant 3 : index
    %c0_121 = arith.constant 0 : index
    %c0_122 = arith.constant 0 : index
    %127 = vector.load %arg2[%c3_120, %c0_121, %c0_122] : memref<5x15x8xbf16, #tpu.memory_space<vmem>>, vector<1x15x8xbf16>
    %128 = vector.shape_cast %127 : vector<1x15x8xbf16> to vector<15x8xbf16>
    %cst_123 = arith.constant dense<0.000000e+00> : vector<128x8xf32>
    %129 = tpu.matmul %126, %128, %cst_123 {dimension_numbers = #tpu.dot_dimension_numbers<[1], [0], [0], [1], [0, 0, 1, 1], [], []>} : vector<128x15xbf16>, vector<15x8xbf16>, vector<128x8xf32> -> vector<128x8xf32>
    %130 = arith.addf %124, %129 : vector<128x8xf32>
    %c0_124 = arith.constant 0 : index
    %c512 = arith.constant 512 : index
    %c0_125 = arith.constant 0 : index
    %131 = vector.load %arg1[%c0_124, %c512, %c0_125] : memref<1x1024x15xbf16, #tpu.memory_space<vmem>>, vector<1x128x15xbf16>
    %132 = vector.shape_cast %131 : vector<1x128x15xbf16> to vector<128x15xbf16>
    %c4_126 = arith.constant 4 : index
    %c0_127 = arith.constant 0 : index
    %c0_128 = arith.constant 0 : index
    %133 = vector.load %arg2[%c4_126, %c0_127, %c0_128] : memref<5x15x8xbf16, #tpu.memory_space<vmem>>, vector<1x15x8xbf16>
    %134 = vector.shape_cast %133 : vector<1x15x8xbf16> to vector<15x8xbf16>
    %cst_129 = arith.constant dense<0.000000e+00> : vector<128x8xf32>
    %135 = tpu.matmul %132, %134, %cst_129 {dimension_numbers = #tpu.dot_dimension_numbers<[1], [0], [0], [1], [0, 0, 1, 1], [], []>} : vector<128x15xbf16>, vector<15x8xbf16>, vector<128x8xf32> -> vector<128x8xf32>
    %136 = arith.addf %130, %135 : vector<128x8xf32>
    %137 = vector.broadcast %0 : vector<1x8xf32> to vector<128x8xf32>
    %138 = arith.addf %136, %137 : vector<128x8xf32>
    %139 = math.tanh %138 : vector<128x8xf32>
    %c384_130 = arith.constant 384 : index
    %c0_131 = arith.constant 0 : index
    %140 = vector.load %arg8[%c384_130, %c0_131] : memref<896x8xf32, #tpu.memory_space<vmem>>, vector<128x8xf32>
    tpu.vector_store %arg8[%c384_130, %c0_131], %139 {strides = array<i32>} : memref<896x8xf32, #tpu.memory_space<vmem>>, vector<128x8xf32>,
    %cst_132 = arith.constant 0.000000e+00 : f32
    %141 = vector.broadcast %cst_132 : f32 to vector<128x8xf32>
    %c0_133 = arith.constant 0 : index
    %c512_134 = arith.constant 512 : index
    %c0_135 = arith.constant 0 : index
    %142 = vector.load %arg1[%c0_133, %c512_134, %c0_135] : memref<1x1024x15xbf16, #tpu.memory_space<vmem>>, vector<1x128x15xbf16>
    %143 = vector.shape_cast %142 : vector<1x128x15xbf16> to vector<128x15xbf16>
    %c0_136 = arith.constant 0 : index
    %c0_137 = arith.constant 0 : index
    %c0_138 = arith.constant 0 : index
    %144 = vector.load %arg2[%c0_136, %c0_137, %c0_138] : memref<5x15x8xbf16, #tpu.memory_space<vmem>>, vector<1x15x8xbf16>
    %145 = vector.shape_cast %144 : vector<1x15x8xbf16> to vector<15x8xbf16>
    %cst_139 = arith.constant dense<0.000000e+00> : vector<128x8xf32>
    %146 = tpu.matmul %143, %145, %cst_139 {dimension_numbers = #tpu.dot_dimension_numbers<[1], [0], [0], [1], [0, 0, 1, 1], [], []>} : vector<128x15xbf16>, vector<15x8xbf16>, vector<128x8xf32> -> vector<128x8xf32>
    %147 = arith.addf %141, %146 : vector<128x8xf32>
    %c0_140 = arith.constant 0 : index
    %c544 = arith.constant 544 : index
    %c0_141 = arith.constant 0 : index
    %148 = vector.load %arg1[%c0_140, %c544, %c0_141] : memref<1x1024x15xbf16, #tpu.memory_space<vmem>>, vector<1x128x15xbf16>
    %149 = vector.shape_cast %148 : vector<1x128x15xbf16> to vector<128x15xbf16>
    %c1_142 = arith.constant 1 : index
    %c0_143 = arith.constant 0 : index
    %c0_144 = arith.constant 0 : index
    %150 = vector.load %arg2[%c1_142, %c0_143, %c0_144] : memref<5x15x8xbf16, #tpu.memory_space<vmem>>, vector<1x15x8xbf16>
    %151 = vector.shape_cast %150 : vector<1x15x8xbf16> to vector<15x8xbf16>
    %cst_145 = arith.constant dense<0.000000e+00> : vector<128x8xf32>
    %152 = tpu.matmul %149, %151, %cst_145 {dimension_numbers = #tpu.dot_dimension_numbers<[1], [0], [0], [1], [0, 0, 1, 1], [], []>} : vector<128x15xbf16>, vector<15x8xbf16>, vector<128x8xf32> -> vector<128x8xf32>
    %153 = arith.addf %147, %152 : vector<128x8xf32>
    %c0_146 = arith.constant 0 : index
    %c576 = arith.constant 576 : index
    %c0_147 = arith.constant 0 : index
    %154 = vector.load %arg1[%c0_146, %c576, %c0_147] : memref<1x1024x15xbf16, #tpu.memory_space<vmem>>, vector<1x128x15xbf16>
    %155 = vector.shape_cast %154 : vector<1x128x15xbf16> to vector<128x15xbf16>
    %c2_148 = arith.constant 2 : index
    %c0_149 = arith.constant 0 : index
    %c0_150 = arith.constant 0 : index
    %156 = vector.load %arg2[%c2_148, %c0_149, %c0_150] : memref<5x15x8xbf16, #tpu.memory_space<vmem>>, vector<1x15x8xbf16>
    %157 = vector.shape_cast %156 : vector<1x15x8xbf16> to vector<15x8xbf16>
    %cst_151 = arith.constant dense<0.000000e+00> : vector<128x8xf32>
    %158 = tpu.matmul %155, %157, %cst_151 {dimension_numbers = #tpu.dot_dimension_numbers<[1], [0], [0], [1], [0, 0, 1, 1], [], []>} : vector<128x15xbf16>, vector<15x8xbf16>, vector<128x8xf32> -> vector<128x8xf32>
    %159 = arith.addf %153, %158 : vector<128x8xf32>
    %c0_152 = arith.constant 0 : index
    %c608 = arith.constant 608 : index
    %c0_153 = arith.constant 0 : index
    %160 = vector.load %arg1[%c0_152, %c608, %c0_153] : memref<1x1024x15xbf16, #tpu.memory_space<vmem>>, vector<1x128x15xbf16>
    %161 = vector.shape_cast %160 : vector<1x128x15xbf16> to vector<128x15xbf16>
    %c3_154 = arith.constant 3 : index
    %c0_155 = arith.constant 0 : index
    %c0_156 = arith.constant 0 : index
    %162 = vector.load %arg2[%c3_154, %c0_155, %c0_156] : memref<5x15x8xbf16, #tpu.memory_space<vmem>>, vector<1x15x8xbf16>
    %163 = vector.shape_cast %162 : vector<1x15x8xbf16> to vector<15x8xbf16>
    %cst_157 = arith.constant dense<0.000000e+00> : vector<128x8xf32>
    %164 = tpu.matmul %161, %163, %cst_157 {dimension_numbers = #tpu.dot_dimension_numbers<[1], [0], [0], [1], [0, 0, 1, 1], [], []>} : vector<128x15xbf16>, vector<15x8xbf16>, vector<128x8xf32> -> vector<128x8xf32>
    %165 = arith.addf %159, %164 : vector<128x8xf32>
    %c0_158 = arith.constant 0 : index
    %c640 = arith.constant 640 : index
    %c0_159 = arith.constant 0 : index
    %166 = vector.load %arg1[%c0_158, %c640, %c0_159] : memref<1x1024x15xbf16, #tpu.memory_space<vmem>>, vector<1x128x15xbf16>
    %167 = vector.shape_cast %166 : vector<1x128x15xbf16> to vector<128x15xbf16>
    %c4_160 = arith.constant 4 : index
    %c0_161 = arith.constant 0 : index
    %c0_162 = arith.constant 0 : index
    %168 = vector.load %arg2[%c4_160, %c0_161, %c0_162] : memref<5x15x8xbf16, #tpu.memory_space<vmem>>, vector<1x15x8xbf16>
    %169 = vector.shape_cast %168 : vector<1x15x8xbf16> to vector<15x8xbf16>
    %cst_163 = arith.constant dense<0.000000e+00> : vector<128x8xf32>
    %170 = tpu.matmul %167, %169, %cst_163 {dimension_numbers = #tpu.dot_dimension_numbers<[1], [0], [0], [1], [0, 0, 1, 1], [], []>} : vector<128x15xbf16>, vector<15x8xbf16>, vector<128x8xf32> -> vector<128x8xf32>
    %171 = arith.addf %165, %170 : vector<128x8xf32>
    %172 = vector.broadcast %0 : vector<1x8xf32> to vector<128x8xf32>
    %173 = arith.addf %171, %172 : vector<128x8xf32>
    %174 = math.tanh %173 : vector<128x8xf32>
    %c512_164 = arith.constant 512 : index
    %c0_165 = arith.constant 0 : index
    %175 = vector.load %arg8[%c512_164, %c0_165] : memref<896x8xf32, #tpu.memory_space<vmem>>, vector<128x8xf32>
    tpu.vector_store %arg8[%c512_164, %c0_165], %174 {strides = array<i32>} : memref<896x8xf32, #tpu.memory_space<vmem>>, vector<128x8xf32>,
    %cst_166 = arith.constant 0.000000e+00 : f32
    %176 = vector.broadcast %cst_166 : f32 to vector<128x8xf32>
    %c0_167 = arith.constant 0 : index
    %c640_168 = arith.constant 640 : index
    %c0_169 = arith.constant 0 : index
    %177 = vector.load %arg1[%c0_167, %c640_168, %c0_169] : memref<1x1024x15xbf16, #tpu.memory_space<vmem>>, vector<1x128x15xbf16>
    %178 = vector.shape_cast %177 : vector<1x128x15xbf16> to vector<128x15xbf16>
    %c0_170 = arith.constant 0 : index
    %c0_171 = arith.constant 0 : index
    %c0_172 = arith.constant 0 : index
    %179 = vector.load %arg2[%c0_170, %c0_171, %c0_172] : memref<5x15x8xbf16, #tpu.memory_space<vmem>>, vector<1x15x8xbf16>
    %180 = vector.shape_cast %179 : vector<1x15x8xbf16> to vector<15x8xbf16>
    %cst_173 = arith.constant dense<0.000000e+00> : vector<128x8xf32>
    %181 = tpu.matmul %178, %180, %cst_173 {dimension_numbers = #tpu.dot_dimension_numbers<[1], [0], [0], [1], [0, 0, 1, 1], [], []>} : vector<128x15xbf16>, vector<15x8xbf16>, vector<128x8xf32> -> vector<128x8xf32>
    %182 = arith.addf %176, %181 : vector<128x8xf32>
    %c0_174 = arith.constant 0 : index
    %c672 = arith.constant 672 : index
    %c0_175 = arith.constant 0 : index
    %183 = vector.load %arg1[%c0_174, %c672, %c0_175] : memref<1x1024x15xbf16, #tpu.memory_space<vmem>>, vector<1x128x15xbf16>
    %184 = vector.shape_cast %183 : vector<1x128x15xbf16> to vector<128x15xbf16>
    %c1_176 = arith.constant 1 : index
    %c0_177 = arith.constant 0 : index
    %c0_178 = arith.constant 0 : index
    %185 = vector.load %arg2[%c1_176, %c0_177, %c0_178] : memref<5x15x8xbf16, #tpu.memory_space<vmem>>, vector<1x15x8xbf16>
    %186 = vector.shape_cast %185 : vector<1x15x8xbf16> to vector<15x8xbf16>
    %cst_179 = arith.constant dense<0.000000e+00> : vector<128x8xf32>
    %187 = tpu.matmul %184, %186, %cst_179 {dimension_numbers = #tpu.dot_dimension_numbers<[1], [0], [0], [1], [0, 0, 1, 1], [], []>} : vector<128x15xbf16>, vector<15x8xbf16>, vector<128x8xf32> -> vector<128x8xf32>
    %188 = arith.addf %182, %187 : vector<128x8xf32>
    %c0_180 = arith.constant 0 : index
    %c704 = arith.constant 704 : index
    %c0_181 = arith.constant 0 : index
    %189 = vector.load %arg1[%c0_180, %c704, %c0_181] : memref<1x1024x15xbf16, #tpu.memory_space<vmem>>, vector<1x128x15xbf16>
    %190 = vector.shape_cast %189 : vector<1x128x15xbf16> to vector<128x15xbf16>
    %c2_182 = arith.constant 2 : index
    %c0_183 = arith.constant 0 : index
    %c0_184 = arith.constant 0 : index
    %191 = vector.load %arg2[%c2_182, %c0_183, %c0_184] : memref<5x15x8xbf16, #tpu.memory_space<vmem>>, vector<1x15x8xbf16>
    %192 = vector.shape_cast %191 : vector<1x15x8xbf16> to vector<15x8xbf16>
    %cst_185 = arith.constant dense<0.000000e+00> : vector<128x8xf32>
    %193 = tpu.matmul %190, %192, %cst_185 {dimension_numbers = #tpu.dot_dimension_numbers<[1], [0], [0], [1], [0, 0, 1, 1], [], []>} : vector<128x15xbf16>, vector<15x8xbf16>, vector<128x8xf32> -> vector<128x8xf32>
    %194 = arith.addf %188, %193 : vector<128x8xf32>
    %c0_186 = arith.constant 0 : index
    %c736 = arith.constant 736 : index
    %c0_187 = arith.constant 0 : index
    %195 = vector.load %arg1[%c0_186, %c736, %c0_187] : memref<1x1024x15xbf16, #tpu.memory_space<vmem>>, vector<1x128x15xbf16>
    %196 = vector.shape_cast %195 : vector<1x128x15xbf16> to vector<128x15xbf16>
    %c3_188 = arith.constant 3 : index
    %c0_189 = arith.constant 0 : index
    %c0_190 = arith.constant 0 : index
    %197 = vector.load %arg2[%c3_188, %c0_189, %c0_190] : memref<5x15x8xbf16, #tpu.memory_space<vmem>>, vector<1x15x8xbf16>
    %198 = vector.shape_cast %197 : vector<1x15x8xbf16> to vector<15x8xbf16>
    %cst_191 = arith.constant dense<0.000000e+00> : vector<128x8xf32>
    %199 = tpu.matmul %196, %198, %cst_191 {dimension_numbers = #tpu.dot_dimension_numbers<[1], [0], [0], [1], [0, 0, 1, 1], [], []>} : vector<128x15xbf16>, vector<15x8xbf16>, vector<128x8xf32> -> vector<128x8xf32>
    %200 = arith.addf %194, %199 : vector<128x8xf32>
    %c0_192 = arith.constant 0 : index
    %c768 = arith.constant 768 : index
    %c0_193 = arith.constant 0 : index
    %201 = vector.load %arg1[%c0_192, %c768, %c0_193] : memref<1x1024x15xbf16, #tpu.memory_space<vmem>>, vector<1x128x15xbf16>
    %202 = vector.shape_cast %201 : vector<1x128x15xbf16> to vector<128x15xbf16>
    %c4_194 = arith.constant 4 : index
    %c0_195 = arith.constant 0 : index
    %c0_196 = arith.constant 0 : index
    %203 = vector.load %arg2[%c4_194, %c0_195, %c0_196] : memref<5x15x8xbf16, #tpu.memory_space<vmem>>, vector<1x15x8xbf16>
    %204 = vector.shape_cast %203 : vector<1x15x8xbf16> to vector<15x8xbf16>
    %cst_197 = arith.constant dense<0.000000e+00> : vector<128x8xf32>
    %205 = tpu.matmul %202, %204, %cst_197 {dimension_numbers = #tpu.dot_dimension_numbers<[1], [0], [0], [1], [0, 0, 1, 1], [], []>} : vector<128x15xbf16>, vector<15x8xbf16>, vector<128x8xf32> -> vector<128x8xf32>
    %206 = arith.addf %200, %205 : vector<128x8xf32>
    %207 = vector.broadcast %0 : vector<1x8xf32> to vector<128x8xf32>
    %208 = arith.addf %206, %207 : vector<128x8xf32>
    %209 = math.tanh %208 : vector<128x8xf32>
    %c640_198 = arith.constant 640 : index
    %c0_199 = arith.constant 0 : index
    %210 = vector.load %arg8[%c640_198, %c0_199] : memref<896x8xf32, #tpu.memory_space<vmem>>, vector<128x8xf32>
    tpu.vector_store %arg8[%c640_198, %c0_199], %209 {strides = array<i32>} : memref<896x8xf32, #tpu.memory_space<vmem>>, vector<128x8xf32>,
    %cst_200 = arith.constant 0.000000e+00 : f32
    %211 = vector.broadcast %cst_200 : f32 to vector<128x8xf32>
    %c0_201 = arith.constant 0 : index
    %c768_202 = arith.constant 768 : index
    %c0_203 = arith.constant 0 : index
    %212 = vector.load %arg1[%c0_201, %c768_202, %c0_203] : memref<1x1024x15xbf16, #tpu.memory_space<vmem>>, vector<1x128x15xbf16>
    %213 = vector.shape_cast %212 : vector<1x128x15xbf16> to vector<128x15xbf16>
    %c0_204 = arith.constant 0 : index
    %c0_205 = arith.constant 0 : index
    %c0_206 = arith.constant 0 : index
    %214 = vector.load %arg2[%c0_204, %c0_205, %c0_206] : memref<5x15x8xbf16, #tpu.memory_space<vmem>>, vector<1x15x8xbf16>
    %215 = vector.shape_cast %214 : vector<1x15x8xbf16> to vector<15x8xbf16>
    %cst_207 = arith.constant dense<0.000000e+00> : vector<128x8xf32>
    %216 = tpu.matmul %213, %215, %cst_207 {dimension_numbers = #tpu.dot_dimension_numbers<[1], [0], [0], [1], [0, 0, 1, 1], [], []>} : vector<128x15xbf16>, vector<15x8xbf16>, vector<128x8xf32> -> vector<128x8xf32>
    %217 = arith.addf %211, %216 : vector<128x8xf32>
    %c0_208 = arith.constant 0 : index
    %c800 = arith.constant 800 : index
    %c0_209 = arith.constant 0 : index
    %218 = vector.load %arg1[%c0_208, %c800, %c0_209] : memref<1x1024x15xbf16, #tpu.memory_space<vmem>>, vector<1x128x15xbf16>
    %219 = vector.shape_cast %218 : vector<1x128x15xbf16> to vector<128x15xbf16>
    %c1_210 = arith.constant 1 : index
    %c0_211 = arith.constant 0 : index
    %c0_212 = arith.constant 0 : index
    %220 = vector.load %arg2[%c1_210, %c0_211, %c0_212] : memref<5x15x8xbf16, #tpu.memory_space<vmem>>, vector<1x15x8xbf16>
    %221 = vector.shape_cast %220 : vector<1x15x8xbf16> to vector<15x8xbf16>
    %cst_213 = arith.constant dense<0.000000e+00> : vector<128x8xf32>
    %222 = tpu.matmul %219, %221, %cst_213 {dimension_numbers = #tpu.dot_dimension_numbers<[1], [0], [0], [1], [0, 0, 1, 1], [], []>} : vector<128x15xbf16>, vector<15x8xbf16>, vector<128x8xf32> -> vector<128x8xf32>
    %223 = arith.addf %217, %222 : vector<128x8xf32>
    %c0_214 = arith.constant 0 : index
    %c832 = arith.constant 832 : index
    %c0_215 = arith.constant 0 : index
    %224 = vector.load %arg1[%c0_214, %c832, %c0_215] : memref<1x1024x15xbf16, #tpu.memory_space<vmem>>, vector<1x128x15xbf16>
    %225 = vector.shape_cast %224 : vector<1x128x15xbf16> to vector<128x15xbf16>
    %c2_216 = arith.constant 2 : index
    %c0_217 = arith.constant 0 : index
    %c0_218 = arith.constant 0 : index
    %226 = vector.load %arg2[%c2_216, %c0_217, %c0_218] : memref<5x15x8xbf16, #tpu.memory_space<vmem>>, vector<1x15x8xbf16>
    %227 = vector.shape_cast %226 : vector<1x15x8xbf16> to vector<15x8xbf16>
    %cst_219 = arith.constant dense<0.000000e+00> : vector<128x8xf32>
    %228 = tpu.matmul %225, %227, %cst_219 {dimension_numbers = #tpu.dot_dimension_numbers<[1], [0], [0], [1], [0, 0, 1, 1], [], []>} : vector<128x15xbf16>, vector<15x8xbf16>, vector<128x8xf32> -> vector<128x8xf32>
    %229 = arith.addf %223, %228 : vector<128x8xf32>
    %c0_220 = arith.constant 0 : index
    %c864 = arith.constant 864 : index
    %c0_221 = arith.constant 0 : index
    %230 = vector.load %arg1[%c0_220, %c864, %c0_221] : memref<1x1024x15xbf16, #tpu.memory_space<vmem>>, vector<1x128x15xbf16>
    %231 = vector.shape_cast %230 : vector<1x128x15xbf16> to vector<128x15xbf16>
    %c3_222 = arith.constant 3 : index
    %c0_223 = arith.constant 0 : index
    %c0_224 = arith.constant 0 : index
    %232 = vector.load %arg2[%c3_222, %c0_223, %c0_224] : memref<5x15x8xbf16, #tpu.memory_space<vmem>>, vector<1x15x8xbf16>
    %233 = vector.shape_cast %232 : vector<1x15x8xbf16> to vector<15x8xbf16>
    %cst_225 = arith.constant dense<0.000000e+00> : vector<128x8xf32>
    %234 = tpu.matmul %231, %233, %cst_225 {dimension_numbers = #tpu.dot_dimension_numbers<[1], [0], [0], [1], [0, 0, 1, 1], [], []>} : vector<128x15xbf16>, vector<15x8xbf16>, vector<128x8xf32> -> vector<128x8xf32>
    %235 = arith.addf %229, %234 : vector<128x8xf32>
    %c0_226 = arith.constant 0 : index
    %c896 = arith.constant 896 : index
    %c0_227 = arith.constant 0 : index
    %236 = vector.load %arg1[%c0_226, %c896, %c0_227] : memref<1x1024x15xbf16, #tpu.memory_space<vmem>>, vector<1x128x15xbf16>
    %237 = vector.shape_cast %236 : vector<1x128x15xbf16> to vector<128x15xbf16>
    %c4_228 = arith.constant 4 : index
    %c0_229 = arith.constant 0 : index
    %c0_230 = arith.constant 0 : index
    %238 = vector.load %arg2[%c4_228, %c0_229, %c0_230] : memref<5x15x8xbf16, #tpu.memory_space<vmem>>, vector<1x15x8xbf16>
    %239 = vector.shape_cast %238 : vector<1x15x8xbf16> to vector<15x8xbf16>
    %cst_231 = arith.constant dense<0.000000e+00> : vector<128x8xf32>
    %240 = tpu.matmul %237, %239, %cst_231 {dimension_numbers = #tpu.dot_dimension_numbers<[1], [0], [0], [1], [0, 0, 1, 1], [], []>} : vector<128x15xbf16>, vector<15x8xbf16>, vector<128x8xf32> -> vector<128x8xf32>
    %241 = arith.addf %235, %240 : vector<128x8xf32>
    %242 = vector.broadcast %0 : vector<1x8xf32> to vector<128x8xf32>
    %243 = arith.addf %241, %242 : vector<128x8xf32>
    %244 = math.tanh %243 : vector<128x8xf32>
    %c768_232 = arith.constant 768 : index
    %c0_233 = arith.constant 0 : index
    %245 = vector.load %arg8[%c768_232, %c0_233] : memref<896x8xf32, #tpu.memory_space<vmem>>, vector<128x8xf32>
    tpu.vector_store %arg8[%c768_232, %c0_233], %244 {strides = array<i32>} : memref<896x8xf32, #tpu.memory_space<vmem>>, vector<128x8xf32>,
    %c0_234 = arith.constant 0 : index
    %c0_235 = arith.constant 0 : index
    %246 = tpu.strided_load %arg8[%c0_234, %c0_235] {strides = array<i32: 2, 1>} : memref<896x8xf32, #tpu.memory_space<vmem>>, vector<14x8xf32>
    %c1_236 = arith.constant 1 : index
    %c0_237 = arith.constant 0 : index
    %247 = tpu.strided_load %arg8[%c1_236, %c0_237] {strides = array<i32: 2, 1>} : memref<896x8xf32, #tpu.memory_space<vmem>>, vector<14x8xf32>
    %248 = arith.addf %246, %247 : vector<14x8xf32>
    %c32_238 = arith.constant 32 : index
    %c0_239 = arith.constant 0 : index
    %249 = tpu.strided_load %arg8[%c32_238, %c0_239] {strides = array<i32: 2, 1>} : memref<896x8xf32, #tpu.memory_space<vmem>>, vector<14x8xf32>
    %250 = arith.addf %248, %249 : vector<14x8xf32>
    %c33 = arith.constant 33 : index
    %c0_240 = arith.constant 0 : index
    %251 = tpu.strided_load %arg8[%c33, %c0_240] {strides = array<i32: 2, 1>} : memref<896x8xf32, #tpu.memory_space<vmem>>, vector<14x8xf32>
    %252 = arith.addf %250, %251 : vector<14x8xf32>
    %cst_241 = arith.constant 2.500000e-01 : f32
    %253 = vector.broadcast %cst_241 : f32 to vector<14x8xf32>
    %254 = arith.mulf %253, %252 : vector<14x8xf32>
    %c0_242 = arith.constant 0 : index
    %c0_243 = arith.constant 0 : index
    %255 = vector.load %arg9[%c0_242, %c0_243] : memref<208x8xf32, #tpu.memory_space<vmem>>, vector<14x8xf32>
    tpu.vector_store %arg9[%c0_242, %c0_243], %254 {strides = array<i32>} : memref<208x8xf32, #tpu.memory_space<vmem>>, vector<14x8xf32>,
    %c64_244 = arith.constant 64 : index
    %c0_245 = arith.constant 0 : index
    %256 = tpu.strided_load %arg8[%c64_244, %c0_245] {strides = array<i32: 2, 1>} : memref<896x8xf32, #tpu.memory_space<vmem>>, vector<14x8xf32>
    %c65 = arith.constant 65 : index
    %c0_246 = arith.constant 0 : index
    %257 = tpu.strided_load %arg8[%c65, %c0_246] {strides = array<i32: 2, 1>} : memref<896x8xf32, #tpu.memory_space<vmem>>, vector<14x8xf32>
    %258 = arith.addf %256, %257 : vector<14x8xf32>
    %c96_247 = arith.constant 96 : index
    %c0_248 = arith.constant 0 : index
    %259 = tpu.strided_load %arg8[%c96_247, %c0_248] {strides = array<i32: 2, 1>} : memref<896x8xf32, #tpu.memory_space<vmem>>, vector<14x8xf32>
    %260 = arith.addf %258, %259 : vector<14x8xf32>
    %c97 = arith.constant 97 : index
    %c0_249 = arith.constant 0 : index
    %261 = tpu.strided_load %arg8[%c97, %c0_249] {strides = array<i32: 2, 1>} : memref<896x8xf32, #tpu.memory_space<vmem>>, vector<14x8xf32>
    %262 = arith.addf %260, %261 : vector<14x8xf32>
    %cst_250 = arith.constant 2.500000e-01 : f32
    %263 = vector.broadcast %cst_250 : f32 to vector<14x8xf32>
    %264 = arith.mulf %263, %262 : vector<14x8xf32>
    %c14 = arith.constant 14 : index
    %c0_251 = arith.constant 0 : index
    %265 = vector.load %arg9[%c14, %c0_251] : memref<208x8xf32, #tpu.memory_space<vmem>>, vector<14x8xf32>
    tpu.vector_store %arg9[%c14, %c0_251], %264 {strides = array<i32>} : memref<208x8xf32, #tpu.memory_space<vmem>>, vector<14x8xf32>,
    %c128_252 = arith.constant 128 : index
    %c0_253 = arith.constant 0 : index
    %266 = tpu.strided_load %arg8[%c128_252, %c0_253] {strides = array<i32: 2, 1>} : memref<896x8xf32, #tpu.memory_space<vmem>>, vector<14x8xf32>
    %c129 = arith.constant 129 : index
    %c0_254 = arith.constant 0 : index
    %267 = tpu.strided_load %arg8[%c129, %c0_254] {strides = array<i32: 2, 1>} : memref<896x8xf32, #tpu.memory_space<vmem>>, vector<14x8xf32>
    %268 = arith.addf %266, %267 : vector<14x8xf32>
    %c160_255 = arith.constant 160 : index
    %c0_256 = arith.constant 0 : index
    %269 = tpu.strided_load %arg8[%c160_255, %c0_256] {strides = array<i32: 2, 1>} : memref<896x8xf32, #tpu.memory_space<vmem>>, vector<14x8xf32>
    %270 = arith.addf %268, %269 : vector<14x8xf32>
    %c161 = arith.constant 161 : index
    %c0_257 = arith.constant 0 : index
    %271 = tpu.strided_load %arg8[%c161, %c0_257] {strides = array<i32: 2, 1>} : memref<896x8xf32, #tpu.memory_space<vmem>>, vector<14x8xf32>
    %272 = arith.addf %270, %271 : vector<14x8xf32>
    %cst_258 = arith.constant 2.500000e-01 : f32
    %273 = vector.broadcast %cst_258 : f32 to vector<14x8xf32>
    %274 = arith.mulf %273, %272 : vector<14x8xf32>
    %c28 = arith.constant 28 : index
    %c0_259 = arith.constant 0 : index
    %275 = vector.load %arg9[%c28, %c0_259] : memref<208x8xf32, #tpu.memory_space<vmem>>, vector<14x8xf32>
    tpu.vector_store %arg9[%c28, %c0_259], %274 {strides = array<i32>} : memref<208x8xf32, #tpu.memory_space<vmem>>, vector<14x8xf32>,
    %c192_260 = arith.constant 192 : index
    %c0_261 = arith.constant 0 : index
    %276 = tpu.strided_load %arg8[%c192_260, %c0_261] {strides = array<i32: 2, 1>} : memref<896x8xf32, #tpu.memory_space<vmem>>, vector<14x8xf32>
    %c193 = arith.constant 193 : index
    %c0_262 = arith.constant 0 : index
    %277 = tpu.strided_load %arg8[%c193, %c0_262] {strides = array<i32: 2, 1>} : memref<896x8xf32, #tpu.memory_space<vmem>>, vector<14x8xf32>
    %278 = arith.addf %276, %277 : vector<14x8xf32>
    %c224_263 = arith.constant 224 : index
    %c0_264 = arith.constant 0 : index
    %279 = tpu.strided_load %arg8[%c224_263, %c0_264] {strides = array<i32: 2, 1>} : memref<896x8xf32, #tpu.memory_space<vmem>>, vector<14x8xf32>
    %280 = arith.addf %278, %279 : vector<14x8xf32>
    %c225 = arith.constant 225 : index
    %c0_265 = arith.constant 0 : index
    %281 = tpu.strided_load %arg8[%c225, %c0_265] {strides = array<i32: 2, 1>} : memref<896x8xf32, #tpu.memory_space<vmem>>, vector<14x8xf32>
    %282 = arith.addf %280, %281 : vector<14x8xf32>
    %cst_266 = arith.constant 2.500000e-01 : f32
    %283 = vector.broadcast %cst_266 : f32 to vector<14x8xf32>
    %284 = arith.mulf %283, %282 : vector<14x8xf32>
    %c42 = arith.constant 42 : index
    %c0_267 = arith.constant 0 : index
    %285 = vector.load %arg9[%c42, %c0_267] : memref<208x8xf32, #tpu.memory_space<vmem>>, vector<14x8xf32>
    tpu.vector_store %arg9[%c42, %c0_267], %284 {strides = array<i32>} : memref<208x8xf32, #tpu.memory_space<vmem>>, vector<14x8xf32>,
    %c256_268 = arith.constant 256 : index
    %c0_269 = arith.constant 0 : index
    %286 = tpu.strided_load %arg8[%c256_268, %c0_269] {strides = array<i32: 2, 1>} : memref<896x8xf32, #tpu.memory_space<vmem>>, vector<14x8xf32>
    %c257 = arith.constant 257 : index
    %c0_270 = arith.constant 0 : index
    %287 = tpu.strided_load %arg8[%c257, %c0_270] {strides = array<i32: 2, 1>} : memref<896x8xf32, #tpu.memory_space<vmem>>, vector<14x8xf32>
    %288 = arith.addf %286, %287 : vector<14x8xf32>
    %c288_271 = arith.constant 288 : index
    %c0_272 = arith.constant 0 : index
    %289 = tpu.strided_load %arg8[%c288_271, %c0_272] {strides = array<i32: 2, 1>} : memref<896x8xf32, #tpu.memory_space<vmem>>, vector<14x8xf32>
    %290 = arith.addf %288, %289 : vector<14x8xf32>
    %c289 = arith.constant 289 : index
    %c0_273 = arith.constant 0 : index
    %291 = tpu.strided_load %arg8[%c289, %c0_273] {strides = array<i32: 2, 1>} : memref<896x8xf32, #tpu.memory_space<vmem>>, vector<14x8xf32>
    %292 = arith.addf %290, %291 : vector<14x8xf32>
    %cst_274 = arith.constant 2.500000e-01 : f32
    %293 = vector.broadcast %cst_274 : f32 to vector<14x8xf32>
    %294 = arith.mulf %293, %292 : vector<14x8xf32>
    %c56 = arith.constant 56 : index
    %c0_275 = arith.constant 0 : index
    %295 = vector.load %arg9[%c56, %c0_275] : memref<208x8xf32, #tpu.memory_space<vmem>>, vector<14x8xf32>
    tpu.vector_store %arg9[%c56, %c0_275], %294 {strides = array<i32>} : memref<208x8xf32, #tpu.memory_space<vmem>>, vector<14x8xf32>,
    %c320_276 = arith.constant 320 : index
    %c0_277 = arith.constant 0 : index
    %296 = tpu.strided_load %arg8[%c320_276, %c0_277] {strides = array<i32: 2, 1>} : memref<896x8xf32, #tpu.memory_space<vmem>>, vector<14x8xf32>
    %c321 = arith.constant 321 : index
    %c0_278 = arith.constant 0 : index
    %297 = tpu.strided_load %arg8[%c321, %c0_278] {strides = array<i32: 2, 1>} : memref<896x8xf32, #tpu.memory_space<vmem>>, vector<14x8xf32>
    %298 = arith.addf %296, %297 : vector<14x8xf32>
    %c352_279 = arith.constant 352 : index
    %c0_280 = arith.constant 0 : index
    %299 = tpu.strided_load %arg8[%c352_279, %c0_280] {strides = array<i32: 2, 1>} : memref<896x8xf32, #tpu.memory_space<vmem>>, vector<14x8xf32>
    %300 = arith.addf %298, %299 : vector<14x8xf32>
    %c353 = arith.constant 353 : index
    %c0_281 = arith.constant 0 : index
    %301 = tpu.strided_load %arg8[%c353, %c0_281] {strides = array<i32: 2, 1>} : memref<896x8xf32, #tpu.memory_space<vmem>>, vector<14x8xf32>
    %302 = arith.addf %300, %301 : vector<14x8xf32>
    %cst_282 = arith.constant 2.500000e-01 : f32
    %303 = vector.broadcast %cst_282 : f32 to vector<14x8xf32>
    %304 = arith.mulf %303, %302 : vector<14x8xf32>
    %c70 = arith.constant 70 : index
    %c0_283 = arith.constant 0 : index
    %305 = vector.load %arg9[%c70, %c0_283] : memref<208x8xf32, #tpu.memory_space<vmem>>, vector<14x8xf32>
    tpu.vector_store %arg9[%c70, %c0_283], %304 {strides = array<i32>} : memref<208x8xf32, #tpu.memory_space<vmem>>, vector<14x8xf32>,
    %c384_284 = arith.constant 384 : index
    %c0_285 = arith.constant 0 : index
    %306 = tpu.strided_load %arg8[%c384_284, %c0_285] {strides = array<i32: 2, 1>} : memref<896x8xf32, #tpu.memory_space<vmem>>, vector<14x8xf32>
    %c385 = arith.constant 385 : index
    %c0_286 = arith.constant 0 : index
    %307 = tpu.strided_load %arg8[%c385, %c0_286] {strides = array<i32: 2, 1>} : memref<896x8xf32, #tpu.memory_space<vmem>>, vector<14x8xf32>
    %308 = arith.addf %306, %307 : vector<14x8xf32>
    %c416_287 = arith.constant 416 : index
    %c0_288 = arith.constant 0 : index
    %309 = tpu.strided_load %arg8[%c416_287, %c0_288] {strides = array<i32: 2, 1>} : memref<896x8xf32, #tpu.memory_space<vmem>>, vector<14x8xf32>
    %310 = arith.addf %308, %309 : vector<14x8xf32>
    %c417 = arith.constant 417 : index
    %c0_289 = arith.constant 0 : index
    %311 = tpu.strided_load %arg8[%c417, %c0_289] {strides = array<i32: 2, 1>} : memref<896x8xf32, #tpu.memory_space<vmem>>, vector<14x8xf32>
    %312 = arith.addf %310, %311 : vector<14x8xf32>
    %cst_290 = arith.constant 2.500000e-01 : f32
    %313 = vector.broadcast %cst_290 : f32 to vector<14x8xf32>
    %314 = arith.mulf %313, %312 : vector<14x8xf32>
    %c84 = arith.constant 84 : index
    %c0_291 = arith.constant 0 : index
    %315 = vector.load %arg9[%c84, %c0_291] : memref<208x8xf32, #tpu.memory_space<vmem>>, vector<14x8xf32>
    tpu.vector_store %arg9[%c84, %c0_291], %314 {strides = array<i32>} : memref<208x8xf32, #tpu.memory_space<vmem>>, vector<14x8xf32>,
    %c448_292 = arith.constant 448 : index
    %c0_293 = arith.constant 0 : index
    %316 = tpu.strided_load %arg8[%c448_292, %c0_293] {strides = array<i32: 2, 1>} : memref<896x8xf32, #tpu.memory_space<vmem>>, vector<14x8xf32>
    %c449 = arith.constant 449 : index
    %c0_294 = arith.constant 0 : index
    %317 = tpu.strided_load %arg8[%c449, %c0_294] {strides = array<i32: 2, 1>} : memref<896x8xf32, #tpu.memory_space<vmem>>, vector<14x8xf32>
    %318 = arith.addf %316, %317 : vector<14x8xf32>
    %c480_295 = arith.constant 480 : index
    %c0_296 = arith.constant 0 : index
    %319 = tpu.strided_load %arg8[%c480_295, %c0_296] {strides = array<i32: 2, 1>} : memref<896x8xf32, #tpu.memory_space<vmem>>, vector<14x8xf32>
    %320 = arith.addf %318, %319 : vector<14x8xf32>
    %c481 = arith.constant 481 : index
    %c0_297 = arith.constant 0 : index
    %321 = tpu.strided_load %arg8[%c481, %c0_297] {strides = array<i32: 2, 1>} : memref<896x8xf32, #tpu.memory_space<vmem>>, vector<14x8xf32>
    %322 = arith.addf %320, %321 : vector<14x8xf32>
    %cst_298 = arith.constant 2.500000e-01 : f32
    %323 = vector.broadcast %cst_298 : f32 to vector<14x8xf32>
    %324 = arith.mulf %323, %322 : vector<14x8xf32>
    %c98 = arith.constant 98 : index
    %c0_299 = arith.constant 0 : index
    %325 = vector.load %arg9[%c98, %c0_299] : memref<208x8xf32, #tpu.memory_space<vmem>>, vector<14x8xf32>
    tpu.vector_store %arg9[%c98, %c0_299], %324 {strides = array<i32>} : memref<208x8xf32, #tpu.memory_space<vmem>>, vector<14x8xf32>,
    %c512_300 = arith.constant 512 : index
    %c0_301 = arith.constant 0 : index
    %326 = tpu.strided_load %arg8[%c512_300, %c0_301] {strides = array<i32: 2, 1>} : memref<896x8xf32, #tpu.memory_space<vmem>>, vector<14x8xf32>
    %c513 = arith.constant 513 : index
    %c0_302 = arith.constant 0 : index
    %327 = tpu.strided_load %arg8[%c513, %c0_302] {strides = array<i32: 2, 1>} : memref<896x8xf32, #tpu.memory_space<vmem>>, vector<14x8xf32>
    %328 = arith.addf %326, %327 : vector<14x8xf32>
    %c544_303 = arith.constant 544 : index
    %c0_304 = arith.constant 0 : index
    %329 = tpu.strided_load %arg8[%c544_303, %c0_304] {strides = array<i32: 2, 1>} : memref<896x8xf32, #tpu.memory_space<vmem>>, vector<14x8xf32>
    %330 = arith.addf %328, %329 : vector<14x8xf32>
    %c545 = arith.constant 545 : index
    %c0_305 = arith.constant 0 : index
    %331 = tpu.strided_load %arg8[%c545, %c0_305] {strides = array<i32: 2, 1>} : memref<896x8xf32, #tpu.memory_space<vmem>>, vector<14x8xf32>
    %332 = arith.addf %330, %331 : vector<14x8xf32>
    %cst_306 = arith.constant 2.500000e-01 : f32
    %333 = vector.broadcast %cst_306 : f32 to vector<14x8xf32>
    %334 = arith.mulf %333, %332 : vector<14x8xf32>
    %c112 = arith.constant 112 : index
    %c0_307 = arith.constant 0 : index
    %335 = vector.load %arg9[%c112, %c0_307] : memref<208x8xf32, #tpu.memory_space<vmem>>, vector<14x8xf32>
    tpu.vector_store %arg9[%c112, %c0_307], %334 {strides = array<i32>} : memref<208x8xf32, #tpu.memory_space<vmem>>, vector<14x8xf32>,
    %c576_308 = arith.constant 576 : index
    %c0_309 = arith.constant 0 : index
    %336 = tpu.strided_load %arg8[%c576_308, %c0_309] {strides = array<i32: 2, 1>} : memref<896x8xf32, #tpu.memory_space<vmem>>, vector<14x8xf32>
    %c577 = arith.constant 577 : index
    %c0_310 = arith.constant 0 : index
    %337 = tpu.strided_load %arg8[%c577, %c0_310] {strides = array<i32: 2, 1>} : memref<896x8xf32, #tpu.memory_space<vmem>>, vector<14x8xf32>
    %338 = arith.addf %336, %337 : vector<14x8xf32>
    %c608_311 = arith.constant 608 : index
    %c0_312 = arith.constant 0 : index
    %339 = tpu.strided_load %arg8[%c608_311, %c0_312] {strides = array<i32: 2, 1>} : memref<896x8xf32, #tpu.memory_space<vmem>>, vector<14x8xf32>
    %340 = arith.addf %338, %339 : vector<14x8xf32>
    %c609 = arith.constant 609 : index
    %c0_313 = arith.constant 0 : index
    %341 = tpu.strided_load %arg8[%c609, %c0_313] {strides = array<i32: 2, 1>} : memref<896x8xf32, #tpu.memory_space<vmem>>, vector<14x8xf32>
    %342 = arith.addf %340, %341 : vector<14x8xf32>
    %cst_314 = arith.constant 2.500000e-01 : f32
    %343 = vector.broadcast %cst_314 : f32 to vector<14x8xf32>
    %344 = arith.mulf %343, %342 : vector<14x8xf32>
    %c126 = arith.constant 126 : index
    %c0_315 = arith.constant 0 : index
    %345 = vector.load %arg9[%c126, %c0_315] : memref<208x8xf32, #tpu.memory_space<vmem>>, vector<14x8xf32>
    tpu.vector_store %arg9[%c126, %c0_315], %344 {strides = array<i32>} : memref<208x8xf32, #tpu.memory_space<vmem>>, vector<14x8xf32>,
    %c640_316 = arith.constant 640 : index
    %c0_317 = arith.constant 0 : index
    %346 = tpu.strided_load %arg8[%c640_316, %c0_317] {strides = array<i32: 2, 1>} : memref<896x8xf32, #tpu.memory_space<vmem>>, vector<14x8xf32>
    %c641 = arith.constant 641 : index
    %c0_318 = arith.constant 0 : index
    %347 = tpu.strided_load %arg8[%c641, %c0_318] {strides = array<i32: 2, 1>} : memref<896x8xf32, #tpu.memory_space<vmem>>, vector<14x8xf32>
    %348 = arith.addf %346, %347 : vector<14x8xf32>
    %c672_319 = arith.constant 672 : index
    %c0_320 = arith.constant 0 : index
    %349 = tpu.strided_load %arg8[%c672_319, %c0_320] {strides = array<i32: 2, 1>} : memref<896x8xf32, #tpu.memory_space<vmem>>, vector<14x8xf32>
    %350 = arith.addf %348, %349 : vector<14x8xf32>
    %c673 = arith.constant 673 : index
    %c0_321 = arith.constant 0 : index
    %351 = tpu.strided_load %arg8[%c673, %c0_321] {strides = array<i32: 2, 1>} : memref<896x8xf32, #tpu.memory_space<vmem>>, vector<14x8xf32>
    %352 = arith.addf %350, %351 : vector<14x8xf32>
    %cst_322 = arith.constant 2.500000e-01 : f32
    %353 = vector.broadcast %cst_322 : f32 to vector<14x8xf32>
    %354 = arith.mulf %353, %352 : vector<14x8xf32>
    %c140 = arith.constant 140 : index
    %c0_323 = arith.constant 0 : index
    %355 = vector.load %arg9[%c140, %c0_323] : memref<208x8xf32, #tpu.memory_space<vmem>>, vector<14x8xf32>
    tpu.vector_store %arg9[%c140, %c0_323], %354 {strides = array<i32>} : memref<208x8xf32, #tpu.memory_space<vmem>>, vector<14x8xf32>,
    %c704_324 = arith.constant 704 : index
    %c0_325 = arith.constant 0 : index
    %356 = tpu.strided_load %arg8[%c704_324, %c0_325] {strides = array<i32: 2, 1>} : memref<896x8xf32, #tpu.memory_space<vmem>>, vector<14x8xf32>
    %c705 = arith.constant 705 : index
    %c0_326 = arith.constant 0 : index
    %357 = tpu.strided_load %arg8[%c705, %c0_326] {strides = array<i32: 2, 1>} : memref<896x8xf32, #tpu.memory_space<vmem>>, vector<14x8xf32>
    %358 = arith.addf %356, %357 : vector<14x8xf32>
    %c736_327 = arith.constant 736 : index
    %c0_328 = arith.constant 0 : index
    %359 = tpu.strided_load %arg8[%c736_327, %c0_328] {strides = array<i32: 2, 1>} : memref<896x8xf32, #tpu.memory_space<vmem>>, vector<14x8xf32>
    %360 = arith.addf %358, %359 : vector<14x8xf32>
    %c737 = arith.constant 737 : index
    %c0_329 = arith.constant 0 : index
    %361 = tpu.strided_load %arg8[%c737, %c0_329] {strides = array<i32: 2, 1>} : memref<896x8xf32, #tpu.memory_space<vmem>>, vector<14x8xf32>
    %362 = arith.addf %360, %361 : vector<14x8xf32>
    %cst_330 = arith.constant 2.500000e-01 : f32
    %363 = vector.broadcast %cst_330 : f32 to vector<14x8xf32>
    %364 = arith.mulf %363, %362 : vector<14x8xf32>
    %c154 = arith.constant 154 : index
    %c0_331 = arith.constant 0 : index
    %365 = vector.load %arg9[%c154, %c0_331] : memref<208x8xf32, #tpu.memory_space<vmem>>, vector<14x8xf32>
    tpu.vector_store %arg9[%c154, %c0_331], %364 {strides = array<i32>} : memref<208x8xf32, #tpu.memory_space<vmem>>, vector<14x8xf32>,
    %c768_332 = arith.constant 768 : index
    %c0_333 = arith.constant 0 : index
    %366 = tpu.strided_load %arg8[%c768_332, %c0_333] {strides = array<i32: 2, 1>} : memref<896x8xf32, #tpu.memory_space<vmem>>, vector<14x8xf32>
    %c769 = arith.constant 769 : index
    %c0_334 = arith.constant 0 : index
    %367 = tpu.strided_load %arg8[%c769, %c0_334] {strides = array<i32: 2, 1>} : memref<896x8xf32, #tpu.memory_space<vmem>>, vector<14x8xf32>
    %368 = arith.addf %366, %367 : vector<14x8xf32>
    %c800_335 = arith.constant 800 : index
    %c0_336 = arith.constant 0 : index
    %369 = tpu.strided_load %arg8[%c800_335, %c0_336] {strides = array<i32: 2, 1>} : memref<896x8xf32, #tpu.memory_space<vmem>>, vector<14x8xf32>
    %370 = arith.addf %368, %369 : vector<14x8xf32>
    %c801 = arith.constant 801 : index
    %c0_337 = arith.constant 0 : index
    %371 = tpu.strided_load %arg8[%c801, %c0_337] {strides = array<i32: 2, 1>} : memref<896x8xf32, #tpu.memory_space<vmem>>, vector<14x8xf32>
    %372 = arith.addf %370, %371 : vector<14x8xf32>
    %cst_338 = arith.constant 2.500000e-01 : f32
    %373 = vector.broadcast %cst_338 : f32 to vector<14x8xf32>
    %374 = arith.mulf %373, %372 : vector<14x8xf32>
    %c168 = arith.constant 168 : index
    %c0_339 = arith.constant 0 : index
    %375 = vector.load %arg9[%c168, %c0_339] : memref<208x8xf32, #tpu.memory_space<vmem>>, vector<14x8xf32>
    tpu.vector_store %arg9[%c168, %c0_339], %374 {strides = array<i32>} : memref<208x8xf32, #tpu.memory_space<vmem>>, vector<14x8xf32>,
    %c832_340 = arith.constant 832 : index
    %c0_341 = arith.constant 0 : index
    %376 = tpu.strided_load %arg8[%c832_340, %c0_341] {strides = array<i32: 2, 1>} : memref<896x8xf32, #tpu.memory_space<vmem>>, vector<14x8xf32>
    %c833 = arith.constant 833 : index
    %c0_342 = arith.constant 0 : index
    %377 = tpu.strided_load %arg8[%c833, %c0_342] {strides = array<i32: 2, 1>} : memref<896x8xf32, #tpu.memory_space<vmem>>, vector<14x8xf32>
    %378 = arith.addf %376, %377 : vector<14x8xf32>
    %c864_343 = arith.constant 864 : index
    %c0_344 = arith.constant 0 : index
    %379 = tpu.strided_load %arg8[%c864_343, %c0_344] {strides = array<i32: 2, 1>} : memref<896x8xf32, #tpu.memory_space<vmem>>, vector<14x8xf32>
    %380 = arith.addf %378, %379 : vector<14x8xf32>
    %c865 = arith.constant 865 : index
    %c0_345 = arith.constant 0 : index
    %381 = tpu.strided_load %arg8[%c865, %c0_345] {strides = array<i32: 2, 1>} : memref<896x8xf32, #tpu.memory_space<vmem>>, vector<14x8xf32>
    %382 = arith.addf %380, %381 : vector<14x8xf32>
    %cst_346 = arith.constant 2.500000e-01 : f32
    %383 = vector.broadcast %cst_346 : f32 to vector<14x8xf32>
    %384 = arith.mulf %383, %382 : vector<14x8xf32>
    %c182 = arith.constant 182 : index
    %c0_347 = arith.constant 0 : index
    %385 = vector.load %arg9[%c182, %c0_347] : memref<208x8xf32, #tpu.memory_space<vmem>>, vector<14x8xf32>
    tpu.vector_store %arg9[%c182, %c0_347], %384 {strides = array<i32>} : memref<208x8xf32, #tpu.memory_space<vmem>>, vector<14x8xf32>,
    %c0_348 = arith.constant 0 : index
    %c0_349 = arith.constant 0 : index
    %386 = vector.load %arg9[%c0_348, %c0_349] : memref<208x8xf32, #tpu.memory_space<vmem>>, vector<200x8xf32>
    %c1_350 = arith.constant 1 : index
    %c0_351 = arith.constant 0 : index
    %387 = vector.load %arg9[%c1_350, %c0_351] : memref<208x8xf32, #tpu.memory_space<vmem>>, vector<200x8xf32>
    %c2_352 = arith.constant 2 : index
    %c0_353 = arith.constant 0 : index
    %388 = vector.load %arg9[%c2_352, %c0_353] : memref<208x8xf32, #tpu.memory_space<vmem>>, vector<200x8xf32>
    %c3_354 = arith.constant 3 : index
    %c0_355 = arith.constant 0 : index
    %389 = vector.load %arg9[%c3_354, %c0_355] : memref<208x8xf32, #tpu.memory_space<vmem>>, vector<200x8xf32>
    %c4_356 = arith.constant 4 : index
    %c0_357 = arith.constant 0 : index
    %390 = vector.load %arg9[%c4_356, %c0_357] : memref<208x8xf32, #tpu.memory_space<vmem>>, vector<200x8xf32>
    %391 = tpu.concatenate %386, %387, %388, %389, %390 in 1 : vector<200x8xf32>, vector<200x8xf32>, vector<200x8xf32>, vector<200x8xf32>, vector<200x8xf32> -> vector<200x40xf32>
    %392 = arith.truncf %391 : vector<200x40xf32> to vector<200x40xbf16>
    %c0_358 = arith.constant 0 : index
    %c0_359 = arith.constant 0 : index
    %393 = vector.load %arg10[%c0_358, %c0_359] : memref<200x40xbf16, #tpu.memory_space<vmem>>, vector<200x40xbf16>
    tpu.vector_store %arg10[%c0_358, %c0_359], %392 {strides = array<i32>} : memref<200x40xbf16, #tpu.memory_space<vmem>>, vector<200x40xbf16>,
    %c1_360 = arith.constant 1 : index
    %c0_361 = arith.constant 0 : index
    %394 = vector.load %arg5[%c1_360, %c0_361] : memref<8x128xf32, #tpu.memory_space<vmem>>, vector<1x16xf32>
    %cst_362 = arith.constant 0.000000e+00 : f32
    %395 = vector.broadcast %cst_362 : f32 to vector<144x16xf32>
    %c0_363 = arith.constant 0 : index
    %c0_364 = arith.constant 0 : index
    %396 = vector.load %arg10[%c0_363, %c0_364] : memref<200x40xbf16, #tpu.memory_space<vmem>>, vector<144x40xbf16>
    %c0_365 = arith.constant 0 : index
    %c0_366 = arith.constant 0 : index
    %c0_367 = arith.constant 0 : index
    %397 = vector.load %arg3[%c0_365, %c0_366, %c0_367] : memref<5x40x16xbf16, #tpu.memory_space<vmem>>, vector<1x40x16xbf16>
    %398 = vector.shape_cast %397 : vector<1x40x16xbf16> to vector<40x16xbf16>
    %cst_368 = arith.constant dense<0.000000e+00> : vector<144x16xf32>
    %399 = tpu.matmul %396, %398, %cst_368 {dimension_numbers = #tpu.dot_dimension_numbers<[1], [0], [0], [1], [0, 0, 1, 1], [], []>} : vector<144x40xbf16>, vector<40x16xbf16>, vector<144x16xf32> -> vector<144x16xf32>
    %400 = arith.addf %395, %399 : vector<144x16xf32>
    %c14_369 = arith.constant 14 : index
    %c0_370 = arith.constant 0 : index
    %401 = vector.load %arg10[%c14_369, %c0_370] : memref<200x40xbf16, #tpu.memory_space<vmem>>, vector<144x40xbf16>
    %c1_371 = arith.constant 1 : index
    %c0_372 = arith.constant 0 : index
    %c0_373 = arith.constant 0 : index
    %402 = vector.load %arg3[%c1_371, %c0_372, %c0_373] : memref<5x40x16xbf16, #tpu.memory_space<vmem>>, vector<1x40x16xbf16>
    %403 = vector.shape_cast %402 : vector<1x40x16xbf16> to vector<40x16xbf16>
    %cst_374 = arith.constant dense<0.000000e+00> : vector<144x16xf32>
    %404 = tpu.matmul %401, %403, %cst_374 {dimension_numbers = #tpu.dot_dimension_numbers<[1], [0], [0], [1], [0, 0, 1, 1], [], []>} : vector<144x40xbf16>, vector<40x16xbf16>, vector<144x16xf32> -> vector<144x16xf32>
    %405 = arith.addf %400, %404 : vector<144x16xf32>
    %c28_375 = arith.constant 28 : index
    %c0_376 = arith.constant 0 : index
    %406 = vector.load %arg10[%c28_375, %c0_376] : memref<200x40xbf16, #tpu.memory_space<vmem>>, vector<144x40xbf16>
    %c2_377 = arith.constant 2 : index
    %c0_378 = arith.constant 0 : index
    %c0_379 = arith.constant 0 : index
    %407 = vector.load %arg3[%c2_377, %c0_378, %c0_379] : memref<5x40x16xbf16, #tpu.memory_space<vmem>>, vector<1x40x16xbf16>
    %408 = vector.shape_cast %407 : vector<1x40x16xbf16> to vector<40x16xbf16>
    %cst_380 = arith.constant dense<0.000000e+00> : vector<144x16xf32>
    %409 = tpu.matmul %406, %408, %cst_380 {dimension_numbers = #tpu.dot_dimension_numbers<[1], [0], [0], [1], [0, 0, 1, 1], [], []>} : vector<144x40xbf16>, vector<40x16xbf16>, vector<144x16xf32> -> vector<144x16xf32>
    %410 = arith.addf %405, %409 : vector<144x16xf32>
    %c42_381 = arith.constant 42 : index
    %c0_382 = arith.constant 0 : index
    %411 = vector.load %arg10[%c42_381, %c0_382] : memref<200x40xbf16, #tpu.memory_space<vmem>>, vector<144x40xbf16>
    %c3_383 = arith.constant 3 : index
    %c0_384 = arith.constant 0 : index
    %c0_385 = arith.constant 0 : index
    %412 = vector.load %arg3[%c3_383, %c0_384, %c0_385] : memref<5x40x16xbf16, #tpu.memory_space<vmem>>, vector<1x40x16xbf16>
    %413 = vector.shape_cast %412 : vector<1x40x16xbf16> to vector<40x16xbf16>
    %cst_386 = arith.constant dense<0.000000e+00> : vector<144x16xf32>
    %414 = tpu.matmul %411, %413, %cst_386 {dimension_numbers = #tpu.dot_dimension_numbers<[1], [0], [0], [1], [0, 0, 1, 1], [], []>} : vector<144x40xbf16>, vector<40x16xbf16>, vector<144x16xf32> -> vector<144x16xf32>
    %415 = arith.addf %410, %414 : vector<144x16xf32>
    %c56_387 = arith.constant 56 : index
    %c0_388 = arith.constant 0 : index
    %416 = vector.load %arg10[%c56_387, %c0_388] : memref<200x40xbf16, #tpu.memory_space<vmem>>, vector<144x40xbf16>
    %c4_389 = arith.constant 4 : index
    %c0_390 = arith.constant 0 : index
    %c0_391 = arith.constant 0 : index
    %417 = vector.load %arg3[%c4_389, %c0_390, %c0_391] : memref<5x40x16xbf16, #tpu.memory_space<vmem>>, vector<1x40x16xbf16>
    %418 = vector.shape_cast %417 : vector<1x40x16xbf16> to vector<40x16xbf16>
    %cst_392 = arith.constant dense<0.000000e+00> : vector<144x16xf32>
    %419 = tpu.matmul %416, %418, %cst_392 {dimension_numbers = #tpu.dot_dimension_numbers<[1], [0], [0], [1], [0, 0, 1, 1], [], []>} : vector<144x40xbf16>, vector<40x16xbf16>, vector<144x16xf32> -> vector<144x16xf32>
    %420 = arith.addf %415, %419 : vector<144x16xf32>
    %421 = vector.broadcast %394 : vector<1x16xf32> to vector<144x16xf32>
    %422 = arith.addf %420, %421 : vector<144x16xf32>
    %423 = math.tanh %422 : vector<144x16xf32>
    %c0_393 = arith.constant 0 : index
    %c0_394 = arith.constant 0 : index
    %424 = vector.load %arg11[%c0_393, %c0_394] : memref<144x16xf32, #tpu.memory_space<vmem>>, vector<144x16xf32>
    tpu.vector_store %arg11[%c0_393, %c0_394], %423 {strides = array<i32>} : memref<144x16xf32, #tpu.memory_space<vmem>>, vector<144x16xf32>,
    %c0_395 = arith.constant 0 : index
    %c0_396 = arith.constant 0 : index
    %425 = tpu.strided_load %arg11[%c0_395, %c0_396] {strides = array<i32: 2, 1>} : memref<144x16xf32, #tpu.memory_space<vmem>>, vector<5x16xf32>
    %c1_397 = arith.constant 1 : index
    %c0_398 = arith.constant 0 : index
    %426 = tpu.strided_load %arg11[%c1_397, %c0_398] {strides = array<i32: 2, 1>} : memref<144x16xf32, #tpu.memory_space<vmem>>, vector<5x16xf32>
    %427 = arith.addf %425, %426 : vector<5x16xf32>
    %c14_399 = arith.constant 14 : index
    %c0_400 = arith.constant 0 : index
    %428 = tpu.strided_load %arg11[%c14_399, %c0_400] {strides = array<i32: 2, 1>} : memref<144x16xf32, #tpu.memory_space<vmem>>, vector<5x16xf32>
    %429 = arith.addf %427, %428 : vector<5x16xf32>
    %c15 = arith.constant 15 : index
    %c0_401 = arith.constant 0 : index
    %430 = tpu.strided_load %arg11[%c15, %c0_401] {strides = array<i32: 2, 1>} : memref<144x16xf32, #tpu.memory_space<vmem>>, vector<5x16xf32>
    %431 = arith.addf %429, %430 : vector<5x16xf32>
    %cst_402 = arith.constant 2.500000e-01 : f32
    %432 = vector.broadcast %cst_402 : f32 to vector<5x16xf32>
    %433 = arith.mulf %432, %431 : vector<5x16xf32>
    %c0_403 = arith.constant 0 : index
    %c0_404 = arith.constant 0 : index
    %434 = vector.load %arg12[%c0_403, %c0_404] : memref<32x16xf32, #tpu.memory_space<vmem>>, vector<5x16xf32>
    tpu.vector_store %arg12[%c0_403, %c0_404], %433 {strides = array<i32>} : memref<32x16xf32, #tpu.memory_space<vmem>>, vector<5x16xf32>,
    %c28_405 = arith.constant 28 : index
    %c0_406 = arith.constant 0 : index
    %435 = tpu.strided_load %arg11[%c28_405, %c0_406] {strides = array<i32: 2, 1>} : memref<144x16xf32, #tpu.memory_space<vmem>>, vector<5x16xf32>
    %c29 = arith.constant 29 : index
    %c0_407 = arith.constant 0 : index
    %436 = tpu.strided_load %arg11[%c29, %c0_407] {strides = array<i32: 2, 1>} : memref<144x16xf32, #tpu.memory_space<vmem>>, vector<5x16xf32>
    %437 = arith.addf %435, %436 : vector<5x16xf32>
    %c42_408 = arith.constant 42 : index
    %c0_409 = arith.constant 0 : index
    %438 = tpu.strided_load %arg11[%c42_408, %c0_409] {strides = array<i32: 2, 1>} : memref<144x16xf32, #tpu.memory_space<vmem>>, vector<5x16xf32>
    %439 = arith.addf %437, %438 : vector<5x16xf32>
    %c43 = arith.constant 43 : index
    %c0_410 = arith.constant 0 : index
    %440 = tpu.strided_load %arg11[%c43, %c0_410] {strides = array<i32: 2, 1>} : memref<144x16xf32, #tpu.memory_space<vmem>>, vector<5x16xf32>
    %441 = arith.addf %439, %440 : vector<5x16xf32>
    %cst_411 = arith.constant 2.500000e-01 : f32
    %442 = vector.broadcast %cst_411 : f32 to vector<5x16xf32>
    %443 = arith.mulf %442, %441 : vector<5x16xf32>
    %c5 = arith.constant 5 : index
    %c0_412 = arith.constant 0 : index
    %444 = vector.load %arg12[%c5, %c0_412] : memref<32x16xf32, #tpu.memory_space<vmem>>, vector<5x16xf32>
    tpu.vector_store %arg12[%c5, %c0_412], %443 {strides = array<i32>} : memref<32x16xf32, #tpu.memory_space<vmem>>, vector<5x16xf32>,
    %c56_413 = arith.constant 56 : index
    %c0_414 = arith.constant 0 : index
    %445 = tpu.strided_load %arg11[%c56_413, %c0_414] {strides = array<i32: 2, 1>} : memref<144x16xf32, #tpu.memory_space<vmem>>, vector<5x16xf32>
    %c57 = arith.constant 57 : index
    %c0_415 = arith.constant 0 : index
    %446 = tpu.strided_load %arg11[%c57, %c0_415] {strides = array<i32: 2, 1>} : memref<144x16xf32, #tpu.memory_space<vmem>>, vector<5x16xf32>
    %447 = arith.addf %445, %446 : vector<5x16xf32>
    %c70_416 = arith.constant 70 : index
    %c0_417 = arith.constant 0 : index
    %448 = tpu.strided_load %arg11[%c70_416, %c0_417] {strides = array<i32: 2, 1>} : memref<144x16xf32, #tpu.memory_space<vmem>>, vector<5x16xf32>
    %449 = arith.addf %447, %448 : vector<5x16xf32>
    %c71 = arith.constant 71 : index
    %c0_418 = arith.constant 0 : index
    %450 = tpu.strided_load %arg11[%c71, %c0_418] {strides = array<i32: 2, 1>} : memref<144x16xf32, #tpu.memory_space<vmem>>, vector<5x16xf32>
    %451 = arith.addf %449, %450 : vector<5x16xf32>
    %cst_419 = arith.constant 2.500000e-01 : f32
    %452 = vector.broadcast %cst_419 : f32 to vector<5x16xf32>
    %453 = arith.mulf %452, %451 : vector<5x16xf32>
    %c10 = arith.constant 10 : index
    %c0_420 = arith.constant 0 : index
    %454 = vector.load %arg12[%c10, %c0_420] : memref<32x16xf32, #tpu.memory_space<vmem>>, vector<5x16xf32>
    tpu.vector_store %arg12[%c10, %c0_420], %453 {strides = array<i32>} : memref<32x16xf32, #tpu.memory_space<vmem>>, vector<5x16xf32>,
    %c84_421 = arith.constant 84 : index
    %c0_422 = arith.constant 0 : index
    %455 = tpu.strided_load %arg11[%c84_421, %c0_422] {strides = array<i32: 2, 1>} : memref<144x16xf32, #tpu.memory_space<vmem>>, vector<5x16xf32>
    %c85 = arith.constant 85 : index
    %c0_423 = arith.constant 0 : index
    %456 = tpu.strided_load %arg11[%c85, %c0_423] {strides = array<i32: 2, 1>} : memref<144x16xf32, #tpu.memory_space<vmem>>, vector<5x16xf32>
    %457 = arith.addf %455, %456 : vector<5x16xf32>
    %c98_424 = arith.constant 98 : index
    %c0_425 = arith.constant 0 : index
    %458 = tpu.strided_load %arg11[%c98_424, %c0_425] {strides = array<i32: 2, 1>} : memref<144x16xf32, #tpu.memory_space<vmem>>, vector<5x16xf32>
    %459 = arith.addf %457, %458 : vector<5x16xf32>
    %c99 = arith.constant 99 : index
    %c0_426 = arith.constant 0 : index
    %460 = tpu.strided_load %arg11[%c99, %c0_426] {strides = array<i32: 2, 1>} : memref<144x16xf32, #tpu.memory_space<vmem>>, vector<5x16xf32>
    %461 = arith.addf %459, %460 : vector<5x16xf32>
    %cst_427 = arith.constant 2.500000e-01 : f32
    %462 = vector.broadcast %cst_427 : f32 to vector<5x16xf32>
    %463 = arith.mulf %462, %461 : vector<5x16xf32>
    %c15_428 = arith.constant 15 : index
    %c0_429 = arith.constant 0 : index
    %464 = vector.load %arg12[%c15_428, %c0_429] : memref<32x16xf32, #tpu.memory_space<vmem>>, vector<5x16xf32>
    tpu.vector_store %arg12[%c15_428, %c0_429], %463 {strides = array<i32>} : memref<32x16xf32, #tpu.memory_space<vmem>>, vector<5x16xf32>,
    %c112_430 = arith.constant 112 : index
    %c0_431 = arith.constant 0 : index
    %465 = tpu.strided_load %arg11[%c112_430, %c0_431] {strides = array<i32: 2, 1>} : memref<144x16xf32, #tpu.memory_space<vmem>>, vector<5x16xf32>
    %c113 = arith.constant 113 : index
    %c0_432 = arith.constant 0 : index
    %466 = tpu.strided_load %arg11[%c113, %c0_432] {strides = array<i32: 2, 1>} : memref<144x16xf32, #tpu.memory_space<vmem>>, vector<5x16xf32>
    %467 = arith.addf %465, %466 : vector<5x16xf32>
    %c126_433 = arith.constant 126 : index
    %c0_434 = arith.constant 0 : index
    %468 = tpu.strided_load %arg11[%c126_433, %c0_434] {strides = array<i32: 2, 1>} : memref<144x16xf32, #tpu.memory_space<vmem>>, vector<5x16xf32>
    %469 = arith.addf %467, %468 : vector<5x16xf32>
    %c127 = arith.constant 127 : index
    %c0_435 = arith.constant 0 : index
    %470 = tpu.strided_load %arg11[%c127, %c0_435] {strides = array<i32: 2, 1>} : memref<144x16xf32, #tpu.memory_space<vmem>>, vector<5x16xf32>
    %471 = arith.addf %469, %470 : vector<5x16xf32>
    %cst_436 = arith.constant 2.500000e-01 : f32
    %472 = vector.broadcast %cst_436 : f32 to vector<5x16xf32>
    %473 = arith.mulf %472, %471 : vector<5x16xf32>
    %c20 = arith.constant 20 : index
    %c0_437 = arith.constant 0 : index
    %474 = vector.load %arg12[%c20, %c0_437] : memref<32x16xf32, #tpu.memory_space<vmem>>, vector<5x16xf32>
    tpu.vector_store %arg12[%c20, %c0_437], %473 {strides = array<i32>} : memref<32x16xf32, #tpu.memory_space<vmem>>, vector<5x16xf32>,
    %c0_438 = arith.constant 0 : index
    %c0_439 = arith.constant 0 : index
    %475 = tpu.strided_load %arg12[%c0_438, %c0_439] {strides = array<i32: 5, 1>} : memref<32x16xf32, #tpu.memory_space<vmem>>, vector<5x16xf32>
    %c1_440 = arith.constant 1 : index
    %c0_441 = arith.constant 0 : index
    %476 = tpu.strided_load %arg12[%c1_440, %c0_441] {strides = array<i32: 5, 1>} : memref<32x16xf32, #tpu.memory_space<vmem>>, vector<5x16xf32>
    %c2_442 = arith.constant 2 : index
    %c0_443 = arith.constant 0 : index
    %477 = tpu.strided_load %arg12[%c2_442, %c0_443] {strides = array<i32: 5, 1>} : memref<32x16xf32, #tpu.memory_space<vmem>>, vector<5x16xf32>
    %c3_444 = arith.constant 3 : index
    %c0_445 = arith.constant 0 : index
    %478 = tpu.strided_load %arg12[%c3_444, %c0_445] {strides = array<i32: 5, 1>} : memref<32x16xf32, #tpu.memory_space<vmem>>, vector<5x16xf32>
    %c4_446 = arith.constant 4 : index
    %c0_447 = arith.constant 0 : index
    %479 = tpu.strided_load %arg12[%c4_446, %c0_447] {strides = array<i32: 5, 1>} : memref<32x16xf32, #tpu.memory_space<vmem>>, vector<5x16xf32>
    %480 = tpu.concatenate %475, %476, %477, %478, %479 in 1 : vector<5x16xf32>, vector<5x16xf32>, vector<5x16xf32>, vector<5x16xf32>, vector<5x16xf32> -> vector<5x80xf32>
    %c2_448 = arith.constant 2 : index
    %c0_449 = arith.constant 0 : index
    %481 = vector.load %arg5[%c2_448, %c0_449] : memref<8x128xf32, #tpu.memory_space<vmem>>, vector<1x128xf32>
    %482 = vector.extract_strided_slice %480 {offsets = [0, 0], sizes = [1, 80], strides = [1, 1]} : vector<5x80xf32> to vector<1x80xf32>
    %483 = arith.truncf %482 : vector<1x80xf32> to vector<1x80xbf16>
    %c0_450 = arith.constant 0 : index
    %c0_451 = arith.constant 0 : index
    %c0_452 = arith.constant 0 : index
    %484 = vector.load %arg4[%c0_450, %c0_451, %c0_452] : memref<5x80x128xbf16, #tpu.memory_space<vmem>>, vector<1x80x128xbf16>
    %485 = vector.shape_cast %484 : vector<1x80x128xbf16> to vector<80x128xbf16>
    %cst_453 = arith.constant dense<0.000000e+00> : vector<1x128xf32>
    %486 = tpu.matmul %483, %485, %cst_453 {dimension_numbers = #tpu.dot_dimension_numbers<[1], [0], [0], [1], [0, 0, 1, 1], [], []>} : vector<1x80xbf16>, vector<80x128xbf16>, vector<1x128xf32> -> vector<1x128xf32>
    %487 = arith.addf %481, %486 : vector<1x128xf32>
    %488 = vector.extract_strided_slice %480 {offsets = [1, 0], sizes = [1, 80], strides = [1, 1]} : vector<5x80xf32> to vector<1x80xf32>
    %489 = arith.truncf %488 : vector<1x80xf32> to vector<1x80xbf16>
    %c1_454 = arith.constant 1 : index
    %c0_455 = arith.constant 0 : index
    %c0_456 = arith.constant 0 : index
    %490 = vector.load %arg4[%c1_454, %c0_455, %c0_456] : memref<5x80x128xbf16, #tpu.memory_space<vmem>>, vector<1x80x128xbf16>
    %491 = vector.shape_cast %490 : vector<1x80x128xbf16> to vector<80x128xbf16>
    %cst_457 = arith.constant dense<0.000000e+00> : vector<1x128xf32>
    %492 = tpu.matmul %489, %491, %cst_457 {dimension_numbers = #tpu.dot_dimension_numbers<[1], [0], [0], [1], [0, 0, 1, 1], [], []>} : vector<1x80xbf16>, vector<80x128xbf16>, vector<1x128xf32> -> vector<1x128xf32>
    %493 = arith.addf %487, %492 : vector<1x128xf32>
    %494 = vector.extract_strided_slice %480 {offsets = [2, 0], sizes = [1, 80], strides = [1, 1]} : vector<5x80xf32> to vector<1x80xf32>
    %495 = arith.truncf %494 : vector<1x80xf32> to vector<1x80xbf16>
    %c2_458 = arith.constant 2 : index
    %c0_459 = arith.constant 0 : index
    %c0_460 = arith.constant 0 : index
    %496 = vector.load %arg4[%c2_458, %c0_459, %c0_460] : memref<5x80x128xbf16, #tpu.memory_space<vmem>>, vector<1x80x128xbf16>
    %497 = vector.shape_cast %496 : vector<1x80x128xbf16> to vector<80x128xbf16>
    %cst_461 = arith.constant dense<0.000000e+00> : vector<1x128xf32>
    %498 = tpu.matmul %495, %497, %cst_461 {dimension_numbers = #tpu.dot_dimension_numbers<[1], [0], [0], [1], [0, 0, 1, 1], [], []>} : vector<1x80xbf16>, vector<80x128xbf16>, vector<1x128xf32> -> vector<1x128xf32>
    %499 = arith.addf %493, %498 : vector<1x128xf32>
    %500 = vector.extract_strided_slice %480 {offsets = [3, 0], sizes = [1, 80], strides = [1, 1]} : vector<5x80xf32> to vector<1x80xf32>
    %501 = arith.truncf %500 : vector<1x80xf32> to vector<1x80xbf16>
    %c3_462 = arith.constant 3 : index
    %c0_463 = arith.constant 0 : index
    %c0_464 = arith.constant 0 : index
    %502 = vector.load %arg4[%c3_462, %c0_463, %c0_464] : memref<5x80x128xbf16, #tpu.memory_space<vmem>>, vector<1x80x128xbf16>
    %503 = vector.shape_cast %502 : vector<1x80x128xbf16> to vector<80x128xbf16>
    %cst_465 = arith.constant dense<0.000000e+00> : vector<1x128xf32>
    %504 = tpu.matmul %501, %503, %cst_465 {dimension_numbers = #tpu.dot_dimension_numbers<[1], [0], [0], [1], [0, 0, 1, 1], [], []>} : vector<1x80xbf16>, vector<80x128xbf16>, vector<1x128xf32> -> vector<1x128xf32>
    %505 = arith.addf %499, %504 : vector<1x128xf32>
    %506 = vector.extract_strided_slice %480 {offsets = [4, 0], sizes = [1, 80], strides = [1, 1]} : vector<5x80xf32> to vector<1x80xf32>
    %507 = arith.truncf %506 : vector<1x80xf32> to vector<1x80xbf16>
    %c4_466 = arith.constant 4 : index
    %c0_467 = arith.constant 0 : index
    %c0_468 = arith.constant 0 : index
    %508 = vector.load %arg4[%c4_466, %c0_467, %c0_468] : memref<5x80x128xbf16, #tpu.memory_space<vmem>>, vector<1x80x128xbf16>
    %509 = vector.shape_cast %508 : vector<1x80x128xbf16> to vector<80x128xbf16>
    %cst_469 = arith.constant dense<0.000000e+00> : vector<1x128xf32>
    %510 = tpu.matmul %507, %509, %cst_469 {dimension_numbers = #tpu.dot_dimension_numbers<[1], [0], [0], [1], [0, 0, 1, 1], [], []>} : vector<1x80xbf16>, vector<80x128xbf16>, vector<1x128xf32> -> vector<1x128xf32>
    %511 = arith.addf %505, %510 : vector<1x128xf32>
    %512 = math.tanh %511 : vector<1x128xf32>
    %513 = arith.truncf %512 : vector<1x128xf32> to vector<1x128xbf16>
    %c0_470 = arith.constant 0 : index
    %c0_471 = arith.constant 0 : index
    %c0_472 = arith.constant 0 : index
    %514 = vector.load %arg6[%c0_470, %c0_471, %c0_472] : memref<2x128x128xbf16, #tpu.memory_space<vmem>>, vector<1x128x128xbf16>
    %515 = vector.shape_cast %514 : vector<1x128x128xbf16> to vector<128x128xbf16>
    %cst_473 = arith.constant dense<0.000000e+00> : vector<1x128xf32>
    %516 = tpu.matmul %513, %515, %cst_473 {dimension_numbers = #tpu.dot_dimension_numbers<[1], [0], [0], [1], [0, 0, 1, 1], [], []>} : vector<1x128xbf16>, vector<128x128xbf16>, vector<1x128xf32> -> vector<1x128xf32>
    %c3_474 = arith.constant 3 : index
    %c0_475 = arith.constant 0 : index
    %517 = vector.load %arg5[%c3_474, %c0_475] : memref<8x128xf32, #tpu.memory_space<vmem>>, vector<1x128xf32>
    %518 = arith.addf %516, %517 : vector<1x128xf32>
    %519 = math.tanh %518 : vector<1x128xf32>
    %520 = arith.truncf %519 : vector<1x128xf32> to vector<1x128xbf16>
    %c1_476 = arith.constant 1 : index
    %c0_477 = arith.constant 0 : index
    %c0_478 = arith.constant 0 : index
    %521 = vector.load %arg6[%c1_476, %c0_477, %c0_478] : memref<2x128x128xbf16, #tpu.memory_space<vmem>>, vector<1x128x128xbf16>
    %522 = vector.shape_cast %521 : vector<1x128x128xbf16> to vector<128x128xbf16>
    %cst_479 = arith.constant dense<0.000000e+00> : vector<1x128xf32>
    %523 = tpu.matmul %520, %522, %cst_479 {dimension_numbers = #tpu.dot_dimension_numbers<[1], [0], [0], [1], [0, 0, 1, 1], [], []>} : vector<1x128xbf16>, vector<128x128xbf16>, vector<1x128xf32> -> vector<1x128xf32>
    %c4_480 = arith.constant 4 : index
    %c0_481 = arith.constant 0 : index
    %524 = vector.load %arg5[%c4_480, %c0_481] : memref<8x128xf32, #tpu.memory_space<vmem>>, vector<1x128xf32>
    %525 = arith.addf %523, %524 : vector<1x128xf32>
    %c0_482 = arith.constant 0 : index
    %c0_483 = arith.constant 0 : index
    %c0_484 = arith.constant 0 : index
    %526 = vector.load %arg7[%c0_482, %c0_483, %c0_484] : memref<1x1x128xf32, #tpu.memory_space<vmem>>, vector<1x1x128xf32>
    %527 = vector.shape_cast %526 : vector<1x1x128xf32> to vector<1x128xf32>
    %528 = vector.shape_cast %525 : vector<1x128xf32> to vector<1x1x128xf32>
    tpu.vector_store %arg7[%c0_482, %c0_483, %c0_484], %528 {strides = array<i32>} : memref<1x1x128xf32, #tpu.memory_space<vmem>>, vector<1x1x128xf32>,
    return
  }
  func.func @transform_0(%arg0: i32) -> (i32, i32, i32) {
    %c0_i32 = arith.constant 0 : i32
    %c0_i32_0 = arith.constant 0 : i32
    %c0_i32_1 = arith.constant 0 : i32
    return %arg0, %c0_i32, %c0_i32_0 : i32, i32, i32
  }
  func.func @transform_1(%arg0: i32) -> (i32, i32, i32) {
    %c0_i32 = arith.constant 0 : i32
    %c0_i32_0 = arith.constant 0 : i32
    %c0_i32_1 = arith.constant 0 : i32
    %c0_i32_2 = arith.constant 0 : i32
    return %c0_i32, %c0_i32_0, %c0_i32_1 : i32, i32, i32
  }
  func.func @transform_2(%arg0: i32) -> (i32, i32, i32) {
    %c0_i32 = arith.constant 0 : i32
    %c0_i32_0 = arith.constant 0 : i32
    %c0_i32_1 = arith.constant 0 : i32
    %c0_i32_2 = arith.constant 0 : i32
    return %c0_i32, %c0_i32_0, %c0_i32_1 : i32, i32, i32
  }
  func.func @transform_3(%arg0: i32) -> (i32, i32, i32) {
    %c0_i32 = arith.constant 0 : i32
    %c0_i32_0 = arith.constant 0 : i32
    %c0_i32_1 = arith.constant 0 : i32
    %c0_i32_2 = arith.constant 0 : i32
    return %c0_i32, %c0_i32_0, %c0_i32_1 : i32, i32, i32
  }
  func.func @transform_4(%arg0: i32) -> (i32, i32) {
    %c0_i32 = arith.constant 0 : i32
    %c0_i32_0 = arith.constant 0 : i32
    %c0_i32_1 = arith.constant 0 : i32
    return %c0_i32, %c0_i32_0 : i32, i32
  }
  func.func @transform_5(%arg0: i32) -> (i32, i32, i32) {
    %c0_i32 = arith.constant 0 : i32
    %c0_i32_0 = arith.constant 0 : i32
    %c0_i32_1 = arith.constant 0 : i32
    %c0_i32_2 = arith.constant 0 : i32
    return %c0_i32, %c0_i32_0, %c0_i32_1 : i32, i32, i32
  }
  func.func @transform_6(%arg0: i32) -> (i32, i32, i32) {
    %c0_i32 = arith.constant 0 : i32
    %c0_i32_0 = arith.constant 0 : i32
    %c0_i32_1 = arith.constant 0 : i32
    return %arg0, %c0_i32, %c0_i32_0 : i32, i32, i32
  }
}

</mosaic_0001>

<bundles_post_ra>
// kernel: lenet5_forward.1
= control target key start
LH: loop header
LB: loop body
LE: loop exit
PB: predicated region body
PF: predicated region fallthrough
CT: control target
= control target key end

     0   :  { %11 = vsyncpa [#allocation8], 0  ;;  %s16031_s0 = inlined_call_operand.vmem [shape: bf16[2,1024,15], index: 0, kind: input, shape index: {}]   ;;  %s16032_s1 = inlined_call_operand.vmem [shape: bf16[5,15,8], index: 1, kind: input, shape index: {}]   ;;  %s16033_s2 = inlined_call_operand.vmem [shape: bf16[5,40,16], index: 2, kind: input, shape index: {}]   ;;  %s16034_s3 = inlined_call_operand.vmem [shape: bf16[5,80,128], index: 3, kind: input, shape index: {}]   ;;  %s16035_s4 = inlined_call_operand.vmem [shape: f32[8,128], index: 4, kind: input, shape index: {}]   ;;  %s16036_s5 = inlined_call_operand.vmem [shape: bf16[2,128,128], index: 5, kind: input, shape index: {}]   ;;  %s16037_s6 = inlined_call_operand.hbm [shape: f32[2,1,128], index: 6, kind: output, shape index: {}]  }
   0x1   :  { %13 = vsyncpa [#allocation8 + $0x1], 0  ;;  %s13940_s21 = smov 0   ;;  %s13942_s22 = smov 0  }
   0x2   :  { %s13944_s23 = smov 0   ;;  %s13946_s24 = smov 0  }
   0x3 LB: > { %s13961_s25 = sadd.s32 4294967295, %s13893_s24   ;;  %s10227_s26 = sadd.s32 4294967294, %s13893_s24   ;;  %s13893_s24 = sphi %s13946_s24, %s16043_s24   ;;  %s13889_s23 = sphi %s13944_s23, %s16042_s23   ;;  %s13885_s22 = sphi %s13942_s22, %s16041_s22   ;;  %s13881_s21 = sphi %s13940_s21, %s16040_s21  }
   0x4   : > { %s13965_s27 = sadd.s32 1, %s13893_s24   ;;  %s157_s28 = sadd.s32 1, %s13889_s23 }
   0x5   : > { %s154_s29 = ssub.s32 %s13893_s24, %s13965_s27  ;;  %p167_p0 = scmp.ne.s32.totalorder %s13889_s23, %s13885_s22 }
   0x6   : > { %p155_p1 = scmp.eq.s32.totalorder %s154_s29, 0  ;;  %p168_p2 = scmp.eq.s32.totalorder %s13961_s25, 1 }
   0x7   : > { %p173_p3 = scmp.ne.s32.totalorder %s13885_s22, %s13881_s21  ;;  %p174_p4 = scmp.eq.s32.totalorder %s10227_s26, 1 }
   0x8   : > { %s13976_s30 = scalar_select %p155_p1, %s13889_s23, %s157_s28  }
   0x9   : > { %p13978_p5 = por %p168_p2, %p167_p0  ;;  %p13982_p6 = por %p174_p4, %p173_p3 }
   0xa   : > { %p10230_p7 = scmp.ge.s32.totalorder %s13893_s24, 1  ;;  %p215_p8 = scmp.lt.s32.totalorder %s13893_s24, 3 }
   0xc   : > { %p216_p9 = pnand %p10230_p7, %p215_p8 }
   0xd   : > { %v13194_v0 = vld [vmem:[%s16032_s1 + $0x8] sm:$0xff] (!%p216_p9)   ;;  %vm346_vm0 = vcmask (!%p216_p9), 1046528   ;;  %vm347_vm1 = vcmask (!%p216_p9), 1047552   ;;  %v13895_v1 = vmov (!%p216_p9), 65535   ;;  %p244_p10 = scmp.lt.s32.totalorder (!%p216_p9), %s13961_s25, 1  ;;  %v13197_v5 = vld [vmem:[%s16032_s1] sm:$0xff] (!%p216_p9)  }
   0xe   : > { %219 = sbr.rel (%p216_p9) target bundleno = 2264 (0x8d8), region = 44  ;;  %v348_v2 = vsel (!%p216_p9), %vm346_vm0, 4294967295, %v13895_v1  ;;  %v13195_v3 = vld [vmem:[%s16032_s1 + $0x8] sm:$0xff] (!%p216_p9)   ;;  %v13205_v8 = vld [vmem:[%s16032_s1] sm:$0xff] (!%p216_p9)   ;;  %v13215_v11 = vld [vmem:[%s16032_s1 + $0x10] sm:$0xff] (!%p216_p9)   ;;  %vm321_vm2 = vcmask (!%p216_p9), 121856  }
   0xf   : > { %v13996_v4 = vsel (!%p216_p9), %vm347_vm1, %v348_v2, 0  ;;  %v13219_v12 = vld [vmem:[%s16032_s1 + $0x10] sm:$0xff] (!%p216_p9)   ;;  %v13221_v33 = vld [vmem:[%s16032_s1 + $0x18] sm:$0xff] (!%p216_p9)   ;;  %v13239_v43 = vld [vmem:[%s16032_s1 + $0x20] sm:$0xff] (!%p216_p9)   ;;  %vm1219_vm3 = vcmask (!%p216_p9), 64512   ;;  %vm7086_vm4 = vcmask (!%p216_p9), 62464  }
  0x10   : > { %v351_v6 = vand.u32 (!%p216_p9), %v13194_v0, %v13996_v4  ;;  %v1330_v7 = vand.u32 (!%p216_p9), %v13195_v3, %v13996_v4  ;;  %v472_v9 = vand.u32 (!%p216_p9), %v13197_v5, %v13996_v4  ;;  %v1451_v10 = vand.u32 (!%p216_p9), %v13205_v8, %v13996_v4  ;;  %v13229_v35 = vld [vmem:[%s16032_s1 + $0x18] sm:$0xff] (!%p216_p9)   ;;  %v13247_v44 = vld [vmem:[%s16032_s1 + $0x20] sm:$0xff] (!%p216_p9)   ;;  %v13258_v63 = vld [vmem:[%s16032_s1 + $0x8] sm:$0xff] (!%p216_p9)   ;;  %s13896_s19 = smov (!%p216_p9), 16   ;;  %s13897_s20 = smov (!%p216_p9), 8  }
  0x11   : > { %v660_v17 = vand.u32 (!%p216_p9), %v13215_v11, %v13996_v4  ;;  %v1638_v19 = vand.u32 (!%p216_p9), %v13219_v12, %v13996_v4  ;;  %v864_v37 = vand.u32 (!%p216_p9), %v13221_v33, %v13996_v4  ;;  %v1841_v38 = vand.u32 (!%p216_p9), %v13229_v35, %v13996_v4  ;;  %v13265_v0 = vld [vmem:[%s16032_s1 + $0x8] sm:$0xff] (!%p216_p9)   ;;  %s13898_s9 = smov (!%p216_p9), 24   ;;  %s13899_s10 = smov (!%p216_p9), 32  }
  0x12   : > { %11551 = vmatprep.subr.bf16.mxu0 (!%p216_p9), %v351_v6  ;;  %11641 = vmatprep.subr.bf16.mxu1 (!%p216_p9), %v1330_v7  ;;  %v1068_v47 = vand.u32 (!%p216_p9), %v13239_v43, %v13996_v4  ;;  %v2044_v48 = vand.u32 (!%p216_p9), %v13247_v44, %v13996_v4  ;;  %v2301_v3 = vand.u32 (!%p216_p9), %v13258_v63, %v13996_v4  ;;  %vm8325_vm5 = vcmask (!%p216_p9), 1043456   ;;  %s13903_s26 = smov (!%p216_p9), 48   ;;  %s242_s11 = sand.u32 (!%p216_p9), 1, %s13885_s22  }
  0x13   : > { %11552 = vmatpush3.bf16.msra.mxu0 (!%p216_p9), %v351_v6  ;;  %11642 = vmatpush3.bf16.msra.mxu1 (!%p216_p9), %v1330_v7  ;;  %v3272_v5 = vand.u32 (!%p216_p9), %v13265_v0, %v13996_v4  ;;  %vm13901_vm6 = vmmov (!%p216_p9), 0   ;;  %vm7976_vm7 = vcmask (!%p216_p9), 130048   ;;  %vm8002_vm8 = vcmask (!%p216_p9), 195584   ;;  %s13904_s16 = smov (!%p216_p9), [#allocation7]  }
  0x14   : > { %11569 = vmatprep.subr.bf16.mxu0 (!%p216_p9), %v472_v9  ;;  %11659 = vmatprep.subr.bf16.mxu1 (!%p216_p9), %v1451_v10  ;;  %vm8028_vm9 = vcmask (!%p216_p9), 261120   ;;  %vm8155_vm10 = vcmask (!%p216_p9), 322560   ;;  %vm8262_vm11 = vcmask (!%p216_p9), 1044480   ;;  %vm8297_vm12 = vcmask (!%p216_p9), 326656   ;;  %s13835_s17 = sshll.u32 (!%p216_p9), %s13904_s16, 4  ;;  %s13836_s17 = int_to_ptr.vmem [resolvable:$false] %s13835_s17 }
  0x15   : > { %s245_s15 = scalar_select %p244_p10, %s13961_s25, 1  ;;  %vm8670_vm13 = vcmask 1045504   ;;  %vm9425_vm14 = vcmask 126976   ;;  %vm9506_vm15 = vcmask 392192   ;;  %vm9552_vm1 = vcmask 654336  }
  0x17   : > { %s11102_s18 = sshll.u32 %s245_s15, 9  ;;  %s10160_s15 = scalar_lea.sflag [#allocation8], %s242_s11 }
  0x18   : > { %s14015_s29 = scalar_lea.vmem %s16031_s0, %s11102_s18  ;;  %s13902_s18 = smov 64  }
  0x19   : > { %v13196_v13 = vld [vmem:[%s14015_s29 + $0x10] sm:$0xff]   ;;  %v13199_v15 = vld [vmem:[%s14015_s29 + $0x18] sm:$0xff]   ;;  %v13201_v18 = vld [vmem:[%s14015_s29 + $0x20] sm:$0xff]  }
  0x1a   : > { %v13198_v14 = vld [vmem:[%s14015_s29 + $0x50] sm:$0xff]   ;;  %11553 = vmatprep.mubr.msk.bf16.mxu0 %vm321_vm2, %v13196_v13  ;;  %v13200_v16 = vld [vmem:[%s14015_s29 + $0x58] sm:$0xff]   ;;  %v13202_v20 = vld [vmem:[%s14015_s29 + $0x60] sm:$0xff]  }
  0x1b   : > { %11643 = vmatprep.mubr.msk.bf16.mxu1 %vm321_vm2, %v13198_v14  ;;  %11554 = vmatmul.mubr.msk.bf16.vlgmr.msra.gmra.mrb[0].mxu0 %vm321_vm2, %v13199_v15  ;;  %v13203_v21 = vld [vmem:[%s14015_s29 + $0x28] sm:$0xff]   ;;  %v13206_v23 = vld [vmem:[%s14015_s29 + $0x30] sm:$0xff]   ;;  %v13208_v25 = vld [vmem:[%s14015_s29 + $0x38] sm:$0xff]  }
  0x1c   : > { %11570 = vmatpush3.bf16.msra.mxu0 %v472_v9  ;;  %11644 = vmatmul.mubr.msk.bf16.vlgmr.msra.gmra.mrb[0].mxu1 %vm321_vm2, %v13200_v16  ;;  %v13204_v22 = vld [vmem:[%s14015_s29 + $0x68] sm:$0xff]   ;;  %v13207_v24 = vld [vmem:[%s14015_s29 + $0x70] sm:$0xff]   ;;  %v13209_v26 = vld [vmem:[%s14015_s29 + $0x78] sm:$0xff]  }
  0x1d   : > { %11557 = vmatprep.mubr.msk.bf16.mxu0 %vm321_vm2, %v13201_v18  ;;  %11660 = vmatpush3.bf16.msra.mxu1 %v1451_v10  ;;  %v13210_v27 = vld [vmem:[%s14015_s29 + $0x40] sm:$0xff]   ;;  %v13212_v29 = vld [vmem:[%s14015_s29 + $0x48] sm:$0xff]   ;;  %v13225_v45 = vld [vmem:[%s14015_s29 + $0x30] sm:$0xff]  }
  0x1e   : > { %11647 = vmatprep.mubr.msk.bf16.mxu1 %vm321_vm2, %v13202_v20  ;;  %11587 = vmatprep.subr.bf16.mxu0 %v660_v17  ;;  %v13211_v28 = vld [vmem:[%s14015_s29 + $0x80] sm:$0xff]   ;;  %v13213_v30 = vld [vmem:[%s14015_s29 + $0x88] sm:$0xff]   ;;  %v13226_v46 = vld [vmem:[%s14015_s29 + $0x70] sm:$0xff]  }
  0x1f   : > { %11677 = vmatprep.subr.bf16.mxu1 %v1638_v19  ;;  %v13214_v31 = vld [vmem:[%s14015_s29] sm:$0xff]   ;;  %v13217_v34 = vld [vmem:[%s14015_s29 + $0x8] sm:$0xff]   ;;  %v13227_v49 = vld [vmem:[%s14015_s29 + $0x38] sm:$0xff]  }
  0x20   : > { %v13216_v32 = vld [vmem:[%s14015_s29 + $0x40] sm:$0xff]   ;;  %v13218_v36 = vld [vmem:[%s14015_s29 + $0x48] sm:$0xff]   ;;  %v13228_v50 = vld [vmem:[%s14015_s29 + $0x78] sm:$0xff]  }
  0x21   : > { %v13220_v39 = vld [vmem:[%s14015_s29 + $0x20] sm:$0xff]   ;;  %v13223_v41 = vld [vmem:[%s14015_s29 + $0x28] sm:$0xff]   ;;  %v13234_v55 = vld [vmem:[%s14015_s29 + $0x50] sm:$0xff]  }
  0x22   : > { %v13222_v40 = vld [vmem:[%s14015_s29 + $0x60] sm:$0xff]   ;;  %v13224_v42 = vld [vmem:[%s14015_s29 + $0x68] sm:$0xff]   ;;  %v13235_v56 = vld [vmem:[%s14015_s29 + $0x90] sm:$0xff]  }
  0x23   : > { %11558 = vmatmul.mubr.msk.bf16.gmra.mrb[4].mxu0 %vm321_vm2, %v13203_v21  ;;  %v13230_v51 = vld [vmem:[%s14015_s29 + $0x40] sm:$0xff]   ;;  %v13232_v53 = vld [vmem:[%s14015_s29 + $0x48] sm:$0xff]   ;;  %v13236_v57 = vld [vmem:[%s14015_s29 + $0x58] sm:$0xff]  }
  0x24   : > { %11648 = vmatmul.mubr.msk.bf16.gmra.mrb[4].mxu1 %vm321_vm2, %v13204_v22  ;;  %11561 = vmatprep.mubr.msk.bf16.mxu0 %vm321_vm2, %v13206_v23  ;;  %v13231_v52 = vld [vmem:[%s14015_s29 + $0x80] sm:$0xff]   ;;  %v13233_v54 = vld [vmem:[%s14015_s29 + $0x88] sm:$0xff]   ;;  %v13237_v58 = vld [vmem:[%s14015_s29 + $0x98] sm:$0xff]  }
  0x25   : > { %11651 = vmatprep.mubr.msk.bf16.mxu1 %vm321_vm2, %v13207_v24  ;;  %v13238_v59 = vld [vmem:[%s14015_s29 + $0x30] sm:$0xff]   ;;  %v13241_v61 = vld [vmem:[%s14015_s29 + $0x38] sm:$0xff]   ;;  %v13243_v1 = vld [vmem:[%s14015_s29 + $0x40] sm:$0xff]  }
  0x26   : > { %v13240_v60 = vld [vmem:[%s14015_s29 + $0x70] sm:$0xff]   ;;  %v13242_v62 = vld [vmem:[%s14015_s29 + $0x78] sm:$0xff]   ;;  %v13244_v2 = vld [vmem:[%s14015_s29 + $0x80] sm:$0xff]  }
  0x27   : > { %v13245_v6 = vld [vmem:[%s14015_s29 + $0x48] sm:$0xff]   ;;  %v13248_v8 = vld [vmem:[%s14015_s29 + $0x50] sm:$0xff]   ;;  %v13250_v10 = vld [vmem:[%s14015_s29 + $0x58] sm:$0xff]  }
  0x28   : > { %v13246_v7 = vld [vmem:[%s14015_s29 + $0x88] sm:$0xff]   ;;  %v13249_v9 = vld [vmem:[%s14015_s29 + $0x90] sm:$0xff]   ;;  %v13251_v11 = vld [vmem:[%s14015_s29 + $0x98] sm:$0xff]  }
  0x29   : > { %v13252_v12 = vld [vmem:[%s14015_s29 + $0x60] sm:$0xff]   ;;  %v13271_v33 = vld [vmem:[%s14015_s29 + $0xb0] sm:$0xff]   ;;  %v13273_v35 = vld [vmem:[%s14015_s29 + $0xb8] sm:$0xff]  }
  0x2a   : > { %v13280_v43 = vld [vmem:[%s14015_s29 + $0xe0] sm:$0xff]  }
  0x2b   : > { %11562 = vmatmul.mubr.msk.bf16.gmra.mrb[8].mxu0 %vm321_vm2, %v13208_v25  ;;  %v13298_v0 = vld [vmem:[%s14015_s29 + $0xa0] sm:$0xff]  }
  0x2c   : > { %11652 = vmatmul.mubr.msk.bf16.gmra.mrb[8].mxu1 %vm321_vm2, %v13209_v26  ;;  %11565 = vmatprep.mubr.msk.bf16.mxu0 %vm321_vm2, %v13210_v27  ;;  %v13264_v27 = vld [vmem:[%s14015_s29 + $0x98] sm:$0xff]  }
  0x2d   : > { %11655 = vmatprep.mubr.msk.bf16.mxu1 %vm321_vm2, %v13211_v28  ;;  %v13266_v28 = vld [vmem:[%s14015_s29 + $0x60] sm:$0xff]  }
  0x33   : > { %11566 = vmatmul.mubr.msk.bf16.gmra.mrb[12].mxu0 %vm321_vm2, %v13212_v29  ;;  %v13267_v29 = vld [vmem:[%s14015_s29 + $0xa0] sm:$0xff]  }
  0x34   : > { %11656 = vmatmul.mubr.msk.bf16.gmra.mrb[12].mxu1 %vm321_vm2, %v13213_v30  ;;  %11571 = vmatprep.mubr.msk.bf16.mxu0 %vm321_vm2, %v13214_v31  ;;  %v13268_v30 = vld [vmem:[%s14015_s29 + $0x68] sm:$0xff]  }
  0x35   : > { %11661 = vmatprep.mubr.msk.bf16.mxu1 %vm321_vm2, %v13216_v32  ;;  %v13269_v31 = vld [vmem:[%s14015_s29 + $0xa8] sm:$0xff]   ;;  %v13270_v32 = vld [vmem:[%s14015_s29 + $0x70] sm:$0xff]  }
  0x3b   : > { %11572 = vmatmul.mubr.msk.bf16.vlgmr.msra.gmra.mrb[0].mxu0 %vm321_vm2, %v13217_v34  ;;  %v13272_v34 = vld [vmem:[%s14015_s29 + $0x78] sm:$0xff]  }
  0x3c   : > { %11588 = vmatpush3.bf16.msra.mxu0 %v660_v17  ;;  %11662 = vmatmul.mubr.msk.bf16.vlgmr.msra.gmra.mrb[0].mxu1 %vm321_vm2, %v13218_v36  ;;  %v13257_v17 = vld [vmem:[%s14015_s29 + $0x80] sm:$0xff]   ;;  %v13274_v36 = vld [vmem:[%s14015_s29 + $0x90] sm:$0xff]  }
  0x3d   : > { %11575 = vmatprep.mubr.msk.bf16.mxu0 %vm321_vm2, %v13196_v13  ;;  %11665 = vmatprep.mubr.msk.bf16.mxu1 %vm321_vm2, %v13198_v14  ;;  %v13253_v13 = vld [vmem:[%s14015_s29 + $0xa0] sm:$0xff]   ;;  %v13254_v14 = vld [vmem:[%s14015_s29 + $0x68] sm:$0xff]  }
  0x3e   : > { %11678 = vmatpush3.bf16.msra.mxu1 %v1638_v19  ;;  %11605 = vmatprep.subr.bf16.mxu0 %v864_v37  ;;  %v13259_v19 = vld [vmem:[%s14015_s29 + $0x48] sm:$0xff]  }
  0x3f   : > { %11695 = vmatprep.subr.bf16.mxu1 %v1841_v38 }
  0x43   : > { %11576 = vmatmul.mubr.msk.bf16.gmra.mrb[4].mxu0 %vm321_vm2, %v13199_v15  ;;  %v13255_v15 = vld [vmem:[%s14015_s29 + $0xa8] sm:$0xff]  }
  0x44   : > { %11666 = vmatmul.mubr.msk.bf16.gmra.mrb[4].mxu1 %vm321_vm2, %v13200_v16  ;;  %11579 = vmatprep.mubr.msk.bf16.mxu0 %vm321_vm2, %v13201_v18  ;;  %v13256_v16 = vld [vmem:[%s14015_s29 + $0x40] sm:$0xff]  }
  0x45   : > { %11669 = vmatprep.mubr.msk.bf16.mxu1 %vm321_vm2, %v13202_v20  ;;  %v13275_v18 = vld [vmem:[%s16032_s1] sm:$0xff]  }
  0x46   : > { %v13283_v20 = vld [vmem:[%s16032_s1] sm:$0xff]  }
  0x4b   : > { %11580 = vmatmul.mubr.msk.bf16.gmra.mrb[8].mxu0 %vm321_vm2, %v13203_v21  ;;  %v13260_v21 = vld [vmem:[%s14015_s29 + $0x88] sm:$0xff]  }
  0x4c   : > { %11670 = vmatmul.mubr.msk.bf16.gmra.mrb[8].mxu1 %vm321_vm2, %v13204_v22  ;;  %11583 = vmatprep.mubr.msk.bf16.mxu0 %vm321_vm2, %v13206_v23  ;;  %v13261_v22 = vld [vmem:[%s14015_s29 + $0x50] sm:$0xff]  }
  0x4d   : > { %11673 = vmatprep.mubr.msk.bf16.mxu1 %vm321_vm2, %v13207_v24  ;;  %v13262_v23 = vld [vmem:[%s14015_s29 + $0x90] sm:$0xff]   ;;  %v2422_v24 = vand.u32 %v13275_v18, %v13996_v4 }
  0x4e   : > { %v13313_v18 = vld [vmem:[%s14015_s29 + $0x110] sm:$0xff]  }
  0x53   : > { %11584 = vmatmul.mubr.msk.bf16.gmra.mrb[12].mxu0 %vm321_vm2, %v13208_v25  ;;  %v3393_v25 = vand.u32 %v13283_v20, %v13996_v4  ;;  %v13315_v20 = vld [vmem:[%s14015_s29 + $0x118] sm:$0xff]  }
  0x54   : > { %11674 = vmatmul.mubr.msk.bf16.gmra.mrb[12].mxu1 %vm321_vm2, %v13209_v26  ;;  %11589 = vmatprep.mubr.msk.bf16.mxu0 %vm321_vm2, %v13220_v39  ;;  %v13263_v26 = vld [vmem:[%s14015_s29 + $0x58] sm:$0xff]   ;;  %v13293_v39 = vld [vmem:[%s16032_s1 + $0x10] sm:$0xff]  }
  0x55   : > { %11679 = vmatprep.mubr.msk.bf16.mxu1 %vm321_vm2, %v13222_v40  ;;  %v13297_v40 = vld [vmem:[%s16032_s1 + $0x10] sm:$0xff]   ;;  %v2609_v44 = vand.u32 %v13293_v39, %v13996_v4  ;;  %v13332_v39 = vld [vmem:[%s14015_s29 + $0xe8] sm:$0xff]  }
  0x5b   : > { %11590 = vmatmul.mubr.msk.bf16.vlgmr.msra.gmra.mrb[0].mxu0 %vm321_vm2, %v13223_v41  ;;  %v13278_v41 = vld [vmem:[%s14015_s29 + $0xd8] sm:$0xff]  }
  0x5c   : > { %11606 = vmatpush3.bf16.msra.mxu0 %v864_v37  ;;  %11680 = vmatmul.mubr.msk.bf16.vlgmr.msra.gmra.mrb[0].mxu1 %vm321_vm2, %v13224_v42  ;;  %v13276_v37 = vld [vmem:[%s14015_s29 + $0xd0] sm:$0xff]   ;;  %v13279_v42 = vld [vmem:[%s14015_s29 + $0xa0] sm:$0xff]  }
  0x5d   : > { %11593 = vmatprep.mubr.msk.bf16.mxu0 %vm321_vm2, %v13225_v45  ;;  %11683 = vmatprep.mubr.msk.bf16.mxu1 %vm321_vm2, %v13226_v46  ;;  %v3580_v45 = vand.u32 %v13297_v40, %v13996_v4  ;;  %v13281_v46 = vld [vmem:[%s14015_s29 + $0xa8] sm:$0xff]  }
  0x5e   : > { %11696 = vmatpush3.bf16.msra.mxu1 %v1841_v38  ;;  %11623 = vmatprep.subr.bf16.mxu0 %v1068_v47  ;;  %v13277_v38 = vld [vmem:[%s14015_s29 + $0x98] sm:$0xff]   ;;  %v13333_v40 = vld [vmem:[%s14015_s29 + $0x128] sm:$0xff]  }
  0x5f   : > { %11713 = vmatprep.subr.bf16.mxu1 %v2044_v48 }
  0x63   : > { %11594 = vmatmul.mubr.msk.bf16.gmra.mrb[4].mxu0 %vm321_vm2, %v13227_v49  ;;  %v13285_v49 = vld [vmem:[%s14015_s29 + $0xf0] sm:$0xff]  }
  0x64   : > { %11684 = vmatmul.mubr.msk.bf16.gmra.mrb[4].mxu1 %vm321_vm2, %v13228_v50  ;;  %11597 = vmatprep.mubr.msk.bf16.mxu0 %vm321_vm2, %v13230_v51  ;;  %v13286_v50 = vld [vmem:[%s14015_s29 + $0xb8] sm:$0xff]  }
  0x65   : > { %11687 = vmatprep.mubr.msk.bf16.mxu1 %vm321_vm2, %v13231_v52  ;;  %v13287_v51 = vld [vmem:[%s14015_s29 + $0xf8] sm:$0xff]   ;;  %v13288_v52 = vld [vmem:[%s14015_s29 + $0xc0] sm:$0xff]  }
  0x6b   : > { %11598 = vmatmul.mubr.msk.bf16.gmra.mrb[8].mxu0 %vm321_vm2, %v13232_v53  ;;  %v13289_v53 = vld [vmem:[%s14015_s29 + $0x100] sm:$0xff]  }
  0x6c   : > { %11688 = vmatmul.mubr.msk.bf16.gmra.mrb[8].mxu1 %vm321_vm2, %v13233_v54  ;;  %11601 = vmatprep.mubr.msk.bf16.mxu0 %vm321_vm2, %v13234_v55  ;;  %v13290_v54 = vld [vmem:[%s14015_s29 + $0xc8] sm:$0xff]  }
  0x6d   : > { %11691 = vmatprep.mubr.msk.bf16.mxu1 %vm321_vm2, %v13235_v56  ;;  %v13291_v55 = vld [vmem:[%s14015_s29 + $0x108] sm:$0xff]   ;;  %v13292_v56 = vld [vmem:[%s14015_s29 + $0x80] sm:$0xff]  }
  0x73   : > { %11602 = vmatmul.mubr.msk.bf16.gmra.mrb[12].mxu0 %vm321_vm2, %v13236_v57  ;;  %v13294_v57 = vld [vmem:[%s14015_s29 + $0xc0] sm:$0xff]  }
  0x74   : > { %11692 = vmatmul.mubr.msk.bf16.gmra.mrb[12].mxu1 %vm321_vm2, %v13237_v58  ;;  %11607 = vmatprep.mubr.msk.bf16.mxu0 %vm321_vm2, %v13238_v59  ;;  %v13299_v58 = vld [vmem:[%s16032_s1 + $0x18] sm:$0xff]   ;;  %v13295_v59 = vld [vmem:[%s14015_s29 + $0x88] sm:$0xff]  }
  0x75   : > { %11697 = vmatprep.mubr.msk.bf16.mxu1 %vm321_vm2, %v13240_v60  ;;  %v13307_v60 = vld [vmem:[%s16032_s1 + $0x18] sm:$0xff]  }
  0x76   : > { %v3783_v63 = vand.u32 %v13307_v60, %v13996_v4  ;;  %v13351_v60 = vld [vmem:[%s14015_s29 + $0x138] sm:$0xff]  }
  0x7b   : > { %11608 = vmatmul.mubr.msk.bf16.vlgmr.msra.gmra.mrb[0].mxu0 %vm321_vm2, %v13241_v61  ;;  %v13296_v61 = vld [vmem:[%s14015_s29 + $0xc8] sm:$0xff]  }
  0x7c   : > { %11624 = vmatpush3.bf16.msra.mxu0 %v1068_v47  ;;  %11698 = vmatmul.mubr.msk.bf16.vlgmr.msra.gmra.mrb[0].mxu1 %vm321_vm2, %v13242_v62  ;;  %v13282_v47 = vld [vmem:[%s14015_s29 + $0xe8] sm:$0xff]   ;;  %v2812_v62 = vand.u32 %v13299_v58, %v13996_v4  ;;  %v13349_v58 = vld [vmem:[%s14015_s29 + $0x130] sm:$0xff]  }
  0x7d   : > { %11611 = vmatprep.mubr.msk.bf16.mxu0 %vm321_vm2, %v13243_v1  ;;  %11701 = vmatprep.mubr.msk.bf16.mxu1 %vm321_vm2, %v13244_v2  ;;  %v13300_v1 = vld [vmem:[%s14015_s29 + $0xe0] sm:$0xff]   ;;  %v13301_v2 = vld [vmem:[%s14015_s29 + $0xa8] sm:$0xff]  }
  0x7e   : > { %11714 = vmatpush3.bf16.msra.mxu1 %v2044_v48  ;;  %11731 = vmatprep.subr.bf16.mxu0 %v2301_v3  ;;  %v13284_v48 = vld [vmem:[%s14015_s29 + $0xb0] sm:$0xff]  }
  0x7f   : > { %11821 = vmatprep.subr.bf16.mxu1 %v3272_v5 }
  0x83   : > { %11612 = vmatmul.mubr.msk.bf16.gmra.mrb[4].mxu0 %vm321_vm2, %v13245_v6  ;;  %v13302_v6 = vld [vmem:[%s14015_s29 + $0xe8] sm:$0xff]  }
  0x84   : > { %11702 = vmatmul.mubr.msk.bf16.gmra.mrb[4].mxu1 %vm321_vm2, %v13246_v7  ;;  %11615 = vmatprep.mubr.msk.bf16.mxu0 %vm321_vm2, %v13248_v8  ;;  %v13303_v7 = vld [vmem:[%s14015_s29 + $0xb0] sm:$0xff]  }
  0x85   : > { %11705 = vmatprep.mubr.msk.bf16.mxu1 %vm321_vm2, %v13249_v9  ;;  %v13304_v8 = vld [vmem:[%s14015_s29 + $0xf0] sm:$0xff]  }
  0x8b   : > { %11616 = vmatmul.mubr.msk.bf16.gmra.mrb[8].mxu0 %vm321_vm2, %v13250_v10 }
  0x8c   : > { %11706 = vmatmul.mubr.msk.bf16.gmra.mrb[8].mxu1 %vm321_vm2, %v13251_v11  ;;  %11619 = vmatprep.mubr.msk.bf16.mxu0 %vm321_vm2, %v13252_v12  ;;  %v13305_v11 = vld [vmem:[%s14015_s29 + $0xb8] sm:$0xff]  }
  0x8d   : > { %11709 = vmatprep.mubr.msk.bf16.mxu1 %vm321_vm2, %v13253_v13  ;;  %v13306_v12 = vld [vmem:[%s14015_s29 + $0xf8] sm:$0xff]   ;;  %v13308_v13 = vld [vmem:[%s14015_s29 + $0xc0] sm:$0xff]  }
  0x93   : > { %11620 = vmatmul.mubr.msk.bf16.gmra.mrb[12].mxu0 %vm321_vm2, %v13254_v14  ;;  %v13309_v14 = vld [vmem:[%s14015_s29 + $0x100] sm:$0xff]  }
  0x94   : > { %11710 = vmatmul.mubr.msk.bf16.gmra.mrb[12].mxu1 %vm321_vm2, %v13255_v15  ;;  %11625 = vmatprep.mubr.msk.bf16.mxu0 %vm321_vm2, %v13256_v16  ;;  %v13310_v15 = vld [vmem:[%s14015_s29 + $0xc8] sm:$0xff]  }
  0x95   : > { %11715 = vmatprep.mubr.msk.bf16.mxu1 %vm321_vm2, %v13257_v17  ;;  %v13311_v16 = vld [vmem:[%s14015_s29 + $0x108] sm:$0xff]   ;;  %v13312_v17 = vld [vmem:[%s14015_s29 + $0xd0] sm:$0xff]  }
  0x9b   : > { %11626 = vmatmul.mubr.msk.bf16.vlgmr.msra.gmra.mrb[0].mxu0 %vm321_vm2, %v13259_v19  ;;  %v13314_v19 = vld [vmem:[%s14015_s29 + $0xd8] sm:$0xff]  }
  0x9c   : > { %11716 = vmatmul.mubr.msk.bf16.vlgmr.msra.gmra.mrb[0].mxu1 %vm321_vm2, %v13260_v21  ;;  %11732 = vmatpush3.bf16.msra.mxu0 %v2301_v3  ;;  %v13317_v3 = vld [vmem:[%s16032_s1 + $0x20] sm:$0xff]   ;;  %v13316_v21 = vld [vmem:[%s14015_s29 + $0xb0] sm:$0xff]  }
  0x9d   : > { %11629 = vmatprep.mubr.msk.bf16.mxu0 %vm321_vm2, %v13261_v22  ;;  %11719 = vmatprep.mubr.msk.bf16.mxu1 %vm321_vm2, %v13262_v23  ;;  %v3015_v9 = vand.u32 %v13317_v3, %v13996_v4  ;;  %v13318_v22 = vld [vmem:[%s14015_s29 + $0xf0] sm:$0xff]   ;;  %v13336_v23 = vld [vmem:[%s16032_s1 + $0x8] sm:$0xff]   ;;  %v14413_v3 = vld [vmem:[%s14015_s29 + $0x120] sm:$0xff]  }
  0x9e   : > { %11822 = vmatpush3.bf16.msra.mxu1 %v3272_v5  ;;  %11749 = vmatprep.subr.bf16.mxu0 %v2422_v24  ;;  %v13325_v5 = vld [vmem:[%s16032_s1 + $0x20] sm:$0xff]  }
  0x9f   : > { %11839 = vmatprep.subr.bf16.mxu1 %v3393_v25  ;;  %v3986_v10 = vand.u32 %v13325_v5, %v13996_v4  ;;  %v14416_v5 = vld [vmem:[%s14015_s29 + $0x160] sm:$0xff]  }
  0xa3   : > { %11630 = vmatmul.mubr.msk.bf16.gmra.mrb[4].mxu0 %vm321_vm2, %v13263_v26  ;;  %v13321_v26 = vld [vmem:[%s14015_s29 + $0xc0] sm:$0xff]  }
  0xa4   : > { %11720 = vmatmul.mubr.msk.bf16.gmra.mrb[4].mxu1 %vm321_vm2, %v13264_v27  ;;  %11633 = vmatprep.mubr.msk.bf16.mxu0 %vm321_vm2, %v13266_v28  ;;  %v13343_v27 = vld [vmem:[%s16032_s1 + $0x8] sm:$0xff]   ;;  %v13322_v28 = vld [vmem:[%s14015_s29 + $0x100] sm:$0xff]  }
  0xa5   : > { %11723 = vmatprep.mubr.msk.bf16.mxu1 %vm321_vm2, %v13267_v29  ;;  %v4243_v29 = vand.u32 %v13336_v23, %v13996_v4 }
  0xab   : > { %11634 = vmatmul.mubr.msk.bf16.gmra.mrb[8].mxu0 %vm321_vm2, %v13268_v30  ;;  %v5214_v30 = vand.u32 %v13343_v27, %v13996_v4  ;;  %v13370_v27 = vld [vmem:[%s14015_s29 + $0x100] sm:$0xff]  }
  0xac   : > { %11724 = vmatmul.mubr.msk.bf16.gmra.mrb[8].mxu1 %vm321_vm2, %v13269_v31  ;;  %11637 = vmatprep.mubr.msk.bf16.mxu0 %vm321_vm2, %v13270_v32  ;;  %v13323_v31 = vld [vmem:[%s14015_s29 + $0xc8] sm:$0xff]  }
  0xad   : > { %11727 = vmatprep.mubr.msk.bf16.mxu1 %vm321_vm2, %v13271_v33  ;;  %v13324_v32 = vld [vmem:[%s14015_s29 + $0x108] sm:$0xff]   ;;  %v13326_v33 = vld [vmem:[%s14015_s29 + $0xd0] sm:$0xff]  }
  0xb3   : > { %11638 = vmatmul.mubr.msk.bf16.gmra.mrb[12].mxu0 %vm321_vm2, %v13272_v34  ;;  %v13327_v34 = vld [vmem:[%s14015_s29 + $0x110] sm:$0xff]  }
  0xb4   : > { %11728 = vmatmul.mubr.msk.bf16.gmra.mrb[12].mxu1 %vm321_vm2, %v13273_v35  ;;  %11733 = vmatprep.mubr.msk.bf16.mxu0 %vm321_vm2, %v13274_v36  ;;  %v13328_v35 = vld [vmem:[%s14015_s29 + $0xd8] sm:$0xff]  }
  0xb5   : > { %11823 = vmatprep.mubr.msk.bf16.mxu1 %vm321_vm2, %v13276_v37 }
  0xbb   : > { %11734 = vmatmul.mubr.msk.bf16.vlgmr.msra.gmra.mrb[16].mxu0 %vm321_vm2, %v13277_v38 }
  0xbc   : > { %11750 = vmatpush3.bf16.msra.mxu0 %v2422_v24  ;;  %11824 = vmatmul.mubr.msk.bf16.vlgmr.msra.gmra.mrb[16].mxu1 %vm321_vm2, %v13278_v41  ;;  %v13319_v24 = vld [vmem:[%s14015_s29 + $0xb8] sm:$0xff]  }
  0xbd   : > { %11737 = vmatprep.mubr.msk.bf16.mxu0 %vm321_vm2, %v13279_v42  ;;  %11827 = vmatprep.mubr.msk.bf16.mxu1 %vm321_vm2, %v13280_v43 }
  0xbe   : > { %11840 = vmatpush3.bf16.msra.mxu1 %v3393_v25  ;;  %11767 = vmatprep.subr.bf16.mxu0 %v2609_v44  ;;  %v13320_v25 = vld [vmem:[%s14015_s29 + $0xf8] sm:$0xff]  }
  0xbf   : > { %11857 = vmatprep.subr.bf16.mxu1 %v3580_v45 }
  0xc3   : > { %11738 = vmatmul.mubr.msk.bf16.gmra.mrb[20].mxu0 %vm321_vm2, %v13281_v46 }
  0xc4   : > { %11828 = vmatmul.mubr.msk.bf16.gmra.mrb[20].mxu1 %vm321_vm2, %v13282_v47  ;;  %11741 = vmatprep.mubr.msk.bf16.mxu0 %vm321_vm2, %v13284_v48 }
  0xc5   : > { %11831 = vmatprep.mubr.msk.bf16.mxu1 %vm321_vm2, %v13285_v49 }
  0xcb   : > { %11742 = vmatmul.mubr.msk.bf16.gmra.mrb[24].mxu0 %vm321_vm2, %v13286_v50 }
  0xcc   : > { %11832 = vmatmul.mubr.msk.bf16.gmra.mrb[24].mxu1 %vm321_vm2, %v13287_v51  ;;  %11745 = vmatprep.mubr.msk.bf16.mxu0 %vm321_vm2, %v13288_v52  ;;  %v13342_v52 = vld [vmem:[%s14015_s29 + $0x118] sm:$0xff]  }
  0xcd   : > { %11835 = vmatprep.mubr.msk.bf16.mxu1 %vm321_vm2, %v13289_v53  ;;  %v13344_v53 = vld [vmem:[%s14015_s29 + $0xe0] sm:$0xff]  }
  0xd3   : > { %11746 = vmatmul.mubr.msk.bf16.gmra.mrb[28].mxu0 %vm321_vm2, %v13290_v54  ;;  %v13345_v54 = vld [vmem:[%s14015_s29 + $0x120] sm:$0xff]  }
  0xd4   : > { %11836 = vmatmul.mubr.msk.bf16.gmra.mrb[28].mxu1 %vm321_vm2, %v13291_v55  ;;  %11751 = vmatprep.mubr.msk.bf16.mxu0 %vm321_vm2, %v13292_v56  ;;  %v13346_v55 = vld [vmem:[%s14015_s29 + $0xe8] sm:$0xff]  }
  0xd5   : > { %11841 = vmatprep.mubr.msk.bf16.mxu1 %vm321_vm2, %v13294_v57  ;;  %v13347_v56 = vld [vmem:[%s14015_s29 + $0x128] sm:$0xff]   ;;  %v13348_v57 = vld [vmem:[%s14015_s29 + $0xf0] sm:$0xff]  }
  0xdb   : > { %11752 = vmatmul.mubr.msk.bf16.vlgmr.msra.gmra.mrb[16].mxu0 %vm321_vm2, %v13295_v59  ;;  %v13350_v59 = vld [vmem:[%s14015_s29 + $0xf8] sm:$0xff]  }
  0xdc   : > { %11768 = vmatpush3.bf16.msra.mxu0 %v2609_v44  ;;  %11842 = vmatmul.mubr.msk.bf16.vlgmr.msra.gmra.mrb[16].mxu1 %vm321_vm2, %v13296_v61  ;;  %v13337_v44 = vld [vmem:[%s14015_s29 + $0xc8] sm:$0xff]   ;;  %v14389_v61 = vld [vmem:[%s14015_s29 + $0x110] sm:$0xff]  }
  0xdd   : > { %11755 = vmatprep.mubr.msk.bf16.mxu0 %vm321_vm2, %v13274_v36  ;;  %11845 = vmatprep.mubr.msk.bf16.mxu1 %vm321_vm2, %v13276_v37  ;;  %v13329_v36 = vld [vmem:[%s14015_s29 + $0x118] sm:$0xff]   ;;  %v13330_v37 = vld [vmem:[%s14015_s29 + $0xe0] sm:$0xff]  }
  0xde   : > { %11858 = vmatpush3.bf16.msra.mxu1 %v3580_v45  ;;  %11785 = vmatprep.subr.bf16.mxu0 %v2812_v62  ;;  %v13361_v45 = vld [vmem:[%s16032_s1] sm:$0xff]  }
  0xdf   : > { %11875 = vmatprep.subr.bf16.mxu1 %v3783_v63 }
  0xe3   : > { %11756 = vmatmul.mubr.msk.bf16.gmra.mrb[20].mxu0 %vm321_vm2, %v13277_v38  ;;  %v13331_v38 = vld [vmem:[%s14015_s29 + $0x120] sm:$0xff]  }
  0xe4   : > { %11846 = vmatmul.mubr.msk.bf16.gmra.mrb[20].mxu1 %vm321_vm2, %v13278_v41  ;;  %11759 = vmatprep.mubr.msk.bf16.mxu0 %vm321_vm2, %v13279_v42  ;;  %v13334_v41 = vld [vmem:[%s14015_s29 + $0xc0] sm:$0xff]  }
  0xe5   : > { %11849 = vmatprep.mubr.msk.bf16.mxu1 %vm321_vm2, %v13280_v43  ;;  %v13335_v42 = vld [vmem:[%s14015_s29 + $0x100] sm:$0xff]  }
  0xe6   : > { %v13353_v43 = vld [vmem:[%s16032_s1] sm:$0xff]  }
  0xeb   : > { %11760 = vmatmul.mubr.msk.bf16.gmra.mrb[24].mxu0 %vm321_vm2, %v13281_v46  ;;  %v13338_v46 = vld [vmem:[%s14015_s29 + $0x108] sm:$0xff]  }
  0xec   : > { %11850 = vmatmul.mubr.msk.bf16.gmra.mrb[24].mxu1 %vm321_vm2, %v13282_v47  ;;  %11763 = vmatprep.mubr.msk.bf16.mxu0 %vm321_vm2, %v13284_v48  ;;  %v13339_v47 = vld [vmem:[%s14015_s29 + $0xd0] sm:$0xff]  }
  0xed   : > { %11853 = vmatprep.mubr.msk.bf16.mxu1 %vm321_vm2, %v13285_v49  ;;  %v13340_v48 = vld [vmem:[%s14015_s29 + $0x110] sm:$0xff]   ;;  %v4364_v49 = vand.u32 %v13353_v43, %v13996_v4  ;;  %v13385_v43 = vld [vmem:[%s16032_s1 + $0x18] sm:$0xff]  }
  0xf3   : > { %11764 = vmatmul.mubr.msk.bf16.gmra.mrb[28].mxu0 %vm321_vm2, %v13286_v50  ;;  %v5335_v50 = vand.u32 %v13361_v45, %v13996_v4 }
  0xf4   : > { %11854 = vmatmul.mubr.msk.bf16.gmra.mrb[28].mxu1 %vm321_vm2, %v13287_v51  ;;  %11769 = vmatprep.mubr.msk.bf16.mxu0 %vm321_vm2, %v13298_v0  ;;  %v13341_v51 = vld [vmem:[%s14015_s29 + $0xd8] sm:$0xff]  }
  0xf5   : > { %11859 = vmatprep.mubr.msk.bf16.mxu1 %vm321_vm2, %v13300_v1  ;;  %v14404_v0 = vld [vmem:[%s14015_s29 + $0x118] sm:$0xff]   ;;  %v13375_v1 = vld [vmem:[%s16032_s1 + $0x10] sm:$0xff]  }
  0xfb   : > { %11770 = vmatmul.mubr.msk.bf16.vlgmr.msra.gmra.mrb[16].mxu0 %vm321_vm2, %v13301_v2  ;;  %v14410_v2 = vld [vmem:[%s14015_s29 + $0x158] sm:$0xff]  }
  0xfc   : > { %11786 = vmatpush3.bf16.msra.mxu0 %v2812_v62  ;;  %11860 = vmatmul.mubr.msk.bf16.vlgmr.msra.gmra.mrb[16].mxu1 %vm321_vm2, %v13302_v6  ;;  %v14392_v62 = vld [vmem:[%s14015_s29 + $0x150] sm:$0xff]  }
  0xfd   : > { %11773 = vmatprep.mubr.msk.bf16.mxu0 %vm321_vm2, %v13303_v7  ;;  %11863 = vmatprep.mubr.msk.bf16.mxu1 %vm321_vm2, %v13304_v8  ;;  %v14424_v7 = vand.u32 %v13375_v1, %v13996_v4  ;;  %v14434_v8 = vld [vmem:[%s14015_s29 + $0x128] sm:$0xff]  }
  0xfe   : > { %11876 = vmatpush3.bf16.msra.mxu1 %v3783_v63  ;;  %11803 = vmatprep.subr.bf16.mxu0 %v3015_v9  ;;  %v13371_v63 = vld [vmem:[%s16032_s1 + $0x10] sm:$0xff]  }
  0xff   : > { %11893 = vmatprep.subr.bf16.mxu1 %v3986_v10  ;;  %v14419_v6 = vand.u32 %v13371_v63, %v13996_v4 }
 0x103   : > { %11774 = vmatmul.mubr.msk.bf16.gmra.mrb[20].mxu0 %vm321_vm2, %v13305_v11  ;;  %v14444_v11 = vld [vmem:[%s14015_s29 + $0x170] sm:$0xff]  }
 0x104   : > { %11864 = vmatmul.mubr.msk.bf16.gmra.mrb[20].mxu1 %vm321_vm2, %v13306_v12  ;;  %11777 = vmatprep.mubr.msk.bf16.mxu0 %vm321_vm2, %v13308_v13  ;;  %v14455_v12 = vld [vmem:[%s14015_s29 + $0x138] sm:$0xff]  }
 0x105   : > { %11867 = vmatprep.mubr.msk.bf16.mxu1 %vm321_vm2, %v13309_v14  ;;  %v14458_v13 = vld [vmem:[%s14015_s29 + $0x178] sm:$0xff]   ;;  %v13366_v14 = vld [vmem:[%s14015_s29 + $0x140] sm:$0xff]  }
 0x10b   : > { %11778 = vmatmul.mubr.msk.bf16.gmra.mrb[24].mxu0 %vm321_vm2, %v13310_v15  ;;  %v13367_v15 = vld [vmem:[%s14015_s29 + $0x180] sm:$0xff]  }
 0x10c   : > { %11868 = vmatmul.mubr.msk.bf16.gmra.mrb[24].mxu1 %vm321_vm2, %v13311_v16  ;;  %11781 = vmatprep.mubr.msk.bf16.mxu0 %vm321_vm2, %v13312_v17  ;;  %v14469_v16 = vld [vmem:[%s16035_s4] ss:$0 sm:$0xff] }
 0x10d   : > { %11871 = vmatprep.mubr.msk.bf16.mxu1 %vm321_vm2, %v13313_v18 }
 0x113   : > { %11782 = vmatmul.mubr.msk.bf16.gmra.mrb[28].mxu0 %vm321_vm2, %v13314_v19 }
 0x114   : > { %11872 = vmatmul.mubr.msk.bf16.gmra.mrb[28].mxu1 %vm321_vm2, %v13315_v20  ;;  %11787 = vmatprep.mubr.msk.bf16.mxu0 %vm321_vm2, %v13316_v21  ;;  %v13368_v21 = vld [vmem:[%s14015_s29 + $0x148] sm:$0xff]  }
 0x115   : > { %11877 = vmatprep.mubr.msk.bf16.mxu1 %vm321_vm2, %v13318_v22 }
 0x11b   : > { %11788 = vmatmul.mubr.msk.bf16.vlgmr.msra.gmra.mrb[16].mxu0 %vm321_vm2, %v13319_v24 }
 0x11c   : > { %11804 = vmatpush3.bf16.msra.mxu0 %v3015_v9  ;;  %11878 = vmatmul.mubr.msk.bf16.vlgmr.msra.gmra.mrb[16].mxu1 %vm321_vm2, %v13320_v25  ;;  %v14438_v9 = vld [vmem:[%s14015_s29 + $0x168] sm:$0xff]  }
 0x11d   : > { %11791 = vmatprep.mubr.msk.bf16.mxu0 %vm321_vm2, %v13321_v26  ;;  %11881 = vmatprep.mubr.msk.bf16.mxu1 %vm321_vm2, %v13322_v28  ;;  %v13369_v26 = vld [vmem:[%s14015_s29 + $0x188] sm:$0xff]  }
 0x11e   : > { %11894 = vmatpush3.bf16.msra.mxu1 %v3986_v10  ;;  %11911 = vmatprep.subr.bf16.mxu0 %v4243_v29  ;;  %v14441_v10 = vld [vmem:[%s14015_s29 + $0x130] sm:$0xff]  }
 0x11f   : > { %12001 = vmatprep.subr.bf16.mxu1 %v5214_v30 }
 0x123   : > { %11792 = vmatmul.mubr.msk.bf16.gmra.mrb[20].mxu0 %vm321_vm2, %v13323_v31 }
 0x124   : > { %11882 = vmatmul.mubr.msk.bf16.gmra.mrb[20].mxu1 %vm321_vm2, %v13324_v32  ;;  %11795 = vmatprep.mubr.msk.bf16.mxu0 %vm321_vm2, %v13326_v33  ;;  %v13372_v32 = vld [vmem:[%s14015_s29 + $0x140] sm:$0xff]  }
 0x125   : > { %11885 = vmatprep.mubr.msk.bf16.mxu1 %vm321_vm2, %v13327_v34 }
 0x12b   : > { %11796 = vmatmul.mubr.msk.bf16.gmra.mrb[24].mxu0 %vm321_vm2, %v13328_v35 }
 0x12c   : > { %11886 = vmatmul.mubr.msk.bf16.gmra.mrb[24].mxu1 %vm321_vm2, %v13329_v36  ;;  %11799 = vmatprep.mubr.msk.bf16.mxu0 %vm321_vm2, %v13330_v37 }
 0x12d   : > { %11889 = vmatprep.mubr.msk.bf16.mxu1 %vm321_vm2, %v13331_v38  ;;  %v13377_v38 = vld [vmem:[%s16032_s1 + $0x18] sm:$0xff]  }
 0x133   : > { %11800 = vmatmul.mubr.msk.bf16.gmra.mrb[28].mxu0 %vm321_vm2, %v13332_v39 }
 0x134   : > { %11890 = vmatmul.mubr.msk.bf16.gmra.mrb[28].mxu1 %vm321_vm2, %v13333_v40  ;;  %11805 = vmatprep.mubr.msk.bf16.mxu0 %vm321_vm2, %v13334_v41 }
 0x135   : > { %11895 = vmatprep.mubr.msk.bf16.mxu1 %vm321_vm2, %v13335_v42  ;;  %v13373_v42 = vld [vmem:[%s14015_s29 + $0x108] sm:$0xff]  }
 0x13b   : > { %11806 = vmatmul.mubr.msk.bf16.vlgmr.msra.gmra.mrb[16].mxu0 %vm321_vm2, %v13337_v44 }
 0x13c   : > { %11896 = vmatmul.mubr.msk.bf16.vlgmr.msra.gmra.mrb[16].mxu1 %vm321_vm2, %v13338_v46  ;;  %11912 = vmatpush3.bf16.msra.mxu0 %v4243_v29 }
 0x13d   : > { %11809 = vmatprep.mubr.msk.bf16.mxu0 %vm321_vm2, %v13339_v47  ;;  %11899 = vmatprep.mubr.msk.bf16.mxu1 %vm321_vm2, %v13340_v48  ;;  %v13374_v48 = vld [vmem:[%s14015_s29 + $0x148] sm:$0xff]  }
 0x13e   : > { %12002 = vmatpush3.bf16.msra.mxu1 %v5214_v30  ;;  %11929 = vmatprep.subr.bf16.mxu0 %v4364_v49 }
 0x13f   : > { %12019 = vmatprep.subr.bf16.mxu1 %v5335_v50 }
 0x143   : > { %11810 = vmatmul.mubr.msk.bf16.gmra.mrb[20].mxu0 %vm321_vm2, %v13341_v51 }
 0x144   : > { %11900 = vmatmul.mubr.msk.bf16.gmra.mrb[20].mxu1 %vm321_vm2, %v13342_v52  ;;  %11813 = vmatprep.mubr.msk.bf16.mxu0 %vm321_vm2, %v13344_v53 }
 0x145   : > { %11903 = vmatprep.mubr.msk.bf16.mxu1 %vm321_vm2, %v13345_v54 }
 0x14b   : > { %11814 = vmatmul.mubr.msk.bf16.gmra.mrb[24].mxu0 %vm321_vm2, %v13346_v55  ;;  %v14504_v55 = vand.u32 %v13377_v38, %v13996_v4 }
 0x14c   : > { %11904 = vmatmul.mubr.msk.bf16.gmra.mrb[24].mxu1 %vm321_vm2, %v13347_v56  ;;  %11817 = vmatprep.mubr.msk.bf16.mxu0 %vm321_vm2, %v13348_v57 }
 0x14d   : > { %11907 = vmatprep.mubr.msk.bf16.mxu1 %vm321_vm2, %v13349_v58  ;;  %v14509_v58 = vand.u32 %v13385_v43, %v13996_v4 }
 0x153   : > { %11818 = vmatmul.mubr.msk.bf16.gmra.mrb[28].mxu0 %vm321_vm2, %v13350_v59 }
 0x154   : > { %11908 = vmatmul.mubr.msk.bf16.gmra.mrb[28].mxu1 %vm321_vm2, %v13351_v60  ;;  %11913 = vmatprep.mubr.msk.bf16.mxu0 %vm321_vm2, %v14389_v61 }
 0x155   : > { %12003 = vmatprep.mubr.msk.bf16.mxu1 %vm321_vm2, %v14392_v62 }
 0x15b   : > { %11914 = vmatmul.mubr.msk.bf16.vlgmr.msra.gmra.mrb[32].mxu0 %vm321_vm2, %v14404_v0 }
 0x15c   : > { %11930 = vmatpush3.bf16.msra.mxu0 %v4364_v49  ;;  %12004 = vmatmul.mubr.msk.bf16.vlgmr.msra.gmra.mrb[32].mxu1 %vm321_vm2, %v14410_v2 }
 0x15d   : > { %11917 = vmatprep.mubr.msk.bf16.mxu0 %vm321_vm2, %v14413_v3  ;;  %12007 = vmatprep.mubr.msk.bf16.mxu1 %vm321_vm2, %v14416_v5 }
 0x15e   : > { %12020 = vmatpush3.bf16.msra.mxu1 %v5335_v50  ;;  %11947 = vmatprep.subr.bf16.mxu0 %v14419_v6 }
 0x15f   : > { %12037 = vmatprep.subr.bf16.mxu1 %v14424_v7 }
 0x163   : > { %11918 = vmatmul.mubr.msk.bf16.gmra.mrb[36].mxu0 %vm321_vm2, %v14434_v8 }
 0x164   : > { %12008 = vmatmul.mubr.msk.bf16.gmra.mrb[36].mxu1 %vm321_vm2, %v14438_v9  ;;  %11921 = vmatprep.mubr.msk.bf16.mxu0 %vm321_vm2, %v14441_v10 }
 0x165   : > { %12011 = vmatprep.mubr.msk.bf16.mxu1 %vm321_vm2, %v14444_v11 }
 0x16b   : > { %11922 = vmatmul.mubr.msk.bf16.gmra.mrb[40].mxu0 %vm321_vm2, %v14455_v12 }
 0x16c   : > { %12012 = vmatmul.mubr.msk.bf16.gmra.mrb[40].mxu1 %vm321_vm2, %v14458_v13  ;;  %11925 = vmatprep.mubr.msk.bf16.mxu0 %vm321_vm2, %v13366_v14 }
 0x16d   : > { %12015 = vmatprep.mubr.msk.bf16.mxu1 %vm321_vm2, %v13367_v15 }
 0x16e   : > { %v11627_v17 = vpop.f32.mrb[0].mxu0 }
 0x16f   : > { %v1189_v18 = vadd.f32 %v11627_v17, %v14469_v16  ;;  %v11717_v19 = vpop.f32.mrb[0].mxu1  ;;  %v1104_v20 = vpop.f32.mrb[1].mxu0 }
 0x170   : > { %v2161_v22 = vadd.f32 %v11717_v19, %v14469_v16  ;;  %v1187_v23 = vadd.f32 %v14469_v16, %v1104_v20  ;;  %v2080_v24 = vpop.f32.mrb[1].mxu1  ;;  %v11628_v25 = vpop.f32.mrb[2].mxu0 }
 0x171   : > { %13563 = vtanh.f32 %v1189_v18  ;;  %v2159_v28 = vadd.f32 %v14469_v16, %v2080_v24  ;;  %v1190_v29 = vadd.f32 %v11628_v25, %v14469_v16  ;;  %v11718_v30 = vpop.f32.mrb[2].mxu1  ;;  %v1107_v31 = vpop.f32.mrb[3].mxu0 }
 0x172   : > { %13565 = vtanh.f32 %v2161_v22  ;;  %v2162_v33 = vadd.f32 %v11718_v30, %v14469_v16  ;;  %v2083_v34 = vpop.f32.mrb[3].mxu1  ;;  %v1188_v35 = vadd.f32 %v14469_v16, %v1107_v31 }
 0x173   : > { %13567 = vtanh.f32 %v1187_v23  ;;  %11926 = vmatmul.mubr.msk.bf16.gmra.mrb[44].mxu0 %vm321_vm2, %v13368_v21  ;;  %v2160_v36 = vadd.f32 %v14469_v16, %v2083_v34 }
 0x174   : > { %13569 = vtanh.f32 %v2159_v28  ;;  %12016 = vmatmul.mubr.msk.bf16.gmra.mrb[44].mxu1 %vm321_vm2, %v13369_v26  ;;  %11931 = vmatprep.mubr.msk.bf16.mxu0 %vm321_vm2, %v13370_v27 }
 0x175   : > { %13571 = vtanh.f32 %v1190_v29  ;;  %12021 = vmatprep.mubr.msk.bf16.mxu1 %vm321_vm2, %v13372_v32 }
 0x176   : > { %13573 = vtanh.f32 %v2162_v33  ;;  %v11631_v37 = vpop.f32.mrb[4].mxu0 }
 0x177   : > { %13575 = vtanh.f32 %v1188_v35  ;;  %v1193_v39 = vadd.f32 %v11631_v37, %v14469_v16  ;;  %v11721_v40 = vpop.f32.mrb[4].mxu1  ;;  %v1120_v41 = vpop.f32.mrb[5].mxu0 }
 0x178   : > { %13577 = vtanh.f32 %v2160_v36  ;;  %v2165_v44 = vadd.f32 %v11721_v40, %v14469_v16  ;;  %v1191_v45 = vadd.f32 %v14469_v16, %v1120_v41  ;;  %v2096_v46 = vpop.f32.mrb[5].mxu1  ;;  %v11632_v47 = vpop.f32.mrb[6].mxu0 }
 0x179   : > { %13579 = vtanh.f32 %v1193_v39  ;;  %v2163_v49 = vadd.f32 %v14469_v16, %v2096_v46  ;;  %v1194_v50 = vadd.f32 %v11632_v47, %v14469_v16  ;;  %v11722_v51 = vpop.f32.mrb[6].mxu1  ;;  %v1123_v52 = vpop.f32.mrb[7].mxu0 }
 0x17a   : > { %13581 = vtanh.f32 %v2165_v44  ;;  %v2166_v53 = vadd.f32 %v11722_v51, %v14469_v16  ;;  %v2099_v54 = vpop.f32.mrb[7].mxu1  ;;  %v1192_v57 = vadd.f32 %v14469_v16, %v1123_v52 }
 0x17b   : > { %v13564_v56 = vpop.eup %13563  ;;  %13583 = vtanh.f32 %v1191_v45  ;;  %11932 = vmatmul.mubr.msk.bf16.vlgmr.msra.gmra.mrb[32].mxu0 %vm321_vm2, %v13373_v42  ;;  %v2164_v60 = vadd.f32 %v14469_v16, %v2099_v54 }
 0x17c   : > { %v13566_v59 = vpop.eup %13565  ;;  %1222 = vst.msk [vmem:[#allocation2 + $0x10] sm:$0xff] %vm1219_vm3, %v13564_v56  ;;  %13585 = vtanh.f32 %v2163_v49  ;;  %11948 = vmatpush3.bf16.msra.mxu0 %v14419_v6  ;;  %12022 = vmatmul.mubr.msk.bf16.vlgmr.msra.gmra.mrb[32].mxu1 %vm321_vm2, %v13374_v48 }
 0x17d   : > { %v13568_v63 = vpop.eup %13567  ;;  %2193 = vst.msk [vmem:[#allocation2 + $0x90] sm:$0xff] %vm1219_vm3, %v13566_v59  ;;  %13587 = vtanh.f32 %v1194_v50  ;;  %11935 = vmatprep.mubr.msk.bf16.mxu0 %vm321_vm2, %v14389_v61  ;;  %12025 = vmatprep.mubr.msk.bf16.mxu1 %vm321_vm2, %v14392_v62 }
 0x17e   : > { %v13570_v1 = vpop.eup %13569  ;;  %1220 = vst.msk [vmem:[#allocation2] sm:$0xff] %vm1219_vm3, %v13568_v63  ;;  %13589 = vtanh.f32 %v2166_v53  ;;  %v11635_v14 = vpop.f32.mrb[8].mxu0  ;;  %12038 = vmatpush3.bf16.msra.mxu1 %v14424_v7  ;;  %11965 = vmatprep.subr.bf16.mxu0 %v14504_v55 }
 0x17f   : > { %v13572_v6 = vpop.eup %13571  ;;  %2191 = vst.msk [vmem:[#allocation2 + $0x80] sm:$0xff] %vm1219_vm3, %v13570_v1  ;;  %13591 = vtanh.f32 %v1192_v57  ;;  %v1197_v15 = vadd.f32 %v11635_v14, %v14469_v16  ;;  %v11725_v17 = vpop.f32.mrb[8].mxu1  ;;  %12055 = vmatprep.subr.bf16.mxu1 %v14509_v58 }
 0x180   : > { %v1136_v61 = vpop.f32.mrb[9].mxu0  ;;  %v13574_v62 = vpop.eup %13573  ;;  %1223 = vst.msk [vmem:[#allocation2 + $0x18] sm:$0xff] %vm1219_vm3, %v13572_v6  ;;  %13593 = vtanh.f32 %v2164_v60  ;;  %v2169_v18 = vadd.f32 %v11725_v17, %v14469_v16 }
 0x181   : > { %v1195_v7 = vadd.f32 %v14469_v16, %v1136_v61  ;;  %v2112_v19 = vpop.f32.mrb[9].mxu1  ;;  %v11636_v20 = vpop.f32.mrb[10].mxu0  ;;  %2194 = vst.msk [vmem:[#allocation2 + $0x98] sm:$0xff] %vm1219_vm3, %v13574_v62  ;;  %13595 = vtanh.f32 %v1197_v15 }
 0x182   : > { %v13576_v21 = vpop.eup %13575  ;;  %v2167_v22 = vadd.f32 %v14469_v16, %v2112_v19  ;;  %v1198_v23 = vadd.f32 %v11636_v20, %v14469_v16  ;;  %v11726_v24 = vpop.f32.mrb[10].mxu1  ;;  %13597 = vtanh.f32 %v2169_v18  ;;  %v13378_v19 = vld [vmem:[%s14015_s29 + $0x160] sm:$0xff]  }
 0x183   : > { %v1139_v25 = vpop.f32.mrb[11].mxu0  ;;  %v13578_v26 = vpop.eup %13577  ;;  %1221 = vst.msk [vmem:[#allocation2 + $0x8] sm:$0xff] %vm1219_vm3, %v13576_v21  ;;  %v2170_v27 = vadd.f32 %v11726_v24, %v14469_v16  ;;  %13599 = vtanh.f32 %v1195_v7  ;;  %11936 = vmatmul.mubr.msk.bf16.gmra.mrb[36].mxu0 %vm321_vm2, %v14404_v0 }
 0x184   : > { %v2115_v28 = vpop.f32.mrb[11].mxu1  ;;  %v13580_v29 = vpop.eup %13579  ;;  %2192 = vst.msk [vmem:[#allocation2 + $0x88] sm:$0xff] %vm1219_vm3, %v13578_v26  ;;  %v1196_v30 = vadd.f32 %v14469_v16, %v1139_v25  ;;  %13601 = vtanh.f32 %v2167_v22  ;;  %12026 = vmatmul.mubr.msk.bf16.gmra.mrb[36].mxu1 %vm321_vm2, %v14410_v2  ;;  %11939 = vmatprep.mubr.msk.bf16.mxu0 %vm321_vm2, %v14413_v3 }
 0x185   : > { %v13582_v31 = vpop.eup %13581  ;;  %1226 = vst.msk [vmem:[#allocation2 + $0x30] sm:$0xff] %vm1219_vm3, %v13580_v29  ;;  %v2168_v32 = vadd.f32 %v14469_v16, %v2115_v28  ;;  %13603 = vtanh.f32 %v1198_v23  ;;  %12029 = vmatprep.mubr.msk.bf16.mxu1 %vm321_vm2, %v14416_v5 }
 0x186   : > { %v13584_v33 = vpop.eup %13583  ;;  %2197 = vst.msk [vmem:[#allocation2 + $0xb0] sm:$0xff] %vm1219_vm3, %v13582_v31  ;;  %13605 = vtanh.f32 %v2170_v27  ;;  %v11639_v34 = vpop.f32.mrb[12].mxu0 }
 0x187   : > { %v13586_v0 = vpop.eup %13585  ;;  %1224 = vst.msk [vmem:[#allocation2 + $0x20] sm:$0xff] %vm1219_vm3, %v13584_v33  ;;  %13607 = vtanh.f32 %v1196_v30  ;;  %v1201_v2 = vadd.f32 %v11639_v34, %v14469_v16  ;;  %v11729_v3 = vpop.f32.mrb[12].mxu1  ;;  %v7064_v43 = vld [vmem:[#allocation2 + $0x10] ss:$2 sm:$0x3f] }
 0x188   : > { %v13588_v35 = vpop.eup %13587  ;;  %2195 = vst.msk [vmem:[#allocation2 + $0xa0] sm:$0xff] %vm1219_vm3, %v13586_v0  ;;  %13609 = vtanh.f32 %v2168_v32  ;;  %v1152_v37 = vpop.f32.mrb[13].mxu0  ;;  %v2173_v5 = vadd.f32 %v11729_v3, %v14469_v16  ;;  %v7068_v49 = vld [vmem:[#allocation2 + $0x11] ss:$2 sm:$0x3f] }
 0x189   : > { %v13590_v36 = vpop.eup %13589  ;;  %1227 = vst.msk [vmem:[#allocation2 + $0x38] sm:$0xff] %vm1219_vm3, %v13588_v35  ;;  %13611 = vtanh.f32 %v1201_v2  ;;  %v1199_v39 = vadd.f32 %v14469_v16, %v1152_v37  ;;  %v2128_v40 = vpop.f32.mrb[13].mxu1  ;;  %v7117_v54 = vld [vmem:[#allocation2 + $0x90] ss:$2 sm:$0x3f]  ;;  %v7070_v1 = vadd.f32 %v7068_v49, %v7064_v43 }
 0x18a   : > { %v13592_v38 = vpop.eup %13591  ;;  %2198 = vst.msk [vmem:[#allocation2 + $0xb8] sm:$0xff] %vm1219_vm3, %v13590_v36  ;;  %v11640_v41 = vpop.f32.mrb[14].mxu0  ;;  %v2171_v44 = vadd.f32 %v14469_v16, %v2128_v40  ;;  %13613 = vtanh.f32 %v2173_v5  ;;  %v7121_v56 = vld [vmem:[#allocation2 + $0x91] ss:$2 sm:$0x3f]  ;;  %v13403_v5 = vld [vmem:[%s16032_s1 + $0x20] sm:$0xff]  }
 0x18b   : > { %v13594_v42 = vpop.eup %13593  ;;  %1225 = vst.msk [vmem:[#allocation2 + $0x28] sm:$0xff] %vm1219_vm3, %v13592_v38  ;;  %v1202_v45 = vadd.f32 %v11640_v41, %v14469_v16  ;;  %v11730_v46 = vpop.f32.mrb[14].mxu1  ;;  %11940 = vmatmul.mubr.msk.bf16.gmra.mrb[40].mxu0 %vm321_vm2, %v14434_v8  ;;  %13615 = vtanh.f32 %v1199_v39  ;;  %v7062_v59 = vld [vmem:[#allocation2] ss:$2 sm:$0xff]  ;;  %v7066_v60 = vld [vmem:[#allocation2 + $0x1] ss:$2 sm:$0xff]  ;;  %v7123_v6 = vadd.f32 %v7121_v56, %v7117_v54 }
 0x18c   : > { %v1155_v47 = vpop.f32.mrb[15].mxu0  ;;  %v13596_v48 = vpop.eup %13595  ;;  %2196 = vst.msk [vmem:[#allocation2 + $0xa8] sm:$0xff] %vm1219_vm3, %v13594_v42  ;;  %v2174_v50 = vadd.f32 %v11730_v46, %v14469_v16  ;;  %12030 = vmatmul.mubr.msk.bf16.gmra.mrb[40].mxu1 %vm321_vm2, %v14438_v9  ;;  %11943 = vmatprep.mubr.msk.bf16.mxu0 %vm321_vm2, %v14441_v10  ;;  %13617 = vtanh.f32 %v2171_v44  ;;  %v7115_v9 = vld [vmem:[#allocation2 + $0x80] ss:$2 sm:$0xff]  ;;  %v7119_v10 = vld [vmem:[#allocation2 + $0x81] ss:$2 sm:$0xff]  ;;  %v7069_v18 = vadd.f32 %v7066_v60, %v7062_v59 }
 0x18d   : > { %v2131_v51 = vpop.f32.mrb[15].mxu1  ;;  %v13598_v52 = vpop.eup %13597  ;;  %1230 = vst.msk [vmem:[#allocation2 + $0x50] sm:$0xff] %vm1219_vm3, %v13596_v48  ;;  %v1200_v53 = vadd.f32 %v14469_v16, %v1155_v47  ;;  %12033 = vmatprep.mubr.msk.bf16.mxu1 %vm321_vm2, %v14444_v11  ;;  %13619 = vtanh.f32 %v1202_v45  ;;  %v13376_v11 = vld [vmem:[%s14015_s29 + $0x120] sm:$0xff]   ;;  %v7122_v20 = vadd.f32 %v7119_v10, %v7115_v9  ;;  %v13379_v38 = vld [vmem:[%s14015_s29 + $0x128] sm:$0xff]   ;;  %v13381_v42 = vld [vmem:[%s14015_s29 + $0x130] sm:$0xff]   ;;  %v14611_v48 = vand.u32 %v13403_v5, %v13996_v4 }
 0x18e   : > { %v13600_v57 = vpop.eup %13599  ;;  %2201 = vst.msk [vmem:[#allocation2 + $0xd0] sm:$0xff] %vm1219_vm3, %v13598_v52  ;;  %v2172_v8 = vadd.f32 %v14469_v16, %v2131_v51  ;;  %13621 = vtanh.f32 %v2174_v50  ;;  %v13380_v40 = vld [vmem:[%s14015_s29 + $0x168] sm:$0xff]   ;;  %v13382_v43 = vld [vmem:[%s14015_s29 + $0x170] sm:$0xff]   ;;  %v13384_v59 = vld [vmem:[%s14015_s29 + $0x178] sm:$0xff]  }
 0x18f   : > { %v13602_v63 = vpop.eup %13601  ;;  %1228 = vst.msk [vmem:[#allocation2 + $0x40] sm:$0xff] %vm1219_vm3, %v13600_v57  ;;  %13623 = vtanh.f32 %v1200_v53  ;;  %v13383_v57 = vld [vmem:[%s14015_s29 + $0x138] sm:$0xff]   ;;  %v13386_v60 = vld [vmem:[%s14015_s29 + $0x140] sm:$0xff]  }
 0x190   : > { %v13604_v14 = vpop.eup %13603  ;;  %2199 = vst.msk [vmem:[#allocation2 + $0xc0] sm:$0xff] %vm1219_vm3, %v13602_v63  ;;  %v7074_v15 = vld [vmem:[#allocation2 + $0x30] ss:$2 sm:$0x3f]  ;;  %13625 = vtanh.f32 %v2172_v8  ;;  %v13387_v10 = vld [vmem:[%s14015_s29 + $0x180] sm:$0xff]  }
 0x191   : > { %v13606_v17 = vpop.eup %13605  ;;  %1231 = vst.msk [vmem:[#allocation2 + $0x58] sm:$0xff] %vm1219_vm3, %v13604_v14  ;;  %v7127_v61 = vld [vmem:[#allocation2 + $0xb0] ss:$2 sm:$0x3f]  ;;  %v7076_v62 = vadd.f32 %v7074_v15, %v7070_v1 }
 0x192   : > { %v13608_v7 = vpop.eup %13607  ;;  %2202 = vst.msk [vmem:[#allocation2 + $0xd8] sm:$0xff] %vm1219_vm3, %v13606_v17  ;;  %v7129_v21 = vadd.f32 %v7127_v61, %v7123_v6  ;;  %v7080_v22 = vld [vmem:[#allocation2 + $0x31] ss:$2 sm:$0x3f]  ;;  %v7072_v23 = vld [vmem:[#allocation2 + $0x20] ss:$2 sm:$0xff] }
 0x193   : > { %v13610_v24 = vpop.eup %13609  ;;  %1229 = vst.msk [vmem:[#allocation2 + $0x48] sm:$0xff] %vm1219_vm3, %v13608_v7  ;;  %v7125_v25 = vld [vmem:[#allocation2 + $0xa0] ss:$2 sm:$0xff]  ;;  %v7133_v26 = vld [vmem:[#allocation2 + $0xb1] ss:$2 sm:$0x3f]  ;;  %v7082_v27 = vadd.f32 %v7080_v22, %v7076_v62  ;;  %v7075_v28 = vadd.f32 %v7072_v23, %v7069_v18  ;;  %11944 = vmatmul.mubr.msk.bf16.gmra.mrb[44].mxu0 %vm321_vm2, %v14455_v12 }
 0x194   : > { %v13612_v29 = vpop.eup %13611  ;;  %2200 = vst.msk [vmem:[#allocation2 + $0xc8] sm:$0xff] %vm1219_vm3, %v13610_v24  ;;  %v7128_v30 = vadd.f32 %v7125_v25, %v7122_v20  ;;  %v7135_v31 = vadd.f32 %v7133_v26, %v7129_v21  ;;  %v7078_v32 = vld [vmem:[#allocation2 + $0x21] ss:$2 sm:$0xff]  ;;  %12034 = vmatmul.mubr.msk.bf16.gmra.mrb[44].mxu1 %vm321_vm2, %v14458_v13  ;;  %11949 = vmatprep.mubr.msk.bf16.mxu0 %vm321_vm2, %v13376_v11 }
 0x195   : > { %1234 = vst.msk [vmem:[#allocation2 + $0x70] sm:$0xff] %vm1219_vm3, %v13612_v29  ;;  %v7131_v33 = vld [vmem:[#allocation2 + $0xa1] ss:$2 sm:$0xff]  ;;  %v7084_v0 = vmul.f32 0.25, %v7082_v27  ;;  %v7081_v34 = vadd.f32 %v7078_v32, %v7075_v28  ;;  %v13614_v35 = vpop.eup %13613  ;;  %12039 = vmatprep.mubr.msk.bf16.mxu1 %vm321_vm2, %v13378_v19  ;;  %v13391_v32 = vld [vmem:[%s14015_s29 + $0x190] sm:$0xff]  }
 0x196   : > { %v7134_v12 = vadd.f32 %v7131_v33, %v7128_v30  ;;  %v7137_v2 = vmul.f32 0.25, %v7135_v31  ;;  %v13616_v36 = vpop.eup %13615  ;;  %2205 = vst.msk [vmem:[#allocation2 + $0xf0] sm:$0xff] %vm1219_vm3, %v13614_v35  ;;  %v13395_v13 = vld [vmem:[%s16032_s1 + $0x20] sm:$0xff]   ;;  %v13388_v26 = vld [vmem:[%s14015_s29 + $0x148] sm:$0xff]   ;;  %v13390_v30 = vld [vmem:[%s14015_s29 + $0x150] sm:$0xff]  }
 0x197   : > { %7087 = vst.msk [vmem:[#allocation3 + $0x8] sm:$0x3f] %vm7086_vm4, %v7084_v0  ;;  %v7083_v3 = vmul.f32 0.25, %v7081_v34  ;;  %v13618_v37 = vpop.eup %13617  ;;  %v14605_v46 = vand.u32 %v13395_v13, %v13996_v4  ;;  %v13389_v29 = vld [vmem:[%s14015_s29 + $0x188] sm:$0xff]   ;;  %v13393_v13 = vld [vmem:[%s14015_s29 + $0x198] sm:$0xff]  }
 0x198   : > { %1232 = vst.msk [vmem:[#allocation2 + $0x60] sm:$0xff] %vm1219_vm3, %v13616_v36  ;;  %v13620_v39 = vpop.eup %13619  ;;  %2203 = vst.msk [vmem:[#allocation2 + $0xe0] sm:$0xff] %vm1219_vm3, %v13618_v37  ;;  %v7136_v44 = vmul.f32 0.25, %v7134_v12  ;;  %v7091_v49 = vld [vmem:[#allocation2 + $0x50] ss:$2 sm:$0x3f] }
 0x199   : > { %7139 = vst.msk [vmem:[#allocation3 + $0x24] sm:$0x3f] %vm7086_vm4, %v7137_v2  ;;  %v13622_v41 = vpop.eup %13621  ;;  %v7095_v50 = vld [vmem:[#allocation2 + $0x51] ss:$2 sm:$0x3f] }
 0x19a   : > { %7085 = vst.msk [vmem:[#allocation3] sm:$0xff] %vm1219_vm3, %v7083_v3  ;;  %1235 = vst.msk [vmem:[#allocation2 + $0x78] sm:$0xff] %vm1219_vm3, %v13620_v39  ;;  %v13624_v45 = vpop.eup %13623  ;;  %v7143_v51 = vld [vmem:[#allocation2 + $0xd0] ss:$2 sm:$0x3f]  ;;  %v7097_v8 = vadd.f32 %v7095_v50, %v7091_v49 }
 0x19b   : > { %2206 = vst.msk [vmem:[#allocation2 + $0xf8] sm:$0xff] %vm1219_vm3, %v13622_v41  ;;  %v13626_v47 = vpop.eup %13625  ;;  %1233 = vst.msk [vmem:[#allocation2 + $0x68] sm:$0xff] %vm1219_vm3, %v13624_v45  ;;  %11950 = vmatmul.mubr.msk.bf16.vlgmr.msra.gmra.mrb[32].mxu0 %vm321_vm2, %v13379_v38  ;;  %v7147_v52 = vld [vmem:[#allocation2 + $0xd1] ss:$2 sm:$0x3f] }
 0x19c   : > { %7138 = vst.msk [vmem:[#allocation3 + $0x1c] sm:$0xff] %vm1219_vm3, %v7136_v44  ;;  %2204 = vst.msk [vmem:[#allocation2 + $0xe8] sm:$0xff] %vm1219_vm3, %v13626_v47  ;;  %11966 = vmatpush3.bf16.msra.mxu0 %v14504_v55  ;;  %12040 = vmatmul.mubr.msk.bf16.vlgmr.msra.gmra.mrb[32].mxu1 %vm321_vm2, %v13380_v40  ;;  %v7089_v53 = vld [vmem:[#allocation2 + $0x40] ss:$2 sm:$0xff]  ;;  %v7093_v54 = vld [vmem:[#allocation2 + $0x41] ss:$2 sm:$0xff]  ;;  %v7149_v9 = vadd.f32 %v7147_v52, %v7143_v51 }
 0x19d   : > { %11953 = vmatprep.mubr.msk.bf16.mxu0 %vm321_vm2, %v13381_v42  ;;  %12043 = vmatprep.mubr.msk.bf16.mxu1 %vm321_vm2, %v13382_v43  ;;  %v7141_v55 = vld [vmem:[#allocation2 + $0xc0] ss:$2 sm:$0xff]  ;;  %v7145_v56 = vld [vmem:[#allocation2 + $0xc1] ss:$2 sm:$0xff]  ;;  %v7096_v14 = vadd.f32 %v7093_v54, %v7089_v53  ;;  %v13392_v36 = vld [vmem:[%s14015_s29 + $0x158] sm:$0xff]  }
 0x19e   : > { %12056 = vmatpush3.bf16.msra.mxu1 %v14509_v58  ;;  %11983 = vmatprep.subr.bf16.mxu0 %v14605_v46  ;;  %v7148_v11 = vadd.f32 %v7145_v56, %v7141_v55  ;;  %v13394_v3 = vld [vmem:[%s14015_s29 + $0x130] sm:$0xff]   ;;  %v13397_v51 = vld [vmem:[%s14015_s29 + $0x138] sm:$0xff]   ;;  %v13420_v53 = vld [vmem:[%s16032_s1 + $0x8] sm:$0xff]  }
 0x19f   : > { %12073 = vmatprep.subr.bf16.mxu1 %v14611_v48  ;;  %v13396_v40 = vld [vmem:[%s14015_s29 + $0x170] sm:$0xff]   ;;  %v13398_v52 = vld [vmem:[%s14015_s29 + $0x178] sm:$0xff]  }
 0x1a1   : > { %v7101_v63 = vld [vmem:[#allocation2 + $0x70] ss:$2 sm:$0x3f]  ;;  %v7107_v15 = vld [vmem:[#allocation2 + $0x71] ss:$2 sm:$0x3f] }
 0x1a2   : > { %v7103_v1 = vadd.f32 %v7101_v63, %v7097_v8  ;;  %v7153_v6 = vld [vmem:[#allocation2 + $0xf0] ss:$2 sm:$0x3f]  ;;  %v7099_v17 = vld [vmem:[#allocation2 + $0x60] ss:$2 sm:$0xff] }
 0x1a3   : > { %v7155_v58 = vadd.f32 %v7153_v6, %v7149_v9  ;;  %11954 = vmatmul.mubr.msk.bf16.gmra.mrb[36].mxu0 %vm321_vm2, %v13383_v57  ;;  %v7102_v62 = vadd.f32 %v7099_v17, %v7096_v14  ;;  %v7151_v18 = vld [vmem:[#allocation2 + $0xe0] ss:$2 sm:$0xff]  ;;  %v7105_v7 = vld [vmem:[#allocation2 + $0x61] ss:$2 sm:$0xff]  ;;  %v6185_v9 = vand.u32 %v13420_v53, %v13996_v4  ;;  %v13900_v14 = vmov 0.0   ;;  %v13405_v6 = vld [vmem:[%s14015_s29 + $0x190] sm:$0xff]  }
 0x1a4   : > { %v7109_v61 = vadd.f32 %v7107_v15, %v7103_v1  ;;  %12044 = vmatmul.mubr.msk.bf16.gmra.mrb[36].mxu1 %vm321_vm2, %v13384_v59  ;;  %11957 = vmatprep.mubr.msk.bf16.mxu0 %vm321_vm2, %v13386_v60  ;;  %v7154_v19 = vadd.f32 %v7151_v18, %v7148_v11  ;;  %v7159_v20 = vld [vmem:[#allocation2 + $0xf1] ss:$2 sm:$0x3f]  ;;  %v7157_v23 = vld [vmem:[#allocation2 + $0xe1] ss:$2 sm:$0xff] }
 0x1a5   : > { %12047 = vmatprep.mubr.msk.bf16.mxu1 %vm321_vm2, %v13387_v10  ;;  %v7108_v22 = vadd.f32 %v7105_v7, %v7102_v62  ;;  %v7161_v24 = vadd.f32 %v7159_v20, %v7155_v58  ;;  %v7480_v33 = vld [vmem:[#allocation3 + $0x22] sm:$0xff]  ;;  %v13404_v1 = vld [vmem:[%s14015_s29 + $0x150] sm:$0xff]   ;;  %v13407_v15 = vld [vmem:[%s14015_s29 + $0x198] sm:$0xff]  }
 0x1a6   : > { %v7111_v21 = vmul.f32 0.25, %v7109_v61  ;;  %v7160_v25 = vadd.f32 %v7157_v23, %v7154_v19  ;;  %v7455_v35 = vld [vmem:[#allocation3 + $0x21] sm:$0xff] }
 0x1a7   : > { %v7110_v27 = vmul.f32 0.25, %v7108_v22  ;;  %v7163_v28 = vmul.f32 0.25, %v7161_v24  ;;  %v7529_v57 = vld [vmem:[#allocation3 + $0x1c] sm:$0xff]  ;;  %v13401_v10 = vld [vmem:[%s14015_s29 + $0x148] sm:$0xff]   ;;  %v13417_v22 = vld [vmem:[%s14015_s29 + $0x190] sm:$0xff]  }
 0x1a8   : > { %7113 = vst.msk [vmem:[#allocation3 + $0x16] sm:$0x3f] %vm7086_vm4, %v7111_v21  ;;  %v7162_v31 = vmul.f32 0.25, %v7160_v25  ;;  %v13399_v8 = vld [vmem:[%s14015_s29 + $0x140] sm:$0xff]   ;;  %v13410_v58 = vld [vmem:[%s14015_s29 + $0x168] sm:$0xff]   ;;  %v13416_v21 = vld [vmem:[%s14015_s29 + $0x150] sm:$0xff]  }
 0x1a9   : > { %7112 = vst.msk [vmem:[#allocation3 + $0xe] sm:$0xff] %vm1219_vm3, %v7110_v27  ;;  %v13400_v59 = vld [vmem:[%s14015_s29 + $0x180] sm:$0xff]   ;;  %v13411_v61 = vld [vmem:[%s14015_s29 + $0x1a8] sm:$0xff]   ;;  %v13441_v24 = vld [vmem:[%s16033_s2 + $0x14] sm:$0xff]  }
 0x1aa   : > { %7165 = vst.msk [vmem:[#allocation3 + $0x32] sm:$0x3f] %vm7086_vm4, %v7163_v28  ;;  %v13408_v17 = vld [vmem:[%s14015_s29 + $0x160] sm:$0xff]   ;;  %v13414_v19 = vld [vmem:[%s14015_s29 + $0x148] sm:$0xff]   ;;  %v13419_v28 = vld [vmem:[%s14015_s29 + $0x198] sm:$0xff]  }
 0x1ab   : > { %7164 = vst.msk [vmem:[#allocation3 + $0x2a] sm:$0xff] %vm1219_vm3, %v7162_v31  ;;  %11958 = vmatmul.mubr.msk.bf16.gmra.mrb[40].mxu0 %vm321_vm2, %v13388_v26  ;;  %v13409_v11 = vld [vmem:[%s14015_s29 + $0x1a0] sm:$0xff]   ;;  %v13415_v20 = vld [vmem:[%s14015_s29 + $0x188] sm:$0xff]   ;;  %v13418_v26 = vld [vmem:[%s14015_s29 + $0x158] sm:$0xff]  }
 0x1ac   : > { %12048 = vmatmul.mubr.msk.bf16.gmra.mrb[40].mxu1 %vm321_vm2, %v13389_v29  ;;  %11961 = vmatprep.mubr.msk.bf16.mxu0 %vm321_vm2, %v13390_v30  ;;  %v13412_v62 = vld [vmem:[%s14015_s29 + $0x140] sm:$0xff]  }
 0x1ad   : > { %12051 = vmatprep.mubr.msk.bf16.mxu1 %vm321_vm2, %v13391_v32  ;;  %v13413_v18 = vld [vmem:[%s14015_s29 + $0x180] sm:$0xff]   ;;  %v13423_v32 = vld [vmem:[%s14015_s29 + $0x168] sm:$0xff]  }
 0x1ae   : > { %v13433_v7 = vld [vmem:[%s16032_s1] sm:$0xff]  }
 0x1af   : > { %v7479_v0 = vld [vmem:[#allocation3 + $0x1a] sm:$0xff]  ;;  %v6306_v23 = vand.u32 %v13433_v7, %v13996_v4  ;;  %v13445_v27 = vld [vmem:[%s16033_s2 + $0x24] ss:$0 sps:$4 sm:$0xff]  }
 0x1b0   : > { %v7454_v34 = vld [vmem:[#allocation3 + $0x19] sm:$0xff]  ;;  %v13019_v12 = vpack.i.bf16 %v7480_v33, %v7479_v0  ;;  %v7477_v37 = vld [vmem:[#allocation3 + $0xa] sm:$0xff]  ;;  %v8327_v31 = vsel %vm8325_vm5, %v13445_v27, 0 }
 0x1b1   : > { %v13014_v2 = vpack.i.bf16 %v7455_v35, %v7454_v34  ;;  %v7478_v38 = vld [vmem:[#allocation3 + $0x12] sm:$0xff]  ;;  %v7452_v5 = vld [vmem:[#allocation3 + $0x9] sm:$0xff]  ;;  %v7504_v43 = vld [vmem:[#allocation3 + $0x1b] sm:$0xff] }
 0x1b2   : > { %13020 = vrot.lane.b32.xlu1 %v13019_v12, %s13896_s19  ;;  %v7453_v39 = vld [vmem:[#allocation3 + $0x11] sm:$0xff]  ;;  %v13029_v41 = vpack.i.bf16 %v7478_v38, %v7477_v37  ;;  %v7505_v44 = vld [vmem:[#allocation3 + $0x23] sm:$0xff] }
 0x1b3   : > { %13015 = vrot.lane.b32.xlu0 %v13014_v2, %s13897_s20  ;;  %v13024_v42 = vpack.i.bf16 %v7453_v39, %v7452_v5  ;;  %11962 = vmatmul.mubr.msk.bf16.gmra.mrb[44].mxu0 %vm321_vm2, %v13392_v36  ;;  %v7502_v45 = vld [vmem:[#allocation3 + $0xb] sm:$0xff]  ;;  %v7503_v47 = vld [vmem:[#allocation3 + $0x13] sm:$0xff]  ;;  %v13039_v49 = vpack.i.bf16 %v7505_v44, %v7504_v43  ;;  %v13442_v25 = vld [vmem:[%s16033_s2 + $0x1c] sm:$0xff]  }
 0x1b4   : > { %12052 = vmatmul.mubr.msk.bf16.gmra.mrb[44].mxu1 %vm321_vm2, %v13393_v13  ;;  %11967 = vmatprep.mubr.msk.bf16.mxu0 %vm321_vm2, %v13394_v3  ;;  %v13034_v50 = vpack.i.bf16 %v7503_v47, %v7502_v45  ;;  %v7530_v54 = vld [vmem:[#allocation3 + $0x24] sm:$0xff]  ;;  %v7527_v55 = vld [vmem:[#allocation3 + $0xc] sm:$0xff]  ;;  %v7528_v56 = vld [vmem:[#allocation3 + $0x14] sm:$0xff] }
 0x1b5   : > { %12057 = vmatprep.mubr.msk.bf16.mxu1 %vm321_vm2, %v13396_v40  ;;  %v13049_v60 = vpack.i.bf16 %v7530_v54, %v7529_v57  ;;  %v13044_v63 = vpack.i.bf16 %v7528_v56, %v7527_v55  ;;  %v13421_v29 = vld [vmem:[%s14015_s29 + $0x160] sm:$0xff]   ;;  %v13424_v33 = vld [vmem:[%s14015_s29 + $0x1a8] sm:$0xff]   ;;  %v13425_v0 = vld [vmem:[%s14015_s29 + $0x170] sm:$0xff]  }
 0x1b6   : > { %13030 = vrot.lane.b32.xlu1 %v13029_v41, %s13896_s19  ;;  %v13422_v30 = vld [vmem:[%s14015_s29 + $0x1a0] sm:$0xff]   ;;  %v13426_v34 = vld [vmem:[%s14015_s29 + $0x1b0] sm:$0xff]   ;;  %v13427_v35 = vld [vmem:[%s14015_s29 + $0x178] sm:$0xff]  }
 0x1b7   : > { %13025 = vrot.lane.b32.xlu0 %v13024_v42, %s13897_s20  ;;  %v13428_v12 = vld [vmem:[%s14015_s29 + $0x1b8] sm:$0xff]   ;;  %v14740_v2 = vld [vmem:[%s14015_s29 + $0x190] sm:$0xff]   ;;  %v14755_v3 = vld [vmem:[%s14015_s29 + $0x1a0] sm:$0xff]  }
 0x1b8   : > { %v13440_v36 = vld [vmem:[%s16032_s1 + $0x10] sm:$0xff]   ;;  %v14752_v13 = vld [vmem:[%s14015_s29 + $0x198] sm:$0xff]   ;;  %v14766_v38 = vld [vmem:[%s14015_s29 + $0x1a8] sm:$0xff]  }
 0x1b9   : > { %v14758_v37 = vand.u32 %v13440_v36, %v13996_v4  ;;  %v14769_v5 = vld [vmem:[%s14015_s29 + $0x1b0] sm:$0xff]   ;;  %v14776_v39 = vld [vmem:[%s14015_s29 + $0x1b8] sm:$0xff]   ;;  %v13436_v40 = vld [vmem:[%s14015_s29 + $0x1c0] sm:$0xff]  }
 0x1ba   : > { %13040 = vrot.lane.b32.xlu1 %v13039_v49, %s13898_s9  ;;  %v13437_v45 = vld [vmem:[%s14015_s29 + $0x1c8] sm:$0xff]  }
 0x1bb   : > { %13035 = vrot.lane.b32.xlu0 %v13034_v50, %s13898_s9  ;;  %11968 = vmatmul.mubr.msk.bf16.vlgmr.msra.gmra.mrb[32].mxu0 %vm321_vm2, %v13397_v51 }
 0x1bc   : > { %11984 = vmatpush3.bf16.msra.mxu0 %v14605_v46  ;;  %12058 = vmatmul.mubr.msk.bf16.vlgmr.msra.gmra.mrb[32].mxu1 %vm321_vm2, %v13398_v52  ;;  %v13402_v46 = vld [vmem:[%s14015_s29 + $0x188] sm:$0xff]   ;;  %v13438_v52 = vld [vmem:[%s14015_s29 + $0x180] sm:$0xff]  }
 0x1bd   : > { %11971 = vmatprep.mubr.msk.bf16.mxu0 %vm321_vm2, %v13399_v8  ;;  %12061 = vmatprep.mubr.msk.bf16.mxu1 %vm321_vm2, %v13400_v59 }
 0x1be   : > { %13050 = vrot.lane.b32.xlu1 %v13049_v60, %s13899_s10  ;;  %12074 = vmatpush3.bf16.msra.mxu1 %v14611_v48  ;;  %v13406_v48 = vld [vmem:[%s14015_s29 + $0x158] sm:$0xff]  }
 0x1bf   : > { %13045 = vrot.lane.b32.xlu0 %v13044_v63, %s13899_s10  ;;  %12091 = vmatprep.subr.bf16.mxu0 %v6185_v9  ;;  %v13450_v63 = vld [vmem:[%s16032_s1 + $0x18] sm:$0xff]  }
 0x1c0   : > { %12181 = vmatprep.subr.bf16.mxu1 %v13900_v14  ;;  %v14804_v7 = vand.u32 %v13450_v63, %v13996_v4 }
 0x1c3   : > { %11972 = vmatmul.mubr.msk.bf16.gmra.mrb[36].mxu0 %vm321_vm2, %v13401_v10 }
 0x1c4   : > { %12062 = vmatmul.mubr.msk.bf16.gmra.mrb[36].mxu1 %vm321_vm2, %v13402_v46  ;;  %11975 = vmatprep.mubr.msk.bf16.mxu0 %vm321_vm2, %v13404_v1 }
 0x1c5   : > { %12065 = vmatprep.mubr.msk.bf16.mxu1 %vm321_vm2, %v13405_v6  ;;  %v13439_v6 = vld [vmem:[%s14015_s29 + $0x188] sm:$0xff]  }
 0x1cb   : > { %11976 = vmatmul.mubr.msk.bf16.gmra.mrb[40].mxu0 %vm321_vm2, %v13406_v48 }
 0x1cc   : > { %12066 = vmatmul.mubr.msk.bf16.gmra.mrb[40].mxu1 %vm321_vm2, %v13407_v15  ;;  %11979 = vmatprep.mubr.msk.bf16.mxu0 %vm321_vm2, %v13408_v17 }
 0x1cd   : > { %12069 = vmatprep.mubr.msk.bf16.mxu1 %vm321_vm2, %v13409_v11 }
 0x1d3   : > { %11980 = vmatmul.mubr.msk.bf16.gmra.mrb[44].mxu0 %vm321_vm2, %v13410_v58 }
 0x1d4   : > { %12070 = vmatmul.mubr.msk.bf16.gmra.mrb[44].mxu1 %vm321_vm2, %v13411_v61  ;;  %11985 = vmatprep.mubr.msk.bf16.mxu0 %vm321_vm2, %v13412_v62 }
 0x1d5   : > { %12075 = vmatprep.mubr.msk.bf16.mxu1 %vm321_vm2, %v13413_v18 }
 0x1db   : > { %11986 = vmatmul.mubr.msk.bf16.vlgmr.msra.gmra.mrb[32].mxu0 %vm321_vm2, %v13414_v19 }
 0x1dc   : > { %12076 = vmatmul.mubr.msk.bf16.vlgmr.msra.gmra.mrb[32].mxu1 %vm321_vm2, %v13415_v20  ;;  %11989 = vmatprep.mubr.msk.bf16.mxu0 %vm321_vm2, %v13416_v21 }
 0x1dd   : > { %12079 = vmatprep.mubr.msk.bf16.mxu1 %vm321_vm2, %v13417_v22  ;;  %12092 = vmatpush3.bf16.msra.mxu0 %v6185_v9 }
 0x1de   : > { %12109 = vmatprep.subr.bf16.mxu0 %v6306_v23  ;;  %12182 = vmatpush3.bf16.msra.mxu1 %v13441_v24 }
 0x1df   : > { %12183 = vmatprep.subr.bf16.mxu1 %v13900_v14 }
 0x1e2   : > { %12184 = vmatpush3.bf16.msra.mxu1 %v13442_v25 }
 0x1e3   : > { %11990 = vmatmul.mubr.msk.bf16.gmra.mrb[36].mxu0 %vm321_vm2, %v13418_v26  ;;  %12185 = vmatprep.subr.bf16.mxu1 %v13900_v14 }
 0x1e4   : > { %12080 = vmatmul.mubr.msk.bf16.gmra.mrb[36].mxu1 %vm321_vm2, %v13419_v28  ;;  %11993 = vmatprep.mubr.msk.bf16.mxu0 %vm321_vm2, %v13421_v29 }
 0x1e5   : > { %12083 = vmatprep.mubr.msk.bf16.mxu1 %vm321_vm2, %v13422_v30 }
 0x1e6   : > { %12186 = vmatpush3.bf16.msra.mxu1 %v8327_v31 }
 0x1e7   : > { %12223 = vmatprep.subr.bf16.mxu1 %v13900_v14 }
 0x1eb   : > { %11994 = vmatmul.mubr.msk.bf16.gmra.mrb[40].mxu0 %vm321_vm2, %v13423_v32 }
 0x1ec   : > { %12084 = vmatmul.mubr.msk.bf16.gmra.mrb[40].mxu1 %vm321_vm2, %v13424_v33  ;;  %11997 = vmatprep.mubr.msk.bf16.mxu0 %vm321_vm2, %v13425_v0 }
 0x1ed   : > { %12087 = vmatprep.mubr.msk.bf16.mxu1 %vm321_vm2, %v13426_v34 }
 0x1f3   : > { %11998 = vmatmul.mubr.msk.bf16.gmra.mrb[44].mxu0 %vm321_vm2, %v13427_v35 }
 0x1f4   : > { %12088 = vmatmul.mubr.msk.bf16.gmra.mrb[44].mxu1 %vm321_vm2, %v13428_v12  ;;  %12093 = vmatprep.mubr.msk.bf16.mxu0 %vm321_vm2, %v14740_v2 }
 0x1f5   : > { %12187 = vmatprep.mubr.msk.bf16.mxu1 %vm13901_vm6, %v13900_v14 }
 0x1fb   : > { %12094 = vmatmul.mubr.msk.bf16.vlgmr.msra.gmra.mrb[48].mxu0 %vm321_vm2, %v14752_v13 }
 0x1fc   : > { %12097 = vmatprep.mubr.msk.bf16.mxu0 %vm321_vm2, %v14755_v3  ;;  %12110 = vmatpush3.bf16.msra.mxu0 %v6306_v23 }
 0x1fd   : > { %12127 = vmatprep.subr.bf16.mxu0 %v14758_v37 }
 0x203   : > { %12098 = vmatmul.mubr.msk.bf16.gmra.mrb[52].mxu0 %vm321_vm2, %v14766_v38 }
 0x204   : > { %12101 = vmatprep.mubr.msk.bf16.mxu0 %vm321_vm2, %v14769_v5 }
 0x20b   : > { %12102 = vmatmul.mubr.msk.bf16.gmra.mrb[56].mxu0 %vm321_vm2, %v14776_v39 }
 0x20c   : > { %12105 = vmatprep.mubr.msk.bf16.mxu0 %vm321_vm2, %v13436_v40 }
 0x20e   : > { %v11807_v41 = vpop.f32.mrb[16].mxu0 }
 0x20f   : > { %v3132_v42 = vadd.f32 %v11807_v41, %v14469_v16  ;;  %v11897_v43 = vpop.f32.mrb[16].mxu1  ;;  %v3051_v44 = vpop.f32.mrb[17].mxu0 }
 0x210   : > { %v4103_v47 = vadd.f32 %v11897_v43, %v14469_v16  ;;  %v3130_v49 = vadd.f32 %v14469_v16, %v3051_v44  ;;  %v4022_v50 = vpop.f32.mrb[17].mxu1  ;;  %v11808_v51 = vpop.f32.mrb[18].mxu0 }
 0x211   : > { %13627 = vtanh.f32 %v3132_v42  ;;  %v4101_v53 = vadd.f32 %v14469_v16, %v4022_v50  ;;  %v3133_v54 = vadd.f32 %v11808_v51, %v14469_v16  ;;  %v11898_v55 = vpop.f32.mrb[18].mxu1  ;;  %v3054_v56 = vpop.f32.mrb[19].mxu0 }
 0x212   : > { %13629 = vtanh.f32 %v4103_v47  ;;  %v4104_v57 = vadd.f32 %v11898_v55, %v14469_v16  ;;  %v4025_v8 = vpop.f32.mrb[19].mxu1  ;;  %v3131_v59 = vadd.f32 %v14469_v16, %v3054_v56  ;;  %v7430_v56 = vld [vmem:[#allocation3 + $0x20] sm:$0xff] }
 0x213   : > { %13631 = vtanh.f32 %v3130_v49  ;;  %12106 = vmatmul.mubr.msk.bf16.gmra.mrb[60].mxu0 %vm321_vm2, %v13437_v45  ;;  %v4102_v60 = vadd.f32 %v14469_v16, %v4025_v8 }
 0x214   : > { %13633 = vtanh.f32 %v4101_v53  ;;  %12111 = vmatprep.mubr.msk.bf16.mxu0 %vm321_vm2, %v13438_v52 }
 0x215   : > { %13635 = vtanh.f32 %v3133_v54 }
 0x216   : > { %13637 = vtanh.f32 %v4104_v57  ;;  %v11811_v9 = vpop.f32.mrb[20].mxu0 }
 0x217   : > { %13639 = vtanh.f32 %v3131_v59  ;;  %v3136_v10 = vadd.f32 %v11811_v9, %v14469_v16  ;;  %v11901_v46 = vpop.f32.mrb[20].mxu1  ;;  %v3067_v1 = vpop.f32.mrb[21].mxu0  ;;  %v7429_v59 = vld [vmem:[#allocation3 + $0x18] sm:$0xff] }
 0x218   : > { %13641 = vtanh.f32 %v4102_v60  ;;  %v4107_v48 = vadd.f32 %v11901_v46, %v14469_v16  ;;  %v3134_v15 = vadd.f32 %v14469_v16, %v3067_v1  ;;  %v4038_v17 = vpop.f32.mrb[21].mxu1  ;;  %v11812_v11 = vpop.f32.mrb[22].mxu0 }
 0x219   : > { %13643 = vtanh.f32 %v3136_v10  ;;  %v4105_v58 = vadd.f32 %v14469_v16, %v4038_v17  ;;  %v3137_v61 = vadd.f32 %v11812_v11, %v14469_v16  ;;  %v11902_v62 = vpop.f32.mrb[22].mxu1  ;;  %v3070_v18 = vpop.f32.mrb[23].mxu0 }
 0x21a   : > { %13645 = vtanh.f32 %v4107_v48  ;;  %v4108_v19 = vadd.f32 %v11902_v62, %v14469_v16  ;;  %v4041_v20 = vpop.f32.mrb[23].mxu1  ;;  %v3135_v22 = vadd.f32 %v14469_v16, %v3070_v18 }
 0x21b   : > { %v13628_v21 = vpop.eup %13627  ;;  %13647 = vtanh.f32 %v3134_v15  ;;  %12112 = vmatmul.mubr.msk.bf16.vlgmr.msra.gmra.mrb[48].mxu0 %vm321_vm2, %v13439_v6  ;;  %v4106_v24 = vadd.f32 %v14469_v16, %v4041_v20  ;;  %v14821_v16 = vld [vmem:[%s16035_s4] ss:$0 sm:$0xff] }
 0x21c   : > { %v13630_v23 = vpop.eup %13629  ;;  %3164 = vst.msk [vmem:[#allocation2 + $0x110] sm:$0xff] %vm1219_vm3, %v13628_v21  ;;  %13649 = vtanh.f32 %v4105_v58  ;;  %12115 = vmatprep.mubr.msk.bf16.mxu0 %vm321_vm2, %v14740_v2  ;;  %12128 = vmatpush3.bf16.msra.mxu0 %v14758_v37 }
 0x21d   : > { %v13632_v25 = vpop.eup %13631  ;;  %4135 = vst.msk [vmem:[#allocation2 + $0x190] sm:$0xff] %vm1219_vm3, %v13630_v23  ;;  %13651 = vtanh.f32 %v3137_v61  ;;  %12145 = vmatprep.subr.bf16.mxu0 %v14804_v7  ;;  %v7428_v61 = vld [vmem:[#allocation3 + $0x10] sm:$0xff] }
 0x21e   : > { %v13634_v26 = vpop.eup %13633  ;;  %3162 = vst.msk [vmem:[#allocation2 + $0x100] sm:$0xff] %vm1219_vm3, %v13632_v25  ;;  %13653 = vtanh.f32 %v4108_v19  ;;  %v11815_v27 = vpop.f32.mrb[24].mxu0 }
 0x21f   : > { %v13636_v28 = vpop.eup %13635  ;;  %4133 = vst.msk [vmem:[#allocation2 + $0x180] sm:$0xff] %vm1219_vm3, %v13634_v26  ;;  %13655 = vtanh.f32 %v3135_v22  ;;  %v3140_v29 = vadd.f32 %v14821_v16, %v11815_v27  ;;  %v11905_v30 = vpop.f32.mrb[24].mxu1  ;;  %v7427_v26 = vld [vmem:[#allocation3 + $0x8] sm:$0xff] }
 0x220   : > { %v3083_v31 = vpop.f32.mrb[25].mxu0  ;;  %v13638_v32 = vpop.eup %13637  ;;  %3165 = vst.msk [vmem:[#allocation2 + $0x118] sm:$0xff] %vm1219_vm3, %v13636_v28  ;;  %13657 = vtanh.f32 %v4106_v24  ;;  %v4111_v33 = vadd.f32 %v14821_v16, %v11905_v30 }
 0x221   : > { %v3138_v0 = vadd.f32 %v14821_v16, %v3083_v31  ;;  %v4054_v34 = vpop.f32.mrb[25].mxu1  ;;  %v11816_v35 = vpop.f32.mrb[26].mxu0  ;;  %4136 = vst.msk [vmem:[#allocation2 + $0x198] sm:$0xff] %vm1219_vm3, %v13638_v32  ;;  %13659 = vtanh.f32 %v3140_v29 }
 0x222   : > { %v13640_v12 = vpop.eup %13639  ;;  %v4109_v2 = vadd.f32 %v14821_v16, %v4054_v34  ;;  %v11906_v36 = vpop.f32.mrb[26].mxu1  ;;  %13661 = vtanh.f32 %v4111_v33  ;;  %v3141_v42 = vadd.f32 %v14821_v16, %v11816_v35 }
 0x223   : > { %v3086_v37 = vpop.f32.mrb[27].mxu0  ;;  %v13642_v40 = vpop.eup %13641  ;;  %3163 = vst.msk [vmem:[#allocation2 + $0x108] sm:$0xff] %vm1219_vm3, %v13640_v12  ;;  %v4112_v41 = vadd.f32 %v14821_v16, %v11906_v36  ;;  %13663 = vtanh.f32 %v3138_v0  ;;  %12116 = vmatmul.mubr.msk.bf16.gmra.mrb[52].mxu0 %vm321_vm2, %v14752_v13 }
 0x224   : > { %v4057_v43 = vpop.f32.mrb[27].mxu1  ;;  %v13644_v44 = vpop.eup %13643  ;;  %4134 = vst.msk [vmem:[#allocation2 + $0x188] sm:$0xff] %vm1219_vm3, %v13642_v40  ;;  %v3139_v49 = vadd.f32 %v14821_v16, %v3086_v37  ;;  %13665 = vtanh.f32 %v4109_v2  ;;  %12119 = vmatprep.mubr.msk.bf16.mxu0 %vm321_vm2, %v14755_v3 }
 0x225   : > { %v13021_v45 = vpop.permute.xlu1 %13020  ;;  %v13016_v47 = vpop.permute.xlu0 %13015  ;;  %3168 = vst.msk [vmem:[#allocation2 + $0x130] sm:$0xff] %vm1219_vm3, %v13644_v44  ;;  %v4110_v53 = vadd.f32 %v14821_v16, %v4057_v43  ;;  %13667 = vtanh.f32 %v4112_v41 }
 0x226   : > { %v13646_v50 = vpop.eup %13645  ;;  %v13023_v51 = vunpack.i.h.bf16 %v13021_v45  ;;  %v13018_v52 = vunpack.i.h.bf16 %v13016_v47  ;;  %v13022_v55 = vunpack.i.l.bf16 %v13021_v45  ;;  %v13017_v57 = vunpack.i.l.bf16 %v13016_v47  ;;  %v11819_v60 = vpop.f32.mrb[28].mxu0 }
 0x227   : > { %v13648_v54 = vpop.eup %13647  ;;  %4139 = vst.msk [vmem:[#allocation2 + $0x1b0] sm:$0xff] %vm1219_vm3, %v13646_v50  ;;  %13669 = vtanh.f32 %v3141_v42  ;;  %v7169_v9 = vld [vmem:[#allocation2 + $0x110] ss:$2 sm:$0x3f]  ;;  %v3144_v6 = vadd.f32 %v14821_v16, %v11819_v60  ;;  %v11909_v21 = vpop.f32.mrb[28].mxu1 }
 0x228   : > { %v13650_v13 = vpop.eup %13649  ;;  %3166 = vst.msk [vmem:[#allocation2 + $0x120] sm:$0xff] %vm1219_vm3, %v13648_v54  ;;  %v7955_v8 = vsel %vm1219_vm3, %v7430_v56, %v13018_v52  ;;  %v7173_v10 = vld [vmem:[#allocation2 + $0x111] ss:$2 sm:$0x3f]  ;;  %v7954_v3 = vsel %vm1219_vm3, %v7429_v59, %v13017_v57  ;;  %13671 = vtanh.f32 %v3139_v49  ;;  %v3099_v22 = vpop.f32.mrb[29].mxu0  ;;  %v4115_v28 = vadd.f32 %v14821_v16, %v11909_v21 }
 0x229   : > { %v13652_v63 = vpop.eup %13651  ;;  %4137 = vst.msk [vmem:[#allocation2 + $0x1a0] sm:$0xff] %vm1219_vm3, %v13650_v13  ;;  %v13031_v46 = vpop.permute.xlu1 %13030  ;;  %v7981_v48 = vsel %vm7976_vm7, %v7955_v8, %v13023_v51  ;;  %13673 = vtanh.f32 %v4110_v53  ;;  %v7980_v23 = vsel %vm7976_vm7, %v7954_v3, %v13022_v55  ;;  %v7175_v24 = vadd.f32 %v7173_v10, %v7169_v9 }
 0x22a   : > { %v13026_v1 = vpop.permute.xlu0 %13025  ;;  %v13654_v15 = vpop.eup %13653  ;;  %3169 = vst.msk [vmem:[#allocation2 + $0x138] sm:$0xff] %vm1219_vm3, %v13652_v63  ;;  %v13033_v17 = vunpack.i.h.bf16 %v13031_v46  ;;  %v13032_v11 = vunpack.i.l.bf16 %v13031_v46  ;;  %v7167_v18 = vld [vmem:[#allocation2 + $0x100] ss:$2 sm:$0xff]  ;;  %v7171_v19 = vld [vmem:[#allocation2 + $0x101] ss:$2 sm:$0xff]  ;;  %13675 = vtanh.f32 %v3144_v6  ;;  %v3142_v29 = vadd.f32 %v14821_v16, %v3099_v22 }
 0x22b   : > { %v13028_v58 = vunpack.i.h.bf16 %v13026_v1  ;;  %v13656_v62 = vpop.eup %13655  ;;  %4140 = vst.msk [vmem:[#allocation2 + $0x1b8] sm:$0xff] %vm1219_vm3, %v13654_v15  ;;  %v13027_v20 = vunpack.i.l.bf16 %v13026_v1  ;;  %v4070_v30 = vpop.f32.mrb[29].mxu1  ;;  %v14854_v32 = vadd.f32 %v7171_v19, %v7167_v18  ;;  %12120 = vmatmul.mubr.msk.bf16.gmra.mrb[56].mxu0 %vm321_vm2, %v14766_v38  ;;  %13677 = vtanh.f32 %v4115_v28  ;;  %v7219_v52 = vld [vmem:[#allocation2 + $0x180] ss:$2 sm:$0xff]  ;;  %v7223_v53 = vld [vmem:[#allocation2 + $0x181] ss:$2 sm:$0xff] }
 0x22c   : > { %v13658_v25 = vpop.eup %13657  ;;  %3167 = vst.msk [vmem:[#allocation2 + $0x128] sm:$0xff] %vm1219_vm3, %v13656_v62  ;;  %v11820_v31 = vpop.f32.mrb[30].mxu0  ;;  %v4113_v34 = vadd.f32 %v14821_v16, %v4070_v30  ;;  %12123 = vmatprep.mubr.msk.bf16.mxu0 %vm321_vm2, %v14769_v5  ;;  %13679 = vtanh.f32 %v3142_v29  ;;  %v13443_v46 = vld [vmem:[%s14015_s29 + $0x1a0] sm:$0xff]   ;;  %v7225_v62 = vld [vmem:[#allocation2 + $0x191] ss:$2 sm:$0x3f] }
 0x22d   : > { %v7953_v27 = vsel %vm1219_vm3, %v7428_v61, %v13028_v58  ;;  %v13660_v33 = vpop.eup %13659  ;;  %4138 = vst.msk [vmem:[#allocation2 + $0x1a8] sm:$0xff] %vm1219_vm3, %v13658_v25  ;;  %v7952_v0 = vsel %vm1219_vm3, %v7427_v26, %v13027_v20  ;;  %v3145_v35 = vadd.f32 %v14821_v16, %v11820_v31  ;;  %v11910_v12 = vpop.f32.mrb[30].mxu1  ;;  %v7226_v58 = vadd.f32 %v7223_v53, %v7219_v52 }
 0x22e   : > { %v13041_v2 = vpop.permute.xlu1 %13040  ;;  %v7979_v36 = vsel %vm7976_vm7, %v7953_v27, %v13033_v17  ;;  %v13662_v37 = vpop.eup %13661  ;;  %3172 = vst.msk [vmem:[#allocation2 + $0x150] sm:$0xff] %vm1219_vm3, %v13660_v33  ;;  %v4116_v40 = vadd.f32 %v14821_v16, %v11910_v12  ;;  %v7978_v38 = vsel %vm7976_vm7, %v7952_v0, %v13032_v11  ;;  %13681 = vtanh.f32 %v4113_v34 }
 0x22f   : > { %v13043_v41 = vunpack.i.h.bf16 %v13041_v2  ;;  %v13042_v42 = vunpack.i.l.bf16 %v13041_v2  ;;  %v13036_v43 = vpop.permute.xlu0 %13035  ;;  %v3102_v44 = vpop.f32.mrb[31].mxu0  ;;  %4143 = vst.msk [vmem:[#allocation2 + $0x1d0] sm:$0xff] %vm1219_vm3, %v13662_v37  ;;  %13683 = vtanh.f32 %v3145_v35 }
 0x230   : > { %v13664_v45 = vpop.eup %13663  ;;  %v13038_v47 = vunpack.i.h.bf16 %v13036_v43  ;;  %v13037_v49 = vunpack.i.l.bf16 %v13036_v43  ;;  %v4073_v50 = vpop.f32.mrb[31].mxu1  ;;  %v3143_v5 = vadd.f32 %v14821_v16, %v3102_v44  ;;  %13685 = vtanh.f32 %v4116_v40  ;;  %v13444_v40 = vld [vmem:[%s14015_s29 + $0x1a8] sm:$0xff]   ;;  %v13448_v44 = vld [vmem:[%s14015_s29 + $0x1b0] sm:$0xff]  }
 0x231   : > { %v13666_v51 = vpop.eup %13665  ;;  %3170 = vst.msk [vmem:[#allocation2 + $0x140] sm:$0xff] %vm1219_vm3, %v13664_v45  ;;  %v8007_v54 = vsel %vm8002_vm8, %v7981_v48, %v13043_v41  ;;  %v8006_v55 = vsel %vm8002_vm8, %v7980_v23, %v13042_v42  ;;  %v4114_v8 = vadd.f32 %v14821_v16, %v4073_v50  ;;  %v7179_v60 = vld [vmem:[#allocation2 + $0x130] ss:$2 sm:$0x3f] }
 0x232   : > { %v13668_v56 = vpop.eup %13667  ;;  %4141 = vst.msk [vmem:[#allocation2 + $0x1c0] sm:$0xff] %vm1219_vm3, %v13666_v51  ;;  %v8004_v57 = vsel %vm8002_vm8, %v7978_v38, %v13037_v49  ;;  %v8005_v13 = vsel %vm8002_vm8, %v7979_v36, %v13038_v47  ;;  %v13051_v59 = vpop.permute.xlu1 %13050  ;;  %v7181_v1 = vadd.f32 %v7179_v60, %v7175_v24  ;;  %v7221_v48 = vld [vmem:[#allocation2 + $0x190] ss:$2 sm:$0x3f]  ;;  %13687 = vtanh.f32 %v3143_v5 }
 0x233   : > { %v13670_v63 = vpop.eup %13669  ;;  %4144 = vst.msk [vmem:[#allocation2 + $0x1d8] sm:$0xff] %vm1219_vm3, %v13668_v56  ;;  %v13053_v9 = vunpack.i.h.bf16 %v13051_v59  ;;  %v13052_v10 = vunpack.i.l.bf16 %v13051_v59  ;;  %v13046_v3 = vpop.permute.xlu0 %13045  ;;  %v7177_v11 = vld [vmem:[#allocation2 + $0x120] ss:$2 sm:$0xff]  ;;  %13689 = vtanh.f32 %v4114_v8  ;;  %12124 = vmatmul.mubr.msk.bf16.gmra.mrb[60].mxu0 %vm321_vm2, %v14776_v39  ;;  %v7183_v27 = vld [vmem:[#allocation2 + $0x121] ss:$2 sm:$0xff]  ;;  %v7227_v34 = vadd.f32 %v7225_v62, %v7221_v48 }
 0x234   : > { %v13672_v6 = vpop.eup %13671  ;;  %3173 = vst.msk [vmem:[#allocation2 + $0x158] sm:$0xff] %vm1219_vm3, %v13670_v63  ;;  %v13048_v15 = vunpack.i.h.bf16 %v13046_v3  ;;  %v13047_v17 = vunpack.i.l.bf16 %v13046_v3  ;;  %v7180_v20 = vadd.f32 %v7177_v11, %v14854_v32  ;;  %v7229_v21 = vld [vmem:[#allocation2 + $0x1a0] ss:$2 sm:$0xff]  ;;  %v7185_v28 = vld [vmem:[#allocation2 + $0x131] ss:$2 sm:$0x3f]  ;;  %12129 = vmatprep.mubr.msk.bf16.mxu0 %vm321_vm2, %v13443_v46 }
 0x235   : > { %v13674_v61 = vpop.eup %13673  ;;  %3171 = vst.msk [vmem:[#allocation2 + $0x148] sm:$0xff] %vm1219_vm3, %v13672_v6  ;;  %v8032_v18 = vsel %vm8028_vm9, %v8006_v55, %v13052_v10  ;;  %v8033_v19 = vsel %vm8028_vm9, %v8007_v54, %v13053_v9  ;;  %v7187_v32 = vadd.f32 %v7185_v28, %v7181_v1  ;;  %v7231_v33 = vld [vmem:[#allocation2 + $0x1b0] ss:$2 sm:$0x3f]  ;;  %v7232_v0 = vadd.f32 %v7229_v21, %v7226_v58  ;;  %v13459_v39 = vld [vmem:[%s16032_s1 + $0x20] sm:$0xff]  }
 0x236   : > { %v13676_v22 = vpop.eup %13675  ;;  %4142 = vst.msk [vmem:[#allocation2 + $0x1c8] sm:$0xff] %vm1219_vm3, %v13674_v61  ;;  %v11106_v23 = vpack.c.bf16 %v8032_v18, %v8032_v18  ;;  %v11107_v24 = vpack.c.bf16 %v8033_v19, %v8033_v19  ;;  %v8030_v25 = vsel %vm8028_vm9, %v8004_v57, %v13047_v17  ;;  %v8031_v26 = vsel %vm8028_vm9, %v8005_v13, %v13048_v15  ;;  %v7235_v36 = vld [vmem:[#allocation2 + $0x1a1] ss:$2 sm:$0xff]  ;;  %v7237_v45 = vld [vmem:[#allocation2 + $0x1b1] ss:$2 sm:$0x3f] }
 0x237   : > { %3176 = vst.msk [vmem:[#allocation2 + $0x170] sm:$0xff] %vm1219_vm3, %v13676_v22  ;;  %v11104_v29 = vpack.c.bf16 %v8030_v25, %v8030_v25  ;;  %v11105_v30 = vpack.c.bf16 %v8031_v26, %v8031_v26  ;;  %v7186_v31 = vadd.f32 %v7183_v27, %v7180_v20  ;;  %v13678_v35 = vpop.eup %13677  ;;  %v7189_v2 = vmul.f32 0.25, %v7187_v32  ;;  %v7481_v57 = vld [vmem:[#allocation3 + $0x2a] sm:$0xff]  ;;  %v13449_v63 = vld [vmem:[%s14015_s29 + $0x1b8] sm:$0xff]  }
 0x238   : > { %8159 = vst.msk [vmem:[#allocation4 + $0xc] sm:$0xf] %vm8155_vm10, %v11106_v23  ;;  %8160 = vst.msk [vmem:[#allocation4 + $0x10] sm:$0xf] %vm8155_vm10, %v11107_v24  ;;  %v13680_v37 = vpop.eup %13679  ;;  %v7238_v41 = vadd.f32 %v7235_v36, %v7232_v0  ;;  %v7233_v42 = vadd.f32 %v7231_v33, %v7227_v34  ;;  %v14906_v50 = vand.u32 %v13459_v39, %v13996_v4  ;;  %v7456_v13 = vld [vmem:[#allocation3 + $0x29] sm:$0xff] }
 0x239   : > { %8157 = vst.msk [vmem:[#allocation4 + $0x4] sm:$0xf] %vm8155_vm10, %v11104_v29  ;;  %8158 = vst.msk [vmem:[#allocation4 + $0x8] sm:$0xf] %vm8155_vm10, %v11105_v30  ;;  %v7188_v12 = vmul.f32 0.25, %v7186_v31  ;;  %v13682_v43 = vpop.eup %13681  ;;  %v7531_v24 = vld [vmem:[#allocation3 + $0x2c] sm:$0xff] }
 0x23a   : > { %4147 = vst.msk [vmem:[#allocation2 + $0x1f0] sm:$0xff] %vm1219_vm3, %v13678_v35  ;;  %3174 = vst.msk [vmem:[#allocation2 + $0x160] sm:$0xff] %vm1219_vm3, %v13680_v37  ;;  %v13684_v47 = vpop.eup %13683  ;;  %v7240_v49 = vmul.f32 0.25, %v7238_v41  ;;  %v7239_v38 = vadd.f32 %v7237_v45, %v7233_v42  ;;  %v7247_v9 = vld [vmem:[#allocation2 + $0x1d0] ss:$2 sm:$0x3f] }
 0x23b   : > { %7190 = vst.msk [vmem:[#allocation3 + $0x38] sm:$0xff] %vm1219_vm3, %v7188_v12  ;;  %4145 = vst.msk [vmem:[#allocation2 + $0x1e0] sm:$0xff] %vm1219_vm3, %v13682_v43  ;;  %v13686_v51 = vpop.eup %13685  ;;  %v7195_v53 = vld [vmem:[#allocation2 + $0x150] ss:$2 sm:$0x3f]  ;;  %12130 = vmatmul.mubr.msk.bf16.vlgmr.msra.gmra.mrb[48].mxu0 %vm321_vm2, %v13444_v40  ;;  %v13452_v42 = vld [vmem:[%s14015_s29 + $0x1c8] sm:$0xff]  }
 0x23c   : > { %7191 = vst.msk [vmem:[#allocation3 + $0x40] sm:$0x3f] %vm7086_vm4, %v7189_v2  ;;  %v13688_v52 = vpop.eup %13687  ;;  %v7199_v54 = vld [vmem:[#allocation2 + $0x151] ss:$2 sm:$0x3f]  ;;  %v7241_v55 = vmul.f32 0.25, %v7239_v38  ;;  %12133 = vmatprep.mubr.msk.bf16.mxu0 %vm321_vm2, %v13448_v44  ;;  %12146 = vmatpush3.bf16.msra.mxu0 %v14804_v7 }
 0x23d   : > { %3177 = vst.msk [vmem:[#allocation2 + $0x178] sm:$0xff] %vm1219_vm3, %v13684_v47  ;;  %4148 = vst.msk [vmem:[#allocation2 + $0x1f8] sm:$0xff] %vm1219_vm3, %v13686_v51  ;;  %v13690_v5 = vpop.eup %13689  ;;  %12163 = vmatprep.subr.bf16.mxu0 %v14906_v50  ;;  %v7251_v10 = vld [vmem:[#allocation2 + $0x1d1] ss:$2 sm:$0x3f]  ;;  %v13451_v7 = vld [vmem:[%s14015_s29 + $0x1c0] sm:$0xff]   ;;  %v7201_v20 = vadd.f32 %v7199_v54, %v7195_v53 }
 0x23e   : > { %7242 = vst.msk [vmem:[#allocation3 + $0x54] sm:$0xff] %vm1219_vm3, %v7240_v49  ;;  %3175 = vst.msk [vmem:[#allocation2 + $0x168] sm:$0xff] %vm1219_vm3, %v13688_v52  ;;  %v7193_v3 = vld [vmem:[#allocation2 + $0x140] ss:$2 sm:$0xff]  ;;  %v7197_v6 = vld [vmem:[#allocation2 + $0x141] ss:$2 sm:$0xff]  ;;  %v7253_v32 = vadd.f32 %v7251_v10, %v7247_v9 }
 0x23f   : > { %v14913_v56 = vld [vmem:[#allocation4 + $0xc] sm:$0xf]  ;;  %v8186_v4 = vld [vmem:[#allocation4 + $0x10] sm:$0xf]  ;;  %4146 = vst.msk [vmem:[#allocation2 + $0x1e8] sm:$0xff] %vm1219_vm3, %v13690_v5  ;;  %v7200_v25 = vadd.f32 %v7197_v6, %v7193_v3  ;;  %v7506_v28 = vld [vmem:[#allocation3 + $0x2b] sm:$0xff] }
 0x240   : > { %v14918_v8 = vld [vmem:[#allocation4 + $0x8] sm:$0xf]  ;;  %v8205_v59 = vld [vmem:[#allocation4 + $0x4] sm:$0x8]  ;;  %v10874_v60 = vcombine.low %v14913_v56, %v8186_v4  ;;  %7243 = vst.msk [vmem:[#allocation3 + $0x5c] sm:$0x3f] %vm7086_vm4, %v7241_v55 }
 0x241   : > { %v10873_v46 = vcombine.low %v8205_v59, %v14918_v8  ;;  %v10896_v1 = vcombine.low %v14918_v8, %v14913_v56  ;;  %v7245_v11 = vld [vmem:[#allocation2 + $0x1c0] ss:$2 sm:$0xff]  ;;  %v7249_v58 = vld [vmem:[#allocation2 + $0x1c1] ss:$2 sm:$0xff]  ;;  %v13453_v47 = vld [vmem:[%s14015_s29 + $0x1d0] sm:$0xff]  }
 0x242   : > { %v7482_v48 = vld [vmem:[#allocation3 + $0x32] sm:$0xff]  ;;  %v14928_v17 = vrot.slane %v10874_v60, 3  ;;  %v7252_v31 = vadd.f32 %v7249_v58, %v7245_v11  ;;  %v13457_v11 = vld [vmem:[%s14015_s29 + $0x1c0] sm:$0xff]  }
 0x243   : > { %v7457_v15 = vld [vmem:[#allocation3 + $0x31] sm:$0xff]  ;;  %v13059_v61 = vpack.i.bf16 %v7482_v48, %v7481_v57  ;;  %v8263_v18 = vrot.slane %v10873_v46, 3  ;;  %12134 = vmatmul.mubr.msk.bf16.gmra.mrb[52].mxu0 %vm321_vm2, %v13449_v63  ;;  %v7483_v53 = vld [vmem:[#allocation3 + $0x3a] sm:$0xff] }
 0x244   : > { %v13054_v62 = vpack.i.bf16 %v7457_v15, %v7456_v13  ;;  %v7532_v19 = vld [vmem:[#allocation3 + $0x34] sm:$0xff]  ;;  %12137 = vmatprep.mubr.msk.bf16.mxu0 %vm321_vm2, %v13451_v7  ;;  %v7533_v63 = vld [vmem:[#allocation3 + $0x3c] sm:$0xff] }
 0x245   : > { %v7507_v21 = vld [vmem:[#allocation3 + $0x33] sm:$0xff]  ;;  %13060 = vrot.lane.b32.xlu1 %v13059_v61, %s13896_s19  ;;  %v8265_v23 = vsel %vm8262_vm11, %v8263_v18, %v14928_v17  ;;  %v13069_v27 = vpack.i.bf16 %v7532_v19, %v7531_v24  ;;  %v7203_v29 = vld [vmem:[#allocation2 + $0x160] ss:$2 sm:$0xff]  ;;  %v7209_v35 = vld [vmem:[#allocation2 + $0x161] ss:$2 sm:$0xff] }
 0x246   : > { %v7205_v22 = vld [vmem:[#allocation2 + $0x170] ss:$2 sm:$0x3f]  ;;  %13055 = vrot.lane.b32.xlu0 %v13054_v62, %s13897_s20  ;;  %12188 = vmatmul.mubr.msk.bf16.vlgmr.msra.gmra.mrb[48].mxu1 %vm8297_vm12, %v8265_v23  ;;  %v7211_v30 = vld [vmem:[#allocation2 + $0x171] ss:$2 sm:$0x3f]  ;;  %v13064_v33 = vpack.i.bf16 %v7507_v21, %v7506_v28  ;;  %v7206_v0 = vadd.f32 %v7203_v29, %v7200_v25 }
 0x247   : > { %v7207_v26 = vadd.f32 %v7205_v22, %v7201_v20  ;;  %v7255_v39 = vld [vmem:[#allocation2 + $0x1e0] ss:$2 sm:$0xff]  ;;  %12191 = vmatprep.mubr.msk.bf16.mxu1 %vm13901_vm6, %v13900_v14  ;;  %v7257_v2 = vld [vmem:[#allocation2 + $0x1f0] ss:$2 sm:$0x3f] }
 0x248   : > { %v7258_v12 = vadd.f32 %v7255_v39, %v7252_v31  ;;  %v7212_v36 = vadd.f32 %v7209_v35, %v7206_v0  ;;  %v7261_v40 = vld [vmem:[#allocation2 + $0x1e1] ss:$2 sm:$0xff]  ;;  %v7259_v41 = vadd.f32 %v7257_v2, %v7253_v32  ;;  %v7263_v44 = vld [vmem:[#allocation2 + $0x1f1] ss:$2 sm:$0x3f] }
 0x249   : > { %v7213_v34 = vadd.f32 %v7211_v30, %v7207_v26  ;;  %13070 = vrot.lane.b32.xlu1 %v13069_v27, %s13899_s10  ;;  %v13454_v52 = vld [vmem:[%s14015_s29 + $0x1d8] sm:$0xff]   ;;  %v13455_v54 = vld [vmem:[%s14015_s29 + $0x1b0] sm:$0xff]   ;;  %v13458_v25 = vld [vmem:[%s14015_s29 + $0x1c8] sm:$0xff]  }
 0x24a   : > { %13065 = vrot.lane.b32.xlu0 %v13064_v33, %s13898_s9  ;;  %v7264_v43 = vadd.f32 %v7261_v40, %v7258_v12  ;;  %v7214_v45 = vmul.f32 0.25, %v7212_v36  ;;  %v7265_v49 = vadd.f32 %v7263_v44, %v7259_v41  ;;  %v7458_v5 = vld [vmem:[#allocation3 + $0x39] sm:$0xff]  ;;  %v13460_v28 = vld [vmem:[%s14015_s29 + $0x1d0] sm:$0xff]   ;;  %v13463_v12 = vld [vmem:[%s14015_s29 + $0x1e8] sm:$0xff]  }
 0x24b   : > { %v7215_v37 = vmul.f32 0.25, %v7213_v34  ;;  %12138 = vmatmul.mubr.msk.bf16.gmra.mrb[56].mxu0 %vm321_vm2, %v13452_v42  ;;  %v7508_v9 = vld [vmem:[#allocation3 + $0x3b] sm:$0xff]  ;;  %v13465_v36 = vld [vmem:[%s14015_s29 + $0x1c8] sm:$0xff]  }
 0x24c   : > { %v7266_v38 = vmul.f32 0.25, %v7264_v43  ;;  %7216 = vst.msk [vmem:[#allocation3 + $0x46] sm:$0xff] %vm1219_vm3, %v7214_v45  ;;  %v7267_v51 = vmul.f32 0.25, %v7265_v49  ;;  %12141 = vmatprep.mubr.msk.bf16.mxu0 %vm321_vm2, %v13453_v47  ;;  %v13456_v7 = vld [vmem:[%s14015_s29 + $0x1b8] sm:$0xff]   ;;  %v13462_v35 = vld [vmem:[%s14015_s29 + $0x1e0] sm:$0xff]   ;;  %v13469_v47 = vld [vmem:[%s14015_s29 + $0x1e8] sm:$0xff]  }
 0x24d   : > { %7217 = vst.msk [vmem:[#allocation3 + $0x4e] sm:$0x3f] %vm7086_vm4, %v7215_v37  ;;  %v7536_v20 = vld [vmem:[#allocation3 + $0x54] sm:$0xff]  ;;  %v13464_v2 = vld [vmem:[%s14015_s29 + $0x1c0] sm:$0xff]   ;;  %v13475_v42 = vld [vmem:[%s16033_s2 + $0x4c] ss:$0 sps:$4 sm:$0xff]  }
 0x24e   : > { %7268 = vst.msk [vmem:[#allocation3 + $0x62] sm:$0xff] %vm1219_vm3, %v7266_v38  ;;  %v7487_v26 = vld [vmem:[#allocation3 + $0x5a] sm:$0xff]  ;;  %v13466_v37 = vld [vmem:[%s14015_s29 + $0x1d0] sm:$0xff]   ;;  %v13474_v41 = vld [vmem:[%s16033_s2 + $0x44] sm:$0xff]   ;;  %v8994_v45 = vsel %vm8325_vm5, %v13475_v42, 0 }
 0x24f   : > { %7269 = vst.msk [vmem:[#allocation3 + $0x6a] sm:$0x3f] %vm7086_vm4, %v7267_v51  ;;  %v7462_v27 = vld [vmem:[#allocation3 + $0x59] sm:$0xff]  ;;  %v13470_v49 = vld [vmem:[%s14015_s29 + $0x1f0] sm:$0xff]  }
 0x250   : > { %v13461_v39 = vld [vmem:[%s14015_s29 + $0x1d8] sm:$0xff]   ;;  %v13468_v44 = vld [vmem:[%s14015_s29 + $0x1e0] sm:$0xff]  }
 0x251   : > { %v13473_v40 = vld [vmem:[%s16033_s2 + $0x3c] sm:$0xff]  }
 0x252   : > { %v13467_v43 = vld [vmem:[%s14015_s29 + $0x1d8] sm:$0xff]   ;;  %v13483_v51 = vld [vmem:[%s16033_s2] sm:$0xff]  }
 0x253   : > { %v7484_v55 = vld [vmem:[#allocation3 + $0x42] sm:$0xff]  ;;  %12142 = vmatmul.mubr.msk.bf16.gmra.mrb[60].mxu0 %vm321_vm2, %v13454_v52  ;;  %v13471_v38 = vld [vmem:[%s14015_s29 + $0x1f8] sm:$0xff]   ;;  %12224 = vmatpush3.bf16.msra.mxu1 %v13483_v51 }
 0x254   : > { %v7459_v4 = vld [vmem:[#allocation3 + $0x41] sm:$0xff]  ;;  %v13079_v57 = vpack.i.bf16 %v7484_v55, %v7483_v53  ;;  %12147 = vmatprep.mubr.msk.bf16.mxu0 %vm321_vm2, %v13455_v54  ;;  %v7486_v46 = vld [vmem:[#allocation3 + $0x52] sm:$0xff]  ;;  %v7485_v6 = vld [vmem:[#allocation3 + $0x4a] sm:$0xff]  ;;  %12225 = vmatprep.subr.bf16.mxu1 %v13900_v14 }
 0x255   : > { %v13074_v13 = vpack.i.bf16 %v7459_v4, %v7458_v5  ;;  %v7534_v59 = vld [vmem:[#allocation3 + $0x44] sm:$0xff]  ;;  %v7461_v15 = vld [vmem:[#allocation3 + $0x51] sm:$0xff]  ;;  %v13099_v58 = vpack.i.bf16 %v7486_v46, %v7485_v6  ;;  %v7537_v31 = vld [vmem:[#allocation3 + $0x5c] sm:$0xff] }
 0x256   : > { %v7509_v60 = vld [vmem:[#allocation3 + $0x43] sm:$0xff]  ;;  %13080 = vrot.lane.b32.xlu1 %v13079_v57, %s13896_s19  ;;  %v13089_v10 = vpack.i.bf16 %v7534_v59, %v7533_v63  ;;  %v7535_v62 = vld [vmem:[#allocation3 + $0x4c] sm:$0xff]  ;;  %v7512_v32 = vld [vmem:[#allocation3 + $0x5b] sm:$0xff] }
 0x257   : > { %13075 = vrot.lane.b32.xlu0 %v13074_v13, %s13897_s20  ;;  %v13084_v3 = vpack.i.bf16 %v7509_v60, %v7508_v9  ;;  %v7460_v48 = vld [vmem:[#allocation3 + $0x49] sm:$0xff]  ;;  %v7511_v19 = vld [vmem:[#allocation3 + $0x53] sm:$0xff]  ;;  %v13109_v21 = vpack.i.bf16 %v7536_v20, %v7535_v62  ;;  %v7463_v24 = vld [vmem:[#allocation3 + $0x61] sm:$0xff] }
 0x258   : > { %v13094_v61 = vpack.i.bf16 %v7461_v15, %v7460_v48  ;;  %v7510_v18 = vld [vmem:[#allocation3 + $0x4b] sm:$0xff]  ;;  %v7488_v23 = vld [vmem:[#allocation3 + $0x62] sm:$0xff]  ;;  %v13114_v30 = vpack.i.bf16 %v7463_v24, %v7462_v27 }
 0x259   : > { %v13104_v22 = vpack.i.bf16 %v7511_v19, %v7510_v18  ;;  %v13119_v29 = vpack.i.bf16 %v7488_v23, %v7487_v26  ;;  %v7513_v33 = vld [vmem:[#allocation3 + $0x63] sm:$0xff] }
 0x25a   : > { %13090 = vrot.lane.b32.xlu1 %v13089_v10, %s13899_s10  ;;  %v13124_v34 = vpack.i.bf16 %v7513_v33, %v7512_v32  ;;  %v7431_v19 = vld [vmem:[#allocation3 + $0x28] sm:$0xff] }
 0x25b   : > { %13085 = vrot.lane.b32.xlu0 %v13084_v3, %s13898_s9  ;;  %12148 = vmatmul.mubr.msk.bf16.vlgmr.msra.gmra.mrb[48].mxu0 %vm321_vm2, %v13456_v7 }
 0x25c   : > { %12151 = vmatprep.mubr.msk.bf16.mxu0 %vm321_vm2, %v13457_v11  ;;  %12164 = vmatpush3.bf16.msra.mxu0 %v14906_v50  ;;  %v7538_v50 = vld [vmem:[#allocation3 + $0x64] sm:$0xff] }
 0x25d   : > { %12307 = vmatprep.subr.bf16.mxu0 %v13900_v14  ;;  %v13129_v0 = vpack.i.bf16 %v7538_v50, %v7537_v31 }
 0x25e   : > { %13100 = vrot.lane.b32.xlu1 %v13099_v58, %s13896_s19 }
 0x25f   : > { %13095 = vrot.lane.b32.xlu0 %v13094_v61, %s13897_s20  ;;  %v7432_v61 = vld [vmem:[#allocation3 + $0x30] sm:$0xff] }
 0x262   : > { %13110 = vrot.lane.b32.xlu1 %v13109_v21, %s13899_s10 }
 0x263   : > { %13105 = vrot.lane.b32.xlu0 %v13104_v22, %s13898_s9  ;;  %12152 = vmatmul.mubr.msk.bf16.gmra.mrb[52].mxu0 %vm321_vm2, %v13458_v25 }
 0x264   : > { %12155 = vmatprep.mubr.msk.bf16.mxu0 %vm321_vm2, %v13460_v28 }
 0x266   : > { %13120 = vrot.lane.b32.xlu1 %v13119_v29, %s13896_s19 }
 0x267   : > { %13115 = vrot.lane.b32.xlu0 %v13114_v30, %s13897_s20 }
 0x26a   : > { %13130 = vrot.lane.b32.xlu1 %v13129_v0, %s13899_s10 }
 0x26b   : > { %13125 = vrot.lane.b32.xlu0 %v13124_v34, %s13898_s9  ;;  %12156 = vmatmul.mubr.msk.bf16.gmra.mrb[56].mxu0 %vm321_vm2, %v13461_v39 }
 0x26c   : > { %12159 = vmatprep.mubr.msk.bf16.mxu0 %vm321_vm2, %v13462_v35 }
 0x273   : > { %12160 = vmatmul.mubr.msk.bf16.gmra.mrb[60].mxu0 %vm321_vm2, %v13463_v12 }
 0x274   : > { %12165 = vmatprep.mubr.msk.bf16.mxu0 %vm321_vm2, %v13464_v2 }
 0x27b   : > { %12166 = vmatmul.mubr.msk.bf16.vlgmr.msra.gmra.mrb[48].mxu0 %vm321_vm2, %v13465_v36 }
 0x27c   : > { %12169 = vmatprep.mubr.msk.bf16.mxu0 %vm321_vm2, %v13466_v37  ;;  %12308 = vmatpush3.bf16.msra.mxu0 %v13473_v40 }
 0x27d   : > { %12309 = vmatprep.subr.bf16.mxu0 %v13900_v14 }
 0x280   : > { %12310 = vmatpush3.bf16.msra.mxu0 %v13474_v41 }
 0x281   : > { %12311 = vmatprep.subr.bf16.mxu0 %v13900_v14 }
 0x283   : > { %12170 = vmatmul.mubr.msk.bf16.gmra.mrb[52].mxu0 %vm321_vm2, %v13467_v43 }
 0x284   : > { %12173 = vmatprep.mubr.msk.bf16.mxu0 %vm321_vm2, %v13468_v44  ;;  %12312 = vmatpush3.bf16.msra.mxu0 %v8994_v45 }
 0x285   : > { %12391 = vmatprep.subr.bf16.mxu0 %v13900_v14 }
 0x28b   : > { %12174 = vmatmul.mubr.msk.bf16.gmra.mrb[56].mxu0 %vm321_vm2, %v13469_v47 }
 0x28c   : > { %12177 = vmatprep.mubr.msk.bf16.mxu0 %vm321_vm2, %v13470_v49 }
 0x293   : > { %12178 = vmatmul.mubr.msk.bf16.gmra.mrb[60].mxu0 %vm321_vm2, %v13471_v38 }
 0x294   : > { %12313 = vmatprep.mubr.msk.bf16.mxu0 %vm13901_vm6, %v13900_v14 }
 0x2ae   : > { %v11987_v52 = vpop.f32.mrb[32].mxu0 }
 0x2af   : > { %v5074_v53 = vadd.f32 %v14821_v16, %v11987_v52  ;;  %v12077_v54 = vpop.f32.mrb[32].mxu1  ;;  %v4993_v55 = vpop.f32.mrb[33].mxu0 }
 0x2b0   : > { %v6045_v5 = vadd.f32 %v14821_v16, %v12077_v54  ;;  %v5072_v4 = vadd.f32 %v14821_v16, %v4993_v55  ;;  %v5964_v57 = vpop.f32.mrb[33].mxu1  ;;  %v11988_v13 = vpop.f32.mrb[34].mxu0 }
 0x2b1   : > { %13691 = vtanh.f32 %v5074_v53  ;;  %v6043_v59 = vadd.f32 %v14821_v16, %v5964_v57  ;;  %v5075_v60 = vadd.f32 %v14821_v16, %v11988_v13  ;;  %v12078_v63 = vpop.f32.mrb[34].mxu1  ;;  %v4996_v9 = vpop.f32.mrb[35].mxu0 }
 0x2b2   : > { %13693 = vtanh.f32 %v6045_v5  ;;  %v6046_v10 = vadd.f32 %v14821_v16, %v12078_v63  ;;  %v5967_v3 = vpop.f32.mrb[35].mxu1  ;;  %v5073_v46 = vadd.f32 %v14821_v16, %v4996_v9 }
 0x2b3   : > { %13695 = vtanh.f32 %v5072_v4  ;;  %v6044_v7 = vadd.f32 %v14821_v16, %v5967_v3 }
 0x2b4   : > { %13697 = vtanh.f32 %v6043_v59 }
 0x2b5   : > { %13699 = vtanh.f32 %v5075_v60 }
 0x2b6   : > { %13701 = vtanh.f32 %v6046_v10  ;;  %v11991_v18 = vpop.f32.mrb[36].mxu0 }
 0x2b7   : > { %v13061_v6 = vpop.permute.xlu1 %13060  ;;  %13703 = vtanh.f32 %v5073_v46  ;;  %v5078_v21 = vadd.f32 %v14821_v16, %v11991_v18  ;;  %v12081_v22 = vpop.f32.mrb[36].mxu1 }
 0x2b8   : > { %v13056_v48 = vpop.permute.xlu0 %13055  ;;  %v13063_v15 = vunpack.i.h.bf16 %v13061_v6  ;;  %v13062_v58 = vunpack.i.l.bf16 %v13061_v6  ;;  %v5009_v23 = vpop.f32.mrb[37].mxu0  ;;  %13705 = vtanh.f32 %v6044_v7  ;;  %v6049_v28 = vadd.f32 %v14821_v16, %v12081_v22 }
 0x2b9   : > { %v13058_v11 = vunpack.i.h.bf16 %v13056_v48  ;;  %v13057_v62 = vunpack.i.l.bf16 %v13056_v48  ;;  %v5980_v32 = vpop.f32.mrb[37].mxu1  ;;  %v11992_v33 = vpop.f32.mrb[38].mxu0  ;;  %13707 = vtanh.f32 %v5078_v21  ;;  %v5076_v34 = vadd.f32 %v14821_v16, %v5009_v23 }
 0x2ba   : > { %v6047_v39 = vadd.f32 %v14821_v16, %v5980_v32  ;;  %v12082_v35 = vpop.f32.mrb[38].mxu1  ;;  %v5012_v12 = vpop.f32.mrb[39].mxu0  ;;  %13709 = vtanh.f32 %v6049_v28  ;;  %v5079_v40 = vadd.f32 %v14821_v16, %v11992_v33  ;;  %v7433_v32 = vld [vmem:[#allocation3 + $0x38] sm:$0xff] }
 0x2bb   : > { %v7957_v20 = vsel %vm1219_vm3, %v7432_v61, %v13058_v11  ;;  %v7956_v24 = vsel %vm1219_vm3, %v7431_v19, %v13057_v62  ;;  %v13071_v25 = vpop.permute.xlu1 %13070  ;;  %v13692_v2 = vpop.eup %13691  ;;  %13711 = vtanh.f32 %v5076_v34  ;;  %v6050_v45 = vadd.f32 %v14821_v16, %v12082_v35 }
 0x2bc   : > { %v13066_v26 = vpop.permute.xlu0 %13065  ;;  %v7983_v27 = vsel %vm7976_vm7, %v7957_v20, %v13063_v15  ;;  %v13073_v29 = vunpack.i.h.bf16 %v13071_v25  ;;  %v13072_v30 = vunpack.i.l.bf16 %v13071_v25  ;;  %v7982_v0 = vsel %vm7976_vm7, %v7956_v24, %v13062_v58  ;;  %v5983_v41 = vpop.f32.mrb[39].mxu1  ;;  %5106 = vst.msk [vmem:[#allocation2 + $0x210] sm:$0xff] %vm1219_vm3, %v13692_v2 }
 0x2bd   : > { %v13068_v31 = vunpack.i.h.bf16 %v13066_v26  ;;  %v13067_v50 = vunpack.i.l.bf16 %v13066_v26  ;;  %v13694_v42 = vpop.eup %13693  ;;  %13713 = vtanh.f32 %v6047_v39  ;;  %v5077_v51 = vadd.f32 %v14821_v16, %v5012_v12 }
 0x2be   : > { %v13696_v47 = vpop.eup %13695  ;;  %6077 = vst.msk [vmem:[#allocation2 + $0x290] sm:$0xff] %vm1219_vm3, %v13694_v42  ;;  %13715 = vtanh.f32 %v5079_v40  ;;  %v6048_v53 = vadd.f32 %v14821_v16, %v5983_v41  ;;  %v11995_v54 = vpop.f32.mrb[40].mxu0  ;;  %v15078_v41 = vld [vmem:[%s16035_s4] ss:$0 sm:$0xff] }
 0x2bf   : > { %v8008_v36 = vsel %vm8002_vm8, %v7982_v0, %v13067_v50  ;;  %v8009_v37 = vsel %vm8002_vm8, %v7983_v27, %v13068_v31  ;;  %v13698_v52 = vpop.eup %13697  ;;  %5104 = vst.msk [vmem:[#allocation2 + $0x200] sm:$0xff] %vm1219_vm3, %v13696_v47  ;;  %13717 = vtanh.f32 %v6050_v45  ;;  %v5082_v5 = vadd.f32 %v14821_v16, %v11995_v54  ;;  %v12085_v4 = vpop.f32.mrb[40].mxu1 }
 0x2c0   : > { %v8034_v43 = vsel %vm8028_vm9, %v8008_v36, %v13072_v30  ;;  %v8035_v44 = vsel %vm8028_vm9, %v8009_v37, %v13073_v29  ;;  %v13700_v55 = vpop.eup %13699  ;;  %6075 = vst.msk [vmem:[#allocation2 + $0x280] sm:$0xff] %vm1219_vm3, %v13698_v52  ;;  %v5025_v57 = vpop.f32.mrb[41].mxu0  ;;  %13719 = vtanh.f32 %v5077_v51  ;;  %v6053_v59 = vadd.f32 %v14821_v16, %v12085_v4  ;;  %v7434_v30 = vld [vmem:[#allocation3 + $0x40] sm:$0xff] }
 0x2c1   : > { %v11108_v49 = vpack.c.bf16 %v8034_v43, %v8034_v43  ;;  %v11109_v38 = vpack.c.bf16 %v8035_v44, %v8035_v44  ;;  %v13702_v13 = vpop.eup %13701  ;;  %5107 = vst.msk [vmem:[#allocation2 + $0x218] sm:$0xff] %vm1219_vm3, %v13700_v55  ;;  %v5080_v60 = vadd.f32 %v14821_v16, %v5025_v57  ;;  %v5996_v63 = vpop.f32.mrb[41].mxu1  ;;  %13721 = vtanh.f32 %v6048_v53 }
 0x2c2   : > { %v11996_v9 = vpop.f32.mrb[42].mxu0  ;;  %v13704_v10 = vpop.eup %13703  ;;  %6078 = vst.msk [vmem:[#allocation2 + $0x298] sm:$0xff] %vm1219_vm3, %v13702_v13  ;;  %v6051_v3 = vadd.f32 %v14821_v16, %v5996_v63  ;;  %13723 = vtanh.f32 %v5082_v5 }
 0x2c3   : > { %8161 = vst.msk [vmem:[#allocation4 + $0x14] sm:$0xf] %vm8155_vm10, %v11108_v49  ;;  %8162 = vst.msk [vmem:[#allocation4 + $0x18] sm:$0xf] %vm8155_vm10, %v11109_v38  ;;  %v12086_v46 = vpop.f32.mrb[42].mxu1  ;;  %v5028_v7 = vpop.f32.mrb[43].mxu0  ;;  %v5083_v48 = vadd.f32 %v14821_v16, %v11996_v9  ;;  %13725 = vtanh.f32 %v6053_v59 }
 0x2c4   : > { %v13706_v6 = vpop.eup %13705  ;;  %5105 = vst.msk [vmem:[#allocation2 + $0x208] sm:$0xff] %vm1219_vm3, %v13704_v10  ;;  %v5999_v15 = vpop.f32.mrb[43].mxu1  ;;  %v6054_v11 = vadd.f32 %v14821_v16, %v12086_v46  ;;  %13727 = vtanh.f32 %v5080_v60  ;;  %v5081_v61 = vadd.f32 %v14821_v16, %v5028_v7 }
 0x2c5   : > { %6076 = vst.msk [vmem:[#allocation2 + $0x288] sm:$0xff] %vm1219_vm3, %v13706_v6  ;;  %v13708_v58 = vpop.eup %13707  ;;  %13729 = vtanh.f32 %v6051_v3  ;;  %v6052_v18 = vadd.f32 %v14821_v16, %v5999_v15 }
 0x2c6   : > { %v13710_v62 = vpop.eup %13709  ;;  %5110 = vst.msk [vmem:[#allocation2 + $0x230] sm:$0xff] %vm1219_vm3, %v13708_v58  ;;  %13731 = vtanh.f32 %v5083_v48  ;;  %v11999_v0 = vpop.f32.mrb[44].mxu0 }
 0x2c7   : > { %v13712_v19 = vpop.eup %13711  ;;  %6081 = vst.msk [vmem:[#allocation2 + $0x2b0] sm:$0xff] %vm1219_vm3, %v13710_v62  ;;  %13733 = vtanh.f32 %v6054_v11  ;;  %v12089_v34 = vpop.f32.mrb[44].mxu1  ;;  %v5086_v42 = vadd.f32 %v15078_v41, %v11999_v0 }
 0x2c8   : > { %v13081_v20 = vpop.permute.xlu1 %13080  ;;  %v13714_v24 = vpop.eup %13713  ;;  %v7273_v25 = vld [vmem:[#allocation2 + $0x210] ss:$2 sm:$0x3f]  ;;  %v7277_v26 = vld [vmem:[#allocation2 + $0x211] ss:$2 sm:$0x3f]  ;;  %13735 = vtanh.f32 %v5081_v61  ;;  %v6057_v43 = vadd.f32 %v15078_v41, %v12089_v34 }
 0x2c9   : > { %v13076_v21 = vpop.permute.xlu0 %13075  ;;  %5108 = vst.msk [vmem:[#allocation2 + $0x220] sm:$0xff] %vm1219_vm3, %v13712_v19  ;;  %v13083_v27 = vunpack.i.h.bf16 %v13081_v20  ;;  %v13716_v29 = vpop.eup %13715  ;;  %6079 = vst.msk [vmem:[#allocation2 + $0x2a0] sm:$0xff] %vm1219_vm3, %v13714_v24  ;;  %v13082_v16 = vunpack.i.l.bf16 %v13081_v20  ;;  %13737 = vtanh.f32 %v6052_v18  ;;  %v15070_v35 = vadd.f32 %v7277_v26, %v7273_v25  ;;  %v7325_v59 = vld [vmem:[#allocation2 + $0x290] ss:$2 sm:$0x3f] }
 0x2ca   : > { %v15060_v22 = vld [vmem:[#allocation4 + $0x14] sm:$0xf]  ;;  %v15062_v23 = vld [vmem:[#allocation4 + $0x18] sm:$0xf]  ;;  %v13078_v28 = vunpack.i.h.bf16 %v13076_v21  ;;  %v13077_v31 = vunpack.i.l.bf16 %v13076_v21  ;;  %v13718_v50 = vpop.eup %13717  ;;  %5111 = vst.msk [vmem:[#allocation2 + $0x238] sm:$0xff] %vm1219_vm3, %v13716_v29  ;;  %v5041_v51 = vpop.f32.mrb[45].mxu0  ;;  %13739 = vtanh.f32 %v5086_v42 }
 0x2cb   : > { %v10875_v39 = vcombine.low %v15060_v22, %v15062_v23  ;;  %v13720_v12 = vpop.eup %13719  ;;  %6082 = vst.msk [vmem:[#allocation2 + $0x2b8] sm:$0xff] %vm1219_vm3, %v13718_v50  ;;  %v6012_v52 = vpop.f32.mrb[45].mxu1  ;;  %v5084_v55 = vadd.f32 %v15078_v41, %v5041_v51  ;;  %13741 = vtanh.f32 %v6057_v43  ;;  %v7329_v7 = vld [vmem:[#allocation2 + $0x291] ss:$2 sm:$0x3f] }
 0x2cc   : > { %v7959_v33 = vsel %vm1219_vm3, %v7434_v30, %v13078_v28  ;;  %v7958_v2 = vsel %vm1219_vm3, %v7433_v32, %v13077_v31  ;;  %v13091_v36 = vpop.permute.xlu1 %13090  ;;  %v13722_v44 = vpop.eup %13721  ;;  %5109 = vst.msk [vmem:[#allocation2 + $0x228] sm:$0xff] %vm1219_vm3, %v13720_v12  ;;  %v6055_v5 = vadd.f32 %v15078_v41, %v6012_v52  ;;  %v15095_v61 = vld [vmem:[#allocation4 + $0x14] sm:$0xfe]   ;;  %v7436_v31 = vld [vmem:[#allocation3 + $0x50] sm:$0xff]  ;;  %v7331_v42 = vadd.f32 %v7329_v7, %v7325_v59 }
 0x2cd   : > { %v13086_v37 = vpop.permute.xlu0 %13085  ;;  %v7985_v40 = vsel %vm7976_vm7, %v7959_v33, %v13083_v27  ;;  %v13093_v45 = vunpack.i.h.bf16 %v13091_v36  ;;  %v13092_v47 = vunpack.i.l.bf16 %v13091_v36  ;;  %v13724_v53 = vpop.eup %13723  ;;  %6080 = vst.msk [vmem:[#allocation2 + $0x2a8] sm:$0xff] %vm1219_vm3, %v13722_v44  ;;  %v7984_v54 = vsel %vm7976_vm7, %v7958_v2, %v13082_v16  ;;  %v7271_v18 = vld [vmem:[#allocation2 + $0x200] ss:$2 sm:$0xff]  ;;  %v7275_v19 = vld [vmem:[#allocation2 + $0x201] ss:$2 sm:$0xff] }
 0x2ce   : > { %v13088_v49 = vunpack.i.h.bf16 %v13086_v37  ;;  %v13087_v38 = vunpack.i.l.bf16 %v13086_v37  ;;  %v12000_v4 = vpop.f32.mrb[46].mxu0  ;;  %v12090_v57 = vpop.f32.mrb[46].mxu1  ;;  %5114 = vst.msk [vmem:[#allocation2 + $0x250] sm:$0xff] %vm1219_vm3, %v13724_v53  ;;  %13743 = vtanh.f32 %v5084_v55  ;;  %v7323_v16 = vld [vmem:[#allocation2 + $0x280] ss:$2 sm:$0xff]  ;;  %v15107_v33 = vrot.slane %v10875_v39, 3 }
 0x2cf   : > { %v13726_v13 = vpop.eup %13725  ;;  %v5087_v9 = vadd.f32 %v15078_v41, %v12000_v4  ;;  %v5044_v10 = vpop.f32.mrb[47].mxu0  ;;  %v6058_v15 = vadd.f32 %v15078_v41, %v12090_v57  ;;  %13745 = vtanh.f32 %v6055_v5  ;;  %v7435_v30 = vld [vmem:[#allocation3 + $0x48] sm:$0xff]  ;;  %v8932_v2 = vrot.slane %v15095_v61, 1  ;;  %v13830_v56 = vld [vmem:[#allocation4 + $0x14] sm:$0xf] }
 0x2d0   : > { %v8010_v60 = vsel %vm8002_vm8, %v7984_v54, %v13087_v38  ;;  %v8011_v63 = vsel %vm8002_vm8, %v7985_v40, %v13088_v49  ;;  %v6015_v3 = vpop.f32.mrb[47].mxu1  ;;  %v13728_v46 = vpop.eup %13727  ;;  %6085 = vst.msk [vmem:[#allocation2 + $0x2d0] sm:$0xff] %vm1219_vm3, %v13726_v13  ;;  %v5085_v24 = vadd.f32 %v15078_v41, %v5044_v10  ;;  %v7278_v36 = vadd.f32 %v7275_v19, %v7271_v18  ;;  %v7327_v44 = vld [vmem:[#allocation2 + $0x281] ss:$2 sm:$0xff] }
 0x2d1   : > { %v8036_v6 = vsel %vm8028_vm9, %v8010_v60, %v13092_v47  ;;  %v8037_v48 = vsel %vm8028_vm9, %v8011_v63, %v13093_v45  ;;  %v13101_v11 = vpop.permute.xlu1 %13100  ;;  %v13096_v58 = vpop.permute.xlu0 %13095  ;;  %5112 = vst.msk [vmem:[#allocation2 + $0x240] sm:$0xff] %vm1219_vm3, %v13728_v46  ;;  %13747 = vtanh.f32 %v5087_v9  ;;  %v6056_v26 = vadd.f32 %v15078_v41, %v6015_v3  ;;  %v7283_v40 = vld [vmem:[#allocation2 + $0x230] ss:$2 sm:$0x3f] }
 0x2d2   : > { %v13730_v62 = vpop.eup %13729  ;;  %v11110_v20 = vpack.c.bf16 %v8036_v6, %v8036_v6  ;;  %v11111_v21 = vpack.c.bf16 %v8037_v48, %v8037_v48  ;;  %v13103_v27 = vunpack.i.h.bf16 %v13101_v11  ;;  %v13102_v28 = vunpack.i.l.bf16 %v13101_v11  ;;  %v7335_v47 = vld [vmem:[#allocation2 + $0x2b0] ss:$2 sm:$0x3f]  ;;  %v7289_v48 = vld [vmem:[#allocation2 + $0x231] ss:$2 sm:$0x3f] }
 0x2d3   : > { %v13732_v25 = vpop.eup %13731  ;;  %6083 = vst.msk [vmem:[#allocation2 + $0x2c0] sm:$0xff] %vm1219_vm3, %v13730_v62  ;;  %13749 = vtanh.f32 %v6058_v15  ;;  %v13098_v50 = vunpack.i.h.bf16 %v13096_v58  ;;  %v13097_v32 = vunpack.i.l.bf16 %v13096_v58  ;;  %v7281_v37 = vld [vmem:[#allocation2 + $0x220] ss:$2 sm:$0xff]  ;;  %v8267_v45 = vsel %vm8262_vm11, %v14928_v17, %v15107_v33 }
 0x2d4   : > { %v13734_v29 = vpop.eup %13733  ;;  %5115 = vst.msk [vmem:[#allocation2 + $0x258] sm:$0xff] %vm1219_vm3, %v13732_v25  ;;  %13751 = vtanh.f32 %v5085_v24  ;;  %12192 = vmatmul.mubr.msk.bf16.gmra.mrb[52].mxu1 %vm8297_vm12, %v8267_v45  ;;  %v7284_v55 = vadd.f32 %v7281_v37, %v7278_v36  ;;  %v7285_v5 = vadd.f32 %v7283_v40, %v15070_v35  ;;  %v7330_v60 = vadd.f32 %v7327_v44, %v7323_v16  ;;  %v7333_v63 = vld [vmem:[#allocation2 + $0x2a0] ss:$2 sm:$0xff]  ;;  %v7437_v35 = vld [vmem:[#allocation3 + $0x58] sm:$0xff] }
 0x2d5   : > { %8163 = vst.msk [vmem:[#allocation4 + $0x1c] sm:$0xf] %vm8155_vm10, %v11110_v20  ;;  %8164 = vst.msk [vmem:[#allocation4 + $0x20] sm:$0xf] %vm8155_vm10, %v11111_v21  ;;  %v13736_v0 = vpop.eup %13735  ;;  %v13111_v34 = vpop.permute.xlu1 %13110  ;;  %13753 = vtanh.f32 %v6056_v26  ;;  %v7961_v22 = vsel %vm1219_vm3, %v7436_v31, %v13098_v50  ;;  %v7960_v39 = vsel %vm1219_vm3, %v7435_v30, %v13097_v32  ;;  %12195 = vmatprep.mubr.msk.bf16.mxu1 %vm13901_vm6, %v13900_v14  ;;  %v7438_v62 = vld [vmem:[#allocation3 + $0x60] sm:$0xff] }
 0x2d6   : > { %6086 = vst.msk [vmem:[#allocation2 + $0x2d8] sm:$0xff] %vm1219_vm3, %v13734_v29  ;;  %v13106_v12 = vpop.permute.xlu0 %13105  ;;  %v13738_v43 = vpop.eup %13737  ;;  %5113 = vst.msk [vmem:[#allocation2 + $0x248] sm:$0xff] %vm1219_vm3, %v13736_v0  ;;  %v13113_v49 = vunpack.i.h.bf16 %v13111_v34  ;;  %v13112_v38 = vunpack.i.l.bf16 %v13111_v34  ;;  %v7986_v53 = vsel %vm7976_vm7, %v7960_v39, %v13102_v28  ;;  %v7987_v54 = vsel %vm7976_vm7, %v7961_v22, %v13103_v27  ;;  %v7287_v20 = vld [vmem:[#allocation2 + $0x221] ss:$2 sm:$0xff] }
 0x2d7   : > { %6084 = vst.msk [vmem:[#allocation2 + $0x2c8] sm:$0xff] %vm1219_vm3, %v13738_v43  ;;  %v13108_v51 = vunpack.i.h.bf16 %v13106_v12  ;;  %v13107_v52 = vunpack.i.l.bf16 %v13106_v12  ;;  %v13740_v17 = vpop.eup %13739  ;;  %v7337_v9 = vadd.f32 %v7335_v47, %v7331_v42  ;;  %v7341_v21 = vld [vmem:[#allocation2 + $0x2b1] ss:$2 sm:$0x3f]  ;;  %v7290_v27 = vadd.f32 %v7287_v20, %v7284_v55 }
 0x2d8   : > { %v13742_v10 = vpop.eup %13741  ;;  %5118 = vst.msk [vmem:[#allocation2 + $0x270] sm:$0xff] %vm1219_vm3, %v13740_v17  ;;  %v7291_v28 = vadd.f32 %v7289_v48, %v7285_v5  ;;  %v7336_v29 = vadd.f32 %v7333_v63, %v7330_v60 }
 0x2d9   : > { %v8012_v4 = vsel %vm8002_vm8, %v7986_v53, %v13107_v52  ;;  %v8013_v57 = vsel %vm8002_vm8, %v7987_v54, %v13108_v51  ;;  %v13121_v13 = vpop.permute.xlu1 %13120  ;;  %v13744_v15 = vpop.eup %13743  ;;  %6089 = vst.msk [vmem:[#allocation2 + $0x2f0] sm:$0xff] %vm1219_vm3, %v13742_v10  ;;  %v7343_v16 = vadd.f32 %v7341_v21, %v7337_v9  ;;  %v7339_v51 = vld [vmem:[#allocation2 + $0x2a1] ss:$2 sm:$0xff] }
 0x2da   : > { %v13116_v59 = vpop.permute.xlu0 %13115  ;;  %v8038_v3 = vsel %vm8028_vm9, %v8012_v4, %v13112_v38  ;;  %v8039_v46 = vsel %vm8028_vm9, %v8013_v57, %v13113_v49  ;;  %v13123_v7 = vunpack.i.h.bf16 %v13121_v13  ;;  %v13122_v6 = vunpack.i.l.bf16 %v13121_v13  ;;  %v13746_v24 = vpop.eup %13745  ;;  %5116 = vst.msk [vmem:[#allocation2 + $0x260] sm:$0xff] %vm1219_vm3, %v13744_v15 }
 0x2db   : > { %v11112_v11 = vpack.c.bf16 %v8038_v3, %v8038_v3  ;;  %v11113_v58 = vpack.c.bf16 %v8039_v46, %v8039_v46  ;;  %v13118_v18 = vunpack.i.h.bf16 %v13116_v59  ;;  %v13117_v19 = vunpack.i.l.bf16 %v13116_v59  ;;  %v13748_v30 = vpop.eup %13747  ;;  %6087 = vst.msk [vmem:[#allocation2 + $0x2e0] sm:$0xff] %vm1219_vm3, %v13746_v24  ;;  %v7299_v39 = vld [vmem:[#allocation2 + $0x250] ss:$2 sm:$0x3f] }
 0x2dc   : > { %v15131_v25 = vld [vmem:[#allocation4 + $0x1c] sm:$0xf]  ;;  %v15133_v26 = vld [vmem:[#allocation4 + $0x20] sm:$0xf]  ;;  %5119 = vst.msk [vmem:[#allocation2 + $0x278] sm:$0xff] %vm1219_vm3, %v13748_v30  ;;  %v7292_v38 = vmul.f32 0.25, %v7290_v27  ;;  %v7342_v9 = vadd.f32 %v7339_v51, %v7336_v29 }
 0x2dd   : > { %8165 = vst.msk [vmem:[#allocation4 + $0x24] sm:$0xf] %vm8155_vm10, %v11112_v11  ;;  %8166 = vst.msk [vmem:[#allocation4 + $0x28] sm:$0xf] %vm8155_vm10, %v11113_v58  ;;  %v7963_v31 = vsel %vm1219_vm3, %v7438_v62, %v13118_v18  ;;  %v7962_v50 = vsel %vm1219_vm3, %v7437_v35, %v13117_v19  ;;  %v13131_v32 = vpop.permute.xlu1 %13130  ;;  %v10876_v34 = vcombine.low %v15131_v25, %v15133_v26  ;;  %v13750_v36 = vpop.eup %13749  ;;  %v15145_v44 = vld [vmem:[#allocation4 + $0x1c] sm:$0xff]   ;;  %v7293_v17 = vmul.f32 0.25, %v7291_v28 }
 0x2de   : > { %v13126_v0 = vpop.permute.xlu0 %13125  ;;  %v10898_v12 = vcombine.low %v15062_v23, %v15131_v25  ;;  %v13133_v37 = vunpack.i.h.bf16 %v13131_v32  ;;  %v13132_v40 = vunpack.i.l.bf16 %v13131_v32  ;;  %v13752_v22 = vpop.eup %13751  ;;  %6090 = vst.msk [vmem:[#allocation2 + $0x2f8] sm:$0xff] %vm1219_vm3, %v13750_v36  ;;  %v7988_v45 = vsel %vm7976_vm7, %v7962_v50, %v13122_v6  ;;  %v7303_v53 = vld [vmem:[#allocation2 + $0x251] ss:$2 sm:$0x3f]  ;;  %7294 = vst.msk [vmem:[#allocation3 + $0x70] sm:$0xff] %vm1219_vm3, %v7292_v38 }
 0x2df   : > { %v13128_v42 = vunpack.i.h.bf16 %v13126_v0  ;;  %v13127_v43 = vunpack.i.l.bf16 %v13126_v0  ;;  %v7989_v47 = vsel %vm7976_vm7, %v7963_v31, %v13123_v7  ;;  %v8268_v49 = vrot.slane %v10876_v34, 3  ;;  %v13754_v52 = vpop.eup %13753  ;;  %5117 = vst.msk [vmem:[#allocation2 + $0x268] sm:$0xff] %vm1219_vm3, %v13752_v22  ;;  %v7297_v10 = vld [vmem:[#allocation2 + $0x240] ss:$2 sm:$0xff]  ;;  %v7301_v3 = vld [vmem:[#allocation2 + $0x241] ss:$2 sm:$0xff] }
 0x2e0   : > { %v8933_v5 = vrot.slane %v15145_v44, 1  ;;  %6088 = vst.msk [vmem:[#allocation2 + $0x2e8] sm:$0xff] %vm1219_vm3, %v13754_v52  ;;  %v7349_v46 = vld [vmem:[#allocation2 + $0x2c0] ss:$2 sm:$0xff]  ;;  %v7305_v7 = vadd.f32 %v7303_v53, %v7299_v39  ;;  %v7353_v11 = vld [vmem:[#allocation2 + $0x2c1] ss:$2 sm:$0xff]  ;;  %v7304_v58 = vadd.f32 %v7301_v3, %v7297_v10 }
 0x2e1   : > { %v8014_v54 = vsel %vm8002_vm8, %v7988_v45, %v13127_v43  ;;  %v8015_v55 = vsel %vm8002_vm8, %v7989_v47, %v13128_v42  ;;  %v8269_v13 = vsel %vm8262_vm11, %v15107_v33, %v8268_v49  ;;  %7295 = vst.msk [vmem:[#allocation3 + $0x78] sm:$0x3f] %vm7086_vm4, %v7293_v17  ;;  %v7345_v33 = vmul.f32 0.25, %v7343_v16  ;;  %v7351_v20 = vld [vmem:[#allocation2 + $0x2d0] ss:$2 sm:$0x3f] }
 0x2e2   : > { %v8040_v4 = vsel %vm8028_vm9, %v8014_v54, %v13132_v40  ;;  %v8041_v57 = vsel %vm8028_vm9, %v8015_v55, %v13133_v37  ;;  %12196 = vmatmul.mubr.msk.bf16.gmra.mrb[56].mxu1 %vm8297_vm12, %v8269_v13  ;;  %v8934_v63 = vsel %vm346_vm0, %v8932_v2, %v8933_v5  ;;  %v7344_v19 = vmul.f32 0.25, %v7342_v9  ;;  %v7355_v21 = vld [vmem:[#allocation2 + $0x2d1] ss:$2 sm:$0x3f] }
 0x2e3   : > { %v11114_v59 = vpack.c.bf16 %v8040_v4, %v8040_v4  ;;  %v11115_v60 = vpack.c.bf16 %v8041_v57, %v8041_v57  ;;  %12314 = vmatmul.mubr.msk.bf16.vlgmr.msra.gmra.mrb[64].mxu0 %vm8297_vm12, %v8934_v63  ;;  %12199 = vmatprep.mubr.msk.bf16.mxu1 %vm13901_vm6, %v13900_v14  ;;  %v7309_v48 = vld [vmem:[#allocation2 + $0x270] ss:$2 sm:$0x3f]  ;;  %7347 = vst.msk [vmem:[#allocation3 + $0x94] sm:$0x3f] %vm7086_vm4, %v7345_v33 }
 0x2e4   : > { %12317 = vmatprep.mubr.msk.bf16.mxu0 %vm13901_vm6, %v13900_v14  ;;  %v15172_v61 = vld [vmem:[#allocation4 + $0x24] sm:$0xf]  ;;  %v15174_v2 = vld [vmem:[#allocation4 + $0x28] sm:$0xf]  ;;  %v7311_v62 = vadd.f32 %v7309_v48, %v7305_v7  ;;  %7346 = vst.msk [vmem:[#allocation3 + $0x8c] sm:$0xff] %vm1219_vm3, %v7344_v19  ;;  %v7356_v42 = vadd.f32 %v7353_v11, %v7349_v46  ;;  %v7357_v52 = vadd.f32 %v7355_v21, %v7351_v20  ;;  %v13484_v48 = vld [vmem:[%s16033_s2 + $0x8] sm:$0xff]  }
 0x2e5   : > { %8167 = vst.msk [vmem:[#allocation4 + $0x2c] sm:$0xf] %vm8155_vm10, %v11114_v59  ;;  %8168 = vst.msk [vmem:[#allocation4 + $0x30] sm:$0xf] %vm8155_vm10, %v11115_v60  ;;  %v10877_v6 = vcombine.low %v15172_v61, %v15174_v2  ;;  %v15178_v35 = vld [vmem:[#allocation4 + $0x24] sm:$0xff]   ;;  %v10899_v15 = vcombine.low %v15133_v26, %v15172_v61  ;;  %v7489_v16 = vld [vmem:[#allocation3 + $0x6a] sm:$0xff]  ;;  %12226 = vmatpush3.bf16.msra.mxu1 %v13484_v48 }
 0x2e6   : > { %v7315_v18 = vld [vmem:[#allocation2 + $0x271] ss:$2 sm:$0x3f]  ;;  %v8935_v27 = vrot.slane %v15178_v35, 1  ;;  %v7307_v28 = vld [vmem:[#allocation2 + $0x260] ss:$2 sm:$0xff]  ;;  %12227 = vmatprep.subr.bf16.mxu1 %v13900_v14 }
 0x2e7   : > { %v8270_v24 = vrot.slane %v10877_v6, 3  ;;  %v7313_v29 = vld [vmem:[#allocation2 + $0x261] ss:$2 sm:$0xff]  ;;  %v7310_v50 = vadd.f32 %v7307_v28, %v7304_v58  ;;  %v7317_v32 = vadd.f32 %v7315_v18, %v7311_v62  ;;  %v7359_v47 = vld [vmem:[#allocation2 + $0x2e0] ss:$2 sm:$0xff] }
 0x2e8   : > { %v7464_v30 = vld [vmem:[#allocation3 + $0x69] sm:$0xff]  ;;  %v7490_v0 = vld [vmem:[#allocation3 + $0x72] sm:$0xff]  ;;  %v8936_v37 = vsel %vm346_vm0, %v8933_v5, %v8935_v27  ;;  %v7362_v51 = vadd.f32 %v7359_v47, %v7356_v42 }
 0x2e9   : > { %v7539_v31 = vld [vmem:[#allocation3 + $0x6c] sm:$0xff]  ;;  %v8271_v36 = vsel %vm8262_vm11, %v8268_v49, %v8270_v24  ;;  %v7540_v40 = vld [vmem:[#allocation3 + $0x74] sm:$0xff]  ;;  %v13139_v43 = vpack.i.bf16 %v7490_v0, %v7489_v16  ;;  %v7316_v45 = vadd.f32 %v7313_v29, %v7310_v50  ;;  %v7319_v5 = vmul.f32 0.25, %v7317_v32 }
 0x2ea   : > { %v7465_v34 = vld [vmem:[#allocation3 + $0x71] sm:$0xff]  ;;  %12200 = vmatmul.mubr.msk.bf16.gmra.mrb[60].mxu1 %vm8297_vm12, %v8271_v36  ;;  %v13149_v4 = vpack.i.bf16 %v7540_v40, %v7539_v31  ;;  %v7365_v13 = vld [vmem:[#allocation2 + $0x2e1] ss:$2 sm:$0xff] }
 0x2eb   : > { %v13134_v44 = vpack.i.bf16 %v7465_v34, %v7464_v30  ;;  %v7514_v22 = vld [vmem:[#allocation3 + $0x6b] sm:$0xff]  ;;  %v7515_v39 = vld [vmem:[#allocation3 + $0x73] sm:$0xff]  ;;  %12318 = vmatmul.mubr.msk.bf16.gmra.mrb[68].mxu0 %vm8297_vm12, %v8936_v37  ;;  %12203 = vmatprep.mubr.msk.bf16.mxu1 %vm13901_vm6, %v13900_v14  ;;  %v7318_v55 = vmul.f32 0.25, %v7316_v45  ;;  %7321 = vst.msk [vmem:[#allocation3 + $0x86] sm:$0x3f] %vm7086_vm4, %v7319_v5  ;;  %v7368_v9 = vadd.f32 %v7365_v13, %v7362_v51 }
 0x2ec   : > { %v15191_v38 = vld [vmem:[#allocation4 + $0x2c] sm:$0xf]  ;;  %v15193_v49 = vld [vmem:[#allocation4 + $0x30] sm:$0xf]  ;;  %13140 = vrot.lane.b32.xlu1 %v13139_v43, %s13896_s19  ;;  %v13144_v57 = vpack.i.bf16 %v7515_v39, %v7514_v22  ;;  %12321 = vmatprep.mubr.msk.bf16.mxu0 %vm13901_vm6, %v13900_v14  ;;  %v7494_v50 = vld [vmem:[#allocation3 + $0x92] sm:$0xff] }
 0x2ed   : > { %13135 = vrot.lane.b32.xlu0 %v13134_v44, %s13897_s20  ;;  %v10878_v53 = vcombine.low %v15191_v38, %v15193_v49  ;;  %v15199_v54 = vld [vmem:[#allocation4 + $0x2c] sm:$0xff]   ;;  %v10900_v17 = vcombine.low %v15174_v2, %v15191_v38  ;;  %v7361_v59 = vld [vmem:[#allocation2 + $0x2f0] ss:$2 sm:$0x3f]  ;;  %7320 = vst.msk [vmem:[#allocation3 + $0x7e] sm:$0xff] %vm1219_vm3, %v7318_v55  ;;  %v7370_v7 = vmul.f32 0.25, %v7368_v9 }
 0x2ee   : > { %v8937_v63 = vrot.slane %v15199_v54, 1  ;;  %v7363_v10 = vadd.f32 %v7361_v59, %v7357_v52  ;;  %v7367_v3 = vld [vmem:[#allocation2 + $0x2f1] ss:$2 sm:$0x3f]  ;;  %v13488_v22 = vld [vmem:[%s16033_s2 + $0x10] ss:$0 sps:$4 sm:$0xff]  }
 0x2ef   : > { %v15205_v60 = vrot.slane %v10878_v53, 3  ;;  %7372 = vst.msk [vmem:[#allocation3 + $0x9a] sm:$0xff] %vm1219_vm3, %v7370_v7  ;;  %v7469_v0 = vld [vmem:[#allocation3 + $0x91] sm:$0xff]  ;;  %v8490_v39 = vsel %vm8325_vm5, %v13488_v22, 0  ;;  %v7476_v53 = vld [vmem:[#allocation3 + $0x2] sm:$0xff] }
 0x2f0   : > { %13150 = vrot.lane.b32.xlu1 %v13149_v4, %s13899_s10  ;;  %v8938_v46 = vsel %vm346_vm0, %v8935_v27, %v8937_v63  ;;  %v7369_v6 = vadd.f32 %v7367_v3, %v7363_v10  ;;  %v7543_v42 = vld [vmem:[#allocation3 + $0x8c] sm:$0xff]  ;;  %12228 = vmatpush3.bf16.msra.mxu1 %v8490_v39  ;;  %v7451_v55 = vld [vmem:[#allocation3 + $0x1] sm:$0xff] }
 0x2f1   : > { %13145 = vrot.lane.b32.xlu0 %v13144_v57, %s13898_s9  ;;  %v8273_v33 = vsel %vm8262_vm11, %v8270_v24, %v15205_v60  ;;  %12265 = vmatprep.subr.bf16.mxu1 %v13900_v14  ;;  %v7526_v5 = vld [vmem:[#allocation3 + $0x4] sm:$0xff] }
 0x2f2   : > { %12204 = vmatmul.mubr.msk.bf16.gmra.mrb[64].mxu1 %vm8297_vm12, %v8273_v33  ;;  %v7371_v35 = vmul.f32 0.25, %v7369_v6  ;;  %v7493_v30 = vld [vmem:[#allocation3 + $0x8a] sm:$0xff] }
 0x2f3   : > { %12322 = vmatmul.mubr.msk.bf16.gmra.mrb[72].mxu0 %vm8297_vm12, %v8938_v46  ;;  %12207 = vmatprep.mubr.msk.bf16.mxu1 %vm13901_vm6, %v13900_v14  ;;  %v7468_v31 = vld [vmem:[#allocation3 + $0x89] sm:$0xff]  ;;  %v13179_v32 = vpack.i.bf16 %v7494_v50, %v7493_v30 }
 0x2f4   : > { %7373 = vst.msk [vmem:[#allocation3 + $0xa2] sm:$0x3f] %vm7086_vm4, %v7371_v35  ;;  %12325 = vmatprep.mubr.msk.bf16.mxu0 %vm13901_vm6, %v13900_v14  ;;  %v7491_v11 = vld [vmem:[#allocation3 + $0x7a] sm:$0xff]  ;;  %v7492_v58 = vld [vmem:[#allocation3 + $0x82] sm:$0xff]  ;;  %v13169_v34 = vpack.i.bf16 %v7469_v0, %v7468_v31  ;;  %v7518_v37 = vld [vmem:[#allocation3 + $0x8b] sm:$0xff] }
 0x2f5   : > { %v7466_v62 = vld [vmem:[#allocation3 + $0x79] sm:$0xff]  ;;  %v13159_v18 = vpack.i.bf16 %v7492_v58, %v7491_v11  ;;  %v7467_v19 = vld [vmem:[#allocation3 + $0x81] sm:$0xff] }
 0x2f6   : > { %v13154_v20 = vpack.i.bf16 %v7467_v19, %v7466_v62  ;;  %v7541_v21 = vld [vmem:[#allocation3 + $0x7c] sm:$0xff]  ;;  %v7542_v24 = vld [vmem:[#allocation3 + $0x84] sm:$0xff]  ;;  %v7544_v36 = vld [vmem:[#allocation3 + $0x94] sm:$0xff] }
 0x2f7   : > { %13160 = vrot.lane.b32.xlu1 %v13159_v18, %s13896_s19  ;;  %v7516_v27 = vld [vmem:[#allocation3 + $0x7b] sm:$0xff]  ;;  %v7517_v28 = vld [vmem:[#allocation3 + $0x83] sm:$0xff]  ;;  %v13174_v29 = vpack.i.bf16 %v7542_v24, %v7541_v21  ;;  %v7519_v40 = vld [vmem:[#allocation3 + $0x93] sm:$0xff]  ;;  %v13189_v43 = vpack.i.bf16 %v7544_v36, %v7543_v42 }
 0x2f8   : > { %13155 = vrot.lane.b32.xlu0 %v13154_v20, %s13897_s20  ;;  %v13164_v16 = vpack.i.bf16 %v7517_v28, %v7516_v27  ;;  %v13184_v44 = vpack.i.bf16 %v7519_v40, %v7518_v37  ;;  %v7495_v45 = vld [vmem:[#allocation3 + $0x9a] sm:$0xff]  ;;  %v7501_v4 = vld [vmem:[#allocation3 + $0x3] sm:$0xff]  ;;  %v7440_v36 = vld [vmem:[#allocation3 + $0x70] sm:$0xff] }
 0x2f9   : > { %v7470_v47 = vld [vmem:[#allocation3 + $0x99] sm:$0xff]  ;;  %v13498_v38 = vld [vmem:[#allocation4 + $0x14] sm:$0xff]  }
 0x2fb   : > { %13175 = vrot.lane.b32.xlu1 %v13174_v29, %s13899_s10  ;;  %v7545_v51 = vld [vmem:[#allocation3 + $0x9c] sm:$0xff] }
 0x2fc   : > { %13165 = vrot.lane.b32.xlu0 %v13164_v16, %s13898_s9  ;;  %v7520_v52 = vld [vmem:[#allocation3 + $0x9b] sm:$0xff] }
 0x2ff   : > { %13180 = vrot.lane.b32.xlu1 %v13179_v32, %s13896_s19 }
 0x300   : > { %13170 = vrot.lane.b32.xlu0 %v13169_v34, %s13897_s20  ;;  %v7439_v34 = vld [vmem:[#allocation3 + $0x68] sm:$0xff] }
 0x303   : > { %13190 = vrot.lane.b32.xlu1 %v13189_v43, %s13899_s10 }
 0x304   : > { %13185 = vrot.lane.b32.xlu0 %v13184_v44, %s13898_s9 }
 0x307   : > { %7714 = vrot.lane.b32.xlu1 %v7495_v45, %s13896_s19 }
 0x308   : > { %7614 = vrot.lane.b32.xlu0 %v7470_v47, %s13897_s20 }
 0x30b   : > { %7914 = vrot.lane.b32.xlu1 %v7545_v51, %s13899_s10 }
 0x30c   : > { %7814 = vrot.lane.b32.xlu0 %v7520_v52, %s13898_s9 }
 0x30f   : > { %7676 = vrot.lane.b32.xlu1 %v7476_v53, %s13896_s19 }
 0x310   : > { %7576 = vrot.lane.b32.xlu0 %v7451_v55, %s13897_s20 }
 0x313   : > { %7876 = vrot.lane.b32.xlu1 %v7526_v5, %s13899_s10 }
 0x314   : > { %7776 = vrot.lane.b32.xlu0 %v7501_v4, %s13898_s9 }
 0x319   : > { %v15250_v57 = vpop.f32.mrb[48].mxu1 }
 0x31a   : > { %v12189_v13 = vpop.f32.mrb[49].mxu1 }
 0x31b   : > { %v15252_v59 = vpop.f32.mrb[50].mxu1 }
 0x31c   : > { %v12190_v9 = vpop.f32.mrb[51].mxu1 }
 0x34e   : > { %v12167_v10 = vpop.f32.mrb[48].mxu0 }
 0x34f   : > { %v7016_v3 = vadd.f32 %v15078_v41, %v12167_v10  ;;  %v6935_v33 = vpop.f32.mrb[49].mxu0 }
 0x350   : > { %v7014_v46 = vadd.f32 %v15078_v41, %v6935_v33  ;;  %v12168_v7 = vpop.f32.mrb[50].mxu0 }
 0x351   : > { %13755 = vtanh.f32 %v7016_v3  ;;  %v7017_v6 = vadd.f32 %v15078_v41, %v12168_v7  ;;  %v6938_v35 = vpop.f32.mrb[51].mxu0 }
 0x352   : > { %13757 = vtanh.f32 %v7014_v46  ;;  %v7015_v48 = vadd.f32 %v15078_v41, %v6938_v35 }
 0x353   : > { %13759 = vtanh.f32 %v7017_v6 }
 0x354   : > { %13761 = vtanh.f32 %v7015_v48 }
 0x356   : > { %v12171_v11 = vpop.f32.mrb[52].mxu0 }
 0x357   : > { %v7020_v58 = vadd.f32 %v15078_v41, %v12171_v11  ;;  %v6951_v62 = vpop.f32.mrb[53].mxu0 }
 0x358   : > { %v7018_v18 = vadd.f32 %v15078_v41, %v6951_v62  ;;  %v12172_v19 = vpop.f32.mrb[54].mxu0 }
 0x359   : > { %13763 = vtanh.f32 %v7020_v58  ;;  %v7021_v20 = vadd.f32 %v15078_v41, %v12172_v19  ;;  %v6954_v21 = vpop.f32.mrb[55].mxu0 }
 0x35a   : > { %13765 = vtanh.f32 %v7018_v18  ;;  %v7019_v24 = vadd.f32 %v15078_v41, %v6954_v21 }
 0x35b   : > { %v13756_v27 = vpop.eup %13755  ;;  %13767 = vtanh.f32 %v7021_v20 }
 0x35c   : > { %v13758_v16 = vpop.eup %13757  ;;  %7048 = vst.msk [vmem:[#allocation2 + $0x310] sm:$0xff] %vm1219_vm3, %v13756_v27  ;;  %13769 = vtanh.f32 %v7019_v24 }
 0x35d   : > { %v13760_v50 = vpop.eup %13759  ;;  %7046 = vst.msk [vmem:[#allocation2 + $0x300] sm:$0xff] %vm1219_vm3, %v13758_v16  ;;  %v7441_v16 = vld [vmem:[#allocation3 + $0x78] sm:$0xff] }
 0x35e   : > { %v13141_v28 = vpop.permute.xlu1 %13140  ;;  %v13762_v37 = vpop.eup %13761  ;;  %7049 = vst.msk [vmem:[#allocation2 + $0x318] sm:$0xff] %vm1219_vm3, %v13760_v50 }
 0x35f   : > { %v13136_v29 = vpop.permute.xlu0 %13135  ;;  %v13143_v32 = vunpack.i.h.bf16 %v13141_v28  ;;  %v13142_v0 = vunpack.i.l.bf16 %v13141_v28  ;;  %v12175_v43 = vpop.f32.mrb[56].mxu0  ;;  %7047 = vst.msk [vmem:[#allocation2 + $0x308] sm:$0xff] %vm1219_vm3, %v13762_v37 }
 0x360   : > { %v13138_v30 = vunpack.i.h.bf16 %v13136_v29  ;;  %v13137_v31 = vunpack.i.l.bf16 %v13136_v29  ;;  %v7024_v39 = vadd.f32 %v15078_v41, %v12175_v43  ;;  %v6967_v53 = vpop.f32.mrb[57].mxu0 }
 0x361   : > { %v7022_v4 = vadd.f32 %v15078_v41, %v6967_v53  ;;  %v12176_v13 = vpop.f32.mrb[58].mxu0 }
 0x362   : > { %v7965_v40 = vsel %vm1219_vm3, %v7440_v36, %v13138_v30  ;;  %v7964_v42 = vsel %vm1219_vm3, %v7439_v34, %v13137_v31  ;;  %v13151_v44 = vpop.permute.xlu1 %13150  ;;  %13771 = vtanh.f32 %v7024_v39  ;;  %v7025_v3 = vadd.f32 %v15078_v41, %v12176_v13  ;;  %v6970_v33 = vpop.f32.mrb[59].mxu0  ;;  %v7442_v30 = vld [vmem:[#allocation3 + $0x80] sm:$0xff] }
 0x363   : > { %v13146_v22 = vpop.permute.xlu0 %13145  ;;  %v13153_v45 = vunpack.i.h.bf16 %v13151_v44  ;;  %v13152_v47 = vunpack.i.l.bf16 %v13151_v44  ;;  %v7990_v55 = vsel %vm7976_vm7, %v7964_v42, %v13142_v0  ;;  %v7991_v5 = vsel %vm7976_vm7, %v7965_v40, %v13143_v32  ;;  %v13764_v46 = vpop.eup %13763 }
 0x364   : > { %v13148_v51 = vunpack.i.h.bf16 %v13146_v22  ;;  %v13147_v52 = vunpack.i.l.bf16 %v13146_v22  ;;  %13773 = vtanh.f32 %v7022_v4  ;;  %v7023_v35 = vadd.f32 %v15078_v41, %v6970_v33  ;;  %v13766_v48 = vpop.eup %13765  ;;  %7052 = vst.msk [vmem:[#allocation2 + $0x330] sm:$0xff] %vm1219_vm3, %v13764_v46 }
 0x365   : > { %13775 = vtanh.f32 %v7025_v3  ;;  %v13768_v62 = vpop.eup %13767  ;;  %7050 = vst.msk [vmem:[#allocation2 + $0x320] sm:$0xff] %vm1219_vm3, %v13766_v48  ;;  %v7377_v40 = vld [vmem:[#allocation2 + $0x310] ss:$2 sm:$0x3f] }
 0x366   : > { %v8016_v9 = vsel %vm8002_vm8, %v7990_v55, %v13147_v52  ;;  %v8017_v10 = vsel %vm8002_vm8, %v7991_v5, %v13148_v51  ;;  %13777 = vtanh.f32 %v7023_v35  ;;  %7053 = vst.msk [vmem:[#allocation2 + $0x338] sm:$0xff] %vm1219_vm3, %v13768_v62  ;;  %v12179_v18 = vpop.f32.mrb[60].mxu0  ;;  %v13770_v19 = vpop.eup %13769  ;;  %v7381_v42 = vld [vmem:[#allocation2 + $0x311] ss:$2 sm:$0x3f] }
 0x367   : > { %v8042_v7 = vsel %vm8028_vm9, %v8016_v9, %v13152_v47  ;;  %v8043_v6 = vsel %vm8028_vm9, %v8017_v10, %v13153_v45  ;;  %v7028_v21 = vadd.f32 %v15078_v41, %v12179_v18  ;;  %v6983_v24 = vpop.f32.mrb[61].mxu0  ;;  %7051 = vst.msk [vmem:[#allocation2 + $0x328] sm:$0xff] %vm1219_vm3, %v13770_v19  ;;  %v7375_v52 = vld [vmem:[#allocation2 + $0x300] ss:$2 sm:$0xff]  ;;  %v7379_v53 = vld [vmem:[#allocation2 + $0x301] ss:$2 sm:$0xff]  ;;  %v7383_v9 = vadd.f32 %v7381_v42, %v7377_v40 }
 0x368   : > { %v11116_v11 = vpack.c.bf16 %v8042_v7, %v8042_v7  ;;  %v11117_v58 = vpack.c.bf16 %v8043_v6, %v8043_v6  ;;  %v7026_v28 = vadd.f32 %v15078_v41, %v6983_v24  ;;  %v12180_v29 = vpop.f32.mrb[62].mxu0  ;;  %v7382_v62 = vadd.f32 %v7379_v53, %v7375_v52 }
 0x369   : > { %v13161_v20 = vpop.permute.xlu1 %13160  ;;  %13779 = vtanh.f32 %v7028_v21  ;;  %v7029_v32 = vadd.f32 %v15078_v41, %v12180_v29  ;;  %v6986_v0 = vpop.f32.mrb[63].mxu0 }
 0x36a   : > { %8169 = vst.msk [vmem:[#allocation4 + $0x34] sm:$0xf] %vm8155_vm10, %v11116_v11  ;;  %8170 = vst.msk [vmem:[#allocation4 + $0x38] sm:$0xf] %vm8155_vm10, %v11117_v58  ;;  %v13156_v27 = vpop.permute.xlu0 %13155  ;;  %v13163_v34 = vunpack.i.h.bf16 %v13161_v20  ;;  %v13162_v36 = vunpack.i.l.bf16 %v13161_v20  ;;  %13781 = vtanh.f32 %v7026_v28  ;;  %v7027_v37 = vadd.f32 %v15078_v41, %v6986_v0  ;;  %v7444_v0 = vld [vmem:[#allocation3 + $0x90] sm:$0xff] }
 0x36b   : > { %v13158_v31 = vunpack.i.h.bf16 %v13156_v27  ;;  %v13157_v50 = vunpack.i.l.bf16 %v13156_v27  ;;  %13783 = vtanh.f32 %v7029_v32  ;;  %v7443_v32 = vld [vmem:[#allocation3 + $0x88] sm:$0xff] }
 0x36c   : > { %v13772_v43 = vpop.eup %13771  ;;  %13785 = vtanh.f32 %v7027_v37 }
 0x36d   : > { %v7967_v44 = vsel %vm1219_vm3, %v7442_v30, %v13158_v31  ;;  %v7966_v22 = vsel %vm1219_vm3, %v7441_v16, %v13157_v50  ;;  %v13176_v39 = vpop.permute.xlu1 %13175  ;;  %7056 = vst.msk [vmem:[#allocation2 + $0x350] sm:$0xff] %vm1219_vm3, %v13772_v43  ;;  %v7387_v6 = vld [vmem:[#allocation2 + $0x330] ss:$2 sm:$0x3f] }
 0x36e   : > { %v13178_v45 = vunpack.i.h.bf16 %v13176_v39  ;;  %v13177_v47 = vunpack.i.l.bf16 %v13176_v39  ;;  %v13166_v51 = vpop.permute.xlu0 %13165  ;;  %v13774_v55 = vpop.eup %13773  ;;  %v7992_v3 = vsel %vm7976_vm7, %v7966_v22, %v13162_v36  ;;  %v7993_v33 = vsel %vm7976_vm7, %v7967_v44, %v13163_v34  ;;  %v7385_v18 = vld [vmem:[#allocation2 + $0x320] ss:$2 sm:$0xff]  ;;  %v7393_v29 = vld [vmem:[#allocation2 + $0x331] ss:$2 sm:$0x3f] }
 0x36f   : > { %v13168_v5 = vunpack.i.h.bf16 %v13166_v51  ;;  %v13167_v4 = vunpack.i.l.bf16 %v13166_v51  ;;  %v13776_v10 = vpop.eup %13775  ;;  %7054 = vst.msk [vmem:[#allocation2 + $0x340] sm:$0xff] %vm1219_vm3, %v13774_v55  ;;  %v7389_v19 = vadd.f32 %v7387_v6, %v7383_v9  ;;  %v7388_v37 = vadd.f32 %v7385_v18, %v7382_v62  ;;  %v7391_v9 = vld [vmem:[#allocation2 + $0x321] ss:$2 sm:$0xff] }
 0x370   : > { %v13778_v35 = vpop.eup %13777  ;;  %7057 = vst.msk [vmem:[#allocation2 + $0x358] sm:$0xff] %vm1219_vm3, %v13776_v10 }
 0x371   : > { %v15291_v41 = vld [vmem:[#allocation4 + $0x34] sm:$0xf]  ;;  %v15293_v13 = vld [vmem:[#allocation4 + $0x38] sm:$0xf]  ;;  %v8018_v48 = vsel %vm8002_vm8, %v7992_v3, %v13167_v4  ;;  %v8019_v11 = vsel %vm8002_vm8, %v7993_v33, %v13168_v5  ;;  %v13181_v58 = vpop.permute.xlu1 %13180  ;;  %7055 = vst.msk [vmem:[#allocation2 + $0x348] sm:$0xff] %vm1219_vm3, %v13778_v35  ;;  %v7395_v40 = vadd.f32 %v7393_v29, %v7389_v19 }
 0x372   : > { %v10879_v46 = vcombine.low %v15291_v41, %v15293_v13  ;;  %v15300_v7 = vld [vmem:[#allocation4 + $0x34] sm:$0xff]   ;;  %v8044_v20 = vsel %vm8028_vm9, %v8018_v48, %v13177_v47  ;;  %v8045_v21 = vsel %vm8028_vm9, %v8019_v11, %v13178_v45  ;;  %v13183_v24 = vunpack.i.h.bf16 %v13181_v58  ;;  %v13171_v28 = vpop.permute.xlu0 %13170  ;;  %v7445_v11 = vld [vmem:[#allocation3 + $0x98] sm:$0xff] }
 0x373   : > { %v13182_v27 = vunpack.i.l.bf16 %v13181_v58  ;;  %v11118_v16 = vpack.c.bf16 %v8044_v20, %v8044_v20  ;;  %v11119_v30 = vpack.c.bf16 %v8045_v21, %v8045_v21  ;;  %v13173_v31 = vunpack.i.h.bf16 %v13171_v28  ;;  %v13780_v42 = vpop.eup %13779 }
 0x374   : > { %v13172_v50 = vunpack.i.l.bf16 %v13171_v28  ;;  %v15308_v34 = vrot.slane %v10879_v46, 3  ;;  %v8939_v36 = vrot.slane %v15300_v7, 1  ;;  %v13782_v39 = vpop.eup %13781  ;;  %7060 = vst.msk [vmem:[#allocation2 + $0x370] sm:$0xff] %vm1219_vm3, %v13780_v42  ;;  %v7397_v10 = vmul.f32 0.25, %v7395_v40 }
 0x375   : > { %8171 = vst.msk [vmem:[#allocation4 + $0x3c] sm:$0xf] %vm8155_vm10, %v11118_v16  ;;  %8172 = vst.msk [vmem:[#allocation4 + $0x40] sm:$0xf] %vm8155_vm10, %v11119_v30  ;;  %v7969_v43 = vsel %vm1219_vm3, %v7444_v0, %v13173_v31  ;;  %v13191_v22 = vpop.permute.xlu1 %13190  ;;  %v13784_v55 = vpop.eup %13783  ;;  %v10901_v2 = vcombine.low %v15193_v49, %v15291_v41  ;;  %v13497_v49 = vld [vmem:[#allocation4 + $0xc] sm:$0xfc]  }
 0x376   : > { %v7968_v44 = vsel %vm1219_vm3, %v7443_v32, %v13172_v50  ;;  %v8275_v45 = vsel %vm8262_vm11, %v15205_v60, %v15308_v34  ;;  %v8940_v47 = vsel %vm346_vm0, %v8937_v63, %v8939_v36  ;;  %v13193_v51 = vunpack.i.h.bf16 %v13191_v22  ;;  %v13186_v53 = vpop.permute.xlu0 %13185  ;;  %7058 = vst.msk [vmem:[#allocation2 + $0x360] sm:$0xff] %vm1219_vm3, %v13782_v39  ;;  %7061 = vst.msk [vmem:[#allocation2 + $0x378] sm:$0xff] %vm1219_vm3, %v13784_v55  ;;  %v13786_v3 = vpop.eup %13785 }
 0x377   : > { %v13192_v52 = vunpack.i.l.bf16 %v13191_v22  ;;  %12208 = vmatmul.mubr.msk.bf16.gmra.mrb[68].mxu1 %vm8297_vm12, %v8275_v45  ;;  %12326 = vmatmul.mubr.msk.bf16.gmra.mrb[76].mxu0 %vm8297_vm12, %v8940_v47  ;;  %v13188_v5 = vunpack.i.h.bf16 %v13186_v53  ;;  %v13187_v4 = vunpack.i.l.bf16 %v13186_v53  ;;  %v7994_v60 = vsel %vm7976_vm7, %v7968_v44, %v13182_v27  ;;  %7059 = vst.msk [vmem:[#allocation2 + $0x368] sm:$0xff] %vm1219_vm3, %v13786_v3  ;;  %v7403_v18 = vld [vmem:[#allocation2 + $0x350] ss:$2 sm:$0x3f] }
 0x378   : > { %v7995_v54 = vsel %vm7976_vm7, %v7969_v43, %v13183_v24  ;;  %12211 = vmatprep.mubr.msk.bf16.mxu1 %vm13901_vm6, %v13900_v14  ;;  %12329 = vmatprep.mubr.msk.bf16.mxu0 %vm13901_vm6, %v13900_v14  ;;  %v7394_v63 = vadd.f32 %v7391_v9, %v7388_v37  ;;  %7399 = vst.msk [vmem:[#allocation3 + $0xb0] sm:$0x3f] %vm7086_vm4, %v7397_v10  ;;  %v7401_v24 = vld [vmem:[#allocation2 + $0x340] ss:$2 sm:$0xff]  ;;  %v7405_v27 = vld [vmem:[#allocation2 + $0x341] ss:$2 sm:$0xff] }
 0x379   : > { %v8020_v33 = vsel %vm8002_vm8, %v7994_v60, %v13187_v4  ;;  %v8021_v46 = vsel %vm8002_vm8, %v7995_v54, %v13188_v5  ;;  %v7715_v6 = vpop.permute.xlu1 %7714  ;;  %v7407_v28 = vld [vmem:[#allocation2 + $0x351] ss:$2 sm:$0x3f]  ;;  %v7408_v45 = vadd.f32 %v7405_v27, %v7401_v24  ;;  %v7426_v9 = vld [vmem:[#allocation3] sm:$0xff]  ;;  %v8671_v41 = vrot.slane %v13497_v49, 2 }
 0x37a   : > { %v8046_v35 = vsel %vm8028_vm9, %v8020_v33, %v13192_v52  ;;  %v8047_v48 = vsel %vm8028_vm9, %v8021_v46, %v13193_v51  ;;  %v7615_v58 = vpop.permute.xlu0 %7614  ;;  %v7396_v62 = vmul.f32 0.25, %v7394_v63  ;;  %v7409_v40 = vadd.f32 %v7407_v28, %v7403_v18 }
 0x37b   : > { %v11120_v19 = vpack.c.bf16 %v8046_v35, %v8046_v35  ;;  %v11121_v20 = vpack.c.bf16 %v8047_v48, %v8047_v48  ;;  %v7970_v21 = vsel %vm1219_vm3, %v7445_v11, %v7615_v58 }
 0x37c   : > { %v15341_v29 = vld [vmem:[#allocation4 + $0x3c] sm:$0xf]  ;;  %v15343_v16 = vld [vmem:[#allocation4 + $0x40] sm:$0xf]  ;;  %7398 = vst.msk [vmem:[#allocation3 + $0xa8] sm:$0xff] %vm1219_vm3, %v7396_v62  ;;  %v7996_v0 = vsel %vm7976_vm7, %v7970_v21, %v7715_v6 }
 0x37d   : > { %8173 = vst.msk [vmem:[#allocation4 + $0x44] sm:$0xf] %vm8155_vm10, %v11120_v19  ;;  %8174 = vst.msk [vmem:[#allocation4 + $0x48] sm:$0xf] %vm8155_vm10, %v11121_v20  ;;  %v7915_v30 = vpop.permute.xlu1 %7914  ;;  %v10880_v31 = vcombine.low %v15341_v29, %v15343_v16  ;;  %v13489_v50 = vld [vmem:[#allocation4 + $0x3c] sm:$0xff]   ;;  %v10902_v32 = vcombine.low %v15293_v13, %v15341_v29 }
 0x37e   : > { %v7815_v37 = vpop.permute.xlu0 %7814  ;;  %v8941_v44 = vrot.slane %v13489_v50, 1  ;;  %v7413_v22 = vld [vmem:[#allocation2 + $0x370] ss:$2 sm:$0x3f]  ;;  %v7411_v5 = vld [vmem:[#allocation2 + $0x360] ss:$2 sm:$0xff] }
 0x37f   : > { %v8022_v42 = vsel %vm8002_vm8, %v7996_v0, %v7815_v37  ;;  %v8276_v43 = vrot.slane %v10880_v31, 3  ;;  %v7415_v47 = vadd.f32 %v7413_v22, %v7409_v40  ;;  %v7419_v4 = vld [vmem:[#allocation2 + $0x371] ss:$2 sm:$0x3f]  ;;  %v7414_v54 = vadd.f32 %v7411_v5, %v7408_v45  ;;  %v7417_v7 = vld [vmem:[#allocation2 + $0x361] ss:$2 sm:$0xff] }
 0x380   : > { %v8048_v39 = vsel %vm8028_vm9, %v8022_v42, %v7915_v30  ;;  %v8942_v55 = vsel %vm346_vm0, %v8939_v36, %v8941_v44  ;;  %v13499_v13 = vld [vmem:[%s16033_s2 + $0x50] sm:$0xff]  }
 0x381   : > { %v11122_v51 = vpack.c.bf16 %v8048_v39, %v8048_v39  ;;  %v7677_v52 = vpop.permute.xlu1 %7676  ;;  %v8277_v53 = vsel %vm8262_vm11, %v15308_v34, %v8276_v43  ;;  %12330 = vmatmul.mubr.msk.bf16.gmra.mrb[80].mxu0 %vm8297_vm12, %v8942_v55  ;;  %v7421_v63 = vadd.f32 %v7419_v4, %v7415_v47  ;;  %v7420_v46 = vadd.f32 %v7417_v7, %v7414_v54  ;;  %v7550_v7 = vld [vmem:[#allocation3 + $0xc4] sm:$0xff] }
 0x382   : > { %v7577_v60 = vpop.permute.xlu0 %7576  ;;  %12212 = vmatmul.mubr.msk.bf16.gmra.mrb[72].mxu1 %vm8297_vm12, %v8277_v53  ;;  %12333 = vmatprep.mubr.msk.bf16.mxu0 %vm13901_vm6, %v13900_v14  ;;  %v13494_v53 = vld [vmem:[%s16033_s2 + $0x28] sm:$0xff]  }
 0x383   : > { %8175 = vst.msk [vmem:[#allocation4 + $0x4c] sm:$0xf] %vm8155_vm10, %v11122_v51  ;;  %v7951_v10 = vsel %vm1219_vm3, %v7426_v9, %v7577_v60  ;;  %v7496_v3 = vld [vmem:[#allocation3 + $0xa2] sm:$0xff]  ;;  %12215 = vmatprep.mubr.msk.bf16.mxu1 %vm13901_vm6, %v13900_v14  ;;  %v7423_v6 = vmul.f32 0.25, %v7421_v63  ;;  %v7422_v19 = vmul.f32 0.25, %v7420_v46  ;;  %v7497_v37 = vld [vmem:[#allocation3 + $0xaa] sm:$0xff] }
 0x384   : > { %v7471_v34 = vld [vmem:[#allocation3 + $0xa1] sm:$0xff]  ;;  %7716 = vrot.lane.b32.xlu1 %v7496_v3, %s13896_s19  ;;  %v15370_v36 = vld [vmem:[#allocation4 + $0x44] sm:$0xf]  ;;  %v8206_v33 = vld [vmem:[#allocation4 + $0x48] sm:$0xf]  ;;  %v7977_v62 = vsel %vm7976_vm7, %v7951_v10, %v7677_v52 }
 0x385   : > { %7616 = vrot.lane.b32.xlu0 %v7471_v34, %s13897_s20  ;;  %v7877_v35 = vpop.permute.xlu1 %7876  ;;  %v10881_v48 = vcombine.low %v15370_v36, %v8206_v33  ;;  %v15373_v11 = vld [vmem:[#allocation4 + $0x44] sm:$0xff]   ;;  %v10903_v58 = vcombine.low %v15343_v16, %v15370_v36  ;;  %7425 = vst.msk [vmem:[#allocation3 + $0xbe] sm:$0x3f] %vm7086_vm4, %v7423_v6  ;;  %v7546_v21 = vld [vmem:[#allocation3 + $0xa4] sm:$0xff]  ;;  %v13829_v46 = vld [vmem:[#allocation4 + $0x10] sm:$0xf] }
 0x386   : > { %v7777_v18 = vpop.permute.xlu0 %7776  ;;  %v7521_v24 = vld [vmem:[#allocation3 + $0xa3] sm:$0xff]  ;;  %v8943_v28 = vrot.slane %v15373_v11, 1  ;;  %7424 = vst.msk [vmem:[#allocation3 + $0xb6] sm:$0xff] %vm1219_vm3, %v7422_v19  ;;  %v7522_v22 = vld [vmem:[#allocation3 + $0xab] sm:$0xff]  ;;  %v13496_v60 = vld [vmem:[%s16033_s2 + $0x38] ss:$0 sps:$4 sm:$0xff]   ;;  %v10897_v8 = vcombine.low %v13829_v46, %v13830_v56 }
 0x387   : > { %v8003_v20 = vsel %vm8002_vm8, %v7977_v62, %v7777_v18  ;;  %v8278_v27 = vrot.slane %v10881_v48, 3  ;;  %v7472_v40 = vld [vmem:[#allocation3 + $0xa9] sm:$0xff]  ;;  %v8733_v10 = vsel %vm8325_vm5, %v13496_v60, 0  ;;  %v13503_v16 = vld [vmem:[%s16033_s2 + $0x58] sm:$0xff]   ;;  %v13508_v36 = vld [vmem:[%s16033_s2 + $0x60] ss:$0 sps:$4 sm:$0xff]  }
 0x388   : > { %v8029_v30 = vsel %vm8028_vm9, %v8003_v20, %v7877_v35  ;;  %7916 = vrot.lane.b32.xlu1 %v7546_v21, %s13899_s10  ;;  %v8944_v0 = vsel %vm346_vm0, %v8941_v44, %v8943_v28  ;;  %v7547_v44 = vld [vmem:[#allocation3 + $0xac] sm:$0xff] }
 0x389   : > { %7816 = vrot.lane.b32.xlu0 %v7521_v24, %s13898_s9  ;;  %v11103_v31 = vpack.c.bf16 %v8029_v30, %v8029_v30  ;;  %v8279_v50 = vsel %vm8262_vm11, %v8276_v43, %v8278_v27  ;;  %12334 = vmatmul.mubr.msk.bf16.gmra.mrb[84].mxu0 %vm8297_vm12, %v8944_v0  ;;  %v13495_v9 = vld [vmem:[%s16033_s2 + $0x30] sm:$0xff]  }
 0x38a   : > { %12216 = vmatmul.mubr.msk.bf16.gmra.mrb[76].mxu1 %vm8297_vm12, %v8279_v50  ;;  %v13492_v42 = vld [vmem:[#allocation4 + $0x4c] ss:$0 sps:$4 sm:$0x77]   ;;  %12337 = vmatprep.mubr.msk.bf16.mxu0 %vm13901_vm6, %v13900_v14 }
 0x38b   : > { %8156 = vst.msk [vmem:[#allocation4] sm:$0xf] %vm8155_vm10, %v11103_v31  ;;  %12219 = vmatprep.mubr.msk.bf16.mxu1 %vm13901_vm6, %v13900_v14  ;;  %v8280_v43 = vrot.slane %v13492_v42, 3 }
 0x38c   : > { %7718 = vrot.lane.b32.xlu1 %v7497_v37, %s13896_s19  ;;  %v7500_v3 = vld [vmem:[#allocation3 + $0xc2] sm:$0xff] }
 0x38d   : > { %7618 = vrot.lane.b32.xlu0 %v7472_v40, %s13897_s20  ;;  %v8281_v39 = vsel %vm8262_vm11, %v8278_v27, %v8280_v43  ;;  %v7498_v45 = vld [vmem:[#allocation3 + $0xb2] sm:$0xff]  ;;  %v7499_v5 = vld [vmem:[#allocation3 + $0xba] sm:$0xff]  ;;  %v7525_v33 = vld [vmem:[#allocation3 + $0xc3] sm:$0xff] }
 0x38e   : > { %v7473_v47 = vld [vmem:[#allocation3 + $0xb1] sm:$0xff]  ;;  %v7474_v4 = vld [vmem:[#allocation3 + $0xb9] sm:$0xff]  ;;  %v7475_v34 = vld [vmem:[#allocation3 + $0xc1] sm:$0xff] }
 0x38f   : > { %v7548_v51 = vld [vmem:[#allocation3 + $0xb4] sm:$0xff]  ;;  %v7549_v54 = vld [vmem:[#allocation3 + $0xbc] sm:$0xff] }
 0x390   : > { %7918 = vrot.lane.b32.xlu1 %v7547_v44, %s13899_s10  ;;  %v7523_v52 = vld [vmem:[#allocation3 + $0xb3] sm:$0xff]  ;;  %v7524_v63 = vld [vmem:[#allocation3 + $0xbb] sm:$0xff] }
 0x391   : > { %7818 = vrot.lane.b32.xlu0 %v7522_v22, %s13898_s9 }
 0x392   : > { %12220 = vmatmul.mubr.msk.bf16.gmra.mrb[80].mxu1 %vm8297_vm12, %v8281_v39  ;;  %v13493_v55 = vld [vmem:[#allocation4] sm:$0xff]  }
 0x393   : > { %12229 = vmatprep.mubr.msk.bf16.mxu1 %vm13901_vm6, %v13900_v14 }
 0x394   : > { %7720 = vrot.lane.b32.xlu1 %v7498_v45, %s13896_s19  ;;  %v9231_v45 = vsel %vm8325_vm5, %v13508_v36, 0 }
 0x395   : > { %7620 = vrot.lane.b32.xlu0 %v7473_v47, %s13897_s20 }
 0x398   : > { %7920 = vrot.lane.b32.xlu1 %v7548_v51, %s13899_s10  ;;  %v13501_v51 = vld [vmem:[#allocation4 + $0x24] sm:$0xff]  }
 0x399   : > { %7820 = vrot.lane.b32.xlu0 %v7523_v52, %s13898_s9  ;;  %v8676_v52 = vrot.slane %v13501_v51, 2 }
 0x39a   : > { %12230 = vmatmul.mubr.msk.bf16.vlgmr.msra.gmra.mrb[84].mxu1 %vm8297_vm12, %v13493_v55  ;;  %v13502_v55 = vld [vmem:[#allocation4 + $0x2c] sm:$0xff]  }
 0x39b   : > { %12266 = vmatpush3.bf16.msra.mxu1 %v13494_v53  ;;  %12233 = vmatprep.mubr.msk.bf16.mxu1 %vm13901_vm6, %v13900_v14 }
 0x39c   : > { %7722 = vrot.lane.b32.xlu1 %v7499_v5, %s13896_s19  ;;  %12267 = vmatprep.subr.bf16.mxu1 %v13900_v14  ;;  %v8678_v5 = vrot.slane %v13502_v55, 2 }
 0x39d   : > { %7622 = vrot.lane.b32.xlu0 %v7474_v4, %s13897_s20 }
 0x39f   : > { %12268 = vmatpush3.bf16.msra.mxu1 %v13495_v9  ;;  %v7446_v9 = vld [vmem:[#allocation3 + $0xa0] sm:$0xff] }
 0x3a0   : > { %7922 = vrot.lane.b32.xlu1 %v7549_v54, %s13899_s10  ;;  %12269 = vmatprep.subr.bf16.mxu1 %v13900_v14 }
 0x3a1   : > { %7822 = vrot.lane.b32.xlu0 %v7524_v63, %s13898_s9  ;;  %v8679_v63 = vsel %vm8670_vm13, %v8676_v52, %v8678_v5 }
 0x3a2   : > { %12234 = vmatmul.mubr.msk.bf16.gmra.mrb[88].mxu1 %vm8297_vm12, %v10896_v1 }
 0x3a3   : > { %12237 = vmatprep.mubr.msk.bf16.mxu1 %vm13901_vm6, %v13900_v14  ;;  %12270 = vmatpush3.bf16.msra.mxu1 %v8733_v10  ;;  %v13504_v10 = vld [vmem:[#allocation4 + $0x34] sm:$0xff]  }
 0x3a4   : > { %7724 = vrot.lane.b32.xlu1 %v7500_v3, %s13896_s19  ;;  %12349 = vmatprep.subr.bf16.mxu1 %v13900_v14 }
 0x3a5   : > { %7624 = vrot.lane.b32.xlu0 %v7475_v34, %s13897_s20 }
 0x3a7   : > { %v15438_v1 = vpop.f32.mrb[52].mxu1 }
 0x3a8   : > { %7924 = vrot.lane.b32.xlu1 %v7550_v7, %s13899_s10  ;;  %v12193_v6 = vpop.f32.mrb[53].mxu1 }
 0x3a9   : > { %7824 = vrot.lane.b32.xlu0 %v7525_v33, %s13898_s9  ;;  %v15441_v35 = vpop.f32.mrb[54].mxu1 }
 0x3aa   : > { %12238 = vmatmul.mubr.msk.bf16.gmra.mrb[92].mxu1 %vm8297_vm12, %v10897_v8  ;;  %v12194_v48 = vpop.f32.mrb[55].mxu1  ;;  %v8680_v8 = vrot.slane %v13504_v10, 2 }
 0x3ab   : > { %12241 = vmatprep.mubr.msk.bf16.mxu1 %vm13901_vm6, %v13900_v14  ;;  %v7447_v48 = vld [vmem:[#allocation3 + $0xa8] sm:$0xff] }
 0x3b2   : > { %12242 = vmatmul.mubr.msk.bf16.gmra.mrb[96].mxu1 %vm8297_vm12, %v10898_v12 }
 0x3b3   : > { %12245 = vmatprep.mubr.msk.bf16.mxu1 %vm13901_vm6, %v13900_v14 }
 0x3b5   : > { %v15451_v62 = vpop.f32.mrb[56].mxu1 }
 0x3b6   : > { %v15453_v18 = vpop.f32.mrb[64].mxu0  ;;  %v12197_v19 = vpop.f32.mrb[57].mxu1 }
 0x3b7   : > { %v12315_v20 = vpop.f32.mrb[65].mxu0  ;;  %v15455_v21 = vpop.f32.mrb[58].mxu1 }
 0x3b8   : > { %v15457_v24 = vpop.f32.mrb[66].mxu0  ;;  %v12198_v27 = vpop.f32.mrb[59].mxu1 }
 0x3b9   : > { %v12316_v30 = vpop.f32.mrb[67].mxu0  ;;  %v8681_v27 = vsel %vm8670_vm13, %v8678_v5, %v8680_v8 }
 0x3ba   : > { %12246 = vmatmul.mubr.msk.bf16.gmra.mrb[100].mxu1 %vm8297_vm12, %v10899_v15  ;;  %v13505_v30 = vld [vmem:[#allocation4 + $0x3c] sm:$0xff]  }
 0x3bb   : > { %12249 = vmatprep.mubr.msk.bf16.mxu1 %vm13901_vm6, %v13900_v14 }
 0x3bd   : > { %v15465_v23 = vpop.f32.mrb[60].mxu1 }
 0x3be   : > { %v15467_v25 = vpop.f32.mrb[68].mxu0  ;;  %v12201_v12 = vpop.f32.mrb[61].mxu1 }
 0x3bf   : > { %v12319_v31 = vpop.f32.mrb[69].mxu0  ;;  %v15469_v50 = vpop.f32.mrb[62].mxu1 }
 0x3c0   : > { %v15471_v0 = vpop.f32.mrb[70].mxu0  ;;  %v12202_v37 = vpop.f32.mrb[63].mxu1 }
 0x3c1   : > { %v12320_v40 = vpop.f32.mrb[71].mxu0 }
 0x3c2   : > { %12250 = vmatmul.mubr.msk.bf16.gmra.mrb[104].mxu1 %vm8297_vm12, %v10900_v17  ;;  %v8672_v17 = vrot.slane %v13498_v38, 2 }
 0x3c3   : > { %12253 = vmatprep.mubr.msk.bf16.mxu1 %vm13901_vm6, %v13900_v14 }
 0x3c4   : > { %v8673_v29 = vsel %vm8670_vm13, %v8671_v41, %v8672_v17 }
 0x3c5   : > { %v15479_v26 = vpop.f32.mrb[64].mxu1 }
 0x3c6   : > { %v15481_v61 = vpop.f32.mrb[72].mxu0  ;;  %v12205_v15 = vpop.f32.mrb[65].mxu1 }
 0x3c7   : > { %v12323_v42 = vpop.f32.mrb[73].mxu0  ;;  %v15483_v43 = vpop.f32.mrb[66].mxu1 }
 0x3c8   : > { %v15485_v44 = vpop.f32.mrb[74].mxu0  ;;  %v12206_v22 = vpop.f32.mrb[67].mxu1 }
 0x3c9   : > { %v12324_v39 = vpop.f32.mrb[75].mxu0  ;;  %v7448_v22 = vld [vmem:[#allocation3 + $0xb0] sm:$0xff] }
 0x3ca   : > { %12254 = vmatmul.mubr.msk.bf16.gmra.mrb[108].mxu1 %vm8297_vm12, %v10901_v2  ;;  %v8682_v39 = vrot.slane %v13505_v30, 2 }
 0x3cb   : > { %12257 = vmatprep.mubr.msk.bf16.mxu1 %vm13901_vm6, %v13900_v14 }
 0x3d2   : > { %12258 = vmatmul.mubr.msk.bf16.gmra.mrb[112].mxu1 %vm8297_vm12, %v10902_v32  ;;  %v13500_v32 = vld [vmem:[#allocation4 + $0x1c] sm:$0xff]  }
 0x3d3   : > { %12261 = vmatprep.mubr.msk.bf16.mxu1 %vm13901_vm6, %v13900_v14 }
 0x3da   : > { %12262 = vmatmul.mubr.msk.bf16.gmra.mrb[116].mxu1 %vm8297_vm12, %v10903_v58  ;;  %v8674_v58 = vrot.slane %v13500_v32, 2 }
 0x3db   : > { %12271 = vmatprep.mubr.msk.bf16.mxu1 %vm13901_vm6, %v13900_v14 }
 0x3dc   : > { %v8675_v47 = vsel %vm8670_vm13, %v8672_v17, %v8674_v58  ;;  %v8677_v53 = vsel %vm8670_vm13, %v8674_v58, %v8676_v52  ;;  %v7449_v52 = vld [vmem:[#allocation3 + $0xb8] sm:$0xff] }
 0x3e2   : > { %12272 = vmatmul.mubr.msk.bf16.vlgmr.msra.gmra.mrb[120].mxu1 %vm8297_vm12, %v8673_v29  ;;  %v13507_v29 = vld [vmem:[#allocation4 + $0x44] sm:$0xff]  }
 0x3e3   : > { %12350 = vmatpush3.bf16.msra.mxu1 %v13499_v13  ;;  %12275 = vmatprep.mubr.msk.bf16.mxu1 %vm13901_vm6, %v13900_v14  ;;  %v8683_v13 = vsel %vm8670_vm13, %v8680_v8, %v8682_v39 }
 0x3e4   : > { %12351 = vmatprep.subr.bf16.mxu1 %v13900_v14 }
 0x3e7   : > { %12352 = vmatpush3.bf16.msra.mxu1 %v13503_v16 }
 0x3e8   : > { %12353 = vmatprep.subr.bf16.mxu1 %v13900_v14 }
 0x3ea   : > { %12276 = vmatmul.mubr.msk.bf16.gmra.mrb[124].mxu1 %vm8297_vm12, %v8675_v47 }
 0x3eb   : > { %12279 = vmatprep.mubr.msk.bf16.mxu1 %vm13901_vm6, %v13900_v14  ;;  %12354 = vmatpush3.bf16.msra.mxu1 %v9231_v45 }
 0x3ec   : > { %12461 = vmatprep.subr.bf16.mxu1 %v13900_v14 }
 0x3f2   : > { %12280 = vmatmul.mubr.msk.bf16.gmra.mrb[128].mxu1 %vm8297_vm12, %v8677_v53  ;;  %v8684_v53 = vrot.slane %v13507_v29, 2 }
 0x3f3   : > { %12283 = vmatprep.mubr.msk.bf16.mxu1 %vm13901_vm6, %v13900_v14 }
 0x3f6   : > { %v7717_v4 = vpop.permute.xlu1 %7716 }
 0x3f7   : > { %v7617_v60 = vpop.permute.xlu0 %7616 }
 0x3f8   : > { %v7971_v54 = vsel %vm1219_vm3, %v7446_v9, %v7617_v60 }
 0x3f9   : > { %v7997_v34 = vsel %vm7976_vm7, %v7971_v54, %v7717_v4 }
 0x3fa   : > { %12284 = vmatmul.mubr.msk.bf16.gmra.mrb[132].mxu1 %vm8297_vm12, %v8679_v63  ;;  %v7917_v3 = vpop.permute.xlu1 %7916 }
 0x3fb   : > { %v7817_v7 = vpop.permute.xlu0 %7816  ;;  %12287 = vmatprep.mubr.msk.bf16.mxu1 %vm13901_vm6, %v13900_v14 }
 0x3fc   : > { %v8023_v33 = vsel %vm8002_vm8, %v7997_v34, %v7817_v7  ;;  %v7450_v34 = vld [vmem:[#allocation3 + $0xc0] sm:$0xff] }
 0x3fd   : > { %v8049_v46 = vsel %vm8028_vm9, %v8023_v33, %v7917_v3 }
 0x3fe   : > { %v11123_v56 = vpack.c.bf16 %v8049_v46, %v8049_v46  ;;  %v7719_v6 = vpop.permute.xlu1 %7718 }
 0x3ff   : > { %v7619_v19 = vpop.permute.xlu0 %7618 }
 0x400   : > { %8176 = vst.msk [vmem:[#allocation4 + $0x50] sm:$0xf] %vm8155_vm10, %v11123_v56  ;;  %v7972_v20 = vsel %vm1219_vm3, %v7447_v48, %v7619_v19 }
 0x401   : > { %v7998_v31 = vsel %vm7976_vm7, %v7972_v20, %v7719_v6 }
 0x402   : > { %12288 = vmatmul.mubr.msk.bf16.gmra.mrb[136].mxu1 %vm8297_vm12, %v8681_v27  ;;  %v7919_v12 = vpop.permute.xlu1 %7918 }
 0x403   : > { %v7819_v37 = vpop.permute.xlu0 %7818  ;;  %12291 = vmatprep.mubr.msk.bf16.mxu1 %vm13901_vm6, %v13900_v14 }
 0x404   : > { %v8024_v40 = vsel %vm8002_vm8, %v7998_v31, %v7819_v37 }
 0x405   : > { %v8050_v15 = vsel %vm8028_vm9, %v8024_v40, %v7919_v12 }
 0x406   : > { %v11124_v42 = vpack.c.bf16 %v8050_v15, %v8050_v15  ;;  %v7721_v2 = vpop.permute.xlu1 %7720 }
 0x407   : > { %v7621_v38 = vpop.permute.xlu0 %7620  ;;  %v13506_v49 = vld [vmem:[#allocation4 + $0x4c] sm:$0xff]  }
 0x408   : > { %8177 = vst.msk [vmem:[#allocation4 + $0x54] sm:$0xf] %vm8155_vm10, %v11124_v42  ;;  %v7973_v17 = vsel %vm1219_vm3, %v7448_v22, %v7621_v38  ;;  %v8945_v41 = vrot.slane %v13506_v49, 1  ;;  %v13509_v4 = vld [vmem:[#allocation4 + $0x4c] sm:$0xff]   ;;  %v13513_v38 = vld [vmem:[#allocation4 + $0x1c] sm:$0xff]   ;;  %v13514_v49 = vld [vmem:[#allocation4 + $0x24] sm:$0xff]  }
 0x409   : > { %v7999_v16 = vsel %vm7976_vm7, %v7973_v17, %v7721_v2  ;;  %v8686_v7 = vrot.slane %v13509_v4, 2  ;;  %v13515_v17 = vld [vmem:[#allocation4 + $0x2c] sm:$0xff]  }
 0x40a   : > { %12292 = vmatmul.mubr.msk.bf16.gmra.mrb[140].mxu1 %vm8297_vm12, %v8683_v13  ;;  %v7921_v32 = vpop.permute.xlu1 %7920  ;;  %v8946_v58 = vsel %vm346_vm0, %v8943_v28, %v8945_v41  ;;  %v8685_v28 = vsel %vm8670_vm13, %v8682_v39, %v8684_v53  ;;  %v13517_v13 = vld [vmem:[#allocation4 + $0x3c] sm:$0xff]  }
 0x40b   : > { %v7821_v36 = vpop.permute.xlu0 %7820  ;;  %12338 = vmatmul.mubr.msk.bf16.gmra.mrb[88].mxu0 %vm8297_vm12, %v8946_v58  ;;  %12295 = vmatprep.mubr.msk.bf16.mxu1 %vm13901_vm6, %v13900_v14  ;;  %v8687_v48 = vsel %vm8670_vm13, %v8684_v53, %v8686_v7 }
 0x40c   : > { %v8025_v45 = vsel %vm8002_vm8, %v7999_v16, %v7821_v36  ;;  %12341 = vmatprep.mubr.msk.bf16.mxu0 %vm13901_vm6, %v13900_v14 }
 0x40d   : > { %v8051_v47 = vsel %vm8028_vm9, %v8025_v45, %v7921_v32 }
 0x40e   : > { %v11125_v51 = vpack.c.bf16 %v8051_v47, %v8051_v47  ;;  %v7723_v55 = vpop.permute.xlu1 %7722 }
 0x40f   : > { %v7623_v5 = vpop.permute.xlu0 %7622  ;;  %v13511_v19 = vld [vmem:[#allocation4 + $0x54] ss:$0 sps:$4 sm:$0x33]  }
 0x410   : > { %8178 = vst.msk [vmem:[#allocation4 + $0x58] sm:$0xf] %vm8155_vm10, %v11125_v51  ;;  %v7974_v11 = vsel %vm1219_vm3, %v7449_v52, %v7623_v5  ;;  %v8688_v15 = vrot.slane %v13511_v19, 2  ;;  %v13518_v52 = vld [vmem:[#allocation4 + $0x44] sm:$0xff]  }
 0x411   : > { %v8000_v60 = vsel %vm7976_vm7, %v7974_v11, %v7723_v55 }
 0x412   : > { %12296 = vmatmul.mubr.msk.bf16.gmra.mrb[144].mxu1 %vm8297_vm12, %v8685_v28  ;;  %v7923_v9 = vpop.permute.xlu1 %7922  ;;  %v8689_v39 = vsel %vm8670_vm13, %v8686_v7, %v8688_v15 }
 0x413   : > { %v7823_v54 = vpop.permute.xlu0 %7822  ;;  %12299 = vmatprep.mubr.msk.bf16.mxu1 %vm13901_vm6, %v13900_v14 }
 0x414   : > { %v8026_v63 = vsel %vm8002_vm8, %v8000_v60, %v7823_v54  ;;  %v13519_v54 = vld [vmem:[#allocation4 + $0x4c] sm:$0xff]  }
 0x415   : > { %v8052_v10 = vsel %vm8028_vm9, %v8026_v63, %v7923_v9 }
 0x416   : > { %v11126_v3 = vpack.c.bf16 %v8052_v10, %v8052_v10  ;;  %v7725_v33 = vpop.permute.xlu1 %7724 }
 0x417   : > { %v7625_v46 = vpop.permute.xlu0 %7624  ;;  %v13510_v56 = vld [vmem:[#allocation4 + $0x54] sm:$0xff]  }
 0x418   : > { %8179 = vst.msk [vmem:[#allocation4 + $0x5c] sm:$0xf] %vm8155_vm10, %v11126_v3  ;;  %v7975_v8 = vsel %vm1219_vm3, %v7450_v34, %v7625_v46  ;;  %v8947_v6 = vrot.slane %v13510_v56, 1 }
 0x419   : > { %v8001_v20 = vsel %vm7976_vm7, %v7975_v8, %v7725_v33  ;;  %v13520_v8 = vld [vmem:[#allocation4 + $0x54] sm:$0xff]  }
 0x41a   : > { %12300 = vmatmul.mubr.msk.bf16.gmra.mrb[148].mxu1 %vm8297_vm12, %v8687_v48  ;;  %v7925_v30 = vpop.permute.xlu1 %7924  ;;  %v8948_v12 = vsel %vm346_vm0, %v8945_v41, %v8947_v6  ;;  %v13516_v41 = vld [vmem:[#allocation4 + $0x34] sm:$0xff]  }
 0x41b   : > { %v7825_v27 = vpop.permute.xlu0 %7824  ;;  %12342 = vmatmul.mubr.msk.bf16.gmra.mrb[92].mxu0 %vm8297_vm12, %v8948_v12  ;;  %12303 = vmatprep.mubr.msk.bf16.mxu1 %vm13901_vm6, %v13900_v14 }
 0x41c   : > { %v8027_v31 = vsel %vm8002_vm8, %v8001_v20, %v7825_v27  ;;  %12345 = vmatprep.mubr.msk.bf16.mxu0 %vm13901_vm6, %v13900_v14 }
 0x41d   : > { %v8053_v37 = vsel %vm8028_vm9, %v8027_v31, %v7925_v30 }
 0x41e   : > { %v11127_v40 = vpack.c.bf16 %v8053_v37, %v8053_v37 }
 0x41f   : > { %v13512_v42 = vld [vmem:[#allocation4 + $0x5c] ss:$0 sps:$4 sm:$0x11]  }
 0x420   : > { %8180 = vst.msk [vmem:[#allocation4 + $0x60] sm:$0xf] %vm8155_vm10, %v11127_v40  ;;  %v8949_v22 = vrot.slane %v13512_v42, 1 }
 0x422   : > { %12304 = vmatmul.mubr.msk.bf16.gmra.mrb[152].mxu1 %vm8297_vm12, %v8689_v39  ;;  %v8950_v2 = vsel %vm346_vm0, %v8947_v6, %v8949_v22  ;;  %vm9508_vm0 = vcmask 523264  }
 0x423   : > { %12346 = vmatmul.mubr.msk.bf16.gmra.mrb[96].mxu0 %vm8297_vm12, %v8950_v2  ;;  %12355 = vmatprep.mubr.msk.bf16.mxu1 %vm13901_vm6, %v13900_v14 }
 0x424   : > { %12401 = vmatprep.mubr.msk.bf16.mxu0 %vm13901_vm6, %v13900_v14 }
 0x427   : > { %v13521_v27 = vld [vmem:[#allocation4 + $0x5c] sm:$0xff]  }
 0x42a   : > { %12356 = vmatmul.mubr.msk.bf16.vlgmr.msra.gmra.mrb[156].mxu1 %vm8297_vm12, %v13513_v38 }
 0x42b   : > { %12359 = vmatprep.mubr.msk.bf16.mxu1 %vm13901_vm6, %v13900_v14 }
 0x432   : > { %12360 = vmatmul.mubr.msk.bf16.gmra.mrb[160].mxu1 %vm8297_vm12, %v13514_v49 }
 0x433   : > { %12363 = vmatprep.mubr.msk.bf16.mxu1 %vm13901_vm6, %v13900_v14 }
 0x43a   : > { %12364 = vmatmul.mubr.msk.bf16.gmra.mrb[164].mxu1 %vm8297_vm12, %v13515_v17 }
 0x43b   : > { %12367 = vmatprep.mubr.msk.bf16.mxu1 %vm13901_vm6, %v13900_v14 }
 0x442   : > { %12368 = vmatmul.mubr.msk.bf16.gmra.mrb[168].mxu1 %vm8297_vm12, %v13516_v41 }
 0x443   : > { %12371 = vmatprep.mubr.msk.bf16.mxu1 %vm13901_vm6, %v13900_v14 }
 0x44a   : > { %v15604_v29 = vpop.f32.mrb[68].mxu1  ;;  %v15606_v32 = vpop.f32.mrb[76].mxu0  ;;  %12372 = vmatmul.mubr.msk.bf16.gmra.mrb[172].mxu1 %vm8297_vm12, %v13517_v13 }
 0x44b   : > { %v12209_v16 = vpop.f32.mrb[69].mxu1  ;;  %v12327_v36 = vpop.f32.mrb[77].mxu0  ;;  %12375 = vmatprep.mubr.msk.bf16.mxu1 %vm13901_vm6, %v13900_v14 }
 0x44c   : > { %v15611_v58 = vpop.f32.mrb[70].mxu1  ;;  %v15613_v45 = vpop.f32.mrb[78].mxu0 }
 0x44d   : > { %v12210_v47 = vpop.f32.mrb[71].mxu1  ;;  %v12328_v51 = vpop.f32.mrb[79].mxu0 }
 0x452   : > { %12376 = vmatmul.mubr.msk.bf16.gmra.mrb[176].mxu1 %vm8297_vm12, %v13518_v52 }
 0x453   : > { %12379 = vmatprep.mubr.msk.bf16.mxu1 %vm13901_vm6, %v13900_v14 }
 0x454   : > { %v15620_v55 = vpop.f32.mrb[80].mxu0 }
 0x455   : > { %v15618_v53 = vpop.f32.mrb[72].mxu1  ;;  %v12331_v11 = vpop.f32.mrb[81].mxu0 }
 0x456   : > { %v12213_v5 = vpop.f32.mrb[73].mxu1  ;;  %v15624_v4 = vpop.f32.mrb[82].mxu0 }
 0x457   : > { %v15622_v28 = vpop.f32.mrb[74].mxu1  ;;  %v12332_v60 = vpop.f32.mrb[83].mxu0 }
 0x458   : > { %v12214_v9 = vpop.f32.mrb[75].mxu1 }
 0x45a   : > { %12380 = vmatmul.mubr.msk.bf16.gmra.mrb[180].mxu1 %vm8297_vm12, %v13519_v54 }
 0x45b   : > { %12383 = vmatprep.mubr.msk.bf16.mxu1 %vm13901_vm6, %v13900_v14 }
 0x45c   : > { %v15629_v10 = vpop.f32.mrb[84].mxu0 }
 0x45d   : > { %v8419_v63 = vpop.f32.mrb[76].mxu1  ;;  %v12335_v34 = vpop.f32.mrb[85].mxu0 }
 0x45e   : > { %v12217_v3 = vpop.f32.mrb[77].mxu1  ;;  %v15631_v33 = vpop.f32.mrb[86].mxu0 }
 0x45f   : > { %v8422_v7 = vpop.f32.mrb[78].mxu1  ;;  %v12336_v56 = vpop.f32.mrb[87].mxu0 }
 0x460   : > { %v12218_v46 = vpop.f32.mrb[79].mxu1 }
 0x462   : > { %12384 = vmatmul.mubr.msk.bf16.gmra.mrb[184].mxu1 %vm8297_vm12, %v13520_v8 }
 0x463   : > { %12387 = vmatprep.mubr.msk.bf16.mxu1 %vm13901_vm6, %v13900_v14 }
 0x465   : > { %v8427_v6 = vpop.f32.mrb[80].mxu1 }
 0x466   : > { %v12221_v48 = vpop.f32.mrb[81].mxu1 }
 0x467   : > { %v8430_v19 = vpop.f32.mrb[82].mxu1 }
 0x468   : > { %v12222_v20 = vpop.f32.mrb[83].mxu1 }
 0x46a   : > { %12388 = vmatmul.mubr.msk.bf16.gmra.mrb[188].mxu1 %vm8297_vm12, %v13521_v27 }
 0x46b   : > { %12477 = vmatprep.mubr.msk.bf16.mxu1 %vm13901_vm6, %v13900_v14 }
 0x46d   : > { %v8526_v30 = vpop.f32.mrb[84].mxu1 }
 0x46e   : > { %v8527_v12 = vadd.f32 %v8526_v30, %v15250_v57  ;;  %v12231_v31 = vpop.f32.mrb[85].mxu1 }
 0x46f   : > { %v8529_v37 = vpop.f32.mrb[86].mxu1 }
 0x470   : > { %v8530_v40 = vadd.f32 %v8529_v37, %v15252_v59  ;;  %v12232_v15 = vpop.f32.mrb[87].mxu1 }
 0x475   : > { %v8534_v42 = vpop.f32.mrb[88].mxu1 }
 0x476   : > { %v8535_v22 = vadd.f32 %v8534_v42, %v15438_v1  ;;  %v12235_v39 = vpop.f32.mrb[89].mxu1 }
 0x477   : > { %v8537_v2 = vpop.f32.mrb[90].mxu1 }
 0x478   : > { %v8538_v38 = vadd.f32 %v8537_v2, %v15441_v35  ;;  %v12236_v49 = vpop.f32.mrb[91].mxu1 }
 0x47d   : > { %v8542_v17 = vpop.f32.mrb[92].mxu1 }
 0x47e   : > { %v8543_v41 = vadd.f32 %v8542_v17, %v15451_v62  ;;  %v12239_v13 = vpop.f32.mrb[93].mxu1 }
 0x47f   : > { %v8545_v16 = vpop.f32.mrb[94].mxu1 }
 0x480   : > { %v8546_v57 = vadd.f32 %v8545_v16, %v15455_v21  ;;  %v12240_v36 = vpop.f32.mrb[95].mxu1 }
 0x485   : > { %v8550_v47 = vpop.f32.mrb[96].mxu1 }
 0x486   : > { %v8551_v59 = vadd.f32 %v8550_v47, %v15465_v23  ;;  %v12243_v51 = vpop.f32.mrb[97].mxu1 }
 0x487   : > { %v8553_v52 = vpop.f32.mrb[98].mxu1 }
 0x488   : > { %v8554_v1 = vadd.f32 %v8553_v52, %v15469_v50  ;;  %v12244_v5 = vpop.f32.mrb[99].mxu1 }
 0x48d   : > { %v8558_v11 = vpop.f32.mrb[100].mxu1 }
 0x48e   : > { %v8559_v35 = vadd.f32 %v8558_v11, %v15479_v26  ;;  %v12247_v9 = vpop.f32.mrb[101].mxu1 }
 0x48f   : > { %v8561_v60 = vpop.f32.mrb[102].mxu1 }
 0x490   : > { %v8562_v62 = vadd.f32 %v8561_v60, %v15483_v43  ;;  %v12248_v54 = vpop.f32.mrb[103].mxu1 }
 0x495   : > { %v8566_v3 = vpop.f32.mrb[104].mxu1 }
 0x496   : > { %v15650_v21 = vadd.f32 %v8566_v3, %v15604_v29  ;;  %v12251_v34 = vpop.f32.mrb[105].mxu1 }
 0x497   : > { %v8569_v46 = vpop.f32.mrb[106].mxu1 }
 0x498   : > { %v15653_v23 = vadd.f32 %v8569_v46, %v15611_v58  ;;  %v12252_v56 = vpop.f32.mrb[107].mxu1 }
 0x49d   : > { %v8574_v50 = vpop.f32.mrb[108].mxu1 }
 0x49e   : > { %v15656_v8 = vadd.f32 %v8574_v50, %v15618_v53  ;;  %v12255_v26 = vpop.f32.mrb[109].mxu1 }
 0x49f   : > { %v8577_v48 = vpop.f32.mrb[110].mxu1 }
 0x4a0   : > { %v15659_v20 = vadd.f32 %v8577_v48, %v15622_v28  ;;  %v12256_v43 = vpop.f32.mrb[111].mxu1 }
 0x4a5   : > { %v8582_v27 = vpop.f32.mrb[112].mxu1 }
 0x4a6   : > { %v15661_v30 = vadd.f32 %v8582_v27, %v8419_v63  ;;  %v12259_v29 = vpop.f32.mrb[113].mxu1 }
 0x4a7   : > { %v8585_v31 = vpop.f32.mrb[114].mxu1 }
 0x4a8   : > { %v15663_v37 = vadd.f32 %v8585_v31, %v8422_v7  ;;  %v12260_v58 = vpop.f32.mrb[115].mxu1 }
 0x4ad   : > { %v8590_v15 = vpop.f32.mrb[116].mxu1 }
 0x4ae   : > { %v15665_v42 = vadd.f32 %v8590_v15, %v8427_v6  ;;  %v12263_v39 = vpop.f32.mrb[117].mxu1 }
 0x4af   : > { %v8593_v53 = vpop.f32.mrb[118].mxu1 }
 0x4b0   : > { %v15667_v2 = vadd.f32 %v8593_v53, %v8430_v19  ;;  %v12264_v49 = vpop.f32.mrb[119].mxu1 }
 0x4b5   : > { %v8769_v17 = vpop.f32.mrb[120].mxu1 }
 0x4b6   : > { %v8840_v28 = vadd.f32 %v8769_v17, %v8527_v12  ;;  %v12273_v13 = vpop.f32.mrb[121].mxu1 }
 0x4b7   : > { %v8772_v16 = vpop.f32.mrb[122].mxu1  ;;  %v13522_v13 = vld [vmem:[%s16034_s3] sm:$0xff]  }
 0x4b8   : > { %v8841_v36 = vadd.f32 %v8772_v16, %v8530_v40  ;;  %v12274_v63 = vpop.f32.mrb[123].mxu1  ;;  %v15670_v47 = vadd.f32 %v15453_v18, %v8840_v28  ;;  %12392 = vmatpush3.bf16.msra.mxu0 %v13522_v13 }
 0x4b9   : > { %12393 = vmatprep.subr.bf16.mxu0 %v13900_v14  ;;  %v13524_v63 = vld [vmem:[%s16034_s3 + $0x10] sm:$0xff]  }
 0x4ba   : > { %v15673_v7 = vadd.f32 %v15457_v24, %v8841_v36 }
 0x4bd   : > { %v8777_v51 = vpop.f32.mrb[124].mxu1 }
 0x4be   : > { %v8842_v6 = vadd.f32 %v8777_v51, %v8535_v22  ;;  %v12277_v52 = vpop.f32.mrb[125].mxu1 }
 0x4bf   : > { %v8780_v5 = vpop.f32.mrb[126].mxu1 }
 0x4c0   : > { %v8843_v11 = vadd.f32 %v8780_v5, %v8538_v38  ;;  %v12278_v19 = vpop.f32.mrb[127].mxu1  ;;  %v15676_v9 = vadd.f32 %v15467_v25, %v8842_v6 }
 0x4c2   : > { %v15679_v12 = vadd.f32 %v15471_v0, %v8843_v11 }
 0x4c5   : > { %v8785_v40 = vpop.f32.mrb[128].mxu1 }
 0x4c6   : > { %v8844_v60 = vadd.f32 %v8785_v40, %v8543_v41  ;;  %v12281_v54 = vpop.f32.mrb[129].mxu1 }
 0x4c7   : > { %v8788_v18 = vpop.f32.mrb[130].mxu1 }
 0x4c8   : > { %v8845_v3 = vadd.f32 %v8788_v18, %v8546_v57  ;;  %v12282_v34 = vpop.f32.mrb[131].mxu1  ;;  %v15682_v24 = vadd.f32 %v15481_v61, %v8844_v60  ;;  %v13525_v18 = vld [vmem:[%s16034_s3 + $0x18] sm:$0xff]  }
 0x4ca   : > { %v15685_v22 = vadd.f32 %v15485_v44, %v8845_v3 }
 0x4cd   : > { %v8793_v38 = vpop.f32.mrb[132].mxu1 }
 0x4ce   : > { %v8846_v46 = vadd.f32 %v8793_v38, %v8551_v59  ;;  %v12285_v56 = vpop.f32.mrb[133].mxu1 }
 0x4cf   : > { %v8796_v25 = vpop.f32.mrb[134].mxu1 }
 0x4d0   : > { %v8847_v50 = vadd.f32 %v8796_v25, %v8554_v1  ;;  %v12286_v26 = vpop.f32.mrb[135].mxu1  ;;  %v15688_v0 = vadd.f32 %v15606_v32, %v8846_v46 }
 0x4d2   : > { %v15691_v41 = vadd.f32 %v15613_v45, %v8847_v50 }
 0x4d5   : > { %v8801_v57 = vpop.f32.mrb[136].mxu1 }
 0x4d6   : > { %v8848_v48 = vadd.f32 %v8801_v57, %v8559_v35  ;;  %v12289_v43 = vpop.f32.mrb[137].mxu1 }
 0x4d7   : > { %v8804_v61 = vpop.f32.mrb[138].mxu1 }
 0x4d8   : > { %v8849_v27 = vadd.f32 %v8804_v61, %v8562_v62  ;;  %v12290_v29 = vpop.f32.mrb[139].mxu1  ;;  %v15694_v44 = vadd.f32 %v15620_v55, %v8848_v48 }
 0x4da   : > { %v15697_v59 = vadd.f32 %v15624_v4, %v8849_v27 }
 0x4dd   : > { %v8809_v1 = vpop.f32.mrb[140].mxu1 }
 0x4de   : > { %v8850_v31 = vadd.f32 %v8809_v1, %v15650_v21  ;;  %v12293_v32 = vpop.f32.mrb[141].mxu1  ;;  %v9078_v58 = vpop.f32.mrb[88].mxu0 }
 0x4df   : > { %v8812_v15 = vpop.f32.mrb[142].mxu1  ;;  %v12339_v45 = vpop.f32.mrb[89].mxu0 }
 0x4e0   : > { %v8851_v39 = vadd.f32 %v8812_v15, %v15653_v23  ;;  %v12294_v35 = vpop.f32.mrb[143].mxu1  ;;  %v9081_v53 = vpop.f32.mrb[90].mxu0  ;;  %v15702_v62 = vadd.f32 %v15629_v10, %v8850_v31  ;;  %v13523_v10 = vld [vmem:[%s16034_s3 + $0x8] sm:$0xff]  }
 0x4e1   : > { %v12340_v49 = vpop.f32.mrb[91].mxu0  ;;  %12394 = vmatpush3.bf16.msra.mxu0 %v13523_v10 }
 0x4e2   : > { %v15705_v55 = vadd.f32 %v15631_v33, %v8851_v39  ;;  %12395 = vmatprep.subr.bf16.mxu0 %v13900_v14 }
 0x4e5   : > { %v8817_v4 = vpop.f32.mrb[144].mxu1  ;;  %12396 = vmatpush3.bf16.msra.mxu0 %v13524_v63 }
 0x4e6   : > { %v8852_v17 = vadd.f32 %v8817_v4, %v15656_v8  ;;  %v12297_v28 = vpop.f32.mrb[145].mxu1  ;;  %12397 = vmatprep.subr.bf16.mxu0 %v13900_v14 }
 0x4e7   : > { %v8820_v21 = vpop.f32.mrb[146].mxu1 }
 0x4e8   : > { %v8853_v23 = vadd.f32 %v8820_v21, %v15659_v20  ;;  %v12298_v16 = vpop.f32.mrb[147].mxu1  ;;  %v15712_v36 = vadd.f32 %v9078_v58, %v8852_v17 }
 0x4e9   : > { %12398 = vmatpush3.bf16.msra.mxu0 %v13525_v18 }
 0x4ea   : > { %v15717_v33 = vadd.f32 %v9081_v53, %v8853_v23  ;;  %12399 = vmatprep.subr.bf16.mxu0 %v13900_v14 }
 0x4ed   : > { %v8825_v8 = vpop.f32.mrb[148].mxu1 }
 0x4ee   : > { %v8854_v20 = vadd.f32 %v8825_v8, %v15661_v30  ;;  %v12301_v51 = vpop.f32.mrb[149].mxu1  ;;  %v9086_v6 = vpop.f32.mrb[92].mxu0 }
 0x4ef   : > { %v8828_v52 = vpop.f32.mrb[150].mxu1  ;;  %v12343_v5 = vpop.f32.mrb[93].mxu0 }
 0x4f0   : > { %v8855_v11 = vadd.f32 %v8828_v52, %v15663_v37  ;;  %v12302_v19 = vpop.f32.mrb[151].mxu1  ;;  %v15726_v40 = vadd.f32 %v9086_v6, %v8854_v20  ;;  %v9089_v60 = vpop.f32.mrb[94].mxu0  ;;  %v13526_v37 = vld [vmem:[%s16034_s3 + $0x20] sm:$0xff]  }
 0x4f1   : > { %v12344_v54 = vpop.f32.mrb[95].mxu0  ;;  %12400 = vmatpush3.bf16.msra.mxu0 %v13526_v37 }
 0x4f2   : > { %v15731_v3 = vadd.f32 %v9089_v60, %v8855_v11  ;;  %12405 = vmatprep.subr.bf16.mxu0 %v13900_v14 }
 0x4f5   : > { %v8833_v30 = vpop.f32.mrb[152].mxu1 }
 0x4f6   : > { %v8856_v34 = vadd.f32 %v8833_v30, %v15665_v42  ;;  %v12305_v38 = vpop.f32.mrb[153].mxu1  ;;  %v9094_v46 = vpop.f32.mrb[96].mxu0  ;;  %v15748_v42 = vld [vmem:[%s16035_s4 + $0x1] ss:$0 sm:$0xff] }
 0x4f7   : > { %v8836_v56 = vpop.f32.mrb[154].mxu1  ;;  %v12347_v25 = vpop.f32.mrb[97].mxu0 }
 0x4f8   : > { %v8857_v50 = vadd.f32 %v8836_v56, %v15667_v2  ;;  %v12306_v26 = vpop.f32.mrb[155].mxu1  ;;  %v15740_v57 = vadd.f32 %v9094_v46, %v8856_v34  ;;  %v9097_v48 = vpop.f32.mrb[98].mxu0 }
 0x4f9   : > { %v12348_v43 = vpop.f32.mrb[99].mxu0 }
 0x4fa   : > { %v15742_v61 = vadd.f32 %v9097_v48, %v8857_v50 }
 0x4fd   : > { %v9267_v27 = vpop.f32.mrb[156].mxu1 }
 0x4fe   : > { %v9338_v29 = vadd.f32 %v9267_v27, %v15670_v47  ;;  %v12357_v1 = vpop.f32.mrb[157].mxu1 }
 0x4ff   : > { %v9270_v2 = vpop.f32.mrb[158].mxu1 }
 0x500   : > { %v9360_v31 = vadd.f32 %v15748_v42, %v9338_v29  ;;  %v9339_v32 = vadd.f32 %v9270_v2, %v15673_v7  ;;  %v12358_v58 = vpop.f32.mrb[159].mxu1 }
 0x502   : > { %13787 = vtanh.f32 %v9360_v31  ;;  %v9361_v15 = vadd.f32 %v15748_v42, %v9339_v32 }
 0x504   : > { %13789 = vtanh.f32 %v9361_v15 }
 0x505   : > { %v9275_v45 = vpop.f32.mrb[160].mxu1 }
 0x506   : > { %v9340_v39 = vadd.f32 %v9275_v45, %v15676_v9  ;;  %v12361_v35 = vpop.f32.mrb[161].mxu1 }
 0x507   : > { %v9278_v53 = vpop.f32.mrb[162].mxu1 }
 0x508   : > { %v9362_v49 = vadd.f32 %v15748_v42, %v9340_v39  ;;  %v9341_v47 = vadd.f32 %v9278_v53, %v15679_v12  ;;  %v12362_v4 = vpop.f32.mrb[163].mxu1 }
 0x50a   : > { %13791 = vtanh.f32 %v9362_v49  ;;  %v9363_v17 = vadd.f32 %v15748_v42, %v9341_v47 }
 0x50c   : > { %v13788_v28 = vpop.eup %13787  ;;  %13793 = vtanh.f32 %v9363_v17 }
 0x50d   : > { %9396 = vst.msk [vmem:[#allocation5] sm:$0xff] %vm7976_vm7, %v13788_v28  ;;  %v9283_v7 = vpop.f32.mrb[164].mxu1 }
 0x50e   : > { %v13790_v21 = vpop.eup %13789  ;;  %v9342_v13 = vadd.f32 %v9283_v7, %v15682_v24  ;;  %v12365_v23 = vpop.f32.mrb[165].mxu1 }
 0x50f   : > { %9397 = vst.msk [vmem:[#allocation5 + $0x8] sm:$0xff] %vm7976_vm7, %v13790_v21  ;;  %v9286_v9 = vpop.f32.mrb[166].mxu1 }
 0x510   : > { %v9364_v16 = vadd.f32 %v15748_v42, %v9342_v13  ;;  %v9343_v12 = vadd.f32 %v9286_v9, %v15685_v22  ;;  %v12366_v10 = vpop.f32.mrb[167].mxu1 }
 0x512   : > { %13795 = vtanh.f32 %v9364_v16  ;;  %v9365_v8 = vadd.f32 %v15748_v42, %v9343_v12 }
 0x514   : > { %v13792_v63 = vpop.eup %13791  ;;  %13797 = vtanh.f32 %v9365_v8 }
 0x515   : > { %9398 = vst.msk [vmem:[#allocation5 + $0x10] sm:$0xff] %vm7976_vm7, %v13792_v63  ;;  %v9291_v20 = vpop.f32.mrb[168].mxu1 }
 0x516   : > { %v13794_v51 = vpop.eup %13793  ;;  %v9344_v24 = vadd.f32 %v9291_v20, %v15688_v0  ;;  %v12369_v6 = vpop.f32.mrb[169].mxu1  ;;  %v9414_v5 = vld [vmem:[#allocation5] ss:$2 sm:$0x1f] }
 0x517   : > { %9399 = vst.msk [vmem:[#allocation5 + $0x18] sm:$0xff] %vm7976_vm7, %v13794_v51  ;;  %v9294_v52 = vpop.f32.mrb[170].mxu1  ;;  %v9416_v60 = vld [vmem:[#allocation5 + $0x1] ss:$2 sm:$0x1f] }
 0x518   : > { %v9366_v11 = vadd.f32 %v15748_v42, %v9344_v24  ;;  %v9345_v22 = vadd.f32 %v9294_v52, %v15691_v41  ;;  %v12370_v19 = vpop.f32.mrb[171].mxu1  ;;  %v9417_v18 = vadd.f32 %v9416_v60, %v9414_v5 }
 0x51a   : > { %13799 = vtanh.f32 %v9366_v11  ;;  %v9367_v54 = vadd.f32 %v15748_v42, %v9345_v22 }
 0x51c   : > { %v13796_v30 = vpop.eup %13795  ;;  %13801 = vtanh.f32 %v9367_v54  ;;  %v9419_v37 = vld [vmem:[#allocation5 + $0xe] ss:$2 sm:$0x1f]  ;;  %v9422_v25 = vld [vmem:[#allocation5 + $0xf] ss:$2 sm:$0x1f] }
 0x51d   : > { %9400 = vst.msk [vmem:[#allocation5 + $0x20] sm:$0xff] %vm7976_vm7, %v13796_v30  ;;  %v9299_v0 = vpop.f32.mrb[172].mxu1  ;;  %v9420_v34 = vadd.f32 %v9419_v37, %v9417_v18 }
 0x51e   : > { %v13798_v38 = vpop.eup %13797  ;;  %v9346_v46 = vadd.f32 %v9299_v0, %v15694_v44  ;;  %v12373_v56 = vpop.f32.mrb[173].mxu1 }
 0x51f   : > { %9401 = vst.msk [vmem:[#allocation5 + $0x28] sm:$0xff] %vm7976_vm7, %v13798_v38  ;;  %v9302_v41 = vpop.f32.mrb[174].mxu1  ;;  %v9423_v50 = vadd.f32 %v9422_v25, %v9420_v34 }
 0x520   : > { %v9368_v26 = vadd.f32 %v15748_v42, %v9346_v46  ;;  %v9347_v48 = vadd.f32 %v9302_v41, %v15697_v59  ;;  %v12374_v43 = vpop.f32.mrb[175].mxu1 }
 0x521   : > { %v9424_v27 = vmul.f32 0.25, %v9423_v50 }
 0x522   : > { %13803 = vtanh.f32 %v9368_v26  ;;  %v9369_v29 = vadd.f32 %v15748_v42, %v9347_v48 }
 0x523   : > { %9426 = vst.msk [vmem:[#allocation6] sm:$0x1f] %vm9425_vm14, %v9424_v27 }
 0x524   : > { %v13800_v1 = vpop.eup %13799  ;;  %13805 = vtanh.f32 %v9369_v29  ;;  %v9428_v58 = vld [vmem:[#allocation5 + $0x1c] ss:$2 sm:$0x1f]  ;;  %v9430_v35 = vld [vmem:[#allocation5 + $0x1d] ss:$2 sm:$0x1f] }
 0x525   : > { %9402 = vst.msk [vmem:[#allocation5 + $0x30] sm:$0xff] %vm7976_vm7, %v13800_v1  ;;  %v9307_v44 = vpop.f32.mrb[176].mxu1  ;;  %v9431_v49 = vadd.f32 %v9430_v35, %v9428_v58 }
 0x526   : > { %v13802_v2 = vpop.eup %13801  ;;  %v9348_v31 = vadd.f32 %v9307_v44, %v15702_v62  ;;  %v12377_v32 = vpop.f32.mrb[177].mxu1 }
 0x527   : > { %9403 = vst.msk [vmem:[#allocation5 + $0x38] sm:$0xff] %vm7976_vm7, %v13802_v2  ;;  %v9310_v59 = vpop.f32.mrb[178].mxu1 }
 0x528   : > { %v9370_v15 = vadd.f32 %v15748_v42, %v9348_v31  ;;  %v9349_v45 = vadd.f32 %v9310_v59, %v15705_v55  ;;  %v12378_v39 = vpop.f32.mrb[179].mxu1 }
 0x52a   : > { %13807 = vtanh.f32 %v9370_v15  ;;  %v9371_v53 = vadd.f32 %v15748_v42, %v9349_v45 }
 0x52c   : > { %v13804_v47 = vpop.eup %13803  ;;  %13809 = vtanh.f32 %v9371_v53  ;;  %v9433_v4 = vld [vmem:[#allocation5 + $0x2a] ss:$2 sm:$0x1f]  ;;  %v9436_v13 = vld [vmem:[#allocation5 + $0x2b] ss:$2 sm:$0x1f] }
 0x52d   : > { %9404 = vst.msk [vmem:[#allocation5 + $0x40] sm:$0xff] %vm7976_vm7, %v13804_v47  ;;  %v9315_v62 = vpop.f32.mrb[180].mxu1  ;;  %v9434_v17 = vadd.f32 %v9433_v4, %v9431_v49 }
 0x52e   : > { %v13806_v28 = vpop.eup %13805  ;;  %v9350_v7 = vadd.f32 %v9315_v62, %v15712_v36  ;;  %v12381_v21 = vpop.f32.mrb[181].mxu1 }
 0x52f   : > { %9405 = vst.msk [vmem:[#allocation5 + $0x48] sm:$0xff] %vm7976_vm7, %v13806_v28  ;;  %v9318_v55 = vpop.f32.mrb[182].mxu1  ;;  %v9437_v23 = vadd.f32 %v9436_v13, %v9434_v17  ;;  %v13547_v28 = vld [vmem:[%s16036_s5] sm:$0xff]   ;;  %v13549_v21 = vld [vmem:[%s16036_s5 + $0x10] sm:$0xff]   ;;  %v13550_v13 = vld [vmem:[%s16036_s5 + $0x18] sm:$0xff]  }
 0x530   : > { %v9372_v9 = vadd.f32 %v15748_v42, %v9350_v7  ;;  %v9351_v16 = vadd.f32 %v9318_v55, %v15717_v33  ;;  %v12382_v12 = vpop.f32.mrb[183].mxu1  ;;  %12462 = vmatpush3.bf16.msra.mxu1 %v13547_v28  ;;  %v13548_v7 = vld [vmem:[%s16036_s5 + $0x8] sm:$0xff]   ;;  %v13551_v55 = vld [vmem:[%s16036_s5 + $0x20] sm:$0xff]  }
 0x531   : > { %v9438_v10 = vmul.f32 0.25, %v9437_v23  ;;  %12463 = vmatprep.subr.bf16.mxu1 %v13900_v14  ;;  %v13552_v23 = vld [vmem:[%s16036_s5 + $0x28] sm:$0xff]  }
 0x532   : > { %13811 = vtanh.f32 %v9372_v9  ;;  %v9373_v8 = vadd.f32 %v15748_v42, %v9351_v16  ;;  %v13553_v9 = vld [vmem:[%s16036_s5 + $0x30] sm:$0xff]  }
 0x533   : > { %9439 = vst.msk [vmem:[#allocation6 + $0x5] sm:$0x1f] %vm9425_vm14, %v9438_v10 }
 0x534   : > { %v13808_v63 = vpop.eup %13807  ;;  %13813 = vtanh.f32 %v9373_v8  ;;  %v9441_v36 = vld [vmem:[#allocation5 + $0x38] ss:$2 sm:$0x1f]  ;;  %v9443_v20 = vld [vmem:[#allocation5 + $0x39] ss:$2 sm:$0x1f]  ;;  %12464 = vmatpush3.bf16.msra.mxu1 %v13548_v7 }
 0x535   : > { %9406 = vst.msk [vmem:[#allocation5 + $0x50] sm:$0xff] %vm7976_vm7, %v13808_v63  ;;  %v9323_v51 = vpop.f32.mrb[184].mxu1  ;;  %v9444_v24 = vadd.f32 %v9443_v20, %v9441_v36  ;;  %12465 = vmatprep.subr.bf16.mxu1 %v13900_v14 }
 0x536   : > { %v13810_v6 = vpop.eup %13809  ;;  %v9352_v52 = vadd.f32 %v9323_v51, %v15726_v40  ;;  %v12385_v5 = vpop.f32.mrb[185].mxu1  ;;  %v9446_v33 = vld [vmem:[#allocation5 + $0x46] ss:$2 sm:$0x1f] }
 0x537   : > { %9407 = vst.msk [vmem:[#allocation5 + $0x58] sm:$0xff] %vm7976_vm7, %v13810_v6  ;;  %v9326_v11 = vpop.f32.mrb[186].mxu1  ;;  %v9447_v22 = vadd.f32 %v9446_v33, %v9444_v24  ;;  %v9449_v18 = vld [vmem:[#allocation5 + $0x47] ss:$2 sm:$0x1f]  ;;  %v13527_v6 = vld [vmem:[%s16034_s3 + $0x28] sm:$0xff]  }
 0x538   : > { %v9374_v19 = vadd.f32 %v15748_v42, %v9352_v52  ;;  %v9353_v60 = vadd.f32 %v9326_v11, %v15731_v3  ;;  %v12386_v54 = vpop.f32.mrb[187].mxu1  ;;  %12466 = vmatpush3.bf16.msra.mxu1 %v13549_v21  ;;  %v13528_v5 = vld [vmem:[%s16034_s3 + $0x30] sm:$0xff]   ;;  %v13529_v33 = vld [vmem:[%s16034_s3 + $0x38] sm:$0xff]   ;;  %v13530_v11 = vld [vmem:[%s16034_s3 + $0x40] sm:$0xff]  }
 0x539   : > { %v9450_v30 = vadd.f32 %v9449_v18, %v9447_v22  ;;  %12467 = vmatprep.subr.bf16.mxu1 %v13900_v14  ;;  %v13531_v22 = vld [vmem:[%s16034_s3 + $0x48] sm:$0xff]   ;;  %v13533_v54 = vld [vmem:[%s16034_s3 + $0x58] sm:$0xff]   ;;  %v13534_v18 = vld [vmem:[%s16034_s3 + $0x60] sm:$0xff]  }
 0x53a   : > { %13815 = vtanh.f32 %v9374_v19  ;;  %v9375_v37 = vadd.f32 %v15748_v42, %v9353_v60  ;;  %v13532_v19 = vld [vmem:[%s16034_s3 + $0x50] sm:$0xff]  }
 0x53b   : > { %v9451_v0 = vmul.f32 0.25, %v9450_v30  ;;  %v13535_v30 = vld [vmem:[%s16034_s3 + $0x68] sm:$0xff]  }
 0x53c   : > { %v13812_v34 = vpop.eup %13811  ;;  %13817 = vtanh.f32 %v9375_v37  ;;  %12468 = vmatpush3.bf16.msra.mxu1 %v13550_v13  ;;  %v13536_v37 = vld [vmem:[%s16034_s3 + $0x70] sm:$0xff]  }
 0x53d   : > { %9408 = vst.msk [vmem:[#allocation5 + $0x60] sm:$0xff] %vm7976_vm7, %v13812_v34  ;;  %v9331_v40 = vpop.f32.mrb[188].mxu1  ;;  %12469 = vmatprep.subr.bf16.mxu1 %v13900_v14 }
 0x53e   : > { %9452 = vst.msk [vmem:[#allocation6 + $0xa] sm:$0x1f] %vm9425_vm14, %v9451_v0  ;;  %v13814_v38 = vpop.eup %13813  ;;  %v9354_v46 = vadd.f32 %v9331_v40, %v15740_v57  ;;  %v12389_v56 = vpop.f32.mrb[189].mxu1  ;;  %v9454_v48 = vld [vmem:[#allocation5 + $0x54] ss:$2 sm:$0x1f] }
 0x53f   : > { %9409 = vst.msk [vmem:[#allocation5 + $0x68] sm:$0xff] %vm7976_vm7, %v13814_v38  ;;  %v9334_v3 = vpop.f32.mrb[190].mxu1  ;;  %v9456_v43 = vld [vmem:[#allocation5 + $0x55] ss:$2 sm:$0x1f]  ;;  %v13537_v0 = vld [vmem:[%s16034_s3 + $0x78] sm:$0xff]  }
 0x540   : > { %v9376_v25 = vadd.f32 %v15748_v42, %v9354_v46  ;;  %v9355_v41 = vadd.f32 %v9334_v3, %v15742_v61  ;;  %v12390_v50 = vpop.f32.mrb[191].mxu1  ;;  %v9457_v29 = vadd.f32 %v9456_v43, %v9454_v48  ;;  %12470 = vmatpush3.bf16.msra.mxu1 %v13551_v55  ;;  %v13538_v40 = vld [vmem:[%s16034_s3 + $0x80] sm:$0xff]   ;;  %v13539_v38 = vld [vmem:[%s16034_s3 + $0x88] sm:$0xff]   ;;  %v13540_v46 = vld [vmem:[%s16034_s3 + $0x90] sm:$0xff]  }
 0x541   : > { %12471 = vmatprep.subr.bf16.mxu1 %v13900_v14  ;;  %v13541_v56 = vld [vmem:[%s16034_s3 + $0x98] sm:$0xff]   ;;  %v13542_v3 = vld [vmem:[%s16034_s3 + $0xa0] sm:$0xff]   ;;  %v13544_v50 = vld [vmem:[%s16034_s3 + $0xb0] sm:$0xff]  }
 0x542   : > { %13819 = vtanh.f32 %v9376_v25  ;;  %v9377_v26 = vadd.f32 %v15748_v42, %v9355_v41  ;;  %v13543_v41 = vld [vmem:[%s16034_s3 + $0xa8] sm:$0xff]   ;;  %v13546_v48 = vld [vmem:[%s16034_s3 + $0xc0] sm:$0xff]  }
 0x544   : > { %v13816_v27 = vpop.eup %13815  ;;  %13821 = vtanh.f32 %v9377_v26  ;;  %12472 = vmatpush3.bf16.msra.mxu1 %v13552_v23  ;;  %v13545_v26 = vld [vmem:[%s16034_s3 + $0xb8] sm:$0xff]  }
 0x545   : > { %9410 = vst.msk [vmem:[#allocation5 + $0x70] sm:$0xff] %vm7976_vm7, %v13816_v27  ;;  %12473 = vmatprep.subr.bf16.mxu1 %v13900_v14  ;;  %v13554_v27 = vld [vmem:[%s16036_s5 + $0x38] sm:$0xff]  }
 0x546   : > { %v13818_v57 = vpop.eup %13817  ;;  %v9459_v1 = vld [vmem:[#allocation5 + $0x62] ss:$2 sm:$0x1f]  ;;  %v9462_v2 = vld [vmem:[#allocation5 + $0x63] ss:$2 sm:$0x1f] }
 0x547   : > { %9411 = vst.msk [vmem:[#allocation5 + $0x78] sm:$0xff] %vm7976_vm7, %v13818_v57  ;;  %v9460_v44 = vadd.f32 %v9459_v1, %v9457_v29  ;;  %v9510_v29 = vld [vmem:[%s16035_s4 + $0x2] sm:$0x1] }
 0x548   : > { %12474 = vmatpush3.bf16.msra.mxu1 %v13553_v9 }
 0x549   : > { %v9463_v31 = vadd.f32 %v9462_v2, %v9460_v44  ;;  %12475 = vmatprep.subr.bf16.mxu1 %v13900_v14 }
 0x54b   : > { %v9464_v32 = vmul.f32 0.25, %v9463_v31 }
 0x54c   : > { %v13820_v61 = vpop.eup %13819  ;;  %12476 = vmatpush3.bf16.msra.mxu1 %v13554_v27 }
 0x54d   : > { %9412 = vst.msk [vmem:[#allocation5 + $0x80] sm:$0xff] %vm7976_vm7, %v13820_v61  ;;  %12481 = vmatprep.subr.bf16.mxu1 %v13900_v14  ;;  %v13555_v61 = vld [vmem:[%s16036_s5 + $0x40] sm:$0xff]  }
 0x54e   : > { %9465 = vst.msk [vmem:[#allocation6 + $0xf] sm:$0x1f] %vm9425_vm14, %v9464_v32  ;;  %v13822_v42 = vpop.eup %13821  ;;  %v9467_v59 = vld [vmem:[#allocation5 + $0x70] ss:$2 sm:$0x1f] }
 0x54f   : > { %v9469_v58 = vld [vmem:[#allocation5 + $0x71] ss:$2 sm:$0x1f] }
 0x550   : > { %v9470_v15 = vadd.f32 %v9469_v58, %v9467_v59  ;;  %v13556_v59 = vld [vmem:[%s16036_s5 + $0x48] sm:$0xff]   ;;  %v13557_v58 = vld [vmem:[%s16036_s5 + $0x50] sm:$0xff]  }
 0x554   : > { %v9472_v45 = vld [vmem:[#allocation5 + $0x7e] ss:$2 sm:$0x1f]  ;;  %v9475_v35 = vld [vmem:[#allocation5 + $0x7f] ss:$2 sm:$0x1f] }
 0x555   : > { %v9473_v39 = vadd.f32 %v9472_v45, %v9470_v15  ;;  %v13558_v15 = vld [vmem:[%s16036_s5 + $0x58] sm:$0xff]   ;;  %v13559_v45 = vld [vmem:[%s16036_s5 + $0x60] sm:$0xff]  }
 0x557   : > { %v9476_v53 = vadd.f32 %v9475_v35, %v9473_v39  ;;  %v13560_v39 = vld [vmem:[%s16036_s5 + $0x68] sm:$0xff]   ;;  %v13561_v35 = vld [vmem:[%s16036_s5 + $0x70] sm:$0xff]  }
 0x559   : > { %v9477_v49 = vmul.f32 0.25, %v9476_v53  ;;  %v13562_v53 = vld [vmem:[%s16036_s5 + $0x78] sm:$0xff]  }
 0x55b   : > { %9478 = vst.msk [vmem:[#allocation6 + $0x14] sm:$0x1f] %vm9425_vm14, %v9477_v49  ;;  %v9961_v49 = vld [vmem:[%s16035_s4 + $0x3] sm:$0x1] }
 0x562   : > { %v9483_v47 = vld [vmem:[#allocation6 + $0x2] ss:$5 sm:$0x1f]  ;;  %v9481_v4 = vld [vmem:[#allocation6 + $0x1] ss:$5 sm:$0x1f] }
 0x563   : > { %9493 = vrot.lane.b32.xlu1 %v9483_v47, %s13899_s10  ;;  %9489 = vrot.lane.b32.xlu0 %v9481_v4, %s13896_s19  ;;  %v9487_v62 = vld [vmem:[#allocation6 + $0x4] ss:$5 sm:$0x1f]  ;;  %v9485_v17 = vld [vmem:[#allocation6 + $0x3] ss:$5 sm:$0x1f] }
 0x564   : > { %v9479_v10 = vld [vmem:[#allocation6] ss:$5 sm:$0x1f]  ;;  %s11099_s10 = sshll.u32 %s13961_s25, 4  ;;  %s243_s19 = scalar_lea.vmem [#allocation7], %s242_s11 }
 0x565   : > { %s10172_s14 = sshll.u32 %s243_s19, 4  ;;  %s15989_s9 = scalar_lea.hbm %s16037_s6, %s11099_s10  ;;  %s15991_s14 = int_to_ptr.vmem [resolvable:$true] %s10172_s14 }
 0x566   : > { %s13831_s25 = scalar_lea.vmem %s15991_s14, 16  ;;  %p13838_p0 = scmp.lt.s32.totalorder %s15991_s14, %s13836_s17 }
 0x567   : > { %9501 = vrot.lane.b32.xlu1 %v9487_v62, %s13902_s18  ;;  %9497 = vrot.lane.b32.xlu0 %v9485_v17, %s13903_s26  ;;  %p13832_p11 = scmp.ne.s32.totalorder %s15991_s14, %s13831_s25  ;;  %s13837_s18 = scalar_lea.vmem %s13836_s17, 32 }
 0x568   : > { %p13839_p1 = scmp.lt.s32.totalorder %s13837_s18, %s13831_s25 }
 0x569   : > { %p13833_p12 = pnand %p13832_p11, %p13978_p5 }
 0x56a   : > { %p13840_p2 = por %p13839_p1, %p13838_p0 }
 0x56b   : > { %p13834_p13 = pneg %p13833_p12 }
 0x56d   : > { %p13841_p3 = pnand %p13840_p2, %p13834_p13 }
 0x5d5   : > { %v9494_v16 = vpop.permute.xlu1 %9493  ;;  %v9490_v12 = vpop.permute.xlu0 %9489 }
 0x5d6   : > { %v9504_v8 = vsel %vm7976_vm7, %v9479_v10, %v9490_v12 }
 0x5d7   : > { %v9505_v20 = vsel %vm8028_vm9, %v9504_v8, %v9494_v16 }
 0x5d9   : > { %v9502_v63 = vpop.permute.xlu1 %9501  ;;  %v9498_v36 = vpop.permute.xlu0 %9497 }
 0x5da   : > { %v9507_v51 = vsel %vm9506_vm15, %v9505_v20, %v9498_v36 }
 0x5db   : > { %v9509_v24 = vsel %vm9508_vm0, %v9507_v51, %v9502_v63 }
 0x5dc   : > { %v15843_v52 = vpack.c.bf16 %v9509_v24, %v9509_v24 }
 0x5de   : > { %12402 = vmatmul.mubr.msk.bf16.vlgmr.msra.gmra.mrb[100].mxu0 %vm9552_vm1, %v15843_v52  ;;  %v9608_v60 = vshrl.u32 %v15843_v52, 16  ;;  %v9696_v34 = vrot.slane %v15843_v52, 1  ;;  %v9868_v43 = vrot.slane %v15843_v52, 2 }
 0x5df   : > { %12406 = vmatpush3.bf16.msra.mxu0 %v13527_v6  ;;  %12415 = vmatprep.mubr.msk.bf16.mxu0 %vm13901_vm6, %v13900_v14 }
 0x5e0   : > { %12407 = vmatprep.subr.bf16.mxu0 %v13900_v14  ;;  %v9782_v25 = vrot.slane %v9608_v60, 1 }
 0x5e3   : > { %12408 = vmatpush3.bf16.msra.mxu0 %v13528_v5 }
 0x5e4   : > { %12409 = vmatprep.subr.bf16.mxu0 %v13900_v14 }
 0x5e7   : > { %12410 = vmatpush3.bf16.msra.mxu0 %v13529_v33 }
 0x5e8   : > { %12411 = vmatprep.subr.bf16.mxu0 %v13900_v14 }
 0x5eb   : > { %12412 = vmatpush3.bf16.msra.mxu0 %v13530_v11 }
 0x5ec   : > { %12413 = vmatprep.subr.bf16.mxu0 %v13900_v14 }
 0x5ef   : > { %12414 = vmatpush3.bf16.msra.mxu0 %v13531_v22 }
 0x5f0   : > { %12419 = vmatprep.subr.bf16.mxu0 %v13900_v14 }
 0x5f2   : > { %12416 = vmatmul.mubr.msk.bf16.vlgmr.msra.gmra.mrb[100].mxu0 %vm9552_vm1, %v9608_v60 }
 0x5f3   : > { %12420 = vmatpush3.bf16.msra.mxu0 %v13532_v19  ;;  %12429 = vmatprep.mubr.msk.bf16.mxu0 %vm13901_vm6, %v13900_v14 }
 0x5f4   : > { %12421 = vmatprep.subr.bf16.mxu0 %v13900_v14 }
 0x5f7   : > { %12422 = vmatpush3.bf16.msra.mxu0 %v13533_v54 }
 0x5f8   : > { %12423 = vmatprep.subr.bf16.mxu0 %v13900_v14 }
 0x5fb   : > { %12424 = vmatpush3.bf16.msra.mxu0 %v13534_v18 }
 0x5fc   : > { %12425 = vmatprep.subr.bf16.mxu0 %v13900_v14 }
 0x5ff   : > { %12426 = vmatpush3.bf16.msra.mxu0 %v13535_v30 }
 0x600   : > { %12427 = vmatprep.subr.bf16.mxu0 %v13900_v14 }
 0x603   : > { %12428 = vmatpush3.bf16.msra.mxu0 %v13536_v37 }
 0x604   : > { %12433 = vmatprep.subr.bf16.mxu0 %v13900_v14 }
 0x606   : > { %12430 = vmatmul.mubr.msk.bf16.vlgmr.msra.gmra.mrb[100].mxu0 %vm9552_vm1, %v9696_v34 }
 0x607   : > { %12434 = vmatpush3.bf16.msra.mxu0 %v13537_v0  ;;  %12443 = vmatprep.mubr.msk.bf16.mxu0 %vm13901_vm6, %v13900_v14 }
 0x608   : > { %12435 = vmatprep.subr.bf16.mxu0 %v13900_v14 }
 0x60b   : > { %12436 = vmatpush3.bf16.msra.mxu0 %v13538_v40 }
 0x60c   : > { %12437 = vmatprep.subr.bf16.mxu0 %v13900_v14 }
 0x60f   : > { %12438 = vmatpush3.bf16.msra.mxu0 %v13539_v38 }
 0x610   : > { %12439 = vmatprep.subr.bf16.mxu0 %v13900_v14 }
 0x613   : > { %12440 = vmatpush3.bf16.msra.mxu0 %v13540_v46 }
 0x614   : > { %12441 = vmatprep.subr.bf16.mxu0 %v13900_v14 }
 0x617   : > { %12442 = vmatpush3.bf16.msra.mxu0 %v13541_v56 }
 0x618   : > { %12447 = vmatprep.subr.bf16.mxu0 %v13900_v14 }
 0x61a   : > { %12444 = vmatmul.mubr.msk.bf16.vlgmr.msra.gmra.mrb[100].mxu0 %vm9552_vm1, %v9782_v25 }
 0x61b   : > { %12448 = vmatpush3.bf16.msra.mxu0 %v13542_v3  ;;  %12457 = vmatprep.mubr.msk.bf16.mxu0 %vm13901_vm6, %v13900_v14 }
 0x61c   : > { %12449 = vmatprep.subr.bf16.mxu0 %v13900_v14 }
 0x61f   : > { %12450 = vmatpush3.bf16.msra.mxu0 %v13543_v41 }
 0x620   : > { %12451 = vmatprep.subr.bf16.mxu0 %v13900_v14 }
 0x623   : > { %12452 = vmatpush3.bf16.msra.mxu0 %v13544_v50 }
 0x624   : > { %12453 = vmatprep.subr.bf16.mxu0 %v13900_v14 }
 0x627   : > { %12454 = vmatpush3.bf16.msra.mxu0 %v13545_v26 }
 0x628   : > { %12455 = vmatprep.subr.bf16.mxu0 %v13900_v14 }
 0x62b   : > { %12456 = vmatpush3.bf16.msra.mxu0 %v13546_v48 }
 0x62e   : > { %12458 = vmatmul.mubr.msk.bf16.vlgmr.msra.gmra.mrb[100].mxu0 %vm9552_vm1, %v9868_v43 }
 0x701   : > { %v9936_v57 = vpop.f32.mrb[100].mxu0 }
 0x702   : > { %v12501_v1 = vadd.f32 %v9936_v57, %v9510_v29  ;;  %v12459_v44 = vpop.f32.mrb[101].mxu0 }
 0x703   : > { %v9939_v2 = vpop.f32.mrb[102].mxu0 }
 0x704   : > { %13823 = vtanh.f32 %v12501_v1  ;;  %v12460_v31 = vpop.f32.mrb[103].mxu0 }
 0x70e   : > { %v13824_v32 = vpop.eup %13823 }
 0x70f   : > { %v9944_v42 = vpack.c.bf16 %v13824_v32, %v13824_v32 }
 0x711   : > { %12478 = vmatmul.mubr.bf16.vlgmr.msra.gmra.mrb[192].mxu1 %v9944_v42 }
 0x712   : > { %12482 = vmatpush3.bf16.msra.mxu1 %v13555_v61  ;;  %12497 = vmatprep.mubr.msk.bf16.mxu1 %vm13901_vm6, %v13900_v14 }
 0x713   : > { %12483 = vmatprep.subr.bf16.mxu1 %v13900_v14 }
 0x716   : > { %12484 = vmatpush3.bf16.msra.mxu1 %v13556_v59 }
 0x717   : > { %12485 = vmatprep.subr.bf16.mxu1 %v13900_v14 }
 0x71a   : > { %12486 = vmatpush3.bf16.msra.mxu1 %v13557_v58 }
 0x71b   : > { %12487 = vmatprep.subr.bf16.mxu1 %v13900_v14 }
 0x71e   : > { %12488 = vmatpush3.bf16.msra.mxu1 %v13558_v15 }
 0x71f   : > { %12489 = vmatprep.subr.bf16.mxu1 %v13900_v14 }
 0x722   : > { %12490 = vmatpush3.bf16.msra.mxu1 %v13559_v45 }
 0x723   : > { %12491 = vmatprep.subr.bf16.mxu1 %v13900_v14 }
 0x726   : > { %12492 = vmatpush3.bf16.msra.mxu1 %v13560_v39 }
 0x727   : > { %12493 = vmatprep.subr.bf16.mxu1 %v13900_v14 }
 0x72a   : > { %12494 = vmatpush3.bf16.msra.mxu1 %v13561_v35 }
 0x72b   : > { %12495 = vmatprep.subr.bf16.mxu1 %v13900_v14  ;;  %v10069_v14 = vld [vmem:[%s16035_s4 + $0x4] sm:$0x1] }
 0x72e   : > { %12496 = vmatpush3.bf16.msra.mxu1 %v13562_v53 }
 0x7e4   : > { %v10044_v47 = vpop.f32.mrb[192].mxu1 }
 0x7e5   : > { %v10045_v4 = vadd.f32 %v10044_v47, %v9961_v49  ;;  %v12479_v62 = vpop.f32.mrb[193].mxu1 }
 0x7e6   : > { %v10047_v17 = vpop.f32.mrb[194].mxu1 }
 0x7e7   : > { %13825 = vtanh.f32 %v10045_v4  ;;  %v12480_v28 = vpop.f32.mrb[195].mxu1 }
 0x7f1   : > { %v13826_v7 = vpop.eup %13825 }
 0x7f2   : > { %v10051_v21 = vpack.c.bf16 %v13826_v7, %v13826_v7 }
 0x7f4   : > { %12498 = vmatmul.mubr.bf16.vlgmr.msra.gmra.mrb[196].mxu1 %v10051_v21 }
 0x8c7   : > { %v10152_v13 = vpop.f32.mrb[196].mxu1 }
 0x8c8   : > { %v10153_v55 = vadd.f32 %v10152_v13, %v10069_v14  ;;  %v12499_v23 = vpop.f32.mrb[197].mxu1 }
 0x8c9   : > { %v10155_v9 = vpop.f32.mrb[198].mxu1 }
 0x8ca   : > { %10158 = vst [vmem:[%s243_s19] sm:$0x1] %v10153_v55  ;;  %v12500_v16 = vpop.f32.mrb[199].mxu1 }
 0x8cb   : > { %13844 = shalt.err (!%p13841_p3)
}
 0x8cc   : > { %s13845_s26 = scalar_lea.hbm %s15989_s9, 16  ;;  %s13849_s12 = scalar_lea.hbm %s16037_s6, 32 }
 0x8cd   : > { %p13846_p4 = scmp.ne.s32.totalorder %s15989_s9, %s13845_s26  ;;  %p13850_p9 = scmp.lt.u32.totalorder %s15989_s9, %s16037_s6 }
 0x8ce   : > { %p13851_p10 = scmp.lt.u32.totalorder %s13849_s12, %s13845_s26  ;;  %p13853_p12 = scmp.lt.u32.totalorder %s13845_s26, %s15989_s9 }
 0x8cf   : > { %p13847_p7 = pnand %p13846_p4, %p13978_p5 }
 0x8d0   : > { %p13852_p11 = por %p13851_p10, %p13850_p9 }
 0x8d1   : > { %p13848_p8 = pneg %p13847_p7 }
 0x8d2   : > { %p13854_p13 = por %p13853_p12, %p13852_p11 }
 0x8d4   : > { %p13855_p0 = pnand %p13854_p13, %p13848_p8 }
 0x8d6   : > { %13858 = shalt.err (!%p13855_p0)
}
 0x8d7   : > { %12966 = dma.vmem_to_hbm [thread:$0]  (%p13978_p5), %s15991_s14, 16, %s15989_s9, %s10160_s15  }
 0x8d8 PF: > { %p12972_p1 = scmp.ge.s32.totalorder %s13893_s24, 2  ;;  %s10184_s19 = sand.u32 1, %s13881_s21  }
 0x8d9   : > { %s10185_s29 = scalar_lea.sflag [#allocation8], %s10184_s19 }
 0x8da   : > { %p12969_p2 = pnand %p12972_p1, %p13982_p6 }
 0x8dc   : > { %13876 = dma.done.wait (!%p12969_p2), %s10185_s29, 16  }
 0x8dd   : > { %13878 = vsyncadd (!%p12969_p2), %s10185_s29, 4294967280  ;;  %p16_p3 = scmp.ge.s32.totalorder %s13965_s27, 4   ;;  %s16040_s21 = smov %s13885_s22 }
 0x8de   : > { %s16041_s22 = smov %s13889_s23  ;;  %s16042_s23 = smov %s13976_s30 }
 0x8df   : > { %s16043_s24 = smov %s13965_s27  ;;  %18 = sbr.rel (!%p16_p3) target bundleno = 3 (0x3), region = 226 }
 0x8e6   :  { %10189 = vsyncpa [#allocation8], 1 }
 0x8e7   :  { %10191 = vsyncpa [#allocation8 + $0x1], 1 }

</bundles_post_ra>
